<compile_context>
chip_gen: v5e
topology: v5e:2x2
jax: 0.10.0
libtpu: 0.0.40
codegen_flags: <defaults>
</compile_context>

<pallas_src>
import functools

import jax
import jax.numpy as jnp
from jax.experimental import pallas as pl
from jax.experimental.pallas import tpu as pltpu

EPS = 1e-5


def _round_up(n, m):
    return (n + m - 1) // m * m


def _vmem_limit_bytes(frac=0.75):
    """Generation-aware scoped-VMEM limit (v5e/v6e: 128 MiB, v7x: 64 MiB)."""
    default = 64 * 1024 * 1024
    try:
        cap = getattr(pltpu.get_tpu_info(), "vmem_capacity_bytes", default)
    except Exception:  # no TPU info available at trace time
        cap = default
    return min(int(cap * frac), 127 * 1024 * 1024)


def _bn_train_folded(x, gamma, beta, inv_n):
    """Training-mode BN folded into one per-feature scale/shift.

    Uses sums so zero-padded batch rows do not perturb the statistics
    (`inv_n` = 1/real_batch).  Biased variance; clamped >= 0 (one-pass form).
    """
    mean = jnp.sum(x, axis=0, keepdims=True) * inv_n
    ex2 = jnp.sum(x * x, axis=0, keepdims=True) * inv_n
    var = jnp.maximum(ex2 - mean * mean, 0.0)
    scale = gamma * jax.lax.rsqrt(var + EPS)
    shift = beta - mean * scale
    return x * scale + shift


def bnlstm_seq_kernel(
    bn_wi_ref,                      # (C, Bp, 4Hp) bf16: bn_ih(x @ W_ih), hoisted
    h0_ref, c0_ref,                 # (Bp, Hp) f32
    w_hh_ref,                       # (Hp, 4Hp) bf16, VMEM-resident across grid
    g_hh_ref, b_hh_ref,             # (1, 4Hp) f32 (b_hh has the LSTM bias folded in)
    g_c_ref, b_c_ref,               # (1, Hp) f32
    mask_ref,                       # (Bp, 1) f32: zero on padded batch rows
    h_out_ref, c_out_ref,           # (C, Bp, Hp) bf16
    h_state, c_state,               # (Bp, Hp) f32 scratch carries
    *, hidden_pad, chunk, inv_batch,
):
    @pl.when(pl.program_id(0) == 0)
    def _():
        h_state[...] = h0_ref[...]
        c_state[...] = c0_ref[...]

    H = hidden_pad
    g_hh = g_hh_ref[...]
    b_hh = b_hh_ref[...]
    g_c = g_c_ref[...]
    b_c = b_c_ref[...]
    mask = mask_ref[...]

    def step(s, carry):
        # Hoisted input path already has bn_ih applied; just upcast.
        wi = bn_wi_ref[s].astype(jnp.float32)                       # (Bp, 4Hp)
        # Recurrent path: bf16 MXU matmul with f32 accumulation.
        h_bf = h_state[...].astype(jnp.bfloat16)
        wh = jnp.dot(h_bf, w_hh_ref[...], preferred_element_type=jnp.float32)
        bn_wh = _bn_train_folded(wh, g_hh, b_hh, inv_batch)

        pre = wi + bn_wh                                            # (Bp, 4Hp)
        f = pre[:, 0 * H:1 * H]
        i = pre[:, 1 * H:2 * H]
        o = pre[:, 2 * H:3 * H]
        g = pre[:, 3 * H:4 * H]

        c1 = (jax.nn.sigmoid(f) * c_state[...]
              + jax.nn.sigmoid(i) * jnp.tanh(g)) * mask
        bn_c1 = _bn_train_folded(c1, g_c, b_c, inv_batch)
        h1 = jax.nn.sigmoid(o) * jnp.tanh(bn_c1) * mask

        h_state[...] = h1
        c_state[...] = c1
        h_out_ref[s] = h1.astype(h_out_ref.dtype)
        c_out_ref[s] = c1.astype(c_out_ref.dtype)
        return carry

    jax.lax.fori_loop(0, chunk, step, 0, unroll=True)


# ---------------------------------------------------------------------------
# Wrapper: hoisted input projection + BN, padding, gate-blocked layout, call.
# ---------------------------------------------------------------------------

def _pad2(a, rows, cols):
    return jnp.pad(a, ((0, rows - a.shape[0]), (0, cols - a.shape[1])))


def _pad_gate_cols(w, rows_p, hidden, hidden_p):
    """(rows, 4*H) -> (rows_p, 4*Hp), per-gate column blocks zero-padded."""
    rows = w.shape[0]
    w = w.reshape(rows, 4, hidden)
    w = jnp.pad(w, ((0, rows_p - rows), (0, 0), (0, hidden_p - hidden)))
    return w.reshape(rows_p, 4 * hidden_p)


def _pad_gate_vec(v, hidden, hidden_p):
    """(4*H,) -> (1, 4*Hp), per-gate blocks zero-padded."""
    v = v.reshape(4, hidden)
    v = jnp.pad(v, ((0, 0), (0, hidden_p - hidden)))
    return v.reshape(1, 4 * hidden_p)


def bnlstm_forward_sequence(x_seq, h0, c0, params, *, time_chunk=8,
                            out_dtype=jnp.bfloat16, trim=True):
    """Run BNLSTMCell over a whole sequence in one pallas_call.

    Set trim=False to keep the padded (T_pad, Bp, Hp) outputs and avoid the
    extra XLA slice-copy when downstream code can handle padding.
    """
    T, B, K = x_seq.shape
    H = h0.shape[1]
    assert B > 1, "training-mode batch norm needs batch > 1"
    Bp = _round_up(B, 16)           # full bf16 (16,128) MXU operand tiles
    Hp = _round_up(H, 128)
    C = max(1, min(time_chunk, T))  # timesteps per grid step
    Tc = pl.cdiv(T, C)
    Tp = Tc * C

    f32 = jnp.float32

    # --- Hoisted, non-recurrent input path (one big MXU matmul over T*B rows).
    w_ih_bf = params["weight_ih"].astype(jnp.bfloat16)
    wi = jnp.einsum("tbk,kn->tbn", x_seq.astype(jnp.bfloat16), w_ih_bf,
                    preferred_element_type=f32)                      # (T, B, 4H)
    mean = jnp.mean(wi, axis=1, keepdims=True)
    var = jnp.mean(jnp.square(wi - mean), axis=1, keepdims=True)     # biased
    bn_wi = ((wi - mean) * jax.lax.rsqrt(var + EPS)
             * params["bn_ih_weight"] + params["bn_ih_bias"])
    # Gate-blocked (Hp per gate) layout + batch/time padding; stream as bf16.
    bn_wi = bn_wi.reshape(T, B, 4, H)
    bn_wi = jnp.pad(bn_wi, ((0, Tp - T), (0, Bp - B), (0, 0), (0, Hp - H)))
    bn_wi = bn_wi.reshape(Tp, Bp, 4 * Hp).astype(jnp.bfloat16)

    # --- Recurrent-path operands (VMEM-resident for the whole time grid).
    h0_p = _pad2(h0.astype(f32), Bp, Hp)
    c0_p = _pad2(c0.astype(f32), Bp, Hp)
    w_hh = _pad_gate_cols(params["weight_hh"], Hp, H, Hp).astype(jnp.bfloat16)
    g_hh = _pad_gate_vec(params["bn_hh_weight"], H, Hp)
    # Fold the LSTM bias into bn_hh's shift: saves one (B,4H) add per step.
    b_hh = _pad_gate_vec(params["bn_hh_bias"] + params["bias"], H, Hp)
    g_c = jnp.pad(params["bn_c_weight"], (0, Hp - H)).reshape(1, Hp)
    b_c = jnp.pad(params["bn_c_bias"], (0, Hp - H)).reshape(1, Hp)
    row_mask = (jnp.arange(Bp) < B).astype(f32).reshape(Bp, 1)

    const = lambda t: (0, 0)
    kernel = functools.partial(bnlstm_seq_kernel, hidden_pad=Hp, chunk=C,
                               inv_batch=1.0 / B)

    grid_spec = pltpu.PrefetchScalarGridSpec(
        num_scalar_prefetch=0,
        grid=(Tc,),
        in_specs=[
            pl.BlockSpec((C, Bp, 4 * Hp), lambda t: (t, 0, 0)),  # bn_ih(x@W_ih) chunk
            pl.BlockSpec((Bp, Hp), const),                        # h0
            pl.BlockSpec((Bp, Hp), const),                        # c0
            pl.BlockSpec((Hp, 4 * Hp), const),                    # W_hh (bf16, resident)
            pl.BlockSpec((1, 4 * Hp), const),                     # gamma_hh
            pl.BlockSpec((1, 4 * Hp), const),                     # beta_hh + bias
            pl.BlockSpec((1, Hp), const),                         # gamma_c
            pl.BlockSpec((1, Hp), const),                         # beta_c
            pl.BlockSpec((Bp, 1), const),                         # batch row mask
        ],
        out_specs=(
            pl.BlockSpec((C, Bp, Hp), lambda t: (t, 0, 0)),       # h sequence
            pl.BlockSpec((C, Bp, Hp), lambda t: (t, 0, 0)),       # c sequence
        ),
        scratch_shapes=[
            pltpu.VMEM((Bp, Hp), jnp.float32),   # h carry (f32 across grid steps)
            pltpu.VMEM((Bp, Hp), jnp.float32),   # c carry
        ],
    )

    h_seq, c_seq = pl.pallas_call(
        kernel,
        out_shape=(
            jax.ShapeDtypeStruct((Tp, Bp, Hp), out_dtype),
            jax.ShapeDtypeStruct((Tp, Bp, Hp), out_dtype),
        ),
        grid_spec=grid_spec,
        compiler_params=pltpu.CompilerParams(
            # Sequential carry over T; batch cannot be sharded across cores
            # without changing the per-timestep batch-norm statistics.
            dimension_semantics=("arbitrary",),
            vmem_limit_bytes=_vmem_limit_bytes(),
        ),
    )(bn_wi, h0_p, c0_p, w_hh, g_hh, b_hh, g_c, b_c, row_mask)

    if trim:
        return h_seq[:T, :B, :H], c_seq[:T, :B, :H]
    return h_seq, c_seq


def bnlstm_cell_forward(x, h0, c0, params, time):
    """Single BNLSTMCell step (API parity with the torch module's forward).

    NOTE: for stepping a whole sequence, call bnlstm_forward_sequence once —
    looping this per step pays per-call weight DMA + dispatch overhead that
    dwarfs the per-step compute.
    """
    # TODO(synk): per-timestep running_mean_t/running_var_t updates (stateful
    #             side effect of training-mode BN) are not materialized; eval
    #             mode stat selection via `time` is not supported.
    del time
    h_seq, c_seq = bnlstm_forward_sequence(x[None], h0, c0, params, time_chunk=1)
    return h_seq[0], c_seq[0]


# ---------------------------------------------------------------------------
# Parameter init mirroring BNLSTMCell.reset_parameters(), and a JAX reference.
# ---------------------------------------------------------------------------

def init_bnlstm_params(key, input_size, hidden_size):
    H = hidden_size
    w_ih = jax.nn.initializers.orthogonal()(key, (input_size, 4 * H), jnp.float32)
    w_hh = jnp.tile(jnp.eye(H, dtype=jnp.float32), (1, 4))
    return {
        "weight_ih": w_ih,
        "weight_hh": w_hh,
        "bias": jnp.zeros((4 * H,), jnp.float32),
        "bn_ih_weight": jnp.full((4 * H,), 0.1, jnp.float32),
        "bn_ih_bias": jnp.zeros((4 * H,), jnp.float32),
        "bn_hh_weight": jnp.full((4 * H,), 0.1, jnp.float32),
        "bn_hh_bias": jnp.zeros((4 * H,), jnp.float32),
        "bn_c_weight": jnp.full((H,), 0.1, jnp.float32),
        "bn_c_bias": jnp.zeros((H,), jnp.float32),
    }


def _ref_bn(x, gamma, beta):
    mean = jnp.mean(x, axis=0, keepdims=True)
    var = jnp.mean((x - mean) ** 2, axis=0, keepdims=True)
    return (x - mean) * jax.lax.rsqrt(var + EPS) * gamma + beta


def _ref_step(x, h0, c0, params):
    # Mirror the kernel's intentional numerical deviations: bf16 matmul operands
    # (f32 accumulation) and the bf16 round-trip of the streamed bn_ih result.
    w_ih = params["weight_ih"].astype(jnp.bfloat16)
    w_hh = params["weight_hh"].astype(jnp.bfloat16)
    wi = jnp.dot(x.astype(jnp.bfloat16), w_ih, preferred_element_type=jnp.float32)
    wh = jnp.dot(h0.astype(jnp.bfloat16), w_hh, preferred_element_type=jnp.float32)
    bn_wi = _ref_bn(wi, params["bn_ih_weight"], params["bn_ih_bias"])
    bn_wi = bn_wi.astype(jnp.bfloat16).astype(jnp.float32)
    bn_wh = _ref_bn(wh, params["bn_hh_weight"], params["bn_hh_bias"])
    s = bn_wh + bn_wi + params["bias"][None, :]
    H = h0.shape[1]
    f, i, o, g = (s[:, k * H:(k + 1) * H] for k in range(4))
    c1 = jax.nn.sigmoid(f) * c0 + jax.nn.sigmoid(i) * jnp.tanh(g)
    bn_c1 = _ref_bn(c1, params["bn_c_weight"], params["bn_c_bias"])
    h1 = jax.nn.sigmoid(o) * jnp.tanh(bn_c1)
    return h1, c1


if __name__ == "__main__":
    batch = 2
    input_size = 16
    hidden_size = 32
    max_length = 8
    seq_len = 8

    key = jax.random.PRNGKey(0)
    k_p, k_x, k_h, k_c = jax.random.split(key, 4)

    params = init_bnlstm_params(k_p, input_size, hidden_size)
    x_seq = jax.random.normal(k_x, (seq_len, batch, input_size), jnp.float32)
    h0 = jax.random.normal(k_h, (batch, hidden_size), jnp.float32)
    c0 = jax.random.normal(k_c, (batch, hidden_size), jnp.float32)

    # Whole recurrence in one pallas_call (input projection hoisted, T chunked).
    h_seq, c_seq = bnlstm_forward_sequence(x_seq, h0, c0, params)
    jax.block_until_ready((h_seq, c_seq))

    # Single-step cell API (one grid step), as in BNLSTMCell.forward.
    h1, c1 = bnlstm_cell_forward(x_seq[0], h0, c0, params,
                                 time=min(3, max_length - 1))
    jax.block_until_ready((h1, c1))

    # Pure-JAX reference recurrence for a sanity check.
    h_ref, c_ref = h0, c0
    hs, cs = [], []
    for t in range(seq_len):
        h_ref, c_ref = _ref_step(x_seq[t], h_ref, c_ref, params)
        hs.append(h_ref)
        cs.append(c_ref)
    h_ref_seq = jnp.stack(hs)
    c_ref_seq = jnp.stack(cs)

    assert h_seq.shape == (seq_len, batch, hidden_size)
    assert c_seq.shape == (seq_len, batch, hidden_size)
    assert h1.shape == (batch, hidden_size) and c1.shape == (batch, hidden_size)
    assert bool(jnp.all(jnp.isfinite(h_seq.astype(jnp.float32))))
    assert bool(jnp.all(jnp.isfinite(c_seq.astype(jnp.float32))))
    assert jnp.allclose(h_seq.astype(jnp.float32), h_ref_seq, atol=5e-2, rtol=5e-2)
    assert jnp.allclose(c_seq.astype(jnp.float32), c_ref_seq, atol=5e-2, rtol=5e-2)
    assert jnp.allclose(h1.astype(jnp.float32), h_ref_seq[0], atol=5e-2, rtol=5e-2)
    assert jnp.allclose(c1.astype(jnp.float32), c_ref_seq[0], atol=5e-2, rtol=5e-2)
    print("KERNEL_OK")
</pallas_src>

<mosaic_0001>
module attributes {stable_mosaic.version = 11 : i64} {
  func.func @bnlstm_seq_kernel(%arg0: i32, %arg1: memref<8x16x512xbf16, #tpu.memory_space<vmem>>, %arg2: memref<16x128xf32, #tpu.memory_space<vmem>>, %arg3: memref<16x128xf32, #tpu.memory_space<vmem>>, %arg4: memref<128x512xbf16, #tpu.memory_space<vmem>>, %arg5: memref<1x512xf32, #tpu.memory_space<vmem>>, %arg6: memref<1x512xf32, #tpu.memory_space<vmem>>, %arg7: memref<1x128xf32, #tpu.memory_space<vmem>>, %arg8: memref<1x128xf32, #tpu.memory_space<vmem>>, %arg9: memref<16x1xf32, #tpu.memory_space<vmem>>, %arg10: memref<8x16x128xbf16, #tpu.memory_space<vmem>>, %arg11: memref<8x16x128xbf16, #tpu.memory_space<vmem>>, %arg12: memref<16x128xf32, #tpu.memory_space<vmem>>, %arg13: memref<16x128xf32, #tpu.memory_space<vmem>>) attributes {dimension_semantics = [#tpu.dimension_semantics<arbitrary>], iteration_bounds = array<i64: 1>, scalar_prefetch = 0 : i64, scratch_operands = 2 : i64, tpu.core_type = #tpu.core_type<tc>, window_params = [{transform_indices = @transform_0, window_bounds = array<i64: 8, 16, 512>}, {pipeline_mode = #tpu.pipeline_mode<synchronous>, transform_indices = @transform_1, window_bounds = array<i64: 16, 128>}, {pipeline_mode = #tpu.pipeline_mode<synchronous>, transform_indices = @transform_2, window_bounds = array<i64: 16, 128>}, {pipeline_mode = #tpu.pipeline_mode<synchronous>, transform_indices = @transform_3, window_bounds = array<i64: 128, 512>}, {pipeline_mode = #tpu.pipeline_mode<synchronous>, transform_indices = @transform_4, window_bounds = array<i64: 1, 512>}, {pipeline_mode = #tpu.pipeline_mode<synchronous>, transform_indices = @transform_5, window_bounds = array<i64: 1, 512>}, {pipeline_mode = #tpu.pipeline_mode<synchronous>, transform_indices = @transform_6, window_bounds = array<i64: 1, 128>}, {pipeline_mode = #tpu.pipeline_mode<synchronous>, transform_indices = @transform_7, window_bounds = array<i64: 1, 128>}, {pipeline_mode = #tpu.pipeline_mode<synchronous>, transform_indices = @transform_8, window_bounds = array<i64: 16, 1>}, {transform_indices = @transform_9, window_bounds = array<i64: 8, 16, 128>}, {transform_indices = @transform_10, window_bounds = array<i64: 8, 16, 128>}]} {
    %c0_i32 = arith.constant 0 : i32
    %0 = arith.cmpi eq, %arg0, %c0_i32 : i32
    %1 = arith.extui %0 : i1 to i32
    %c0_i32_0 = arith.constant 0 : i32
    %2 = arith.cmpi ne, %1, %c0_i32_0 : i32
    scf.if %2 {
      %c0_266 = arith.constant 0 : index
      %c0_267 = arith.constant 0 : index
      %784 = vector.load %arg2[%c0_266, %c0_267] : memref<16x128xf32, #tpu.memory_space<vmem>>, vector<16x128xf32>
      %c0_268 = arith.constant 0 : index
      %c0_269 = arith.constant 0 : index
      %785 = vector.load %arg12[%c0_268, %c0_269] : memref<16x128xf32, #tpu.memory_space<vmem>>, vector<16x128xf32>
      tpu.vector_store %arg12[%c0_268, %c0_269], %784 {strides = array<i32>} : memref<16x128xf32, #tpu.memory_space<vmem>>, vector<16x128xf32>,
      %c0_270 = arith.constant 0 : index
      %c0_271 = arith.constant 0 : index
      %786 = vector.load %arg3[%c0_270, %c0_271] : memref<16x128xf32, #tpu.memory_space<vmem>>, vector<16x128xf32>
      %c0_272 = arith.constant 0 : index
      %c0_273 = arith.constant 0 : index
      %787 = vector.load %arg13[%c0_272, %c0_273] : memref<16x128xf32, #tpu.memory_space<vmem>>, vector<16x128xf32>
      tpu.vector_store %arg13[%c0_272, %c0_273], %786 {strides = array<i32>} : memref<16x128xf32, #tpu.memory_space<vmem>>, vector<16x128xf32>,
    } else {
    }
    %c0 = arith.constant 0 : index
    %c0_1 = arith.constant 0 : index
    %3 = vector.load %arg5[%c0, %c0_1] : memref<1x512xf32, #tpu.memory_space<vmem>>, vector<1x512xf32>
    %c0_2 = arith.constant 0 : index
    %c0_3 = arith.constant 0 : index
    %4 = vector.load %arg6[%c0_2, %c0_3] : memref<1x512xf32, #tpu.memory_space<vmem>>, vector<1x512xf32>
    %c0_4 = arith.constant 0 : index
    %c0_5 = arith.constant 0 : index
    %5 = vector.load %arg7[%c0_4, %c0_5] : memref<1x128xf32, #tpu.memory_space<vmem>>, vector<1x128xf32>
    %c0_6 = arith.constant 0 : index
    %c0_7 = arith.constant 0 : index
    %6 = vector.load %arg8[%c0_6, %c0_7] : memref<1x128xf32, #tpu.memory_space<vmem>>, vector<1x128xf32>
    %c0_8 = arith.constant 0 : index
    %c0_9 = arith.constant 0 : index
    %7 = vector.load %arg9[%c0_8, %c0_9] : memref<16x1xf32, #tpu.memory_space<vmem>>, vector<16x1xf32>
    %c0_i32_10 = arith.constant 0 : i32
    %8 = arith.index_cast %c0_i32_10 : i32 to index
    %c0_11 = arith.constant 0 : index
    %c0_12 = arith.constant 0 : index
    %9 = vector.load %arg1[%8, %c0_11, %c0_12] : memref<8x16x512xbf16, #tpu.memory_space<vmem>>, vector<1x16x512xbf16>
    %10 = vector.shape_cast %9 : vector<1x16x512xbf16> to vector<16x512xbf16>
    %11 = arith.extf %10 : vector<16x512xbf16> to vector<16x512xf32>
    %c0_13 = arith.constant 0 : index
    %c0_14 = arith.constant 0 : index
    %12 = vector.load %arg12[%c0_13, %c0_14] : memref<16x128xf32, #tpu.memory_space<vmem>>, vector<16x128xf32>
    %13 = arith.truncf %12 : vector<16x128xf32> to vector<16x128xbf16>
    %c0_15 = arith.constant 0 : index
    %c0_16 = arith.constant 0 : index
    %14 = vector.load %arg4[%c0_15, %c0_16] : memref<128x512xbf16, #tpu.memory_space<vmem>>, vector<128x512xbf16>
    %cst = arith.constant dense<0.000000e+00> : vector<16x512xf32>
    %15 = tpu.matmul %13, %14, %cst {dimension_numbers = #tpu.dot_dimension_numbers<[1], [0], [0], [1], [0, 0, 1, 1], [], []>} : vector<16x128xbf16>, vector<128x512xbf16>, vector<16x512xf32> -> vector<16x512xf32>
    %cst_17 = arith.constant dense<0.000000e+00> : vector<512xf32>
    %16 = vector.multi_reduction <add>, %15, %cst_17 [0] : vector<16x512xf32> to vector<512xf32>
    %17 = vector.shape_cast %16 : vector<512xf32> to vector<1x512xf32>
    %cst_18 = arith.constant 5.000000e-01 : f32
    %18 = vector.broadcast %cst_18 : f32 to vector<1x512xf32>
    %19 = arith.mulf %17, %18 : vector<1x512xf32>
    %20 = arith.mulf %15, %15 : vector<16x512xf32>
    %cst_19 = arith.constant dense<0.000000e+00> : vector<512xf32>
    %21 = vector.multi_reduction <add>, %20, %cst_19 [0] : vector<16x512xf32> to vector<512xf32>
    %22 = vector.shape_cast %21 : vector<512xf32> to vector<1x512xf32>
    %cst_20 = arith.constant 5.000000e-01 : f32
    %23 = vector.broadcast %cst_20 : f32 to vector<1x512xf32>
    %24 = arith.mulf %22, %23 : vector<1x512xf32>
    %25 = arith.mulf %19, %19 : vector<1x512xf32>
    %26 = arith.subf %24, %25 : vector<1x512xf32>
    %cst_21 = arith.constant 0.000000e+00 : f32
    %27 = vector.broadcast %cst_21 : f32 to vector<1x512xf32>
    %28 = arith.maximumf %26, %27 : vector<1x512xf32>
    %cst_22 = arith.constant 9.99999974E-6 : f32
    %29 = vector.broadcast %cst_22 : f32 to vector<1x512xf32>
    %30 = arith.addf %28, %29 : vector<1x512xf32>
    %31 = math.rsqrt %30 : vector<1x512xf32>
    %32 = arith.mulf %3, %31 : vector<1x512xf32>
    %33 = arith.mulf %19, %32 : vector<1x512xf32>
    %34 = arith.subf %4, %33 : vector<1x512xf32>
    %35 = vector.broadcast %32 : vector<1x512xf32> to vector<16x512xf32>
    %36 = arith.mulf %15, %35 : vector<16x512xf32>
    %37 = vector.broadcast %34 : vector<1x512xf32> to vector<16x512xf32>
    %38 = arith.addf %36, %37 : vector<16x512xf32>
    %39 = arith.addf %11, %38 : vector<16x512xf32>
    %40 = vector.extract_strided_slice %39 {offsets = [0, 0], sizes = [16, 128], strides = [1, 1]} : vector<16x512xf32> to vector<16x128xf32>
    %41 = vector.extract_strided_slice %39 {offsets = [0, 128], sizes = [16, 128], strides = [1, 1]} : vector<16x512xf32> to vector<16x128xf32>
    %42 = vector.extract_strided_slice %39 {offsets = [0, 256], sizes = [16, 128], strides = [1, 1]} : vector<16x512xf32> to vector<16x128xf32>
    %43 = vector.extract_strided_slice %39 {offsets = [0, 384], sizes = [16, 128], strides = [1, 1]} : vector<16x512xf32> to vector<16x128xf32>
    %44 = arith.negf %40 : vector<16x128xf32>
    %45 = math.exp %44 : vector<16x128xf32>
    %cst_23 = arith.constant 1.000000e+00 : f32
    %46 = vector.broadcast %cst_23 : f32 to vector<16x128xf32>
    %47 = arith.addf %46, %45 : vector<16x128xf32>
    %48 = arith.divf %46, %47 : vector<16x128xf32>
    %c0_24 = arith.constant 0 : index
    %c0_25 = arith.constant 0 : index
    %49 = vector.load %arg13[%c0_24, %c0_25] : memref<16x128xf32, #tpu.memory_space<vmem>>, vector<16x128xf32>
    %50 = arith.mulf %48, %49 : vector<16x128xf32>
    %51 = arith.negf %41 : vector<16x128xf32>
    %52 = math.exp %51 : vector<16x128xf32>
    %cst_26 = arith.constant 1.000000e+00 : f32
    %53 = vector.broadcast %cst_26 : f32 to vector<16x128xf32>
    %54 = arith.addf %53, %52 : vector<16x128xf32>
    %55 = arith.divf %53, %54 : vector<16x128xf32>
    %56 = math.tanh %43 : vector<16x128xf32>
    %57 = arith.mulf %55, %56 : vector<16x128xf32>
    %58 = arith.addf %50, %57 : vector<16x128xf32>
    %59 = vector.broadcast %7 : vector<16x1xf32> to vector<16x128xf32>
    %60 = arith.mulf %58, %59 : vector<16x128xf32>
    %cst_27 = arith.constant dense<0.000000e+00> : vector<128xf32>
    %61 = vector.multi_reduction <add>, %60, %cst_27 [0] : vector<16x128xf32> to vector<128xf32>
    %62 = vector.shape_cast %61 : vector<128xf32> to vector<1x128xf32>
    %cst_28 = arith.constant 5.000000e-01 : f32
    %63 = vector.broadcast %cst_28 : f32 to vector<1x128xf32>
    %64 = arith.mulf %62, %63 : vector<1x128xf32>
    %65 = arith.mulf %60, %60 : vector<16x128xf32>
    %cst_29 = arith.constant dense<0.000000e+00> : vector<128xf32>
    %66 = vector.multi_reduction <add>, %65, %cst_29 [0] : vector<16x128xf32> to vector<128xf32>
    %67 = vector.shape_cast %66 : vector<128xf32> to vector<1x128xf32>
    %cst_30 = arith.constant 5.000000e-01 : f32
    %68 = vector.broadcast %cst_30 : f32 to vector<1x128xf32>
    %69 = arith.mulf %67, %68 : vector<1x128xf32>
    %70 = arith.mulf %64, %64 : vector<1x128xf32>
    %71 = arith.subf %69, %70 : vector<1x128xf32>
    %cst_31 = arith.constant 0.000000e+00 : f32
    %72 = vector.broadcast %cst_31 : f32 to vector<1x128xf32>
    %73 = arith.maximumf %71, %72 : vector<1x128xf32>
    %cst_32 = arith.constant 9.99999974E-6 : f32
    %74 = vector.broadcast %cst_32 : f32 to vector<1x128xf32>
    %75 = arith.addf %73, %74 : vector<1x128xf32>
    %76 = math.rsqrt %75 : vector<1x128xf32>
    %77 = arith.mulf %5, %76 : vector<1x128xf32>
    %78 = arith.mulf %64, %77 : vector<1x128xf32>
    %79 = arith.subf %6, %78 : vector<1x128xf32>
    %80 = vector.broadcast %77 : vector<1x128xf32> to vector<16x128xf32>
    %81 = arith.mulf %60, %80 : vector<16x128xf32>
    %82 = vector.broadcast %79 : vector<1x128xf32> to vector<16x128xf32>
    %83 = arith.addf %81, %82 : vector<16x128xf32>
    %84 = arith.negf %42 : vector<16x128xf32>
    %85 = math.exp %84 : vector<16x128xf32>
    %cst_33 = arith.constant 1.000000e+00 : f32
    %86 = vector.broadcast %cst_33 : f32 to vector<16x128xf32>
    %87 = arith.addf %86, %85 : vector<16x128xf32>
    %88 = arith.divf %86, %87 : vector<16x128xf32>
    %89 = math.tanh %83 : vector<16x128xf32>
    %90 = arith.mulf %88, %89 : vector<16x128xf32>
    %91 = vector.broadcast %7 : vector<16x1xf32> to vector<16x128xf32>
    %92 = arith.mulf %90, %91 : vector<16x128xf32>
    %c0_34 = arith.constant 0 : index
    %c0_35 = arith.constant 0 : index
    %93 = vector.load %arg12[%c0_34, %c0_35] : memref<16x128xf32, #tpu.memory_space<vmem>>, vector<16x128xf32>
    tpu.vector_store %arg12[%c0_34, %c0_35], %92 {strides = array<i32>} : memref<16x128xf32, #tpu.memory_space<vmem>>, vector<16x128xf32>,
    %c0_36 = arith.constant 0 : index
    %c0_37 = arith.constant 0 : index
    %94 = vector.load %arg13[%c0_36, %c0_37] : memref<16x128xf32, #tpu.memory_space<vmem>>, vector<16x128xf32>
    tpu.vector_store %arg13[%c0_36, %c0_37], %60 {strides = array<i32>} : memref<16x128xf32, #tpu.memory_space<vmem>>, vector<16x128xf32>,
    %95 = arith.truncf %92 : vector<16x128xf32> to vector<16x128xbf16>
    %96 = arith.index_cast %c0_i32_10 : i32 to index
    %c0_38 = arith.constant 0 : index
    %c0_39 = arith.constant 0 : index
    %97 = vector.load %arg10[%96, %c0_38, %c0_39] : memref<8x16x128xbf16, #tpu.memory_space<vmem>>, vector<1x16x128xbf16>
    %98 = vector.shape_cast %97 : vector<1x16x128xbf16> to vector<16x128xbf16>
    %99 = vector.shape_cast %95 : vector<16x128xbf16> to vector<1x16x128xbf16>
    tpu.vector_store %arg10[%96, %c0_38, %c0_39], %99 {strides = array<i32>} : memref<8x16x128xbf16, #tpu.memory_space<vmem>>, vector<1x16x128xbf16>,
    %100 = arith.truncf %60 : vector<16x128xf32> to vector<16x128xbf16>
    %101 = arith.index_cast %c0_i32_10 : i32 to index
    %c0_40 = arith.constant 0 : index
    %c0_41 = arith.constant 0 : index
    %102 = vector.load %arg11[%101, %c0_40, %c0_41] : memref<8x16x128xbf16, #tpu.memory_space<vmem>>, vector<1x16x128xbf16>
    %103 = vector.shape_cast %102 : vector<1x16x128xbf16> to vector<16x128xbf16>
    %104 = vector.shape_cast %100 : vector<16x128xbf16> to vector<1x16x128xbf16>
    tpu.vector_store %arg11[%101, %c0_40, %c0_41], %104 {strides = array<i32>} : memref<8x16x128xbf16, #tpu.memory_space<vmem>>, vector<1x16x128xbf16>,
    %c1_i32 = arith.constant 1 : i32
    %105 = arith.index_cast %c1_i32 : i32 to index
    %c0_42 = arith.constant 0 : index
    %c0_43 = arith.constant 0 : index
    %106 = vector.load %arg1[%105, %c0_42, %c0_43] : memref<8x16x512xbf16, #tpu.memory_space<vmem>>, vector<1x16x512xbf16>
    %107 = vector.shape_cast %106 : vector<1x16x512xbf16> to vector<16x512xbf16>
    %108 = arith.extf %107 : vector<16x512xbf16> to vector<16x512xf32>
    %c0_44 = arith.constant 0 : index
    %c0_45 = arith.constant 0 : index
    %109 = vector.load %arg12[%c0_44, %c0_45] : memref<16x128xf32, #tpu.memory_space<vmem>>, vector<16x128xf32>
    %110 = arith.truncf %109 : vector<16x128xf32> to vector<16x128xbf16>
    %c0_46 = arith.constant 0 : index
    %c0_47 = arith.constant 0 : index
    %111 = vector.load %arg4[%c0_46, %c0_47] : memref<128x512xbf16, #tpu.memory_space<vmem>>, vector<128x512xbf16>
    %cst_48 = arith.constant dense<0.000000e+00> : vector<16x512xf32>
    %112 = tpu.matmul %110, %111, %cst_48 {dimension_numbers = #tpu.dot_dimension_numbers<[1], [0], [0], [1], [0, 0, 1, 1], [], []>} : vector<16x128xbf16>, vector<128x512xbf16>, vector<16x512xf32> -> vector<16x512xf32>
    %cst_49 = arith.constant dense<0.000000e+00> : vector<512xf32>
    %113 = vector.multi_reduction <add>, %112, %cst_49 [0] : vector<16x512xf32> to vector<512xf32>
    %114 = vector.shape_cast %113 : vector<512xf32> to vector<1x512xf32>
    %cst_50 = arith.constant 5.000000e-01 : f32
    %115 = vector.broadcast %cst_50 : f32 to vector<1x512xf32>
    %116 = arith.mulf %114, %115 : vector<1x512xf32>
    %117 = arith.mulf %112, %112 : vector<16x512xf32>
    %cst_51 = arith.constant dense<0.000000e+00> : vector<512xf32>
    %118 = vector.multi_reduction <add>, %117, %cst_51 [0] : vector<16x512xf32> to vector<512xf32>
    %119 = vector.shape_cast %118 : vector<512xf32> to vector<1x512xf32>
    %cst_52 = arith.constant 5.000000e-01 : f32
    %120 = vector.broadcast %cst_52 : f32 to vector<1x512xf32>
    %121 = arith.mulf %119, %120 : vector<1x512xf32>
    %122 = arith.mulf %116, %116 : vector<1x512xf32>
    %123 = arith.subf %121, %122 : vector<1x512xf32>
    %cst_53 = arith.constant 0.000000e+00 : f32
    %124 = vector.broadcast %cst_53 : f32 to vector<1x512xf32>
    %125 = arith.maximumf %123, %124 : vector<1x512xf32>
    %cst_54 = arith.constant 9.99999974E-6 : f32
    %126 = vector.broadcast %cst_54 : f32 to vector<1x512xf32>
    %127 = arith.addf %125, %126 : vector<1x512xf32>
    %128 = math.rsqrt %127 : vector<1x512xf32>
    %129 = arith.mulf %3, %128 : vector<1x512xf32>
    %130 = arith.mulf %116, %129 : vector<1x512xf32>
    %131 = arith.subf %4, %130 : vector<1x512xf32>
    %132 = vector.broadcast %129 : vector<1x512xf32> to vector<16x512xf32>
    %133 = arith.mulf %112, %132 : vector<16x512xf32>
    %134 = vector.broadcast %131 : vector<1x512xf32> to vector<16x512xf32>
    %135 = arith.addf %133, %134 : vector<16x512xf32>
    %136 = arith.addf %108, %135 : vector<16x512xf32>
    %137 = vector.extract_strided_slice %136 {offsets = [0, 0], sizes = [16, 128], strides = [1, 1]} : vector<16x512xf32> to vector<16x128xf32>
    %138 = vector.extract_strided_slice %136 {offsets = [0, 128], sizes = [16, 128], strides = [1, 1]} : vector<16x512xf32> to vector<16x128xf32>
    %139 = vector.extract_strided_slice %136 {offsets = [0, 256], sizes = [16, 128], strides = [1, 1]} : vector<16x512xf32> to vector<16x128xf32>
    %140 = vector.extract_strided_slice %136 {offsets = [0, 384], sizes = [16, 128], strides = [1, 1]} : vector<16x512xf32> to vector<16x128xf32>
    %141 = arith.negf %137 : vector<16x128xf32>
    %142 = math.exp %141 : vector<16x128xf32>
    %cst_55 = arith.constant 1.000000e+00 : f32
    %143 = vector.broadcast %cst_55 : f32 to vector<16x128xf32>
    %144 = arith.addf %143, %142 : vector<16x128xf32>
    %145 = arith.divf %143, %144 : vector<16x128xf32>
    %c0_56 = arith.constant 0 : index
    %c0_57 = arith.constant 0 : index
    %146 = vector.load %arg13[%c0_56, %c0_57] : memref<16x128xf32, #tpu.memory_space<vmem>>, vector<16x128xf32>
    %147 = arith.mulf %145, %146 : vector<16x128xf32>
    %148 = arith.negf %138 : vector<16x128xf32>
    %149 = math.exp %148 : vector<16x128xf32>
    %cst_58 = arith.constant 1.000000e+00 : f32
    %150 = vector.broadcast %cst_58 : f32 to vector<16x128xf32>
    %151 = arith.addf %150, %149 : vector<16x128xf32>
    %152 = arith.divf %150, %151 : vector<16x128xf32>
    %153 = math.tanh %140 : vector<16x128xf32>
    %154 = arith.mulf %152, %153 : vector<16x128xf32>
    %155 = arith.addf %147, %154 : vector<16x128xf32>
    %156 = vector.broadcast %7 : vector<16x1xf32> to vector<16x128xf32>
    %157 = arith.mulf %155, %156 : vector<16x128xf32>
    %cst_59 = arith.constant dense<0.000000e+00> : vector<128xf32>
    %158 = vector.multi_reduction <add>, %157, %cst_59 [0] : vector<16x128xf32> to vector<128xf32>
    %159 = vector.shape_cast %158 : vector<128xf32> to vector<1x128xf32>
    %cst_60 = arith.constant 5.000000e-01 : f32
    %160 = vector.broadcast %cst_60 : f32 to vector<1x128xf32>
    %161 = arith.mulf %159, %160 : vector<1x128xf32>
    %162 = arith.mulf %157, %157 : vector<16x128xf32>
    %cst_61 = arith.constant dense<0.000000e+00> : vector<128xf32>
    %163 = vector.multi_reduction <add>, %162, %cst_61 [0] : vector<16x128xf32> to vector<128xf32>
    %164 = vector.shape_cast %163 : vector<128xf32> to vector<1x128xf32>
    %cst_62 = arith.constant 5.000000e-01 : f32
    %165 = vector.broadcast %cst_62 : f32 to vector<1x128xf32>
    %166 = arith.mulf %164, %165 : vector<1x128xf32>
    %167 = arith.mulf %161, %161 : vector<1x128xf32>
    %168 = arith.subf %166, %167 : vector<1x128xf32>
    %cst_63 = arith.constant 0.000000e+00 : f32
    %169 = vector.broadcast %cst_63 : f32 to vector<1x128xf32>
    %170 = arith.maximumf %168, %169 : vector<1x128xf32>
    %cst_64 = arith.constant 9.99999974E-6 : f32
    %171 = vector.broadcast %cst_64 : f32 to vector<1x128xf32>
    %172 = arith.addf %170, %171 : vector<1x128xf32>
    %173 = math.rsqrt %172 : vector<1x128xf32>
    %174 = arith.mulf %5, %173 : vector<1x128xf32>
    %175 = arith.mulf %161, %174 : vector<1x128xf32>
    %176 = arith.subf %6, %175 : vector<1x128xf32>
    %177 = vector.broadcast %174 : vector<1x128xf32> to vector<16x128xf32>
    %178 = arith.mulf %157, %177 : vector<16x128xf32>
    %179 = vector.broadcast %176 : vector<1x128xf32> to vector<16x128xf32>
    %180 = arith.addf %178, %179 : vector<16x128xf32>
    %181 = arith.negf %139 : vector<16x128xf32>
    %182 = math.exp %181 : vector<16x128xf32>
    %cst_65 = arith.constant 1.000000e+00 : f32
    %183 = vector.broadcast %cst_65 : f32 to vector<16x128xf32>
    %184 = arith.addf %183, %182 : vector<16x128xf32>
    %185 = arith.divf %183, %184 : vector<16x128xf32>
    %186 = math.tanh %180 : vector<16x128xf32>
    %187 = arith.mulf %185, %186 : vector<16x128xf32>
    %188 = vector.broadcast %7 : vector<16x1xf32> to vector<16x128xf32>
    %189 = arith.mulf %187, %188 : vector<16x128xf32>
    %c0_66 = arith.constant 0 : index
    %c0_67 = arith.constant 0 : index
    %190 = vector.load %arg12[%c0_66, %c0_67] : memref<16x128xf32, #tpu.memory_space<vmem>>, vector<16x128xf32>
    tpu.vector_store %arg12[%c0_66, %c0_67], %189 {strides = array<i32>} : memref<16x128xf32, #tpu.memory_space<vmem>>, vector<16x128xf32>,
    %c0_68 = arith.constant 0 : index
    %c0_69 = arith.constant 0 : index
    %191 = vector.load %arg13[%c0_68, %c0_69] : memref<16x128xf32, #tpu.memory_space<vmem>>, vector<16x128xf32>
    tpu.vector_store %arg13[%c0_68, %c0_69], %157 {strides = array<i32>} : memref<16x128xf32, #tpu.memory_space<vmem>>, vector<16x128xf32>,
    %192 = arith.truncf %189 : vector<16x128xf32> to vector<16x128xbf16>
    %193 = arith.index_cast %c1_i32 : i32 to index
    %c0_70 = arith.constant 0 : index
    %c0_71 = arith.constant 0 : index
    %194 = vector.load %arg10[%193, %c0_70, %c0_71] : memref<8x16x128xbf16, #tpu.memory_space<vmem>>, vector<1x16x128xbf16>
    %195 = vector.shape_cast %194 : vector<1x16x128xbf16> to vector<16x128xbf16>
    %196 = vector.shape_cast %192 : vector<16x128xbf16> to vector<1x16x128xbf16>
    tpu.vector_store %arg10[%193, %c0_70, %c0_71], %196 {strides = array<i32>} : memref<8x16x128xbf16, #tpu.memory_space<vmem>>, vector<1x16x128xbf16>,
    %197 = arith.truncf %157 : vector<16x128xf32> to vector<16x128xbf16>
    %198 = arith.index_cast %c1_i32 : i32 to index
    %c0_72 = arith.constant 0 : index
    %c0_73 = arith.constant 0 : index
    %199 = vector.load %arg11[%198, %c0_72, %c0_73] : memref<8x16x128xbf16, #tpu.memory_space<vmem>>, vector<1x16x128xbf16>
    %200 = vector.shape_cast %199 : vector<1x16x128xbf16> to vector<16x128xbf16>
    %201 = vector.shape_cast %197 : vector<16x128xbf16> to vector<1x16x128xbf16>
    tpu.vector_store %arg11[%198, %c0_72, %c0_73], %201 {strides = array<i32>} : memref<8x16x128xbf16, #tpu.memory_space<vmem>>, vector<1x16x128xbf16>,
    %c2_i32 = arith.constant 2 : i32
    %202 = arith.index_cast %c2_i32 : i32 to index
    %c0_74 = arith.constant 0 : index
    %c0_75 = arith.constant 0 : index
    %203 = vector.load %arg1[%202, %c0_74, %c0_75] : memref<8x16x512xbf16, #tpu.memory_space<vmem>>, vector<1x16x512xbf16>
    %204 = vector.shape_cast %203 : vector<1x16x512xbf16> to vector<16x512xbf16>
    %205 = arith.extf %204 : vector<16x512xbf16> to vector<16x512xf32>
    %c0_76 = arith.constant 0 : index
    %c0_77 = arith.constant 0 : index
    %206 = vector.load %arg12[%c0_76, %c0_77] : memref<16x128xf32, #tpu.memory_space<vmem>>, vector<16x128xf32>
    %207 = arith.truncf %206 : vector<16x128xf32> to vector<16x128xbf16>
    %c0_78 = arith.constant 0 : index
    %c0_79 = arith.constant 0 : index
    %208 = vector.load %arg4[%c0_78, %c0_79] : memref<128x512xbf16, #tpu.memory_space<vmem>>, vector<128x512xbf16>
    %cst_80 = arith.constant dense<0.000000e+00> : vector<16x512xf32>
    %209 = tpu.matmul %207, %208, %cst_80 {dimension_numbers = #tpu.dot_dimension_numbers<[1], [0], [0], [1], [0, 0, 1, 1], [], []>} : vector<16x128xbf16>, vector<128x512xbf16>, vector<16x512xf32> -> vector<16x512xf32>
    %cst_81 = arith.constant dense<0.000000e+00> : vector<512xf32>
    %210 = vector.multi_reduction <add>, %209, %cst_81 [0] : vector<16x512xf32> to vector<512xf32>
    %211 = vector.shape_cast %210 : vector<512xf32> to vector<1x512xf32>
    %cst_82 = arith.constant 5.000000e-01 : f32
    %212 = vector.broadcast %cst_82 : f32 to vector<1x512xf32>
    %213 = arith.mulf %211, %212 : vector<1x512xf32>
    %214 = arith.mulf %209, %209 : vector<16x512xf32>
    %cst_83 = arith.constant dense<0.000000e+00> : vector<512xf32>
    %215 = vector.multi_reduction <add>, %214, %cst_83 [0] : vector<16x512xf32> to vector<512xf32>
    %216 = vector.shape_cast %215 : vector<512xf32> to vector<1x512xf32>
    %cst_84 = arith.constant 5.000000e-01 : f32
    %217 = vector.broadcast %cst_84 : f32 to vector<1x512xf32>
    %218 = arith.mulf %216, %217 : vector<1x512xf32>
    %219 = arith.mulf %213, %213 : vector<1x512xf32>
    %220 = arith.subf %218, %219 : vector<1x512xf32>
    %cst_85 = arith.constant 0.000000e+00 : f32
    %221 = vector.broadcast %cst_85 : f32 to vector<1x512xf32>
    %222 = arith.maximumf %220, %221 : vector<1x512xf32>
    %cst_86 = arith.constant 9.99999974E-6 : f32
    %223 = vector.broadcast %cst_86 : f32 to vector<1x512xf32>
    %224 = arith.addf %222, %223 : vector<1x512xf32>
    %225 = math.rsqrt %224 : vector<1x512xf32>
    %226 = arith.mulf %3, %225 : vector<1x512xf32>
    %227 = arith.mulf %213, %226 : vector<1x512xf32>
    %228 = arith.subf %4, %227 : vector<1x512xf32>
    %229 = vector.broadcast %226 : vector<1x512xf32> to vector<16x512xf32>
    %230 = arith.mulf %209, %229 : vector<16x512xf32>
    %231 = vector.broadcast %228 : vector<1x512xf32> to vector<16x512xf32>
    %232 = arith.addf %230, %231 : vector<16x512xf32>
    %233 = arith.addf %205, %232 : vector<16x512xf32>
    %234 = vector.extract_strided_slice %233 {offsets = [0, 0], sizes = [16, 128], strides = [1, 1]} : vector<16x512xf32> to vector<16x128xf32>
    %235 = vector.extract_strided_slice %233 {offsets = [0, 128], sizes = [16, 128], strides = [1, 1]} : vector<16x512xf32> to vector<16x128xf32>
    %236 = vector.extract_strided_slice %233 {offsets = [0, 256], sizes = [16, 128], strides = [1, 1]} : vector<16x512xf32> to vector<16x128xf32>
    %237 = vector.extract_strided_slice %233 {offsets = [0, 384], sizes = [16, 128], strides = [1, 1]} : vector<16x512xf32> to vector<16x128xf32>
    %238 = arith.negf %234 : vector<16x128xf32>
    %239 = math.exp %238 : vector<16x128xf32>
    %cst_87 = arith.constant 1.000000e+00 : f32
    %240 = vector.broadcast %cst_87 : f32 to vector<16x128xf32>
    %241 = arith.addf %240, %239 : vector<16x128xf32>
    %242 = arith.divf %240, %241 : vector<16x128xf32>
    %c0_88 = arith.constant 0 : index
    %c0_89 = arith.constant 0 : index
    %243 = vector.load %arg13[%c0_88, %c0_89] : memref<16x128xf32, #tpu.memory_space<vmem>>, vector<16x128xf32>
    %244 = arith.mulf %242, %243 : vector<16x128xf32>
    %245 = arith.negf %235 : vector<16x128xf32>
    %246 = math.exp %245 : vector<16x128xf32>
    %cst_90 = arith.constant 1.000000e+00 : f32
    %247 = vector.broadcast %cst_90 : f32 to vector<16x128xf32>
    %248 = arith.addf %247, %246 : vector<16x128xf32>
    %249 = arith.divf %247, %248 : vector<16x128xf32>
    %250 = math.tanh %237 : vector<16x128xf32>
    %251 = arith.mulf %249, %250 : vector<16x128xf32>
    %252 = arith.addf %244, %251 : vector<16x128xf32>
    %253 = vector.broadcast %7 : vector<16x1xf32> to vector<16x128xf32>
    %254 = arith.mulf %252, %253 : vector<16x128xf32>
    %cst_91 = arith.constant dense<0.000000e+00> : vector<128xf32>
    %255 = vector.multi_reduction <add>, %254, %cst_91 [0] : vector<16x128xf32> to vector<128xf32>
    %256 = vector.shape_cast %255 : vector<128xf32> to vector<1x128xf32>
    %cst_92 = arith.constant 5.000000e-01 : f32
    %257 = vector.broadcast %cst_92 : f32 to vector<1x128xf32>
    %258 = arith.mulf %256, %257 : vector<1x128xf32>
    %259 = arith.mulf %254, %254 : vector<16x128xf32>
    %cst_93 = arith.constant dense<0.000000e+00> : vector<128xf32>
    %260 = vector.multi_reduction <add>, %259, %cst_93 [0] : vector<16x128xf32> to vector<128xf32>
    %261 = vector.shape_cast %260 : vector<128xf32> to vector<1x128xf32>
    %cst_94 = arith.constant 5.000000e-01 : f32
    %262 = vector.broadcast %cst_94 : f32 to vector<1x128xf32>
    %263 = arith.mulf %261, %262 : vector<1x128xf32>
    %264 = arith.mulf %258, %258 : vector<1x128xf32>
    %265 = arith.subf %263, %264 : vector<1x128xf32>
    %cst_95 = arith.constant 0.000000e+00 : f32
    %266 = vector.broadcast %cst_95 : f32 to vector<1x128xf32>
    %267 = arith.maximumf %265, %266 : vector<1x128xf32>
    %cst_96 = arith.constant 9.99999974E-6 : f32
    %268 = vector.broadcast %cst_96 : f32 to vector<1x128xf32>
    %269 = arith.addf %267, %268 : vector<1x128xf32>
    %270 = math.rsqrt %269 : vector<1x128xf32>
    %271 = arith.mulf %5, %270 : vector<1x128xf32>
    %272 = arith.mulf %258, %271 : vector<1x128xf32>
    %273 = arith.subf %6, %272 : vector<1x128xf32>
    %274 = vector.broadcast %271 : vector<1x128xf32> to vector<16x128xf32>
    %275 = arith.mulf %254, %274 : vector<16x128xf32>
    %276 = vector.broadcast %273 : vector<1x128xf32> to vector<16x128xf32>
    %277 = arith.addf %275, %276 : vector<16x128xf32>
    %278 = arith.negf %236 : vector<16x128xf32>
    %279 = math.exp %278 : vector<16x128xf32>
    %cst_97 = arith.constant 1.000000e+00 : f32
    %280 = vector.broadcast %cst_97 : f32 to vector<16x128xf32>
    %281 = arith.addf %280, %279 : vector<16x128xf32>
    %282 = arith.divf %280, %281 : vector<16x128xf32>
    %283 = math.tanh %277 : vector<16x128xf32>
    %284 = arith.mulf %282, %283 : vector<16x128xf32>
    %285 = vector.broadcast %7 : vector<16x1xf32> to vector<16x128xf32>
    %286 = arith.mulf %284, %285 : vector<16x128xf32>
    %c0_98 = arith.constant 0 : index
    %c0_99 = arith.constant 0 : index
    %287 = vector.load %arg12[%c0_98, %c0_99] : memref<16x128xf32, #tpu.memory_space<vmem>>, vector<16x128xf32>
    tpu.vector_store %arg12[%c0_98, %c0_99], %286 {strides = array<i32>} : memref<16x128xf32, #tpu.memory_space<vmem>>, vector<16x128xf32>,
    %c0_100 = arith.constant 0 : index
    %c0_101 = arith.constant 0 : index
    %288 = vector.load %arg13[%c0_100, %c0_101] : memref<16x128xf32, #tpu.memory_space<vmem>>, vector<16x128xf32>
    tpu.vector_store %arg13[%c0_100, %c0_101], %254 {strides = array<i32>} : memref<16x128xf32, #tpu.memory_space<vmem>>, vector<16x128xf32>,
    %289 = arith.truncf %286 : vector<16x128xf32> to vector<16x128xbf16>
    %290 = arith.index_cast %c2_i32 : i32 to index
    %c0_102 = arith.constant 0 : index
    %c0_103 = arith.constant 0 : index
    %291 = vector.load %arg10[%290, %c0_102, %c0_103] : memref<8x16x128xbf16, #tpu.memory_space<vmem>>, vector<1x16x128xbf16>
    %292 = vector.shape_cast %291 : vector<1x16x128xbf16> to vector<16x128xbf16>
    %293 = vector.shape_cast %289 : vector<16x128xbf16> to vector<1x16x128xbf16>
    tpu.vector_store %arg10[%290, %c0_102, %c0_103], %293 {strides = array<i32>} : memref<8x16x128xbf16, #tpu.memory_space<vmem>>, vector<1x16x128xbf16>,
    %294 = arith.truncf %254 : vector<16x128xf32> to vector<16x128xbf16>
    %295 = arith.index_cast %c2_i32 : i32 to index
    %c0_104 = arith.constant 0 : index
    %c0_105 = arith.constant 0 : index
    %296 = vector.load %arg11[%295, %c0_104, %c0_105] : memref<8x16x128xbf16, #tpu.memory_space<vmem>>, vector<1x16x128xbf16>
    %297 = vector.shape_cast %296 : vector<1x16x128xbf16> to vector<16x128xbf16>
    %298 = vector.shape_cast %294 : vector<16x128xbf16> to vector<1x16x128xbf16>
    tpu.vector_store %arg11[%295, %c0_104, %c0_105], %298 {strides = array<i32>} : memref<8x16x128xbf16, #tpu.memory_space<vmem>>, vector<1x16x128xbf16>,
    %c3_i32 = arith.constant 3 : i32
    %299 = arith.index_cast %c3_i32 : i32 to index
    %c0_106 = arith.constant 0 : index
    %c0_107 = arith.constant 0 : index
    %300 = vector.load %arg1[%299, %c0_106, %c0_107] : memref<8x16x512xbf16, #tpu.memory_space<vmem>>, vector<1x16x512xbf16>
    %301 = vector.shape_cast %300 : vector<1x16x512xbf16> to vector<16x512xbf16>
    %302 = arith.extf %301 : vector<16x512xbf16> to vector<16x512xf32>
    %c0_108 = arith.constant 0 : index
    %c0_109 = arith.constant 0 : index
    %303 = vector.load %arg12[%c0_108, %c0_109] : memref<16x128xf32, #tpu.memory_space<vmem>>, vector<16x128xf32>
    %304 = arith.truncf %303 : vector<16x128xf32> to vector<16x128xbf16>
    %c0_110 = arith.constant 0 : index
    %c0_111 = arith.constant 0 : index
    %305 = vector.load %arg4[%c0_110, %c0_111] : memref<128x512xbf16, #tpu.memory_space<vmem>>, vector<128x512xbf16>
    %cst_112 = arith.constant dense<0.000000e+00> : vector<16x512xf32>
    %306 = tpu.matmul %304, %305, %cst_112 {dimension_numbers = #tpu.dot_dimension_numbers<[1], [0], [0], [1], [0, 0, 1, 1], [], []>} : vector<16x128xbf16>, vector<128x512xbf16>, vector<16x512xf32> -> vector<16x512xf32>
    %cst_113 = arith.constant dense<0.000000e+00> : vector<512xf32>
    %307 = vector.multi_reduction <add>, %306, %cst_113 [0] : vector<16x512xf32> to vector<512xf32>
    %308 = vector.shape_cast %307 : vector<512xf32> to vector<1x512xf32>
    %cst_114 = arith.constant 5.000000e-01 : f32
    %309 = vector.broadcast %cst_114 : f32 to vector<1x512xf32>
    %310 = arith.mulf %308, %309 : vector<1x512xf32>
    %311 = arith.mulf %306, %306 : vector<16x512xf32>
    %cst_115 = arith.constant dense<0.000000e+00> : vector<512xf32>
    %312 = vector.multi_reduction <add>, %311, %cst_115 [0] : vector<16x512xf32> to vector<512xf32>
    %313 = vector.shape_cast %312 : vector<512xf32> to vector<1x512xf32>
    %cst_116 = arith.constant 5.000000e-01 : f32
    %314 = vector.broadcast %cst_116 : f32 to vector<1x512xf32>
    %315 = arith.mulf %313, %314 : vector<1x512xf32>
    %316 = arith.mulf %310, %310 : vector<1x512xf32>
    %317 = arith.subf %315, %316 : vector<1x512xf32>
    %cst_117 = arith.constant 0.000000e+00 : f32
    %318 = vector.broadcast %cst_117 : f32 to vector<1x512xf32>
    %319 = arith.maximumf %317, %318 : vector<1x512xf32>
    %cst_118 = arith.constant 9.99999974E-6 : f32
    %320 = vector.broadcast %cst_118 : f32 to vector<1x512xf32>
    %321 = arith.addf %319, %320 : vector<1x512xf32>
    %322 = math.rsqrt %321 : vector<1x512xf32>
    %323 = arith.mulf %3, %322 : vector<1x512xf32>
    %324 = arith.mulf %310, %323 : vector<1x512xf32>
    %325 = arith.subf %4, %324 : vector<1x512xf32>
    %326 = vector.broadcast %323 : vector<1x512xf32> to vector<16x512xf32>
    %327 = arith.mulf %306, %326 : vector<16x512xf32>
    %328 = vector.broadcast %325 : vector<1x512xf32> to vector<16x512xf32>
    %329 = arith.addf %327, %328 : vector<16x512xf32>
    %330 = arith.addf %302, %329 : vector<16x512xf32>
    %331 = vector.extract_strided_slice %330 {offsets = [0, 0], sizes = [16, 128], strides = [1, 1]} : vector<16x512xf32> to vector<16x128xf32>
    %332 = vector.extract_strided_slice %330 {offsets = [0, 128], sizes = [16, 128], strides = [1, 1]} : vector<16x512xf32> to vector<16x128xf32>
    %333 = vector.extract_strided_slice %330 {offsets = [0, 256], sizes = [16, 128], strides = [1, 1]} : vector<16x512xf32> to vector<16x128xf32>
    %334 = vector.extract_strided_slice %330 {offsets = [0, 384], sizes = [16, 128], strides = [1, 1]} : vector<16x512xf32> to vector<16x128xf32>
    %335 = arith.negf %331 : vector<16x128xf32>
    %336 = math.exp %335 : vector<16x128xf32>
    %cst_119 = arith.constant 1.000000e+00 : f32
    %337 = vector.broadcast %cst_119 : f32 to vector<16x128xf32>
    %338 = arith.addf %337, %336 : vector<16x128xf32>
    %339 = arith.divf %337, %338 : vector<16x128xf32>
    %c0_120 = arith.constant 0 : index
    %c0_121 = arith.constant 0 : index
    %340 = vector.load %arg13[%c0_120, %c0_121] : memref<16x128xf32, #tpu.memory_space<vmem>>, vector<16x128xf32>
    %341 = arith.mulf %339, %340 : vector<16x128xf32>
    %342 = arith.negf %332 : vector<16x128xf32>
    %343 = math.exp %342 : vector<16x128xf32>
    %cst_122 = arith.constant 1.000000e+00 : f32
    %344 = vector.broadcast %cst_122 : f32 to vector<16x128xf32>
    %345 = arith.addf %344, %343 : vector<16x128xf32>
    %346 = arith.divf %344, %345 : vector<16x128xf32>
    %347 = math.tanh %334 : vector<16x128xf32>
    %348 = arith.mulf %346, %347 : vector<16x128xf32>
    %349 = arith.addf %341, %348 : vector<16x128xf32>
    %350 = vector.broadcast %7 : vector<16x1xf32> to vector<16x128xf32>
    %351 = arith.mulf %349, %350 : vector<16x128xf32>
    %cst_123 = arith.constant dense<0.000000e+00> : vector<128xf32>
    %352 = vector.multi_reduction <add>, %351, %cst_123 [0] : vector<16x128xf32> to vector<128xf32>
    %353 = vector.shape_cast %352 : vector<128xf32> to vector<1x128xf32>
    %cst_124 = arith.constant 5.000000e-01 : f32
    %354 = vector.broadcast %cst_124 : f32 to vector<1x128xf32>
    %355 = arith.mulf %353, %354 : vector<1x128xf32>
    %356 = arith.mulf %351, %351 : vector<16x128xf32>
    %cst_125 = arith.constant dense<0.000000e+00> : vector<128xf32>
    %357 = vector.multi_reduction <add>, %356, %cst_125 [0] : vector<16x128xf32> to vector<128xf32>
    %358 = vector.shape_cast %357 : vector<128xf32> to vector<1x128xf32>
    %cst_126 = arith.constant 5.000000e-01 : f32
    %359 = vector.broadcast %cst_126 : f32 to vector<1x128xf32>
    %360 = arith.mulf %358, %359 : vector<1x128xf32>
    %361 = arith.mulf %355, %355 : vector<1x128xf32>
    %362 = arith.subf %360, %361 : vector<1x128xf32>
    %cst_127 = arith.constant 0.000000e+00 : f32
    %363 = vector.broadcast %cst_127 : f32 to vector<1x128xf32>
    %364 = arith.maximumf %362, %363 : vector<1x128xf32>
    %cst_128 = arith.constant 9.99999974E-6 : f32
    %365 = vector.broadcast %cst_128 : f32 to vector<1x128xf32>
    %366 = arith.addf %364, %365 : vector<1x128xf32>
    %367 = math.rsqrt %366 : vector<1x128xf32>
    %368 = arith.mulf %5, %367 : vector<1x128xf32>
    %369 = arith.mulf %355, %368 : vector<1x128xf32>
    %370 = arith.subf %6, %369 : vector<1x128xf32>
    %371 = vector.broadcast %368 : vector<1x128xf32> to vector<16x128xf32>
    %372 = arith.mulf %351, %371 : vector<16x128xf32>
    %373 = vector.broadcast %370 : vector<1x128xf32> to vector<16x128xf32>
    %374 = arith.addf %372, %373 : vector<16x128xf32>
    %375 = arith.negf %333 : vector<16x128xf32>
    %376 = math.exp %375 : vector<16x128xf32>
    %cst_129 = arith.constant 1.000000e+00 : f32
    %377 = vector.broadcast %cst_129 : f32 to vector<16x128xf32>
    %378 = arith.addf %377, %376 : vector<16x128xf32>
    %379 = arith.divf %377, %378 : vector<16x128xf32>
    %380 = math.tanh %374 : vector<16x128xf32>
    %381 = arith.mulf %379, %380 : vector<16x128xf32>
    %382 = vector.broadcast %7 : vector<16x1xf32> to vector<16x128xf32>
    %383 = arith.mulf %381, %382 : vector<16x128xf32>
    %c0_130 = arith.constant 0 : index
    %c0_131 = arith.constant 0 : index
    %384 = vector.load %arg12[%c0_130, %c0_131] : memref<16x128xf32, #tpu.memory_space<vmem>>, vector<16x128xf32>
    tpu.vector_store %arg12[%c0_130, %c0_131], %383 {strides = array<i32>} : memref<16x128xf32, #tpu.memory_space<vmem>>, vector<16x128xf32>,
    %c0_132 = arith.constant 0 : index
    %c0_133 = arith.constant 0 : index
    %385 = vector.load %arg13[%c0_132, %c0_133] : memref<16x128xf32, #tpu.memory_space<vmem>>, vector<16x128xf32>
    tpu.vector_store %arg13[%c0_132, %c0_133], %351 {strides = array<i32>} : memref<16x128xf32, #tpu.memory_space<vmem>>, vector<16x128xf32>,
    %386 = arith.truncf %383 : vector<16x128xf32> to vector<16x128xbf16>
    %387 = arith.index_cast %c3_i32 : i32 to index
    %c0_134 = arith.constant 0 : index
    %c0_135 = arith.constant 0 : index
    %388 = vector.load %arg10[%387, %c0_134, %c0_135] : memref<8x16x128xbf16, #tpu.memory_space<vmem>>, vector<1x16x128xbf16>
    %389 = vector.shape_cast %388 : vector<1x16x128xbf16> to vector<16x128xbf16>
    %390 = vector.shape_cast %386 : vector<16x128xbf16> to vector<1x16x128xbf16>
    tpu.vector_store %arg10[%387, %c0_134, %c0_135], %390 {strides = array<i32>} : memref<8x16x128xbf16, #tpu.memory_space<vmem>>, vector<1x16x128xbf16>,
    %391 = arith.truncf %351 : vector<16x128xf32> to vector<16x128xbf16>
    %392 = arith.index_cast %c3_i32 : i32 to index
    %c0_136 = arith.constant 0 : index
    %c0_137 = arith.constant 0 : index
    %393 = vector.load %arg11[%392, %c0_136, %c0_137] : memref<8x16x128xbf16, #tpu.memory_space<vmem>>, vector<1x16x128xbf16>
    %394 = vector.shape_cast %393 : vector<1x16x128xbf16> to vector<16x128xbf16>
    %395 = vector.shape_cast %391 : vector<16x128xbf16> to vector<1x16x128xbf16>
    tpu.vector_store %arg11[%392, %c0_136, %c0_137], %395 {strides = array<i32>} : memref<8x16x128xbf16, #tpu.memory_space<vmem>>, vector<1x16x128xbf16>,
    %c4_i32 = arith.constant 4 : i32
    %396 = arith.index_cast %c4_i32 : i32 to index
    %c0_138 = arith.constant 0 : index
    %c0_139 = arith.constant 0 : index
    %397 = vector.load %arg1[%396, %c0_138, %c0_139] : memref<8x16x512xbf16, #tpu.memory_space<vmem>>, vector<1x16x512xbf16>
    %398 = vector.shape_cast %397 : vector<1x16x512xbf16> to vector<16x512xbf16>
    %399 = arith.extf %398 : vector<16x512xbf16> to vector<16x512xf32>
    %c0_140 = arith.constant 0 : index
    %c0_141 = arith.constant 0 : index
    %400 = vector.load %arg12[%c0_140, %c0_141] : memref<16x128xf32, #tpu.memory_space<vmem>>, vector<16x128xf32>
    %401 = arith.truncf %400 : vector<16x128xf32> to vector<16x128xbf16>
    %c0_142 = arith.constant 0 : index
    %c0_143 = arith.constant 0 : index
    %402 = vector.load %arg4[%c0_142, %c0_143] : memref<128x512xbf16, #tpu.memory_space<vmem>>, vector<128x512xbf16>
    %cst_144 = arith.constant dense<0.000000e+00> : vector<16x512xf32>
    %403 = tpu.matmul %401, %402, %cst_144 {dimension_numbers = #tpu.dot_dimension_numbers<[1], [0], [0], [1], [0, 0, 1, 1], [], []>} : vector<16x128xbf16>, vector<128x512xbf16>, vector<16x512xf32> -> vector<16x512xf32>
    %cst_145 = arith.constant dense<0.000000e+00> : vector<512xf32>
    %404 = vector.multi_reduction <add>, %403, %cst_145 [0] : vector<16x512xf32> to vector<512xf32>
    %405 = vector.shape_cast %404 : vector<512xf32> to vector<1x512xf32>
    %cst_146 = arith.constant 5.000000e-01 : f32
    %406 = vector.broadcast %cst_146 : f32 to vector<1x512xf32>
    %407 = arith.mulf %405, %406 : vector<1x512xf32>
    %408 = arith.mulf %403, %403 : vector<16x512xf32>
    %cst_147 = arith.constant dense<0.000000e+00> : vector<512xf32>
    %409 = vector.multi_reduction <add>, %408, %cst_147 [0] : vector<16x512xf32> to vector<512xf32>
    %410 = vector.shape_cast %409 : vector<512xf32> to vector<1x512xf32>
    %cst_148 = arith.constant 5.000000e-01 : f32
    %411 = vector.broadcast %cst_148 : f32 to vector<1x512xf32>
    %412 = arith.mulf %410, %411 : vector<1x512xf32>
    %413 = arith.mulf %407, %407 : vector<1x512xf32>
    %414 = arith.subf %412, %413 : vector<1x512xf32>
    %cst_149 = arith.constant 0.000000e+00 : f32
    %415 = vector.broadcast %cst_149 : f32 to vector<1x512xf32>
    %416 = arith.maximumf %414, %415 : vector<1x512xf32>
    %cst_150 = arith.constant 9.99999974E-6 : f32
    %417 = vector.broadcast %cst_150 : f32 to vector<1x512xf32>
    %418 = arith.addf %416, %417 : vector<1x512xf32>
    %419 = math.rsqrt %418 : vector<1x512xf32>
    %420 = arith.mulf %3, %419 : vector<1x512xf32>
    %421 = arith.mulf %407, %420 : vector<1x512xf32>
    %422 = arith.subf %4, %421 : vector<1x512xf32>
    %423 = vector.broadcast %420 : vector<1x512xf32> to vector<16x512xf32>
    %424 = arith.mulf %403, %423 : vector<16x512xf32>
    %425 = vector.broadcast %422 : vector<1x512xf32> to vector<16x512xf32>
    %426 = arith.addf %424, %425 : vector<16x512xf32>
    %427 = arith.addf %399, %426 : vector<16x512xf32>
    %428 = vector.extract_strided_slice %427 {offsets = [0, 0], sizes = [16, 128], strides = [1, 1]} : vector<16x512xf32> to vector<16x128xf32>
    %429 = vector.extract_strided_slice %427 {offsets = [0, 128], sizes = [16, 128], strides = [1, 1]} : vector<16x512xf32> to vector<16x128xf32>
    %430 = vector.extract_strided_slice %427 {offsets = [0, 256], sizes = [16, 128], strides = [1, 1]} : vector<16x512xf32> to vector<16x128xf32>
    %431 = vector.extract_strided_slice %427 {offsets = [0, 384], sizes = [16, 128], strides = [1, 1]} : vector<16x512xf32> to vector<16x128xf32>
    %432 = arith.negf %428 : vector<16x128xf32>
    %433 = math.exp %432 : vector<16x128xf32>
    %cst_151 = arith.constant 1.000000e+00 : f32
    %434 = vector.broadcast %cst_151 : f32 to vector<16x128xf32>
    %435 = arith.addf %434, %433 : vector<16x128xf32>
    %436 = arith.divf %434, %435 : vector<16x128xf32>
    %c0_152 = arith.constant 0 : index
    %c0_153 = arith.constant 0 : index
    %437 = vector.load %arg13[%c0_152, %c0_153] : memref<16x128xf32, #tpu.memory_space<vmem>>, vector<16x128xf32>
    %438 = arith.mulf %436, %437 : vector<16x128xf32>
    %439 = arith.negf %429 : vector<16x128xf32>
    %440 = math.exp %439 : vector<16x128xf32>
    %cst_154 = arith.constant 1.000000e+00 : f32
    %441 = vector.broadcast %cst_154 : f32 to vector<16x128xf32>
    %442 = arith.addf %441, %440 : vector<16x128xf32>
    %443 = arith.divf %441, %442 : vector<16x128xf32>
    %444 = math.tanh %431 : vector<16x128xf32>
    %445 = arith.mulf %443, %444 : vector<16x128xf32>
    %446 = arith.addf %438, %445 : vector<16x128xf32>
    %447 = vector.broadcast %7 : vector<16x1xf32> to vector<16x128xf32>
    %448 = arith.mulf %446, %447 : vector<16x128xf32>
    %cst_155 = arith.constant dense<0.000000e+00> : vector<128xf32>
    %449 = vector.multi_reduction <add>, %448, %cst_155 [0] : vector<16x128xf32> to vector<128xf32>
    %450 = vector.shape_cast %449 : vector<128xf32> to vector<1x128xf32>
    %cst_156 = arith.constant 5.000000e-01 : f32
    %451 = vector.broadcast %cst_156 : f32 to vector<1x128xf32>
    %452 = arith.mulf %450, %451 : vector<1x128xf32>
    %453 = arith.mulf %448, %448 : vector<16x128xf32>
    %cst_157 = arith.constant dense<0.000000e+00> : vector<128xf32>
    %454 = vector.multi_reduction <add>, %453, %cst_157 [0] : vector<16x128xf32> to vector<128xf32>
    %455 = vector.shape_cast %454 : vector<128xf32> to vector<1x128xf32>
    %cst_158 = arith.constant 5.000000e-01 : f32
    %456 = vector.broadcast %cst_158 : f32 to vector<1x128xf32>
    %457 = arith.mulf %455, %456 : vector<1x128xf32>
    %458 = arith.mulf %452, %452 : vector<1x128xf32>
    %459 = arith.subf %457, %458 : vector<1x128xf32>
    %cst_159 = arith.constant 0.000000e+00 : f32
    %460 = vector.broadcast %cst_159 : f32 to vector<1x128xf32>
    %461 = arith.maximumf %459, %460 : vector<1x128xf32>
    %cst_160 = arith.constant 9.99999974E-6 : f32
    %462 = vector.broadcast %cst_160 : f32 to vector<1x128xf32>
    %463 = arith.addf %461, %462 : vector<1x128xf32>
    %464 = math.rsqrt %463 : vector<1x128xf32>
    %465 = arith.mulf %5, %464 : vector<1x128xf32>
    %466 = arith.mulf %452, %465 : vector<1x128xf32>
    %467 = arith.subf %6, %466 : vector<1x128xf32>
    %468 = vector.broadcast %465 : vector<1x128xf32> to vector<16x128xf32>
    %469 = arith.mulf %448, %468 : vector<16x128xf32>
    %470 = vector.broadcast %467 : vector<1x128xf32> to vector<16x128xf32>
    %471 = arith.addf %469, %470 : vector<16x128xf32>
    %472 = arith.negf %430 : vector<16x128xf32>
    %473 = math.exp %472 : vector<16x128xf32>
    %cst_161 = arith.constant 1.000000e+00 : f32
    %474 = vector.broadcast %cst_161 : f32 to vector<16x128xf32>
    %475 = arith.addf %474, %473 : vector<16x128xf32>
    %476 = arith.divf %474, %475 : vector<16x128xf32>
    %477 = math.tanh %471 : vector<16x128xf32>
    %478 = arith.mulf %476, %477 : vector<16x128xf32>
    %479 = vector.broadcast %7 : vector<16x1xf32> to vector<16x128xf32>
    %480 = arith.mulf %478, %479 : vector<16x128xf32>
    %c0_162 = arith.constant 0 : index
    %c0_163 = arith.constant 0 : index
    %481 = vector.load %arg12[%c0_162, %c0_163] : memref<16x128xf32, #tpu.memory_space<vmem>>, vector<16x128xf32>
    tpu.vector_store %arg12[%c0_162, %c0_163], %480 {strides = array<i32>} : memref<16x128xf32, #tpu.memory_space<vmem>>, vector<16x128xf32>,
    %c0_164 = arith.constant 0 : index
    %c0_165 = arith.constant 0 : index
    %482 = vector.load %arg13[%c0_164, %c0_165] : memref<16x128xf32, #tpu.memory_space<vmem>>, vector<16x128xf32>
    tpu.vector_store %arg13[%c0_164, %c0_165], %448 {strides = array<i32>} : memref<16x128xf32, #tpu.memory_space<vmem>>, vector<16x128xf32>,
    %483 = arith.truncf %480 : vector<16x128xf32> to vector<16x128xbf16>
    %484 = arith.index_cast %c4_i32 : i32 to index
    %c0_166 = arith.constant 0 : index
    %c0_167 = arith.constant 0 : index
    %485 = vector.load %arg10[%484, %c0_166, %c0_167] : memref<8x16x128xbf16, #tpu.memory_space<vmem>>, vector<1x16x128xbf16>
    %486 = vector.shape_cast %485 : vector<1x16x128xbf16> to vector<16x128xbf16>
    %487 = vector.shape_cast %483 : vector<16x128xbf16> to vector<1x16x128xbf16>
    tpu.vector_store %arg10[%484, %c0_166, %c0_167], %487 {strides = array<i32>} : memref<8x16x128xbf16, #tpu.memory_space<vmem>>, vector<1x16x128xbf16>,
    %488 = arith.truncf %448 : vector<16x128xf32> to vector<16x128xbf16>
    %489 = arith.index_cast %c4_i32 : i32 to index
    %c0_168 = arith.constant 0 : index
    %c0_169 = arith.constant 0 : index
    %490 = vector.load %arg11[%489, %c0_168, %c0_169] : memref<8x16x128xbf16, #tpu.memory_space<vmem>>, vector<1x16x128xbf16>
    %491 = vector.shape_cast %490 : vector<1x16x128xbf16> to vector<16x128xbf16>
    %492 = vector.shape_cast %488 : vector<16x128xbf16> to vector<1x16x128xbf16>
    tpu.vector_store %arg11[%489, %c0_168, %c0_169], %492 {strides = array<i32>} : memref<8x16x128xbf16, #tpu.memory_space<vmem>>, vector<1x16x128xbf16>,
    %c5_i32 = arith.constant 5 : i32
    %493 = arith.index_cast %c5_i32 : i32 to index
    %c0_170 = arith.constant 0 : index
    %c0_171 = arith.constant 0 : index
    %494 = vector.load %arg1[%493, %c0_170, %c0_171] : memref<8x16x512xbf16, #tpu.memory_space<vmem>>, vector<1x16x512xbf16>
    %495 = vector.shape_cast %494 : vector<1x16x512xbf16> to vector<16x512xbf16>
    %496 = arith.extf %495 : vector<16x512xbf16> to vector<16x512xf32>
    %c0_172 = arith.constant 0 : index
    %c0_173 = arith.constant 0 : index
    %497 = vector.load %arg12[%c0_172, %c0_173] : memref<16x128xf32, #tpu.memory_space<vmem>>, vector<16x128xf32>
    %498 = arith.truncf %497 : vector<16x128xf32> to vector<16x128xbf16>
    %c0_174 = arith.constant 0 : index
    %c0_175 = arith.constant 0 : index
    %499 = vector.load %arg4[%c0_174, %c0_175] : memref<128x512xbf16, #tpu.memory_space<vmem>>, vector<128x512xbf16>
    %cst_176 = arith.constant dense<0.000000e+00> : vector<16x512xf32>
    %500 = tpu.matmul %498, %499, %cst_176 {dimension_numbers = #tpu.dot_dimension_numbers<[1], [0], [0], [1], [0, 0, 1, 1], [], []>} : vector<16x128xbf16>, vector<128x512xbf16>, vector<16x512xf32> -> vector<16x512xf32>
    %cst_177 = arith.constant dense<0.000000e+00> : vector<512xf32>
    %501 = vector.multi_reduction <add>, %500, %cst_177 [0] : vector<16x512xf32> to vector<512xf32>
    %502 = vector.shape_cast %501 : vector<512xf32> to vector<1x512xf32>
    %cst_178 = arith.constant 5.000000e-01 : f32
    %503 = vector.broadcast %cst_178 : f32 to vector<1x512xf32>
    %504 = arith.mulf %502, %503 : vector<1x512xf32>
    %505 = arith.mulf %500, %500 : vector<16x512xf32>
    %cst_179 = arith.constant dense<0.000000e+00> : vector<512xf32>
    %506 = vector.multi_reduction <add>, %505, %cst_179 [0] : vector<16x512xf32> to vector<512xf32>
    %507 = vector.shape_cast %506 : vector<512xf32> to vector<1x512xf32>
    %cst_180 = arith.constant 5.000000e-01 : f32
    %508 = vector.broadcast %cst_180 : f32 to vector<1x512xf32>
    %509 = arith.mulf %507, %508 : vector<1x512xf32>
    %510 = arith.mulf %504, %504 : vector<1x512xf32>
    %511 = arith.subf %509, %510 : vector<1x512xf32>
    %cst_181 = arith.constant 0.000000e+00 : f32
    %512 = vector.broadcast %cst_181 : f32 to vector<1x512xf32>
    %513 = arith.maximumf %511, %512 : vector<1x512xf32>
    %cst_182 = arith.constant 9.99999974E-6 : f32
    %514 = vector.broadcast %cst_182 : f32 to vector<1x512xf32>
    %515 = arith.addf %513, %514 : vector<1x512xf32>
    %516 = math.rsqrt %515 : vector<1x512xf32>
    %517 = arith.mulf %3, %516 : vector<1x512xf32>
    %518 = arith.mulf %504, %517 : vector<1x512xf32>
    %519 = arith.subf %4, %518 : vector<1x512xf32>
    %520 = vector.broadcast %517 : vector<1x512xf32> to vector<16x512xf32>
    %521 = arith.mulf %500, %520 : vector<16x512xf32>
    %522 = vector.broadcast %519 : vector<1x512xf32> to vector<16x512xf32>
    %523 = arith.addf %521, %522 : vector<16x512xf32>
    %524 = arith.addf %496, %523 : vector<16x512xf32>
    %525 = vector.extract_strided_slice %524 {offsets = [0, 0], sizes = [16, 128], strides = [1, 1]} : vector<16x512xf32> to vector<16x128xf32>
    %526 = vector.extract_strided_slice %524 {offsets = [0, 128], sizes = [16, 128], strides = [1, 1]} : vector<16x512xf32> to vector<16x128xf32>
    %527 = vector.extract_strided_slice %524 {offsets = [0, 256], sizes = [16, 128], strides = [1, 1]} : vector<16x512xf32> to vector<16x128xf32>
    %528 = vector.extract_strided_slice %524 {offsets = [0, 384], sizes = [16, 128], strides = [1, 1]} : vector<16x512xf32> to vector<16x128xf32>
    %529 = arith.negf %525 : vector<16x128xf32>
    %530 = math.exp %529 : vector<16x128xf32>
    %cst_183 = arith.constant 1.000000e+00 : f32
    %531 = vector.broadcast %cst_183 : f32 to vector<16x128xf32>
    %532 = arith.addf %531, %530 : vector<16x128xf32>
    %533 = arith.divf %531, %532 : vector<16x128xf32>
    %c0_184 = arith.constant 0 : index
    %c0_185 = arith.constant 0 : index
    %534 = vector.load %arg13[%c0_184, %c0_185] : memref<16x128xf32, #tpu.memory_space<vmem>>, vector<16x128xf32>
    %535 = arith.mulf %533, %534 : vector<16x128xf32>
    %536 = arith.negf %526 : vector<16x128xf32>
    %537 = math.exp %536 : vector<16x128xf32>
    %cst_186 = arith.constant 1.000000e+00 : f32
    %538 = vector.broadcast %cst_186 : f32 to vector<16x128xf32>
    %539 = arith.addf %538, %537 : vector<16x128xf32>
    %540 = arith.divf %538, %539 : vector<16x128xf32>
    %541 = math.tanh %528 : vector<16x128xf32>
    %542 = arith.mulf %540, %541 : vector<16x128xf32>
    %543 = arith.addf %535, %542 : vector<16x128xf32>
    %544 = vector.broadcast %7 : vector<16x1xf32> to vector<16x128xf32>
    %545 = arith.mulf %543, %544 : vector<16x128xf32>
    %cst_187 = arith.constant dense<0.000000e+00> : vector<128xf32>
    %546 = vector.multi_reduction <add>, %545, %cst_187 [0] : vector<16x128xf32> to vector<128xf32>
    %547 = vector.shape_cast %546 : vector<128xf32> to vector<1x128xf32>
    %cst_188 = arith.constant 5.000000e-01 : f32
    %548 = vector.broadcast %cst_188 : f32 to vector<1x128xf32>
    %549 = arith.mulf %547, %548 : vector<1x128xf32>
    %550 = arith.mulf %545, %545 : vector<16x128xf32>
    %cst_189 = arith.constant dense<0.000000e+00> : vector<128xf32>
    %551 = vector.multi_reduction <add>, %550, %cst_189 [0] : vector<16x128xf32> to vector<128xf32>
    %552 = vector.shape_cast %551 : vector<128xf32> to vector<1x128xf32>
    %cst_190 = arith.constant 5.000000e-01 : f32
    %553 = vector.broadcast %cst_190 : f32 to vector<1x128xf32>
    %554 = arith.mulf %552, %553 : vector<1x128xf32>
    %555 = arith.mulf %549, %549 : vector<1x128xf32>
    %556 = arith.subf %554, %555 : vector<1x128xf32>
    %cst_191 = arith.constant 0.000000e+00 : f32
    %557 = vector.broadcast %cst_191 : f32 to vector<1x128xf32>
    %558 = arith.maximumf %556, %557 : vector<1x128xf32>
    %cst_192 = arith.constant 9.99999974E-6 : f32
    %559 = vector.broadcast %cst_192 : f32 to vector<1x128xf32>
    %560 = arith.addf %558, %559 : vector<1x128xf32>
    %561 = math.rsqrt %560 : vector<1x128xf32>
    %562 = arith.mulf %5, %561 : vector<1x128xf32>
    %563 = arith.mulf %549, %562 : vector<1x128xf32>
    %564 = arith.subf %6, %563 : vector<1x128xf32>
    %565 = vector.broadcast %562 : vector<1x128xf32> to vector<16x128xf32>
    %566 = arith.mulf %545, %565 : vector<16x128xf32>
    %567 = vector.broadcast %564 : vector<1x128xf32> to vector<16x128xf32>
    %568 = arith.addf %566, %567 : vector<16x128xf32>
    %569 = arith.negf %527 : vector<16x128xf32>
    %570 = math.exp %569 : vector<16x128xf32>
    %cst_193 = arith.constant 1.000000e+00 : f32
    %571 = vector.broadcast %cst_193 : f32 to vector<16x128xf32>
    %572 = arith.addf %571, %570 : vector<16x128xf32>
    %573 = arith.divf %571, %572 : vector<16x128xf32>
    %574 = math.tanh %568 : vector<16x128xf32>
    %575 = arith.mulf %573, %574 : vector<16x128xf32>
    %576 = vector.broadcast %7 : vector<16x1xf32> to vector<16x128xf32>
    %577 = arith.mulf %575, %576 : vector<16x128xf32>
    %c0_194 = arith.constant 0 : index
    %c0_195 = arith.constant 0 : index
    %578 = vector.load %arg12[%c0_194, %c0_195] : memref<16x128xf32, #tpu.memory_space<vmem>>, vector<16x128xf32>
    tpu.vector_store %arg12[%c0_194, %c0_195], %577 {strides = array<i32>} : memref<16x128xf32, #tpu.memory_space<vmem>>, vector<16x128xf32>,
    %c0_196 = arith.constant 0 : index
    %c0_197 = arith.constant 0 : index
    %579 = vector.load %arg13[%c0_196, %c0_197] : memref<16x128xf32, #tpu.memory_space<vmem>>, vector<16x128xf32>
    tpu.vector_store %arg13[%c0_196, %c0_197], %545 {strides = array<i32>} : memref<16x128xf32, #tpu.memory_space<vmem>>, vector<16x128xf32>,
    %580 = arith.truncf %577 : vector<16x128xf32> to vector<16x128xbf16>
    %581 = arith.index_cast %c5_i32 : i32 to index
    %c0_198 = arith.constant 0 : index
    %c0_199 = arith.constant 0 : index
    %582 = vector.load %arg10[%581, %c0_198, %c0_199] : memref<8x16x128xbf16, #tpu.memory_space<vmem>>, vector<1x16x128xbf16>
    %583 = vector.shape_cast %582 : vector<1x16x128xbf16> to vector<16x128xbf16>
    %584 = vector.shape_cast %580 : vector<16x128xbf16> to vector<1x16x128xbf16>
    tpu.vector_store %arg10[%581, %c0_198, %c0_199], %584 {strides = array<i32>} : memref<8x16x128xbf16, #tpu.memory_space<vmem>>, vector<1x16x128xbf16>,
    %585 = arith.truncf %545 : vector<16x128xf32> to vector<16x128xbf16>
    %586 = arith.index_cast %c5_i32 : i32 to index
    %c0_200 = arith.constant 0 : index
    %c0_201 = arith.constant 0 : index
    %587 = vector.load %arg11[%586, %c0_200, %c0_201] : memref<8x16x128xbf16, #tpu.memory_space<vmem>>, vector<1x16x128xbf16>
    %588 = vector.shape_cast %587 : vector<1x16x128xbf16> to vector<16x128xbf16>
    %589 = vector.shape_cast %585 : vector<16x128xbf16> to vector<1x16x128xbf16>
    tpu.vector_store %arg11[%586, %c0_200, %c0_201], %589 {strides = array<i32>} : memref<8x16x128xbf16, #tpu.memory_space<vmem>>, vector<1x16x128xbf16>,
    %c6_i32 = arith.constant 6 : i32
    %590 = arith.index_cast %c6_i32 : i32 to index
    %c0_202 = arith.constant 0 : index
    %c0_203 = arith.constant 0 : index
    %591 = vector.load %arg1[%590, %c0_202, %c0_203] : memref<8x16x512xbf16, #tpu.memory_space<vmem>>, vector<1x16x512xbf16>
    %592 = vector.shape_cast %591 : vector<1x16x512xbf16> to vector<16x512xbf16>
    %593 = arith.extf %592 : vector<16x512xbf16> to vector<16x512xf32>
    %c0_204 = arith.constant 0 : index
    %c0_205 = arith.constant 0 : index
    %594 = vector.load %arg12[%c0_204, %c0_205] : memref<16x128xf32, #tpu.memory_space<vmem>>, vector<16x128xf32>
    %595 = arith.truncf %594 : vector<16x128xf32> to vector<16x128xbf16>
    %c0_206 = arith.constant 0 : index
    %c0_207 = arith.constant 0 : index
    %596 = vector.load %arg4[%c0_206, %c0_207] : memref<128x512xbf16, #tpu.memory_space<vmem>>, vector<128x512xbf16>
    %cst_208 = arith.constant dense<0.000000e+00> : vector<16x512xf32>
    %597 = tpu.matmul %595, %596, %cst_208 {dimension_numbers = #tpu.dot_dimension_numbers<[1], [0], [0], [1], [0, 0, 1, 1], [], []>} : vector<16x128xbf16>, vector<128x512xbf16>, vector<16x512xf32> -> vector<16x512xf32>
    %cst_209 = arith.constant dense<0.000000e+00> : vector<512xf32>
    %598 = vector.multi_reduction <add>, %597, %cst_209 [0] : vector<16x512xf32> to vector<512xf32>
    %599 = vector.shape_cast %598 : vector<512xf32> to vector<1x512xf32>
    %cst_210 = arith.constant 5.000000e-01 : f32
    %600 = vector.broadcast %cst_210 : f32 to vector<1x512xf32>
    %601 = arith.mulf %599, %600 : vector<1x512xf32>
    %602 = arith.mulf %597, %597 : vector<16x512xf32>
    %cst_211 = arith.constant dense<0.000000e+00> : vector<512xf32>
    %603 = vector.multi_reduction <add>, %602, %cst_211 [0] : vector<16x512xf32> to vector<512xf32>
    %604 = vector.shape_cast %603 : vector<512xf32> to vector<1x512xf32>
    %cst_212 = arith.constant 5.000000e-01 : f32
    %605 = vector.broadcast %cst_212 : f32 to vector<1x512xf32>
    %606 = arith.mulf %604, %605 : vector<1x512xf32>
    %607 = arith.mulf %601, %601 : vector<1x512xf32>
    %608 = arith.subf %606, %607 : vector<1x512xf32>
    %cst_213 = arith.constant 0.000000e+00 : f32
    %609 = vector.broadcast %cst_213 : f32 to vector<1x512xf32>
    %610 = arith.maximumf %608, %609 : vector<1x512xf32>
    %cst_214 = arith.constant 9.99999974E-6 : f32
    %611 = vector.broadcast %cst_214 : f32 to vector<1x512xf32>
    %612 = arith.addf %610, %611 : vector<1x512xf32>
    %613 = math.rsqrt %612 : vector<1x512xf32>
    %614 = arith.mulf %3, %613 : vector<1x512xf32>
    %615 = arith.mulf %601, %614 : vector<1x512xf32>
    %616 = arith.subf %4, %615 : vector<1x512xf32>
    %617 = vector.broadcast %614 : vector<1x512xf32> to vector<16x512xf32>
    %618 = arith.mulf %597, %617 : vector<16x512xf32>
    %619 = vector.broadcast %616 : vector<1x512xf32> to vector<16x512xf32>
    %620 = arith.addf %618, %619 : vector<16x512xf32>
    %621 = arith.addf %593, %620 : vector<16x512xf32>
    %622 = vector.extract_strided_slice %621 {offsets = [0, 0], sizes = [16, 128], strides = [1, 1]} : vector<16x512xf32> to vector<16x128xf32>
    %623 = vector.extract_strided_slice %621 {offsets = [0, 128], sizes = [16, 128], strides = [1, 1]} : vector<16x512xf32> to vector<16x128xf32>
    %624 = vector.extract_strided_slice %621 {offsets = [0, 256], sizes = [16, 128], strides = [1, 1]} : vector<16x512xf32> to vector<16x128xf32>
    %625 = vector.extract_strided_slice %621 {offsets = [0, 384], sizes = [16, 128], strides = [1, 1]} : vector<16x512xf32> to vector<16x128xf32>
    %626 = arith.negf %622 : vector<16x128xf32>
    %627 = math.exp %626 : vector<16x128xf32>
    %cst_215 = arith.constant 1.000000e+00 : f32
    %628 = vector.broadcast %cst_215 : f32 to vector<16x128xf32>
    %629 = arith.addf %628, %627 : vector<16x128xf32>
    %630 = arith.divf %628, %629 : vector<16x128xf32>
    %c0_216 = arith.constant 0 : index
    %c0_217 = arith.constant 0 : index
    %631 = vector.load %arg13[%c0_216, %c0_217] : memref<16x128xf32, #tpu.memory_space<vmem>>, vector<16x128xf32>
    %632 = arith.mulf %630, %631 : vector<16x128xf32>
    %633 = arith.negf %623 : vector<16x128xf32>
    %634 = math.exp %633 : vector<16x128xf32>
    %cst_218 = arith.constant 1.000000e+00 : f32
    %635 = vector.broadcast %cst_218 : f32 to vector<16x128xf32>
    %636 = arith.addf %635, %634 : vector<16x128xf32>
    %637 = arith.divf %635, %636 : vector<16x128xf32>
    %638 = math.tanh %625 : vector<16x128xf32>
    %639 = arith.mulf %637, %638 : vector<16x128xf32>
    %640 = arith.addf %632, %639 : vector<16x128xf32>
    %641 = vector.broadcast %7 : vector<16x1xf32> to vector<16x128xf32>
    %642 = arith.mulf %640, %641 : vector<16x128xf32>
    %cst_219 = arith.constant dense<0.000000e+00> : vector<128xf32>
    %643 = vector.multi_reduction <add>, %642, %cst_219 [0] : vector<16x128xf32> to vector<128xf32>
    %644 = vector.shape_cast %643 : vector<128xf32> to vector<1x128xf32>
    %cst_220 = arith.constant 5.000000e-01 : f32
    %645 = vector.broadcast %cst_220 : f32 to vector<1x128xf32>
    %646 = arith.mulf %644, %645 : vector<1x128xf32>
    %647 = arith.mulf %642, %642 : vector<16x128xf32>
    %cst_221 = arith.constant dense<0.000000e+00> : vector<128xf32>
    %648 = vector.multi_reduction <add>, %647, %cst_221 [0] : vector<16x128xf32> to vector<128xf32>
    %649 = vector.shape_cast %648 : vector<128xf32> to vector<1x128xf32>
    %cst_222 = arith.constant 5.000000e-01 : f32
    %650 = vector.broadcast %cst_222 : f32 to vector<1x128xf32>
    %651 = arith.mulf %649, %650 : vector<1x128xf32>
    %652 = arith.mulf %646, %646 : vector<1x128xf32>
    %653 = arith.subf %651, %652 : vector<1x128xf32>
    %cst_223 = arith.constant 0.000000e+00 : f32
    %654 = vector.broadcast %cst_223 : f32 to vector<1x128xf32>
    %655 = arith.maximumf %653, %654 : vector<1x128xf32>
    %cst_224 = arith.constant 9.99999974E-6 : f32
    %656 = vector.broadcast %cst_224 : f32 to vector<1x128xf32>
    %657 = arith.addf %655, %656 : vector<1x128xf32>
    %658 = math.rsqrt %657 : vector<1x128xf32>
    %659 = arith.mulf %5, %658 : vector<1x128xf32>
    %660 = arith.mulf %646, %659 : vector<1x128xf32>
    %661 = arith.subf %6, %660 : vector<1x128xf32>
    %662 = vector.broadcast %659 : vector<1x128xf32> to vector<16x128xf32>
    %663 = arith.mulf %642, %662 : vector<16x128xf32>
    %664 = vector.broadcast %661 : vector<1x128xf32> to vector<16x128xf32>
    %665 = arith.addf %663, %664 : vector<16x128xf32>
    %666 = arith.negf %624 : vector<16x128xf32>
    %667 = math.exp %666 : vector<16x128xf32>
    %cst_225 = arith.constant 1.000000e+00 : f32
    %668 = vector.broadcast %cst_225 : f32 to vector<16x128xf32>
    %669 = arith.addf %668, %667 : vector<16x128xf32>
    %670 = arith.divf %668, %669 : vector<16x128xf32>
    %671 = math.tanh %665 : vector<16x128xf32>
    %672 = arith.mulf %670, %671 : vector<16x128xf32>
    %673 = vector.broadcast %7 : vector<16x1xf32> to vector<16x128xf32>
    %674 = arith.mulf %672, %673 : vector<16x128xf32>
    %c0_226 = arith.constant 0 : index
    %c0_227 = arith.constant 0 : index
    %675 = vector.load %arg12[%c0_226, %c0_227] : memref<16x128xf32, #tpu.memory_space<vmem>>, vector<16x128xf32>
    tpu.vector_store %arg12[%c0_226, %c0_227], %674 {strides = array<i32>} : memref<16x128xf32, #tpu.memory_space<vmem>>, vector<16x128xf32>,
    %c0_228 = arith.constant 0 : index
    %c0_229 = arith.constant 0 : index
    %676 = vector.load %arg13[%c0_228, %c0_229] : memref<16x128xf32, #tpu.memory_space<vmem>>, vector<16x128xf32>
    tpu.vector_store %arg13[%c0_228, %c0_229], %642 {strides = array<i32>} : memref<16x128xf32, #tpu.memory_space<vmem>>, vector<16x128xf32>,
    %677 = arith.truncf %674 : vector<16x128xf32> to vector<16x128xbf16>
    %678 = arith.index_cast %c6_i32 : i32 to index
    %c0_230 = arith.constant 0 : index
    %c0_231 = arith.constant 0 : index
    %679 = vector.load %arg10[%678, %c0_230, %c0_231] : memref<8x16x128xbf16, #tpu.memory_space<vmem>>, vector<1x16x128xbf16>
    %680 = vector.shape_cast %679 : vector<1x16x128xbf16> to vector<16x128xbf16>
    %681 = vector.shape_cast %677 : vector<16x128xbf16> to vector<1x16x128xbf16>
    tpu.vector_store %arg10[%678, %c0_230, %c0_231], %681 {strides = array<i32>} : memref<8x16x128xbf16, #tpu.memory_space<vmem>>, vector<1x16x128xbf16>,
    %682 = arith.truncf %642 : vector<16x128xf32> to vector<16x128xbf16>
    %683 = arith.index_cast %c6_i32 : i32 to index
    %c0_232 = arith.constant 0 : index
    %c0_233 = arith.constant 0 : index
    %684 = vector.load %arg11[%683, %c0_232, %c0_233] : memref<8x16x128xbf16, #tpu.memory_space<vmem>>, vector<1x16x128xbf16>
    %685 = vector.shape_cast %684 : vector<1x16x128xbf16> to vector<16x128xbf16>
    %686 = vector.shape_cast %682 : vector<16x128xbf16> to vector<1x16x128xbf16>
    tpu.vector_store %arg11[%683, %c0_232, %c0_233], %686 {strides = array<i32>} : memref<8x16x128xbf16, #tpu.memory_space<vmem>>, vector<1x16x128xbf16>,
    %c7_i32 = arith.constant 7 : i32
    %687 = arith.index_cast %c7_i32 : i32 to index
    %c0_234 = arith.constant 0 : index
    %c0_235 = arith.constant 0 : index
    %688 = vector.load %arg1[%687, %c0_234, %c0_235] : memref<8x16x512xbf16, #tpu.memory_space<vmem>>, vector<1x16x512xbf16>
    %689 = vector.shape_cast %688 : vector<1x16x512xbf16> to vector<16x512xbf16>
    %690 = arith.extf %689 : vector<16x512xbf16> to vector<16x512xf32>
    %c0_236 = arith.constant 0 : index
    %c0_237 = arith.constant 0 : index
    %691 = vector.load %arg12[%c0_236, %c0_237] : memref<16x128xf32, #tpu.memory_space<vmem>>, vector<16x128xf32>
    %692 = arith.truncf %691 : vector<16x128xf32> to vector<16x128xbf16>
    %c0_238 = arith.constant 0 : index
    %c0_239 = arith.constant 0 : index
    %693 = vector.load %arg4[%c0_238, %c0_239] : memref<128x512xbf16, #tpu.memory_space<vmem>>, vector<128x512xbf16>
    %cst_240 = arith.constant dense<0.000000e+00> : vector<16x512xf32>
    %694 = tpu.matmul %692, %693, %cst_240 {dimension_numbers = #tpu.dot_dimension_numbers<[1], [0], [0], [1], [0, 0, 1, 1], [], []>} : vector<16x128xbf16>, vector<128x512xbf16>, vector<16x512xf32> -> vector<16x512xf32>
    %cst_241 = arith.constant dense<0.000000e+00> : vector<512xf32>
    %695 = vector.multi_reduction <add>, %694, %cst_241 [0] : vector<16x512xf32> to vector<512xf32>
    %696 = vector.shape_cast %695 : vector<512xf32> to vector<1x512xf32>
    %cst_242 = arith.constant 5.000000e-01 : f32
    %697 = vector.broadcast %cst_242 : f32 to vector<1x512xf32>
    %698 = arith.mulf %696, %697 : vector<1x512xf32>
    %699 = arith.mulf %694, %694 : vector<16x512xf32>
    %cst_243 = arith.constant dense<0.000000e+00> : vector<512xf32>
    %700 = vector.multi_reduction <add>, %699, %cst_243 [0] : vector<16x512xf32> to vector<512xf32>
    %701 = vector.shape_cast %700 : vector<512xf32> to vector<1x512xf32>
    %cst_244 = arith.constant 5.000000e-01 : f32
    %702 = vector.broadcast %cst_244 : f32 to vector<1x512xf32>
    %703 = arith.mulf %701, %702 : vector<1x512xf32>
    %704 = arith.mulf %698, %698 : vector<1x512xf32>
    %705 = arith.subf %703, %704 : vector<1x512xf32>
    %cst_245 = arith.constant 0.000000e+00 : f32
    %706 = vector.broadcast %cst_245 : f32 to vector<1x512xf32>
    %707 = arith.maximumf %705, %706 : vector<1x512xf32>
    %cst_246 = arith.constant 9.99999974E-6 : f32
    %708 = vector.broadcast %cst_246 : f32 to vector<1x512xf32>
    %709 = arith.addf %707, %708 : vector<1x512xf32>
    %710 = math.rsqrt %709 : vector<1x512xf32>
    %711 = arith.mulf %3, %710 : vector<1x512xf32>
    %712 = arith.mulf %698, %711 : vector<1x512xf32>
    %713 = arith.subf %4, %712 : vector<1x512xf32>
    %714 = vector.broadcast %711 : vector<1x512xf32> to vector<16x512xf32>
    %715 = arith.mulf %694, %714 : vector<16x512xf32>
    %716 = vector.broadcast %713 : vector<1x512xf32> to vector<16x512xf32>
    %717 = arith.addf %715, %716 : vector<16x512xf32>
    %718 = arith.addf %690, %717 : vector<16x512xf32>
    %719 = vector.extract_strided_slice %718 {offsets = [0, 0], sizes = [16, 128], strides = [1, 1]} : vector<16x512xf32> to vector<16x128xf32>
    %720 = vector.extract_strided_slice %718 {offsets = [0, 128], sizes = [16, 128], strides = [1, 1]} : vector<16x512xf32> to vector<16x128xf32>
    %721 = vector.extract_strided_slice %718 {offsets = [0, 256], sizes = [16, 128], strides = [1, 1]} : vector<16x512xf32> to vector<16x128xf32>
    %722 = vector.extract_strided_slice %718 {offsets = [0, 384], sizes = [16, 128], strides = [1, 1]} : vector<16x512xf32> to vector<16x128xf32>
    %723 = arith.negf %719 : vector<16x128xf32>
    %724 = math.exp %723 : vector<16x128xf32>
    %cst_247 = arith.constant 1.000000e+00 : f32
    %725 = vector.broadcast %cst_247 : f32 to vector<16x128xf32>
    %726 = arith.addf %725, %724 : vector<16x128xf32>
    %727 = arith.divf %725, %726 : vector<16x128xf32>
    %c0_248 = arith.constant 0 : index
    %c0_249 = arith.constant 0 : index
    %728 = vector.load %arg13[%c0_248, %c0_249] : memref<16x128xf32, #tpu.memory_space<vmem>>, vector<16x128xf32>
    %729 = arith.mulf %727, %728 : vector<16x128xf32>
    %730 = arith.negf %720 : vector<16x128xf32>
    %731 = math.exp %730 : vector<16x128xf32>
    %cst_250 = arith.constant 1.000000e+00 : f32
    %732 = vector.broadcast %cst_250 : f32 to vector<16x128xf32>
    %733 = arith.addf %732, %731 : vector<16x128xf32>
    %734 = arith.divf %732, %733 : vector<16x128xf32>
    %735 = math.tanh %722 : vector<16x128xf32>
    %736 = arith.mulf %734, %735 : vector<16x128xf32>
    %737 = arith.addf %729, %736 : vector<16x128xf32>
    %738 = vector.broadcast %7 : vector<16x1xf32> to vector<16x128xf32>
    %739 = arith.mulf %737, %738 : vector<16x128xf32>
    %cst_251 = arith.constant dense<0.000000e+00> : vector<128xf32>
    %740 = vector.multi_reduction <add>, %739, %cst_251 [0] : vector<16x128xf32> to vector<128xf32>
    %741 = vector.shape_cast %740 : vector<128xf32> to vector<1x128xf32>
    %cst_252 = arith.constant 5.000000e-01 : f32
    %742 = vector.broadcast %cst_252 : f32 to vector<1x128xf32>
    %743 = arith.mulf %741, %742 : vector<1x128xf32>
    %744 = arith.mulf %739, %739 : vector<16x128xf32>
    %cst_253 = arith.constant dense<0.000000e+00> : vector<128xf32>
    %745 = vector.multi_reduction <add>, %744, %cst_253 [0] : vector<16x128xf32> to vector<128xf32>
    %746 = vector.shape_cast %745 : vector<128xf32> to vector<1x128xf32>
    %cst_254 = arith.constant 5.000000e-01 : f32
    %747 = vector.broadcast %cst_254 : f32 to vector<1x128xf32>
    %748 = arith.mulf %746, %747 : vector<1x128xf32>
    %749 = arith.mulf %743, %743 : vector<1x128xf32>
    %750 = arith.subf %748, %749 : vector<1x128xf32>
    %cst_255 = arith.constant 0.000000e+00 : f32
    %751 = vector.broadcast %cst_255 : f32 to vector<1x128xf32>
    %752 = arith.maximumf %750, %751 : vector<1x128xf32>
    %cst_256 = arith.constant 9.99999974E-6 : f32
    %753 = vector.broadcast %cst_256 : f32 to vector<1x128xf32>
    %754 = arith.addf %752, %753 : vector<1x128xf32>
    %755 = math.rsqrt %754 : vector<1x128xf32>
    %756 = arith.mulf %5, %755 : vector<1x128xf32>
    %757 = arith.mulf %743, %756 : vector<1x128xf32>
    %758 = arith.subf %6, %757 : vector<1x128xf32>
    %759 = vector.broadcast %756 : vector<1x128xf32> to vector<16x128xf32>
    %760 = arith.mulf %739, %759 : vector<16x128xf32>
    %761 = vector.broadcast %758 : vector<1x128xf32> to vector<16x128xf32>
    %762 = arith.addf %760, %761 : vector<16x128xf32>
    %763 = arith.negf %721 : vector<16x128xf32>
    %764 = math.exp %763 : vector<16x128xf32>
    %cst_257 = arith.constant 1.000000e+00 : f32
    %765 = vector.broadcast %cst_257 : f32 to vector<16x128xf32>
    %766 = arith.addf %765, %764 : vector<16x128xf32>
    %767 = arith.divf %765, %766 : vector<16x128xf32>
    %768 = math.tanh %762 : vector<16x128xf32>
    %769 = arith.mulf %767, %768 : vector<16x128xf32>
    %770 = vector.broadcast %7 : vector<16x1xf32> to vector<16x128xf32>
    %771 = arith.mulf %769, %770 : vector<16x128xf32>
    %c0_258 = arith.constant 0 : index
    %c0_259 = arith.constant 0 : index
    %772 = vector.load %arg12[%c0_258, %c0_259] : memref<16x128xf32, #tpu.memory_space<vmem>>, vector<16x128xf32>
    tpu.vector_store %arg12[%c0_258, %c0_259], %771 {strides = array<i32>} : memref<16x128xf32, #tpu.memory_space<vmem>>, vector<16x128xf32>,
    %c0_260 = arith.constant 0 : index
    %c0_261 = arith.constant 0 : index
    %773 = vector.load %arg13[%c0_260, %c0_261] : memref<16x128xf32, #tpu.memory_space<vmem>>, vector<16x128xf32>
    tpu.vector_store %arg13[%c0_260, %c0_261], %739 {strides = array<i32>} : memref<16x128xf32, #tpu.memory_space<vmem>>, vector<16x128xf32>,
    %774 = arith.truncf %771 : vector<16x128xf32> to vector<16x128xbf16>
    %775 = arith.index_cast %c7_i32 : i32 to index
    %c0_262 = arith.constant 0 : index
    %c0_263 = arith.constant 0 : index
    %776 = vector.load %arg10[%775, %c0_262, %c0_263] : memref<8x16x128xbf16, #tpu.memory_space<vmem>>, vector<1x16x128xbf16>
    %777 = vector.shape_cast %776 : vector<1x16x128xbf16> to vector<16x128xbf16>
    %778 = vector.shape_cast %774 : vector<16x128xbf16> to vector<1x16x128xbf16>
    tpu.vector_store %arg10[%775, %c0_262, %c0_263], %778 {strides = array<i32>} : memref<8x16x128xbf16, #tpu.memory_space<vmem>>, vector<1x16x128xbf16>,
    %779 = arith.truncf %739 : vector<16x128xf32> to vector<16x128xbf16>
    %780 = arith.index_cast %c7_i32 : i32 to index
    %c0_264 = arith.constant 0 : index
    %c0_265 = arith.constant 0 : index
    %781 = vector.load %arg11[%780, %c0_264, %c0_265] : memref<8x16x128xbf16, #tpu.memory_space<vmem>>, vector<1x16x128xbf16>
    %782 = vector.shape_cast %781 : vector<1x16x128xbf16> to vector<16x128xbf16>
    %783 = vector.shape_cast %779 : vector<16x128xbf16> to vector<1x16x128xbf16>
    tpu.vector_store %arg11[%780, %c0_264, %c0_265], %783 {strides = array<i32>} : memref<8x16x128xbf16, #tpu.memory_space<vmem>>, vector<1x16x128xbf16>,
    %c8_i32 = arith.constant 8 : i32
    return
  }
  func.func @transform_0(%arg0: i32) -> (i32, i32, i32) {
    %c0_i32 = arith.constant 0 : i32
    %c0_i32_0 = arith.constant 0 : i32
    %c0_i32_1 = arith.constant 0 : i32
    return %arg0, %c0_i32, %c0_i32_0 : i32, i32, i32
  }
  func.func @transform_1(%arg0: i32) -> (i32, i32) {
    %c0_i32 = arith.constant 0 : i32
    %c0_i32_0 = arith.constant 0 : i32
    %c0_i32_1 = arith.constant 0 : i32
    return %c0_i32, %c0_i32_0 : i32, i32
  }
  func.func @transform_2(%arg0: i32) -> (i32, i32) {
    %c0_i32 = arith.constant 0 : i32
    %c0_i32_0 = arith.constant 0 : i32
    %c0_i32_1 = arith.constant 0 : i32
    return %c0_i32, %c0_i32_0 : i32, i32
  }
  func.func @transform_3(%arg0: i32) -> (i32, i32) {
    %c0_i32 = arith.constant 0 : i32
    %c0_i32_0 = arith.constant 0 : i32
    %c0_i32_1 = arith.constant 0 : i32
    return %c0_i32, %c0_i32_0 : i32, i32
  }
  func.func @transform_4(%arg0: i32) -> (i32, i32) {
    %c0_i32 = arith.constant 0 : i32
    %c0_i32_0 = arith.constant 0 : i32
    %c0_i32_1 = arith.constant 0 : i32
    return %c0_i32, %c0_i32_0 : i32, i32
  }
  func.func @transform_5(%arg0: i32) -> (i32, i32) {
    %c0_i32 = arith.constant 0 : i32
    %c0_i32_0 = arith.constant 0 : i32
    %c0_i32_1 = arith.constant 0 : i32
    return %c0_i32, %c0_i32_0 : i32, i32
  }
  func.func @transform_6(%arg0: i32) -> (i32, i32) {
    %c0_i32 = arith.constant 0 : i32
    %c0_i32_0 = arith.constant 0 : i32
    %c0_i32_1 = arith.constant 0 : i32
    return %c0_i32, %c0_i32_0 : i32, i32
  }
  func.func @transform_7(%arg0: i32) -> (i32, i32) {
    %c0_i32 = arith.constant 0 : i32
    %c0_i32_0 = arith.constant 0 : i32
    %c0_i32_1 = arith.constant 0 : i32
    return %c0_i32, %c0_i32_0 : i32, i32
  }
  func.func @transform_8(%arg0: i32) -> (i32, i32) {
    %c0_i32 = arith.constant 0 : i32
    %c0_i32_0 = arith.constant 0 : i32
    %c0_i32_1 = arith.constant 0 : i32
    return %c0_i32, %c0_i32_0 : i32, i32
  }
  func.func @transform_9(%arg0: i32) -> (i32, i32, i32) {
    %c0_i32 = arith.constant 0 : i32
    %c0_i32_0 = arith.constant 0 : i32
    %c0_i32_1 = arith.constant 0 : i32
    return %arg0, %c0_i32, %c0_i32_0 : i32, i32, i32
  }
  func.func @transform_10(%arg0: i32) -> (i32, i32, i32) {
    %c0_i32 = arith.constant 0 : i32
    %c0_i32_0 = arith.constant 0 : i32
    %c0_i32_1 = arith.constant 0 : i32
    return %arg0, %c0_i32, %c0_i32_0 : i32, i32, i32
  }
}

</mosaic_0001>

<bundles_post_ra>
// kernel: tpu_custom_call.1
= control target key start
LH: loop header
LB: loop body
LE: loop exit
PB: predicated region body
PF: predicated region fallthrough
CT: control target
= control target key end

     0   :  { %16 = vsyncpa [#allocation5], 0  ;;  %s9309_s0 = inlined_call_operand.hbm [shape: bf16[8,16,512], index: 0, kind: input, shape index: {}]   ;;  %s9310_s1 = inlined_call_operand.vmem [shape: f32[16,128], index: 1, kind: input, shape index: {}]   ;;  %s9311_s2 = inlined_call_operand.hbm [shape: f32[16,128], index: 2, kind: input, shape index: {}]   ;;  %s9312_s3 = inlined_call_operand.hbm [shape: bf16[128,512], index: 3, kind: input, shape index: {}]   ;;  %s9313_s4 = inlined_call_operand.hbm [shape: f32[1,512], index: 4, kind: input, shape index: {}]   ;;  %s9314_s5 = inlined_call_operand.hbm [shape: f32[1,512], index: 5, kind: input, shape index: {}]   ;;  %s9315_s6 = inlined_call_operand.vmem [shape: f32[1,128], index: 6, kind: input, shape index: {}]   ;;  %s9316_s7 = inlined_call_operand.vmem [shape: f32[1,128], index: 7, kind: input, shape index: {}]   ;;  %s9317_s8 = inlined_call_operand.vmem [shape: f32[16,1], index: 8, kind: input, shape index: {}]   ;;  %s9318_s9 = inlined_call_operand.hbm [shape: bf16[8,16,128], index: 9, kind: output, shape index: {0}]   ;;  %s9319_s10 = inlined_call_operand.hbm [shape: bf16[8,16,128], index: 10, kind: output, shape index: {1}]  }
   0x1   :  { %17 = vsyncpa [#allocation8], 0 }
   0x2   :  { %18 = vsyncpa [#allocation11], 0 }
   0x3   :  { %19 = vsyncpa [#allocation6], 0  ;;  %s40_s15 = sshll.u32 %s9311_s2, 4  ;;  %s41_s15 = int_to_ptr.hbm [resolvable:$true] %s40_s15 }
   0x4   :  { %20 = vsyncpa [#allocation15], 0  ;;  %s7364_s16 = smov [#allocation7]   ;;  %s67_s20 = sshll.u32 %s9313_s4, 4  ;;  %s68_s20 = int_to_ptr.hbm [resolvable:$true] %s67_s20 }
   0x5   :  { %s42_s17 = sshll.u32 %s7364_s16, 4  ;;  %s7365_s21 = smov 128   ;;  %s43_s17 = int_to_ptr.vmem [resolvable:$true] %s42_s17 }
   0x6   :  { %s7366_s22 = smov 8   ;;  %s7367_s23 = smov [#allocation10]  }
   0x7   :  { %48 = dma.hbm_to_vmem [thread:$0]  %s41_s15, 256, %s43_s17, [#allocation8], %s7365_s21, %s7365_s21, %s7366_s22  }
   0x8   :  { %s69_s24 = sshll.u32 %s7367_s23, 4  ;;  %s25_s27 = sshll.u32 %s9309_s0, 4  ;;  %s70_s24 = int_to_ptr.vmem [resolvable:$true] %s69_s24  ;;  %s26_s27 = int_to_ptr.hbm [resolvable:$true] %s25_s27 }
   0x9   :  { %72 = dma.hbm_to_vmem [thread:$0]  %s68_s20, 64, %s70_s24, [#allocation11]  }
   0xa   :  { %s7368_s2 = smov [#allocation4]   ;;  %s53_s4 = sshll.u32 %s9312_s3, 4  ;;  %s54_s4 = int_to_ptr.hbm [resolvable:$true] %s53_s4 }
   0xb   :  { %s27_s28 = sshll.u32 %s7368_s2, 4  ;;  %s7369_s11 = smov 256   ;;  %s28_s28 = int_to_ptr.vmem [resolvable:$true] %s27_s28 }
   0xc   :  { %s7370_s12 = smov 16   ;;  %s7371_s13 = smov [#allocation9]  }
   0xd   :  { %33 = dma.hbm_to_vmem [thread:$0]  %s26_s27, 4096, %s28_s28, [#allocation5], %s7369_s11, %s7369_s11, %s7370_s12  }
   0xe   :  { %s55_s14 = sshll.u32 %s7371_s13, 4  ;;  %s78_s0 = sshll.u32 %s9314_s5, 4  ;;  %s56_s14 = int_to_ptr.vmem [resolvable:$true] %s55_s14  ;;  %s79_s0 = int_to_ptr.hbm [resolvable:$true] %s78_s0 }
   0xf   :  { %61 = dma.hbm_to_vmem [thread:$0]  %s54_s4, 4096, %s56_s14, [#allocation8], %s7369_s11, %s7369_s11, %s7370_s12  }
  0x10   :  { %s7372_s17 = smov [#allocation12]  }
  0x11   :  { %s80_s18 = sshll.u32 %s7372_s17, 4  ;;  %s81_s18 = int_to_ptr.vmem [resolvable:$true] %s80_s18 }
  0x12   :  { %83 = dma.hbm_to_vmem [thread:$0]  %s79_s0, 64, %s81_s18, [#allocation11]  }
  0x13   :  { %7354 = dma.done.wait [#allocation5], 4096  }
  0x14   :  { %7355 = vsyncadd [#allocation5], 4294963200 }
  0x15   :  { %7356 = dma.done.wait [#allocation8], 4352  }
  0x16   :  { %7357 = vsyncadd [#allocation8], 4294962944 }
  0x17   :  { %7358 = dma.done.wait [#allocation11], 128  }
  0x18   :  { %7359 = vsyncadd [#allocation11], 4294967168  ;;  %v5515_v0 = vld [vmem:[#allocation9 + $0xe0] sm:$0xf]  ;;  %v6503_v1 = vld [vmem:[#allocation9 + $0xec] sm:$0xf0] }
  0x19   :  { %v6501_v2 = vld [vmem:[#allocation9 + $0xe4] sm:$0xf]  ;;  %v5516_v3 = vor.u32 %v6503_v1, %v5515_v0  ;;  %v5517_v4 = vld [vmem:[#allocation9 + $0xf0] sm:$0xf0]  ;;  %v5523_v5 = vld [vmem:[#allocation9 + $0xe8] sm:$0xf] }
  0x1a   :  { %v6504_v6 = vld [vmem:[#allocation9 + $0xf4] sm:$0xf0]  ;;  %v5520_v7 = vor.u32 %v6501_v2, %v5517_v4  ;;  %v6502_v9 = vld [vmem:[#allocation9 + $0xec] sm:$0xf]  ;;  %v5525_v10 = vld [vmem:[#allocation9 + $0xf8] sm:$0xf0] }
  0x1b   :  { %v5524_v8 = vor.u32 %v6504_v6, %v5523_v5  ;;  %v5499_v11 = vld [vmem:[#allocation9 + $0xc0] sm:$0xf]  ;;  %335 = vmatpush.bf16.msra.mxu0 %v5516_v3  ;;  %v5528_v12 = vor.u32 %v6502_v9, %v5525_v10  ;;  %v6499_v13 = vld [vmem:[#allocation9 + $0xcc] sm:$0xf0]  ;;  %v6497_v14 = vld [vmem:[#allocation9 + $0xc4] sm:$0xf] }
  0x1c   :  { %v5501_v15 = vld [vmem:[#allocation9 + $0xd0] sm:$0xf0]  ;;  %349 = vmatpush.bf16.msra.mxu1 %v5520_v7  ;;  %v5500_v16 = vor.u32 %v6499_v13, %v5499_v11  ;;  %v5507_v18 = vld [vmem:[#allocation9 + $0xc8] sm:$0xf]  ;;  %v6500_v19 = vld [vmem:[#allocation9 + $0xd4] sm:$0xf0] }
  0x1d   :  { %363 = vmatpush.bf16.msra.mxu2 %v5524_v8  ;;  %v5504_v17 = vor.u32 %v6497_v14, %v5501_v15  ;;  %v6498_v20 = vld [vmem:[#allocation9 + $0xcc] sm:$0xf]  ;;  %377 = vmatpush.bf16.msra.mxu3 %v5528_v12  ;;  %v5508_v21 = vor.u32 %v6500_v19, %v5507_v18  ;;  %v5509_v22 = vld [vmem:[#allocation9 + $0xd8] sm:$0xf0]  ;;  %v5483_v23 = vld [vmem:[#allocation9 + $0xa0] sm:$0xf] }
  0x1e   :  { %v6495_v24 = vld [vmem:[#allocation9 + $0xac] sm:$0xf0]  ;;  %v5512_v25 = vor.u32 %v6498_v20, %v5509_v22  ;;  %v6493_v26 = vld [vmem:[#allocation9 + $0xa4] sm:$0xf]  ;;  %v5485_v27 = vld [vmem:[#allocation9 + $0xb0] sm:$0xf0] }
  0x1f   :  { %v5491_v28 = vld [vmem:[#allocation9 + $0xa8] sm:$0xf]  ;;  %336 = vmatpush.bf16.msra.mxu0 %v5500_v16  ;;  %v5484_v29 = vor.u32 %v6495_v24, %v5483_v23  ;;  %v6496_v30 = vld [vmem:[#allocation9 + $0xb4] sm:$0xf0]  ;;  %v6494_v31 = vld [vmem:[#allocation9 + $0xac] sm:$0xf]  ;;  %v5488_v33 = vor.u32 %v6493_v26, %v5485_v27 }
  0x20   :  { %v5493_v32 = vld [vmem:[#allocation9 + $0xb8] sm:$0xf0]  ;;  %350 = vmatpush.bf16.msra.mxu1 %v5504_v17  ;;  %v5492_v34 = vor.u32 %v6496_v30, %v5491_v28  ;;  %v5467_v35 = vld [vmem:[#allocation9 + $0x80] sm:$0xf]  ;;  %v6491_v36 = vld [vmem:[#allocation9 + $0x8c] sm:$0xf0] }
  0x21   :  { %364 = vmatpush.bf16.msra.mxu2 %v5508_v21  ;;  %v6489_v37 = vld [vmem:[#allocation9 + $0x84] sm:$0xf]  ;;  %378 = vmatpush.bf16.msra.mxu3 %v5512_v25  ;;  %v5496_v38 = vor.u32 %v6494_v31, %v5493_v32  ;;  %v5469_v39 = vld [vmem:[#allocation9 + $0x90] sm:$0xf0]  ;;  %v5475_v40 = vld [vmem:[#allocation9 + $0x88] sm:$0xf]  ;;  %v5468_v44 = vor.u32 %v6491_v36, %v5467_v35 }
  0x22   :  { %v6492_v41 = vld [vmem:[#allocation9 + $0x94] sm:$0xf0]  ;;  %v6490_v42 = vld [vmem:[#allocation9 + $0x8c] sm:$0xf]  ;;  %v5477_v43 = vld [vmem:[#allocation9 + $0x98] sm:$0xf0]  ;;  %v5472_v45 = vor.u32 %v6489_v37, %v5469_v39 }
  0x23   :  { %337 = vmatpush.bf16.msra.mxu0 %v5484_v29  ;;  %v5476_v46 = vor.u32 %v6492_v41, %v5475_v40  ;;  %v5451_v47 = vld [vmem:[#allocation9 + $0x60] sm:$0xf]  ;;  %v6487_v48 = vld [vmem:[#allocation9 + $0x6c] sm:$0xf0]  ;;  %v6485_v49 = vld [vmem:[#allocation9 + $0x64] sm:$0xf]  ;;  %v5480_v50 = vor.u32 %v6490_v42, %v5477_v43 }
  0x24   :  { %351 = vmatpush.bf16.msra.mxu1 %v5488_v33  ;;  %v5453_v51 = vld [vmem:[#allocation9 + $0x70] sm:$0xf0]  ;;  %v5459_v52 = vld [vmem:[#allocation9 + $0x68] sm:$0xf]  ;;  %v6488_v53 = vld [vmem:[#allocation9 + $0x74] sm:$0xf0]  ;;  %v5452_v56 = vor.u32 %v6487_v48, %v5451_v47 }
  0x25   :  { %365 = vmatpush.bf16.msra.mxu2 %v5492_v34  ;;  %379 = vmatpush.bf16.msra.mxu3 %v5496_v38  ;;  %v6486_v54 = vld [vmem:[#allocation9 + $0x6c] sm:$0xf]  ;;  %v5461_v55 = vld [vmem:[#allocation9 + $0x78] sm:$0xf0]  ;;  %v5456_v57 = vor.u32 %v6485_v49, %v5453_v51  ;;  %v5460_v58 = vor.u32 %v6488_v53, %v5459_v52  ;;  %v5435_v59 = vld [vmem:[#allocation9 + $0x40] sm:$0xf] }
  0x26   :  { %v6483_v60 = vld [vmem:[#allocation9 + $0x4c] sm:$0xf0]  ;;  %v6481_v61 = vld [vmem:[#allocation9 + $0x44] sm:$0xf]  ;;  %v5464_v62 = vor.u32 %v6486_v54, %v5461_v55  ;;  %v5437_v63 = vld [vmem:[#allocation9 + $0x50] sm:$0xf0] }
  0x27   :  { %338 = vmatpush.bf16.msra.mxu0 %v5468_v44  ;;  %v5443_v0 = vld [vmem:[#allocation9 + $0x48] sm:$0xf]  ;;  %v6484_v1 = vld [vmem:[#allocation9 + $0x54] sm:$0xf0]  ;;  %v6482_v2 = vld [vmem:[#allocation9 + $0x4c] sm:$0xf]  ;;  %v5436_v4 = vor.u32 %v6483_v60, %v5435_v59  ;;  %v5440_v6 = vor.u32 %v6481_v61, %v5437_v63 }
  0x28   :  { %352 = vmatpush.bf16.msra.mxu1 %v5472_v45  ;;  %v5445_v3 = vld [vmem:[#allocation9 + $0x58] sm:$0xf0]  ;;  %v5419_v5 = vld [vmem:[#allocation9 + $0x20] sm:$0xf]  ;;  %v5444_v7 = vor.u32 %v6484_v1, %v5443_v0  ;;  %v6479_v8 = vld [vmem:[#allocation9 + $0x2c] sm:$0xf0] }
  0x29   :  { %366 = vmatpush.bf16.msra.mxu2 %v5476_v46  ;;  %380 = vmatpush.bf16.msra.mxu3 %v5480_v50  ;;  %v6477_v9 = vld [vmem:[#allocation9 + $0x24] sm:$0xf]  ;;  %v5421_v10 = vld [vmem:[#allocation9 + $0x30] sm:$0xf0]  ;;  %v5448_v11 = vor.u32 %v6482_v2, %v5445_v3  ;;  %v5427_v12 = vld [vmem:[#allocation9 + $0x28] sm:$0xf]  ;;  %v5420_v18 = vor.u32 %v6479_v8, %v5419_v5 }
  0x2a   :  { %v6480_v13 = vld [vmem:[#allocation9 + $0x34] sm:$0xf0]  ;;  %v6478_v14 = vld [vmem:[#allocation9 + $0x2c] sm:$0xf]  ;;  %v5429_v15 = vld [vmem:[#allocation9 + $0x38] sm:$0xf0]  ;;  %v5424_v19 = vor.u32 %v6477_v9, %v5421_v10 }
  0x2b   :  { %339 = vmatpush.bf16.msra.mxu0 %v5452_v56  ;;  %v7373_v16 = vmov 0   ;;  %v126_v17 = vld [vmem:[%s9317_s8] sm:$0xff]  ;;  %v5428_v20 = vor.u32 %v6480_v13, %v5427_v12  ;;  %v5403_v21 = vld [vmem:[#allocation9] sm:$0xf]  ;;  %v6473_v23 = vld [vmem:[#allocation9 + $0x4] sm:$0xf]  ;;  %v5432_v24 = vor.u32 %v6478_v14, %v5429_v15 }
  0x2c   :  { %353 = vmatpush.bf16.msra.mxu1 %v5456_v57  ;;  %6823 = vset.pattern.permute.xlu0 %v7373_v16  ;;  %v6475_v22 = vld [vmem:[#allocation9 + $0xc] sm:$0xf0]  ;;  %v5405_v25 = vld [vmem:[#allocation9 + $0x10] sm:$0xf0]  ;;  %v5411_v26 = vld [vmem:[#allocation9 + $0x8] sm:$0xf] }
  0x2d   :  { %367 = vmatpush.bf16.msra.mxu2 %v5460_v58  ;;  %381 = vmatpush.bf16.msra.mxu3 %v5464_v62  ;;  %v6476_v27 = vld [vmem:[#allocation9 + $0x14] sm:$0xf0]  ;;  %v6474_v28 = vld [vmem:[#allocation9 + $0xc] sm:$0xf]  ;;  %v5413_v29 = vld [vmem:[#allocation9 + $0x18] sm:$0xf0]  ;;  %v5404_v30 = vor.u32 %v6475_v22, %v5403_v21  ;;  %v5408_v33 = vor.u32 %v6473_v23, %v5405_v25 }
  0x2e   :  { %680 = vperm.xlu0 %6823, %v126_v17   ;;  %v114_v31 = vld [vmem:[%s9310_s1] sm:$0xff]  ;;  %v115_v32 = vld [vmem:[%s9310_s1 + $0x8] sm:$0xff]  ;;  %v5412_v34 = vor.u32 %v6476_v27, %v5411_v26  ;;  %v5416_v36 = vor.u32 %v6474_v28, %v5413_v29  ;;  %vm526_vm11 = vcmask 1040384   ;;  %vm528_vm12 = vcmask 1042434   ;;  %s5381_s26 = sshll.u32 %s9319_s10, 4  ;;  %s7375_s10 = smov 64   ;;  %s5382_s26 = int_to_ptr.hbm [resolvable:$true] %s5381_s26 }
  0x2f   :  { %340 = vmatpush.bf16.msra.mxu0 %v5436_v4  ;;  %v127_v35 = vld [vmem:[%s9317_s8 + $0x8] sm:$0xff]  ;;  %v142_v37 = vpack.c.bf16 %v115_v32, %v114_v31  ;;  %vm530_vm14 = vcmask 1041408   ;;  %s7376_s27 = smov 4   ;;  %s7377_s2 = smov [#allocation13]  }
  0x30   :  { %354 = vmatpush.bf16.msra.mxu1 %v5440_v6  ;;  %s5366_s28 = sshll.u32 %s7377_s2, 4  ;;  %s5368_s4 = sshll.u32 %s9318_s9, 4  ;;  %s5367_s28 = int_to_ptr.vmem [resolvable:$true] %s5366_s28  ;;  %s5369_s4 = int_to_ptr.hbm [resolvable:$true] %s5368_s4 }
  0x31   :  { %368 = vmatpush.bf16.msra.mxu2 %v5444_v7  ;;  %382 = vmatpush.bf16.msra.mxu3 %v5448_v11 }
  0x33   :  { %341 = vmatpush.bf16.msra.mxu0 %v5420_v18 }
  0x34   :  { %355 = vmatpush.bf16.msra.mxu1 %v5424_v19 }
  0x35   :  { %369 = vmatpush.bf16.msra.mxu2 %v5428_v20  ;;  %383 = vmatpush.bf16.msra.mxu3 %v5432_v24 }
  0x36   :  { %685 = vperm.xlu0 %6823, %v127_v35  }
  0x37   :  { %342 = vmatpush.bf16.msra.mxu0 %v5404_v30 }
  0x38   :  { %356 = vmatpush.bf16.msra.mxu1 %v5408_v33 }
  0x39   :  { %370 = vmatpush.bf16.msra.mxu2 %v5412_v34  ;;  %384 = vmatpush.bf16.msra.mxu3 %v5416_v36 }
  0x3a   :  { %343 = vmatmul.bf16.vlgmr.msra.gmra.mxu0 %v142_v37 }
  0x3b   :  { %357 = vmatmul.bf16.vlgmr.msra.gmra.mxu1 %v142_v37 }
  0x3c   :  { %371 = vmatmul.bf16.vlgmr.msra.gmra.mxu2 %v142_v37  ;;  %385 = vmatmul.bf16.vlgmr.msra.gmra.mxu3 %v142_v37 }
  0xb7   :  { %v7460_v38 = vpop.f32.mrf.mxu0 }
  0xb8   :  { %v7462_v39 = vpop.f32.mrf.mxu1  ;;  %v423_v40 = vmul.f32 %v7460_v38, %v7460_v38 }
  0xb9   :  { %v424_v47 = vmul.f32 %v7462_v39, %v7462_v39 }
  0xbf   :  { %v7466_v41 = vpop.f32.mrf.mxu2  ;;  %v7468_v42 = vpop.f32.mrf.mxu3 }
  0xc0   :  { %v7470_v43 = vpop.f32.mrf.mxu0  ;;  %v7476_v46 = vpop.f32.mrf.mxu1  ;;  %v425_v58 = vmul.f32 %v7466_v41, %v7466_v41  ;;  %v426_v59 = vmul.f32 %v7468_v42, %v7468_v42 }
  0xc1   :  { %v391_v44 = vadd.f32 %v7470_v43, %v7460_v38  ;;  %v427_v45 = vmul.f32 %v7470_v43, %v7470_v43  ;;  %v398_v48 = vadd.f32 %v7476_v46, %v7462_v39  ;;  %v428_v49 = vmul.f32 %v7476_v46, %v7476_v46 }
  0xc3   :  { %v392_v50 = vrot.slane %v391_v44, 4  ;;  %v431_v51 = vadd.f32 %v427_v45, %v423_v40  ;;  %v399_v52 = vrot.slane %v398_v48, 4  ;;  %v438_v53 = vadd.f32 %v428_v49, %v424_v47 }
  0xc5   :  { %v393_v54 = vadd.f32 %v392_v50, %v391_v44  ;;  %v432_v55 = vrot.slane %v431_v51, 4  ;;  %v400_v56 = vadd.f32 %v399_v52, %v398_v48  ;;  %v439_v57 = vrot.slane %v438_v53, 4 }
  0xc7   :  { %v394_v60 = vrot.slane %v393_v54, 2  ;;  %v433_v61 = vadd.f32 %v432_v55, %v431_v51  ;;  %v7488_v62 = vpop.f32.mrf.mxu2  ;;  %v401_v63 = vrot.slane %v400_v56, 2  ;;  %v440_v0 = vadd.f32 %v439_v57, %v438_v53  ;;  %v7494_v3 = vpop.f32.mrf.mxu3 }
  0xc8   :  { %v405_v1 = vadd.f32 %v7488_v62, %v7466_v41  ;;  %v429_v2 = vmul.f32 %v7488_v62, %v7488_v62  ;;  %v412_v6 = vadd.f32 %v7494_v3, %v7468_v42  ;;  %v430_v7 = vmul.f32 %v7494_v3, %v7494_v3 }
  0xc9   :  { %v395_v4 = vadd.f32 %v394_v60, %v393_v54  ;;  %v434_v5 = vrot.slane %v433_v61, 2  ;;  %v402_v8 = vadd.f32 %v401_v63, %v400_v56  ;;  %v441_v9 = vrot.slane %v440_v0, 2 }
  0xca   :  { %v406_v10 = vrot.slane %v405_v1, 4  ;;  %v445_v11 = vadd.f32 %v429_v2, %v425_v58  ;;  %v413_v14 = vrot.slane %v412_v6, 4  ;;  %v452_v15 = vadd.f32 %v430_v7, %v426_v59 }
  0xcb   :  { %v396_v12 = vrot.slane %v395_v4, 1  ;;  %v435_v13 = vadd.f32 %v434_v5, %v433_v61  ;;  %v403_v16 = vrot.slane %v402_v8, 1  ;;  %v442_v17 = vadd.f32 %v441_v9, %v440_v0 }
  0xcc   :  { %v407_v18 = vadd.f32 %v406_v10, %v405_v1  ;;  %v446_v19 = vrot.slane %v445_v11, 4  ;;  %v414_v22 = vadd.f32 %v413_v14, %v412_v6  ;;  %v453_v23 = vrot.slane %v452_v15, 4 }
  0xcd   :  { %v397_v20 = vadd.f32 %v396_v12, %v395_v4  ;;  %v436_v21 = vrot.slane %v435_v13, 1  ;;  %v404_v24 = vadd.f32 %v403_v16, %v402_v8  ;;  %v443_v25 = vrot.slane %v442_v17, 1 }
  0xce   :  { %v408_v26 = vrot.slane %v407_v18, 2  ;;  %v447_v27 = vadd.f32 %v446_v19, %v445_v11  ;;  %v415_v30 = vrot.slane %v414_v22, 2  ;;  %v454_v31 = vadd.f32 %v453_v23, %v452_v15 }
  0xcf   :  { %v7500_v28 = vmul.f32 0.5, %v397_v20  ;;  %v437_v29 = vadd.f32 %v436_v21, %v435_v13  ;;  %v7502_v32 = vmul.f32 0.5, %v404_v24  ;;  %v444_v33 = vadd.f32 %v443_v25, %v442_v17 }
  0xd0   :  { %v409_v34 = vadd.f32 %v408_v26, %v407_v18  ;;  %v448_v35 = vrot.slane %v447_v27, 2  ;;  %v416_v40 = vadd.f32 %v415_v30, %v414_v22  ;;  %v455_v44 = vrot.slane %v454_v31, 2 }
  0xd1   :  { %v459_v36 = vmul.f32 0.5, %v437_v29  ;;  %v463_v37 = vmul.f32 %v7500_v28, %v7500_v28  ;;  %v460_v45 = vmul.f32 0.5, %v444_v33  ;;  %v464_v47 = vmul.f32 %v7502_v32, %v7502_v32 }
  0xd2   :  { %v410_v48 = vrot.slane %v409_v34, 1  ;;  %v449_v49 = vadd.f32 %v448_v35, %v447_v27  ;;  %v417_v54 = vrot.slane %v416_v40, 1  ;;  %v456_v56 = vadd.f32 %v455_v44, %v454_v31 }
  0xd3   :  { %v467_v50 = vsub.f32 %v459_v36, %v463_v37  ;;  %v468_v51 = vsub.f32 %v460_v45, %v464_v47 }
  0xd4   :  { %v411_v52 = vadd.f32 %v410_v48, %v409_v34  ;;  %v450_v53 = vrot.slane %v449_v49, 1  ;;  %v418_v1 = vadd.f32 %v417_v54, %v416_v40  ;;  %v457_v2 = vrot.slane %v456_v56, 1 }
  0xd5   :  { %v471_v55 = vmax.f32 %v467_v50, 0.0  ;;  %v472_v57 = vmax.f32 %v468_v51, 0.0 }
  0xd6   :  { %v7508_v58 = vmul.f32 0.5, %v411_v52  ;;  %v451_v59 = vadd.f32 %v450_v53, %v449_v49  ;;  %v7512_v5 = vmul.f32 0.5, %v418_v1  ;;  %v458_v6 = vadd.f32 %v457_v2, %v456_v56  ;;  %v122_v52 = vld [vmem:[#allocation10] sm:$0xf] }
  0xd7   :  { %v475_v60 = vadd.f32 1e-05, %v471_v55  ;;  %v476_v61 = vadd.f32 1e-05, %v472_v57 }
  0xd8   :  { %v461_v63 = vmul.f32 0.5, %v451_v59  ;;  %v465_v0 = vmul.f32 %v7508_v58, %v7508_v58  ;;  %v466_v8 = vmul.f32 %v7512_v5, %v7512_v5  ;;  %v462_v9 = vmul.f32 0.5, %v458_v6 }
  0xd9   :  { %6824 = vrsqrt.f32 %v476_v61  ;;  %vm495_vm2 = vweird.f32 %v476_v61  ;;  %vm485_vm10 = vweird.f32 %v475_v60 }
  0xda   :  { %v469_v4 = vsub.f32 %v461_v63, %v465_v0  ;;  %6826 = vrsqrt.f32 %v475_v60  ;;  %v470_v11 = vsub.f32 %v462_v9, %v466_v8 }
  0xdc   :  { %v473_v7 = vmax.f32 %v469_v4, 0.0  ;;  %v474_v15 = vmax.f32 %v470_v11, 0.0  ;;  %v128_v11 = vld [vmem:[#allocation4] sm:$0xff] }
  0xde   :  { %v477_v10 = vadd.f32 1e-05, %v473_v7  ;;  %v478_v17 = vadd.f32 1e-05, %v474_v15  ;;  %v132_v15 = vunpack.c.l.bf16 %v128_v11 }
  0xdf   :  { %v6825_v12 = vpop.eup %6824 }
  0xe0   :  { %6828 = vrsqrt.f32 %v477_v10  ;;  %v6827_v13 = vpop.eup %6826  ;;  %v490_v14 = vmul.f32 %v6825_v12, %v476_v61  ;;  %vm496_vm0 = vweird.f32 %v6825_v12  ;;  %vm505_vm4 = vweird.f32 %v477_v10 }
  0xe1   :  { %v480_v18 = vmul.f32 %v6827_v13, %v475_v60  ;;  %6830 = vrsqrt.f32 %v478_v17  ;;  %vm497_vm3 = vmor %vm495_vm2, %vm496_vm0  ;;  %vm486_vm7 = vweird.f32 %v6827_v13  ;;  %vm515_vm8 = vweird.f32 %v478_v17 }
  0xe2   :  { %v491_v16 = vmul.f32 %v6825_v12, %v490_v14  ;;  %vm487_vm13 = vmor %vm485_vm10, %vm486_vm7 }
  0xe3   :  { %v481_v22 = vmul.f32 %v6827_v13, %v480_v18 }
  0xe4   :  { %v492_v20 = vmul.f32 0.5, %v491_v16 }
  0xe5   :  { %v482_v27 = vmul.f32 0.5, %v481_v22 }
  0xe6   :  { %v6829_v19 = vpop.eup %6828  ;;  %v493_v24 = vsub.f32 1.5, %v492_v20 }
  0xe7   :  { %v500_v21 = vmul.f32 %v6829_v19, %v477_v10  ;;  %v6831_v25 = vpop.eup %6830  ;;  %vm506_vm1 = vweird.f32 %v6829_v19  ;;  %v483_v35 = vsub.f32 1.5, %v482_v27  ;;  %v123_v10 = vld [vmem:[#allocation12] sm:$0xf] }
  0xe8   :  { %v510_v29 = vmul.f32 %v6831_v25, %v478_v17  ;;  %v494_v31 = vmul.f32 %v6825_v12, %v493_v24  ;;  %vm507_vm5 = vmor %vm505_vm4, %vm506_vm1  ;;  %vm516_vm6 = vweird.f32 %v6831_v25 }
  0xe9   :  { %v501_v23 = vmul.f32 %v6829_v19, %v500_v21  ;;  %v484_v45 = vmul.f32 %v6827_v13, %v483_v35  ;;  %vm517_vm9 = vmor %vm515_vm8, %vm516_vm6 }
  0xea   :  { %v511_v33 = vmul.f32 %v6831_v25, %v510_v29  ;;  %v498_v37 = vsel %vm497_vm3, %v6825_v12, %v494_v31  ;;  %v130_v12 = vld [vmem:[#allocation4 + $0x10] sm:$0xff] }
  0xeb   :  { %v502_v26 = vmul.f32 0.5, %v501_v23  ;;  %v523_v48 = vrot.slane %v498_v37, 7  ;;  %v488_v53 = vsel %vm487_vm13, %v6827_v13, %v484_v45  ;;  %v136_v16 = vunpack.c.l.bf16 %v130_v12  ;;  %v7544_v37 = vld [vmem:[#allocation4 + $0x8] sm:$0xff]  ;;  %v7547_v45 = vld [vmem:[#allocation4 + $0x18] sm:$0xff] }
  0xec   :  { %v512_v36 = vmul.f32 0.5, %v511_v33  ;;  %v137_v20 = vunpack.c.h.bf16 %v130_v12  ;;  %v5617_v12 = vld [vmem:[#allocation9 + $0xa0] sm:$0xf] }
  0xed   :  { %v503_v30 = vsub.f32 1.5, %v502_v26  ;;  %v527_v54 = vsel %vm526_vm11, %v488_v53, %v523_v48 }
  0xee   :  { %v513_v44 = vsub.f32 1.5, %v512_v36 }
  0xef   :  { %v504_v34 = vmul.f32 %v6829_v19, %v503_v30 }
  0xf0   :  { %v514_v47 = vmul.f32 %v6831_v25, %v513_v44  ;;  %v6533_v44 = vld [vmem:[#allocation9 + $0xe4] sm:$0xf] }
  0xf1   :  { %v508_v40 = vsel %vm507_vm5, %v6829_v19, %v504_v34 }
  0xf2   :  { %v524_v49 = vrot.slane %v508_v40, 6  ;;  %v518_v50 = vsel %vm517_vm9, %v6831_v25, %v514_v47  ;;  %v6535_v40 = vld [vmem:[#allocation9 + $0xec] sm:$0xf0] }
  0xf3   :  { %v525_v51 = vrot.slane %v518_v50, 5  ;;  %v5657_v50 = vld [vmem:[#allocation9 + $0xe8] sm:$0xf] }
  0xf5   :  { %v529_v55 = vsel %vm528_vm12, %v524_v49, %v525_v51  ;;  %v5651_v49 = vld [vmem:[#allocation9 + $0xf0] sm:$0xf0]  ;;  %v6536_v51 = vld [vmem:[#allocation9 + $0xf4] sm:$0xf0] }
  0xf6   :  { %v531_v56 = vsel %vm530_vm14, %v527_v54, %v529_v55  ;;  %v5658_v53 = vor.u32 %v6536_v51, %v5657_v50  ;;  %v6534_v54 = vld [vmem:[#allocation9 + $0xec] sm:$0xf]  ;;  %v5659_v55 = vld [vmem:[#allocation9 + $0xf8] sm:$0xf0] }
  0xf7   :  { %v533_v57 = vmul.f32 %v531_v56, %v122_v52  ;;  %v5654_v52 = vor.u32 %v6533_v44, %v5651_v49  ;;  %v5633_v56 = vld [vmem:[#allocation9 + $0xc0] sm:$0xf]  ;;  %v5609_v44 = vld [vmem:[#allocation9 + $0x88] sm:$0xf] }
  0xf8   :  { %1027 = vmatpush.bf16.msrb.mxu2 %v5658_v53  ;;  %v6522_v53 = vld [vmem:[#allocation9 + $0x8c] sm:$0xf] }
  0xf9   :  { %v535_v59 = vperm.slane %v533_v57, 0  ;;  %v536_v61 = vperm.slane %v533_v57, 1  ;;  %v537_v63 = vperm.slane %v533_v57, 2  ;;  %v7519_v0 = vperm.slane %v533_v57, 3  ;;  %1013 = vmatpush.bf16.msrb.mxu1 %v5654_v52 }
  0xfa   :  { %v135_v57 = vunpack.c.h.bf16 %v7544_v37 }
  0xfb   :  { %v544_v60 = vmul.f32 %v536_v61, %v7502_v32  ;;  %v545_v1 = vmul.f32 %v537_v63, %v7508_v58  ;;  %v546_v2 = vmul.f32 %v7519_v0, %v7512_v5  ;;  %v561_v4 = vmul.f32 %v537_v63, %v7466_v41 }
  0xfc   :  { %v543_v6 = vmul.f32 %v535_v59, %v7500_v28  ;;  %v133_v5 = vunpack.c.h.bf16 %v128_v11  ;;  %v559_v41 = vmul.f32 %v535_v59, %v7460_v38  ;;  %v560_v28 = vmul.f32 %v536_v61, %v7462_v39  ;;  %v5643_v11 = vld [vmem:[#allocation9 + $0xd8] sm:$0xf0] }
  0xfd   :  { %v551_v7 = vrot.slane %v544_v60, 7  ;;  %v552_v8 = vrot.slane %v545_v1, 6  ;;  %v553_v9 = vrot.slane %v546_v2, 5  ;;  %v563_v21 = vmul.f32 %v535_v59, %v7470_v43  ;;  %v6529_v60 = vld [vmem:[#allocation9 + $0xc4] sm:$0xf] }
  0xfe   :  { %v564_v22 = vmul.f32 %v536_v61, %v7476_v46  ;;  %v565_v23 = vmul.f32 %v537_v63, %v7488_v62  ;;  %v5649_v62 = vld [vmem:[#allocation9 + $0xe0] sm:$0xf]  ;;  %v562_v47 = vmul.f32 %v7519_v0, %v7468_v42  ;;  %v5662_v61 = vor.u32 %v6534_v54, %v5659_v55  ;;  %v6531_v63 = vld [vmem:[#allocation9 + $0xcc] sm:$0xf0]  ;;  %v5635_v1 = vld [vmem:[#allocation9 + $0xd0] sm:$0xf0] }
  0xff   :  { %v554_v13 = vsel %vm526_vm11, %v543_v6, %v551_v7  ;;  %v555_v14 = vsel %vm528_vm12, %v552_v8, %v553_v9  ;;  %v5650_v48 = vor.u32 %v6535_v40, %v5649_v62  ;;  %v566_v42 = vmul.f32 %v7519_v0, %v7494_v3  ;;  %v5641_v6 = vld [vmem:[#allocation9 + $0xc8] sm:$0xf]  ;;  %v6532_v7 = vld [vmem:[#allocation9 + $0xd4] sm:$0xf0]  ;;  %v6530_v8 = vld [vmem:[#allocation9 + $0xcc] sm:$0xf] }
 0x100   :  { %v556_v32 = vsel %vm530_vm14, %v554_v13, %v555_v14  ;;  %v5634_v2 = vor.u32 %v6531_v63, %v5633_v56  ;;  %1041 = vmatpush.bf16.msrb.mxu3 %v5662_v61  ;;  %v6527_v13 = vld [vmem:[#allocation9 + $0xac] sm:$0xf0]  ;;  %v5646_v3 = vor.u32 %v6530_v8, %v5643_v11  ;;  %v6525_v0 = vld [vmem:[#allocation9 + $0xa4] sm:$0xf]  ;;  %v5603_v40 = vld [vmem:[#allocation9 + $0x90] sm:$0xf0] }
 0x101   :  { %v7530_v58 = vsub.f32 %v123_v10, %v556_v32  ;;  %999 = vmatpush.bf16.msrb.mxu0 %v5650_v48  ;;  %v5642_v10 = vor.u32 %v6532_v7, %v5641_v6  ;;  %v139_v32 = vunpack.c.h.bf16 %v7547_v45  ;;  %v5611_v54 = vld [vmem:[#allocation9 + $0x98] sm:$0xf0]  ;;  %v5585_v61 = vld [vmem:[#allocation9 + $0x60] sm:$0xf]  ;;  %v6519_v63 = vld [vmem:[#allocation9 + $0x6c] sm:$0xf0] }
 0x102   :  { %v6517_v6 = vld [vmem:[#allocation9 + $0x64] sm:$0xf]  ;;  %v5587_v7 = vld [vmem:[#allocation9 + $0x70] sm:$0xf0]  ;;  %v5586_v11 = vor.u32 %v6519_v63, %v5585_v61  ;;  %v6512_v56 = vld [vmem:[#allocation9 + $0x34] sm:$0xf0] }
 0x103   :  { %v568_v17 = vperm.slane %v7530_v58, 0  ;;  %v569_v18 = vperm.slane %v7530_v58, 1  ;;  %v570_v19 = vperm.slane %v7530_v58, 2  ;;  %v571_v46 = vperm.slane %v7530_v58, 3  ;;  %1028 = vmatpush.bf16.msrb.mxu2 %v5642_v10 }
 0x104   :  { %1042 = vmatpush.bf16.msrb.mxu3 %v5646_v3  ;;  %v5614_v10 = vor.u32 %v6522_v53, %v5611_v54  ;;  %v5590_v3 = vor.u32 %v6517_v6, %v5587_v7  ;;  %v7645_v53 = vpop.permute.xlu0 %680  ;;  %v6514_v54 = vld [vmem:[#allocation9 + $0x4c] sm:$0xf] }
 0x105   :  { %v576_v24 = vadd.f32 %v568_v17, %v559_v41  ;;  %v577_v25 = vadd.f32 %v569_v18, %v560_v28  ;;  %v7540_v26 = vadd.f32 %v570_v19, %v561_v4  ;;  %v580_v38 = vadd.f32 %v568_v17, %v563_v21  ;;  %1000 = vmatpush.bf16.msrb.mxu0 %v5634_v2  ;;  %v5625_v21 = vld [vmem:[#allocation9 + $0xa8] sm:$0xf] }
 0x106   :  { %v581_v27 = vadd.f32 %v569_v18, %v564_v22  ;;  %v7542_v39 = vadd.f32 %v570_v19, %v565_v23  ;;  %v579_v59 = vadd.f32 %v571_v46, %v562_v47  ;;  %v5638_v4 = vor.u32 %v6529_v60, %v5635_v1  ;;  %v6524_v47 = vld [vmem:[#allocation9 + $0x94] sm:$0xf0] }
 0x107   :  { %v584_v29 = vadd.f32 %v576_v24, %v132_v15  ;;  %v585_v30 = vadd.f32 %v577_v25, %v133_v5  ;;  %v588_v31 = vadd.f32 %v580_v38, %v136_v16  ;;  %v583_v58 = vadd.f32 %v571_v46, %v566_v42  ;;  %v5619_v5 = vld [vmem:[#allocation9 + $0xb0] sm:$0xf0]  ;;  %v6528_v38 = vld [vmem:[#allocation9 + $0xb4] sm:$0xf0] }
 0x108   :  { %v589_v33 = vadd.f32 %v581_v27, %v137_v20  ;;  %v587_v41 = vadd.f32 %v579_v59, %v135_v57  ;;  %v5618_v17 = vor.u32 %v6527_v13, %v5617_v12  ;;  %1014 = vmatpush.bf16.msrb.mxu1 %v5638_v4  ;;  %v5622_v20 = vor.u32 %v6525_v0, %v5619_v5  ;;  %v5593_v12 = vld [vmem:[#allocation9 + $0x68] sm:$0xf]  ;;  %v6520_v13 = vld [vmem:[#allocation9 + $0x74] sm:$0xf0]  ;;  %v6518_v0 = vld [vmem:[#allocation9 + $0x6c] sm:$0xf] }
 0x109   :  { %v5529_v34 = vmul.f32 -1.442695, %v584_v29  ;;  %v5531_v35 = vmul.f32 -1.442695, %v585_v30  ;;  %v5530_v36 = vmul.f32 -1.442695, %v588_v31  ;;  %v591_v22 = vadd.f32 %v583_v58, %v139_v32 }
 0x10a   :  { %v5532_v43 = vmul.f32 -1.442695, %v589_v33  ;;  %1001 = vmatpush.bf16.msrb.mxu0 %v5618_v17  ;;  %v6526_v30 = vld [vmem:[#allocation9 + $0xac] sm:$0xf]  ;;  %v5627_v33 = vld [vmem:[#allocation9 + $0xb8] sm:$0xf0]  ;;  %v5626_v62 = vor.u32 %v6528_v38, %v5625_v21  ;;  %v5610_v4 = vor.u32 %v6524_v47, %v5609_v44 }
 0x10b   :  { %6832 = vpow2.f32 %v5529_v34  ;;  %v5601_v34 = vld [vmem:[#allocation9 + $0x80] sm:$0xf]  ;;  %v5630_v59 = vor.u32 %v6526_v30, %v5627_v33  ;;  %v5595_v5 = vld [vmem:[#allocation9 + $0x78] sm:$0xf0]  ;;  %v6515_v21 = vld [vmem:[#allocation9 + $0x4c] sm:$0xf0] }
 0x10c   :  { %6834 = vpow2.f32 %v5530_v36  ;;  %1015 = vmatpush.bf16.msrb.mxu1 %v5622_v20  ;;  %v6523_v36 = vld [vmem:[#allocation9 + $0x8c] sm:$0xf0]  ;;  %1029 = vmatpush.bf16.msrb.mxu2 %v5626_v62  ;;  %v5594_v20 = vor.u32 %v6520_v13, %v5593_v12  ;;  %v5571_v30 = vld [vmem:[#allocation9 + $0x50] sm:$0xf0]  ;;  %v5577_v33 = vld [vmem:[#allocation9 + $0x48] sm:$0xf]  ;;  %v5598_v62 = vor.u32 %v6518_v0, %v5595_v5 }
 0x10d   :  { %6836 = vpow2.f32 %v5531_v35  ;;  %v5602_v42 = vor.u32 %v6523_v36, %v5601_v34  ;;  %1043 = vmatpush.bf16.msrb.mxu3 %v5630_v59  ;;  %v118_v34 = vld [vmem:[#allocation7] sm:$0xff]  ;;  %v119_v44 = vld [vmem:[#allocation7 + $0x8] sm:$0xff]  ;;  %v5553_v59 = vld [vmem:[#allocation9 + $0x20] sm:$0xf] }
 0x10e   :  { %6838 = vpow2.f32 %v5532_v43  ;;  %v6521_v43 = vld [vmem:[#allocation9 + $0x84] sm:$0xf] }
 0x10f   :  { %v5606_v2 = vor.u32 %v6521_v43, %v5603_v40  ;;  %1002 = vmatpush.bf16.msrb.mxu0 %v5602_v42  ;;  %v6516_v40 = vld [vmem:[#allocation9 + $0x54] sm:$0xf0]  ;;  %v6511_v42 = vld [vmem:[#allocation9 + $0x2c] sm:$0xf0] }
 0x110   :  { %1030 = vmatpush.bf16.msrb.mxu2 %v5610_v4  ;;  %v5555_v4 = vld [vmem:[#allocation9 + $0x30] sm:$0xf0]  ;;  %v5554_v12 = vor.u32 %v6511_v42, %v5553_v59 }
 0x111   :  { %v6833_v9 = vpop.eup %6832  ;;  %1016 = vmatpush.bf16.msrb.mxu1 %v5606_v2  ;;  %1044 = vmatpush.bf16.msrb.mxu3 %v5614_v10  ;;  %v6509_v2 = vld [vmem:[#allocation9 + $0x24] sm:$0xf] }
 0x112   :  { %v6835_v14 = vpop.eup %6834  ;;  %v7555_v15 = vadd.f32 1.0, %v6833_v9  ;;  %v5558_v13 = vor.u32 %v6509_v2, %v5555_v4 }
 0x113   :  { %v6837_v16 = vpop.eup %6836  ;;  %v7557_v28 = vadd.f32 1.0, %v6835_v14  ;;  %1003 = vmatpush.bf16.msrb.mxu0 %v5586_v11 }
 0x114   :  { %v6839_v18 = vpop.eup %6838  ;;  %6840 = vrcp.f32 %v7555_v15  ;;  %v611_v19 = vand.u32 2147483648, %v7555_v15  ;;  %v609_v23 = vand.u32 2147483647, %v7555_v15  ;;  %v7563_v24 = vadd.f32 1.0, %v6837_v16  ;;  %v5569_v16 = vld [vmem:[#allocation9 + $0x40] sm:$0xf]  ;;  %1031 = vmatpush.bf16.msrb.mxu2 %v5594_v20 }
 0x115   :  { %6842 = vrcp.f32 %v7557_v28  ;;  %v7565_v25 = vadd.f32 1.0, %v6839_v18  ;;  %v624_v27 = vand.u32 2147483647, %v7557_v28  ;;  %v626_v29 = vand.u32 2147483648, %v7557_v28  ;;  %1017 = vmatpush.bf16.msrb.mxu1 %v5590_v3  ;;  %1045 = vmatpush.bf16.msrb.mxu3 %v5598_v62  ;;  %v5537_v3 = vld [vmem:[#allocation9] sm:$0xf] }
 0x116   :  { %6844 = vtanh.f32 %v587_v41  ;;  %v7569_v31 = vor.u32 1.1754944e-38, %v611_v19  ;;  %v651_v35 = vand.u32 2147483647, %v7563_v24  ;;  %vm605_vm15 = vweird.f32 %v7555_v15 }
 0x117   :  { %6846 = vrcp.f32 %v7563_v24  ;;  %vm7581_vm0 = vcmp.eq.f32.partialorder %v609_v23, 8.507059e+37  ;;  %vm620_vm1 = vweird.f32 %v7557_v28  ;;  %v7586_v51 = vor.u32 1.1754944e-38, %v626_v29 }
 0x118   :  { %6848 = vrcp.f32 %v7565_v25  ;;  %v653_v52 = vand.u32 2147483648, %v7563_v24  ;;  %vm7591_vm2 = vcmp.eq.f32.partialorder %v624_v27, 8.507059e+37  ;;  %vm647_vm3 = vweird.f32 %v7563_v24 }
 0x119   :  { %6850 = vtanh.f32 %v591_v22  ;;  %v666_v57 = vand.u32 2147483647, %v7565_v25  ;;  %vm662_vm4 = vweird.f32 %v7565_v25  ;;  %v668_v19 = vand.u32 2147483648, %v7565_v25  ;;  %v6513_v22 = vld [vmem:[#allocation9 + $0x44] sm:$0xf] }
 0x11a   :  { %v7574_v46 = vpop.eup %6840  ;;  %vm7627_vm9 = vcmp.eq.f32.partialorder %v651_v35, 8.507059e+37  ;;  %v5570_v35 = vor.u32 %v6515_v21, %v5569_v16  ;;  %v5545_v21 = vld [vmem:[#allocation9 + $0x8] sm:$0xf] }
 0x11b   :  { %v7577_v48 = vpop.eup %6842  ;;  %v601_v49 = vmul.f32 %v7574_v46, %v7555_v15  ;;  %vm606_vm5 = vweird.f32 %v7574_v46  ;;  %v7695_v15 = vpop.permute.xlu0 %685 }
 0x11c   :  { %v616_v55 = vmul.f32 %v7577_v48, %v7557_v28  ;;  %v7597_v60 = vpop.eup %6844  ;;  %vm621_vm6 = vweird.f32 %v7577_v48  ;;  %vm7620_vm7 = vmor %vm605_vm15, %vm606_vm5  ;;  %v5574_v28 = vor.u32 %v6513_v22, %v5571_v30  ;;  %1004 = vmatpush.bf16.msrb.mxu0 %v5570_v35  ;;  %v6508_v22 = vld [vmem:[#allocation9 + $0x14] sm:$0xf0]  ;;  %v6506_v30 = vld [vmem:[#allocation9 + $0xc] sm:$0xf] }
 0x11d   :  { %v602_v1 = vsub.f32 1.0, %v601_v49  ;;  %v7600_v8 = vpop.eup %6846  ;;  %vm7636_vm10 = vmor %vm620_vm1, %vm621_vm6 }
 0x11e   :  { %v617_v9 = vsub.f32 1.0, %v616_v55  ;;  %v7603_v14 = vpop.eup %6848  ;;  %v643_v58 = vmul.f32 %v7600_v8, %v7563_v24  ;;  %vm648_vm8 = vweird.f32 %v7600_v8  ;;  %v5579_v55 = vld [vmem:[#allocation9 + $0x58] sm:$0xf0]  ;;  %v669_v24 = vor.u32 1.1754944e-38, %v668_v19  ;;  %1018 = vmatpush.bf16.msrb.mxu1 %v5574_v28 }
 0x11f   :  { %v603_v32 = vmul.f32 %v7574_v46, %v602_v1  ;;  %v7609_v41 = vpop.eup %6850  ;;  %v658_v18 = vmul.f32 %v7603_v14, %v7565_v25  ;;  %vm663_vm13 = vweird.f32 %v7603_v14  ;;  %v5578_v1 = vor.u32 %v6516_v40, %v5577_v33  ;;  %vm7662_vm15 = vmor %vm647_vm3, %vm648_vm8  ;;  %v5547_v33 = vld [vmem:[#allocation9 + $0x18] sm:$0xf0] }
 0x120   :  { %v618_v17 = vmul.f32 %v7577_v48, %v617_v9  ;;  %v644_v27 = vsub.f32 1.0, %v643_v58  ;;  %vm7679_vm1 = vmor %vm662_vm4, %vm663_vm13  ;;  %v5563_v58 = vld [vmem:[#allocation9 + $0x38] sm:$0xf0]  ;;  %1005 = vmatpush.bf16.msrb.mxu0 %v5554_v12 }
 0x121   :  { %v604_v23 = vadd.f32 %v7574_v46, %v603_v32  ;;  %v659_v43 = vsub.f32 1.0, %v658_v18  ;;  %v6510_v32 = vld [vmem:[#allocation9 + $0x2c] sm:$0xf]  ;;  %1032 = vmatpush.bf16.msrb.mxu2 %v5578_v1  ;;  %v6505_v18 = vld [vmem:[#allocation9 + $0x4] sm:$0xf] }
 0x122   :  { %v619_v36 = vadd.f32 %v7577_v48, %v618_v17  ;;  %v645_v49 = vmul.f32 %v7600_v8, %v644_v27  ;;  %v6507_v17 = vld [vmem:[#allocation9 + $0xc] sm:$0xf0]  ;;  %v5566_v38 = vor.u32 %v6510_v32, %v5563_v58  ;;  %1019 = vmatpush.bf16.msrb.mxu1 %v5558_v13 }
 0x123   :  { %v608_v47 = vsel %vm7620_vm7, %v7574_v46, %v604_v23  ;;  %v660_v63 = vmul.f32 %v7603_v14, %v659_v43  ;;  %v5550_v43 = vor.u32 %v6506_v30, %v5547_v33 }
 0x124   :  { %v613_v61 = vsel %vm7581_vm0, %v7569_v31, %v608_v47  ;;  %v623_v46 = vsel %vm7636_vm10, %v7577_v48, %v619_v36  ;;  %v646_v7 = vadd.f32 %v7600_v8, %v645_v49  ;;  %v654_v48 = vor.u32 1.1754944e-38, %v653_v52 }
 0x125   :  { %v628_v6 = vsel %vm7591_vm2, %v7586_v51, %v623_v46  ;;  %vm7670_vm0 = vcmp.eq.f32.partialorder %v666_v57, 8.507059e+37  ;;  %v5561_v51 = vld [vmem:[#allocation9 + $0x28] sm:$0xf]  ;;  %v632_v9 = vmul.f32 %v613_v61, %v118_v34  ;;  %v661_v10 = vadd.f32 %v7603_v14, %v660_v63 }
 0x126   :  { %v5582_v52 = vor.u32 %v6514_v54, %v5579_v55  ;;  %v650_v57 = vsel %vm7662_vm15, %v7600_v8, %v646_v7  ;;  %v633_v0 = vmul.f32 %v628_v6, %v119_v44  ;;  %v5562_v16 = vor.u32 %v6512_v56, %v5561_v51  ;;  %v5539_v8 = vld [vmem:[#allocation9 + $0x10] sm:$0xf0] }
 0x127   :  { %v655_v25 = vsel %vm7627_vm9, %v654_v48, %v650_v57  ;;  %v665_v5 = vsel %vm7679_vm1, %v7603_v14, %v661_v10  ;;  %v5538_v14 = vor.u32 %v6507_v17, %v5537_v3  ;;  %v5542_v29 = vor.u32 %v6505_v18, %v5539_v8  ;;  %v125_v8 = vld [vmem:[%s9316_s7] sm:$0x1] }
 0x128   :  { %v670_v19 = vsel %vm7670_vm0, %v669_v24, %v665_v5  ;;  %v674_v20 = vmul.f32 %v7597_v60, %v655_v25  ;;  %1046 = vmatpush.bf16.msrb.mxu3 %v5582_v52  ;;  %1033 = vmatpush.bf16.msrb.mxu2 %v5562_v16  ;;  %v5546_v36 = vor.u32 %v6508_v22, %v5545_v21  ;;  %v134_v54 = vunpack.c.l.bf16 %v7544_v37 }
 0x129   :  { %v675_v23 = vmul.f32 %v7609_v41, %v670_v19  ;;  %1006 = vmatpush.bf16.msrb.mxu0 %v5538_v14  ;;  %1020 = vmatpush.bf16.msrb.mxu1 %v5542_v29  ;;  %v138_v55 = vunpack.c.l.bf16 %v7547_v45 }
 0x12a   :  { %v676_v27 = vadd.f32 %v674_v20, %v632_v9  ;;  %v586_v1 = vadd.f32 %v7540_v26, %v134_v54 }
 0x12b   :  { %v677_v34 = vadd.f32 %v675_v23, %v633_v0  ;;  %v590_v42 = vadd.f32 %v7542_v39, %v138_v55  ;;  %v124_v0 = vld [vmem:[%s9315_s6] sm:$0x1] }
 0x12c   :  { %v7698_v60 = vmul.f32 %v7645_v53, %v676_v27  ;;  %1047 = vmatpush.bf16.msrb.mxu3 %v5566_v38  ;;  %1034 = vmatpush.bf16.msrb.mxu2 %v5546_v36  ;;  %v5533_v31 = vmul.f32 -1.442695, %v586_v1 }
 0x12d   :  { %v7701_v41 = vmul.f32 %v7695_v15, %v677_v34  ;;  %v5534_v48 = vmul.f32 -1.442695, %v590_v42 }
 0x12e   :  { %v698_v62 = vmul.f32 %v7698_v60, %v7698_v60  ;;  %6852 = vpow2.f32 %v5533_v31 }
 0x12f   :  { %v690_v35 = vadd.f32 %v7701_v41, %v7698_v60  ;;  %v699_v40 = vmul.f32 %v7701_v41, %v7701_v41  ;;  %6854 = vpow2.f32 %v5534_v48 }
 0x130   :  { %1048 = vmatpush.bf16.msrb.mxu3 %v5550_v43 }
 0x131   :  { %v691_v44 = vrot.slane %v690_v35, 4  ;;  %v700_v47 = vadd.f32 %v699_v40, %v698_v62 }
 0x133   :  { %v692_v49 = vadd.f32 %v691_v44, %v690_v35  ;;  %v701_v28 = vrot.slane %v700_v47, 4 }
 0x134   :  { %v6853_v11 = vpop.eup %6852 }
 0x135   :  { %v693_v59 = vrot.slane %v692_v49, 2  ;;  %v702_v61 = vadd.f32 %v701_v28, %v700_v47  ;;  %v6855_v24 = vpop.eup %6854  ;;  %v741_v26 = vadd.f32 1.0, %v6853_v11 }
 0x136   :  { %v742_v39 = vadd.f32 1.0, %v6855_v24 }
 0x137   :  { %v694_v46 = vadd.f32 %v693_v59, %v692_v49  ;;  %v703_v63 = vrot.slane %v702_v61, 2  ;;  %v754_v43 = vand.u32 2147483648, %v741_v26  ;;  %vm748_vm7 = vweird.f32 %v741_v26 }
 0x138   :  { %v752_v35 = vand.u32 2147483647, %v741_v26  ;;  %v769_v40 = vand.u32 2147483648, %v742_v39  ;;  %vm763_vm9 = vweird.f32 %v742_v39  ;;  %v767_v44 = vand.u32 2147483647, %v742_v39 }
 0x139   :  { %v695_v2 = vrot.slane %v694_v46, 1  ;;  %v704_v4 = vadd.f32 %v703_v63, %v702_v61  ;;  %v755_v49 = vor.u32 1.1754944e-38, %v754_v43 }
 0x13a   :  { %vm753_vm13 = vcmp.eq.f32.partialorder %v752_v35, 8.507059e+37  ;;  %v770_v54 = vor.u32 1.1754944e-38, %v769_v40  ;;  %vm768_vm15 = vcmp.eq.f32.partialorder %v767_v44, 8.507059e+37 }
 0x13b   :  { %v696_v6 = vadd.f32 %v695_v2, %v694_v46  ;;  %v705_v7 = vrot.slane %v704_v4, 1 }
 0x13d   :  { %v697_v50 = vmul.f32 0.5, %v696_v6  ;;  %v706_v51 = vadd.f32 %v705_v7, %v704_v4  ;;  %v6737_v6 = vpack.c.bf16 %v7701_v41, %v7698_v60 }
 0x13f   :  { %v707_v56 = vmul.f32 0.5, %v706_v51  ;;  %v708_v37 = vmul.f32 %v697_v50, %v697_v50  ;;  %6738 = vst [vmem:[#allocation14] sm:$0xff] %v6737_v6  }
 0x141   :  { %v709_v45 = vsub.f32 %v707_v56, %v708_v37 }
 0x143   :  { %v710_v9 = vmax.f32 %v709_v45, 0.0 }
 0x145   :  { %v711_v10 = vadd.f32 1e-05, %v710_v9 }
 0x147   :  { %6856 = vrsqrt.f32 %v711_v10  ;;  %vm718_vm3 = vweird.f32 %v711_v10 }
 0x148   :  { %6858 = vrcp.f32 %v741_v26 }
 0x149   :  { %6860 = vrcp.f32 %v742_v39 }
 0x14d   :  { %v6857_v52 = vpop.eup %6856 }
 0x14e   :  { %v713_v57 = vmul.f32 %v6857_v52, %v711_v10  ;;  %v6859_v32 = vpop.eup %6858  ;;  %vm719_vm2 = vweird.f32 %v6857_v52 }
 0x14f   :  { %v6861_v58 = vpop.eup %6860  ;;  %v744_v5 = vmul.f32 %v6859_v32, %v741_v26  ;;  %vm720_vm4 = vmor %vm718_vm3, %vm719_vm2  ;;  %vm749_vm5 = vweird.f32 %v6859_v32 }
 0x150   :  { %v714_v12 = vmul.f32 %v6857_v52, %v713_v57  ;;  %v759_v16 = vmul.f32 %v6861_v58, %v742_v39  ;;  %vm764_vm6 = vweird.f32 %v6861_v58  ;;  %vm750_vm8 = vmor %vm748_vm7, %vm749_vm5 }
 0x151   :  { %v745_v19 = vsub.f32 1.0, %v744_v5  ;;  %vm765_vm10 = vmor %vm763_vm9, %vm764_vm6 }
 0x152   :  { %v715_v13 = vmul.f32 0.5, %v714_v12  ;;  %v760_v22 = vsub.f32 1.0, %v759_v16 }
 0x153   :  { %v746_v38 = vmul.f32 %v6859_v32, %v745_v19 }
 0x154   :  { %v716_v3 = vsub.f32 1.5, %v715_v13  ;;  %v761_v30 = vmul.f32 %v6861_v58, %v760_v22 }
 0x155   :  { %v747_v36 = vadd.f32 %v6859_v32, %v746_v38 }
 0x156   :  { %v717_v25 = vmul.f32 %v6857_v52, %v716_v3  ;;  %v762_v62 = vadd.f32 %v6861_v58, %v761_v30 }
 0x157   :  { %v751_v47 = vsel %vm750_vm8, %v6859_v32, %v747_v36 }
 0x158   :  { %v721_v17 = vsel %vm720_vm4, %v6857_v52, %v717_v25  ;;  %v766_v28 = vsel %vm765_vm10, %v6861_v58, %v762_v62  ;;  %v756_v59 = vsel %vm753_vm13, %v755_v49, %v751_v47 }
 0x159   :  { %v722_v18 = vmul.f32 %v721_v17, %v124_v0  ;;  %v771_v46 = vsel %vm768_vm15, %v770_v54, %v766_v28 }
 0x15b   :  { %v723_v20 = vmul.f32 %v722_v18, %v697_v50  ;;  %v726_v21 = vperm.slane %v722_v18, 0 }
 0x15d   :  { %v724_v23 = vsub.f32 %v125_v8, %v723_v20  ;;  %v728_v27 = vmul.f32 %v726_v21, %v7698_v60  ;;  %v729_v14 = vmul.f32 %v726_v21, %v7701_v41 }
 0x15f   :  { %v731_v29 = vperm.slane %v724_v23, 0 }
 0x161   :  { %v733_v33 = vadd.f32 %v731_v29, %v728_v27  ;;  %v734_v34 = vadd.f32 %v731_v29, %v729_v14 }
 0x163   :  { %6862 = vtanh.f32 %v733_v33 }
 0x164   :  { %6864 = vtanh.f32 %v734_v34 }
 0x169   :  { %v6863_v55 = vpop.eup %6862 }
 0x16a   :  { %v6865_v61 = vpop.eup %6864  ;;  %v775_v63 = vmul.f32 %v6863_v55, %v756_v59 }
 0x16b   :  { %v776_v1 = vmul.f32 %v6865_v61, %v771_v46 }
 0x16c   :  { %v777_v42 = vmul.f32 %v775_v63, %v7645_v53 }
 0x16d   :  { %v778_v2 = vmul.f32 %v776_v1, %v7695_v15 }
 0x16f   :  { %v6732_v4 = vpack.c.bf16 %v778_v2, %v777_v42 }
 0x171   :  { %6733 = vst [vmem:[#allocation13] sm:$0xff] %v6732_v4   ;;  %1007 = vmatmul.bf16.vlgmr.msrb.gmra.mxu0 %v6732_v4  ;;  %1021 = vmatmul.bf16.vlgmr.msrb.gmra.mxu1 %v6732_v4 }
 0x172   :  { %1035 = vmatmul.bf16.vlgmr.msrb.gmra.mxu2 %v6732_v4  ;;  %1049 = vmatmul.bf16.vlgmr.msrb.gmra.mxu3 %v6732_v4 }
 0x1ee   :  { %v7725_v7 = vpop.f32.mrf.mxu0  ;;  %v7727_v31 = vpop.f32.mrf.mxu1 }
 0x1ef   :  { %v1087_v51 = vmul.f32 %v7725_v7, %v7725_v7  ;;  %v1088_v56 = vmul.f32 %v7727_v31, %v7727_v31 }
 0x1f5   :  { %v7729_v48 = vpop.f32.mrf.mxu2  ;;  %v7731_v50 = vpop.f32.mrf.mxu3 }
 0x1f6   :  { %v7737_v37 = vpop.f32.mrf.mxu0  ;;  %v7739_v45 = vpop.f32.mrf.mxu1  ;;  %v1089_v3 = vmul.f32 %v7729_v48, %v7729_v48  ;;  %v1090_v0 = vmul.f32 %v7731_v50, %v7731_v50 }
 0x1f7   :  { %v1055_v9 = vadd.f32 %v7737_v37, %v7725_v7  ;;  %v1091_v10 = vmul.f32 %v7737_v37, %v7737_v37  ;;  %v1062_v11 = vadd.f32 %v7739_v45, %v7727_v31  ;;  %v1092_v24 = vmul.f32 %v7739_v45, %v7739_v45 }
 0x1f9   :  { %v1056_v26 = vrot.slane %v1055_v9, 4  ;;  %v1095_v39 = vadd.f32 %v1091_v10, %v1087_v51  ;;  %v1063_v52 = vrot.slane %v1062_v11, 4  ;;  %v1102_v57 = vadd.f32 %v1092_v24, %v1088_v56 }
 0x1fb   :  { %v1057_v12 = vadd.f32 %v1056_v26, %v1055_v9  ;;  %v1096_v13 = vrot.slane %v1095_v39, 4  ;;  %v1064_v32 = vadd.f32 %v1063_v52, %v1062_v11  ;;  %v1103_v58 = vrot.slane %v1102_v57, 4 }
 0x1fd   :  { %v1058_v25 = vrot.slane %v1057_v12, 2  ;;  %v1097_v5 = vadd.f32 %v1096_v13, %v1095_v39  ;;  %v1065_v16 = vrot.slane %v1064_v32, 2  ;;  %v1104_v17 = vadd.f32 %v1103_v58, %v1102_v57  ;;  %v7753_v18 = vpop.f32.mrf.mxu2  ;;  %v7755_v8 = vpop.f32.mrf.mxu3 }
 0x1fe   :  { %v1069_v19 = vadd.f32 %v7753_v18, %v7729_v48  ;;  %v1093_v20 = vmul.f32 %v7753_v18, %v7753_v18  ;;  %v1076_v21 = vadd.f32 %v7755_v8, %v7731_v50  ;;  %v1094_v22 = vmul.f32 %v7755_v8, %v7755_v8 }
 0x1ff   :  { %v1059_v23 = vadd.f32 %v1058_v25, %v1057_v12  ;;  %v1098_v38 = vrot.slane %v1097_v5, 2  ;;  %v1066_v27 = vadd.f32 %v1065_v16, %v1064_v32  ;;  %v1105_v14 = vrot.slane %v1104_v17, 2 }
 0x200   :  { %v1070_v29 = vrot.slane %v1069_v19, 4  ;;  %v1109_v30 = vadd.f32 %v1093_v20, %v1089_v3  ;;  %v1077_v33 = vrot.slane %v1076_v21, 4  ;;  %v1116_v34 = vadd.f32 %v1094_v22, %v1090_v0 }
 0x201   :  { %v1060_v36 = vrot.slane %v1059_v23, 1  ;;  %v1099_v43 = vadd.f32 %v1098_v38, %v1097_v5  ;;  %v1067_v62 = vrot.slane %v1066_v27, 1  ;;  %v1106_v35 = vadd.f32 %v1105_v14, %v1104_v17 }
 0x202   :  { %v1071_v40 = vadd.f32 %v1070_v29, %v1069_v19  ;;  %v1110_v44 = vrot.slane %v1109_v30, 4  ;;  %v1078_v47 = vadd.f32 %v1077_v33, %v1076_v21  ;;  %v1117_v49 = vrot.slane %v1116_v34, 4 }
 0x203   :  { %v1061_v28 = vadd.f32 %v1060_v36, %v1059_v23  ;;  %v1100_v54 = vrot.slane %v1099_v43, 1  ;;  %v1068_v55 = vadd.f32 %v1067_v62, %v1066_v27  ;;  %v1107_v59 = vrot.slane %v1106_v35, 1 }
 0x204   :  { %v1072_v61 = vrot.slane %v1071_v40, 2  ;;  %v1111_v46 = vadd.f32 %v1110_v44, %v1109_v30  ;;  %v1079_v63 = vrot.slane %v1078_v47, 2  ;;  %v1118_v1 = vadd.f32 %v1117_v49, %v1116_v34 }
 0x205   :  { %v7765_v42 = vmul.f32 0.5, %v1061_v28  ;;  %v1101_v2 = vadd.f32 %v1100_v54, %v1099_v43  ;;  %v7767_v4 = vmul.f32 0.5, %v1068_v55  ;;  %v1108_v6 = vadd.f32 %v1107_v59, %v1106_v35 }
 0x206   :  { %v1073_v51 = vadd.f32 %v1072_v61, %v1071_v40  ;;  %v1112_v56 = vrot.slane %v1111_v46, 2  ;;  %v1080_v9 = vadd.f32 %v1079_v63, %v1078_v47  ;;  %v1119_v10 = vrot.slane %v1118_v1, 2 }
 0x207   :  { %v1123_v11 = vmul.f32 0.5, %v1101_v2  ;;  %v1127_v24 = vmul.f32 %v7765_v42, %v7765_v42  ;;  %v1124_v26 = vmul.f32 0.5, %v1108_v6  ;;  %v1128_v39 = vmul.f32 %v7767_v4, %v7767_v4 }
 0x208   :  { %v1074_v52 = vrot.slane %v1073_v51, 1  ;;  %v1113_v57 = vadd.f32 %v1112_v56, %v1111_v46  ;;  %v1081_v32 = vrot.slane %v1080_v9, 1  ;;  %v1120_v58 = vadd.f32 %v1119_v10, %v1118_v1 }
 0x209   :  { %v1131_v12 = vsub.f32 %v1123_v11, %v1127_v24  ;;  %v1132_v13 = vsub.f32 %v1124_v26, %v1128_v39 }
 0x20a   :  { %v1075_v3 = vadd.f32 %v1074_v52, %v1073_v51  ;;  %v1114_v0 = vrot.slane %v1113_v57, 1  ;;  %v1082_v21 = vadd.f32 %v1081_v32, %v1080_v9  ;;  %v1121_v22 = vrot.slane %v1120_v58, 1 }
 0x20b   :  { %v1135_v25 = vmax.f32 %v1131_v12, 0.0  ;;  %v1136_v5 = vmax.f32 %v1132_v13, 0.0 }
 0x20c   :  { %v7773_v16 = vmul.f32 0.5, %v1075_v3  ;;  %v1115_v17 = vadd.f32 %v1114_v0, %v1113_v57  ;;  %v7777_v27 = vmul.f32 0.5, %v1082_v21  ;;  %v1122_v29 = vadd.f32 %v1121_v22, %v1120_v58  ;;  %v7160_v21 = vld [vmem:[#allocation10] sm:$0xf] }
 0x20d   :  { %v1139_v19 = vadd.f32 1e-05, %v1135_v25  ;;  %v1140_v20 = vadd.f32 1e-05, %v1136_v5 }
 0x20e   :  { %v1125_v23 = vmul.f32 0.5, %v1115_v17  ;;  %v1129_v38 = vmul.f32 %v7773_v16, %v7773_v16  ;;  %v1130_v30 = vmul.f32 %v7777_v27, %v7777_v27  ;;  %v1126_v34 = vmul.f32 0.5, %v1122_v29 }
 0x20f   :  { %6866 = vrsqrt.f32 %v1140_v20  ;;  %vm1159_vm2 = vweird.f32 %v1140_v20  ;;  %vm1149_vm10 = vweird.f32 %v1139_v19 }
 0x210   :  { %v1133_v14 = vsub.f32 %v1125_v23, %v1129_v38  ;;  %6868 = vrsqrt.f32 %v1139_v19  ;;  %v1134_v43 = vsub.f32 %v1126_v34, %v1130_v30 }
 0x212   :  { %v1137_v33 = vmax.f32 %v1133_v14, 0.0  ;;  %v1138_v44 = vmax.f32 %v1134_v43, 0.0 }
 0x214   :  { %v1141_v36 = vadd.f32 1e-05, %v1137_v33  ;;  %v1142_v49 = vadd.f32 1e-05, %v1138_v44  ;;  %v794_v44 = vld [vmem:[#allocation4 + $0x30] sm:$0xff] }
 0x215   :  { %v6867_v62 = vpop.eup %6866 }
 0x216   :  { %6870 = vrsqrt.f32 %v1141_v36  ;;  %v6869_v35 = vpop.eup %6868  ;;  %v1154_v40 = vmul.f32 %v6867_v62, %v1140_v20  ;;  %vm1160_vm0 = vweird.f32 %v6867_v62  ;;  %vm1169_vm4 = vweird.f32 %v1141_v36 }
 0x217   :  { %v1144_v28 = vmul.f32 %v6869_v35, %v1139_v19  ;;  %6872 = vrsqrt.f32 %v1142_v49  ;;  %vm1161_vm3 = vmor %vm1159_vm2, %vm1160_vm0  ;;  %vm1150_vm7 = vweird.f32 %v6869_v35  ;;  %vm1179_vm8 = vweird.f32 %v1142_v49 }
 0x218   :  { %v1155_v47 = vmul.f32 %v6867_v62, %v1154_v40  ;;  %vm1151_vm13 = vmor %vm1149_vm10, %vm1150_vm7  ;;  %v792_v40 = vld [vmem:[#allocation4 + $0x20] sm:$0xff] }
 0x219   :  { %v1145_v61 = vmul.f32 %v6869_v35, %v1144_v28 }
 0x21a   :  { %v1156_v55 = vmul.f32 0.5, %v1155_v47 }
 0x21b   :  { %v1146_v6 = vmul.f32 0.5, %v1145_v61 }
 0x21c   :  { %v6871_v54 = vpop.eup %6870  ;;  %v1157_v63 = vsub.f32 1.5, %v1156_v55  ;;  %v797_v55 = vunpack.c.h.bf16 %v792_v40 }
 0x21d   :  { %v1164_v59 = vmul.f32 %v6871_v54, %v1141_v36  ;;  %v6873_v1 = vpop.eup %6872  ;;  %vm1170_vm1 = vweird.f32 %v6871_v54  ;;  %v1147_v24 = vsub.f32 1.5, %v1146_v6 }
 0x21e   :  { %v1174_v51 = vmul.f32 %v6873_v1, %v1142_v49  ;;  %v1158_v9 = vmul.f32 %v6867_v62, %v1157_v63  ;;  %vm1171_vm5 = vmor %vm1169_vm4, %vm1170_vm1  ;;  %vm1180_vm6 = vweird.f32 %v6873_v1  ;;  %v801_v63 = vunpack.c.h.bf16 %v794_v44 }
 0x21f   :  { %v1165_v46 = vmul.f32 %v6871_v54, %v1164_v59  ;;  %v1148_v12 = vmul.f32 %v6869_v35, %v1147_v24  ;;  %vm1181_vm9 = vmor %vm1179_vm8, %vm1180_vm6 }
 0x220   :  { %v1175_v10 = vmul.f32 %v6873_v1, %v1174_v51  ;;  %v1162_v39 = vsel %vm1161_vm3, %v6867_v62, %v1158_v9 }
 0x221   :  { %v1166_v2 = vmul.f32 0.5, %v1165_v46  ;;  %v1187_v32 = vrot.slane %v1162_v39, 7  ;;  %v1152_v25 = vsel %vm1151_vm13, %v6869_v35, %v1148_v12 }
 0x222   :  { %v1176_v26 = vmul.f32 0.5, %v1175_v10 }
 0x223   :  { %v1167_v56 = vsub.f32 1.5, %v1166_v2  ;;  %v1190_v5 = vsel %vm526_vm11, %v1152_v25, %v1187_v32 }
 0x224   :  { %v1177_v57 = vsub.f32 1.5, %v1176_v26 }
 0x225   :  { %v1168_v11 = vmul.f32 %v6871_v54, %v1167_v56 }
 0x226   :  { %v1178_v13 = vmul.f32 %v6873_v1, %v1177_v57 }
 0x227   :  { %v1172_v52 = vsel %vm1171_vm5, %v6871_v54, %v1168_v11 }
 0x228   :  { %v1188_v58 = vrot.slane %v1172_v52, 6  ;;  %v1182_v3 = vsel %vm1181_vm9, %v6873_v1, %v1178_v13 }
 0x229   :  { %v1189_v0 = vrot.slane %v1182_v3, 5  ;;  %v7804_v3 = vld [vmem:[#allocation4 + $0x38] sm:$0xff] }
 0x22b   :  { %v1191_v17 = vsel %vm528_vm12, %v1188_v58, %v1189_v0 }
 0x22c   :  { %v1192_v20 = vsel %vm530_vm14, %v1190_v5, %v1191_v17 }
 0x22d   :  { %v1194_v22 = vmul.f32 %v7160_v21, %v1192_v20 }
 0x22f   :  { %v1196_v23 = vperm.slane %v1194_v22, 0  ;;  %v1197_v38 = vperm.slane %v1194_v22, 1  ;;  %v1198_v14 = vperm.slane %v1194_v22, 2  ;;  %v1199_v29 = vperm.slane %v1194_v22, 3 }
 0x231   :  { %v1205_v30 = vmul.f32 %v1197_v38, %v7767_v4  ;;  %v1206_v19 = vmul.f32 %v1198_v14, %v7773_v16  ;;  %v1207_v33 = vmul.f32 %v1199_v29, %v7777_v27  ;;  %v1222_v34 = vmul.f32 %v1198_v14, %v7729_v48  ;;  %v7161_v4 = vld [vmem:[#allocation12] sm:$0xf] }
 0x232   :  { %v1204_v36 = vmul.f32 %v1196_v23, %v7765_v42  ;;  %v796_v16 = vunpack.c.l.bf16 %v792_v40  ;;  %v800_v27 = vunpack.c.l.bf16 %v794_v44  ;;  %v1220_v48 = vmul.f32 %v1196_v23, %v7725_v7  ;;  %v5783_v44 = vld [vmem:[#allocation9 + $0xe0] sm:$0xf] }
 0x233   :  { %v1212_v43 = vrot.slane %v1205_v30, 7  ;;  %v1213_v62 = vrot.slane %v1206_v19, 6  ;;  %v1214_v35 = vrot.slane %v1207_v33, 5  ;;  %v1221_v42 = vmul.f32 %v1197_v38, %v7727_v31 }
 0x234   :  { %v1224_v1 = vmul.f32 %v1196_v23, %v7737_v37  ;;  %v1225_v2 = vmul.f32 %v1197_v38, %v7739_v45  ;;  %v1226_v6 = vmul.f32 %v1198_v14, %v7753_v18  ;;  %v7801_v18 = vld [vmem:[#allocation4 + $0x28] sm:$0xff]  ;;  %v1223_v13 = vmul.f32 %v1199_v29, %v7731_v50 }
 0x235   :  { %v1215_v47 = vsel %vm526_vm11, %v1204_v36, %v1212_v43  ;;  %v1216_v49 = vsel %vm528_vm12, %v1213_v62, %v1214_v35  ;;  %v799_v0 = vunpack.c.h.bf16 %v7801_v18  ;;  %v1227_v20 = vmul.f32 %v1199_v29, %v7755_v8 }
 0x236   :  { %v1217_v28 = vsel %vm530_vm14, %v1215_v47, %v1216_v49  ;;  %v803_v23 = vunpack.c.h.bf16 %v7804_v3  ;;  %v6567_v47 = vld [vmem:[#allocation9 + $0xec] sm:$0xf0] }
 0x237   :  { %v1219_v54 = vsub.f32 %v7161_v4, %v1217_v28  ;;  %v6555_v4 = vld [vmem:[#allocation9 + $0x8c] sm:$0xf0] }
 0x239   :  { %v1229_v59 = vperm.slane %v1219_v54, 0  ;;  %v1230_v61 = vperm.slane %v1219_v54, 1  ;;  %v1231_v46 = vperm.slane %v1219_v54, 2  ;;  %v1232_v45 = vperm.slane %v1219_v54, 3 }
 0x23b   :  { %v1237_v51 = vadd.f32 %v1229_v59, %v1220_v48  ;;  %v1238_v56 = vadd.f32 %v1230_v61, %v1221_v42  ;;  %v7797_v9 = vadd.f32 %v1231_v46, %v1222_v34  ;;  %v1241_v10 = vadd.f32 %v1229_v59, %v1224_v1 }
 0x23c   :  { %v1242_v11 = vadd.f32 %v1230_v61, %v1225_v2  ;;  %v7799_v24 = vadd.f32 %v1231_v46, %v1226_v6  ;;  %v1240_v25 = vadd.f32 %v1232_v45, %v1223_v13  ;;  %v1244_v38 = vadd.f32 %v1232_v45, %v1227_v20  ;;  %v5791_v61 = vld [vmem:[#allocation9 + $0xe8] sm:$0xf]  ;;  %v6568_v46 = vld [vmem:[#allocation9 + $0xf4] sm:$0xf0]  ;;  %v6566_v6 = vld [vmem:[#allocation9 + $0xec] sm:$0xf] }
 0x23d   :  { %v1245_v7 = vadd.f32 %v1237_v51, %v796_v16  ;;  %v1246_v31 = vadd.f32 %v1238_v56, %v797_v55  ;;  %v1249_v26 = vadd.f32 %v1241_v10, %v800_v27  ;;  %v6565_v16 = vld [vmem:[#allocation9 + $0xe4] sm:$0xf]  ;;  %v5785_v55 = vld [vmem:[#allocation9 + $0xf0] sm:$0xf0]  ;;  %v5784_v59 = vor.u32 %v6567_v47, %v5783_v44  ;;  %v5793_v51 = vld [vmem:[#allocation9 + $0xf8] sm:$0xf0] }
 0x23e   :  { %v1250_v39 = vadd.f32 %v1242_v11, %v801_v63  ;;  %v1248_v50 = vadd.f32 %v1240_v25, %v799_v0  ;;  %v7819_v29 = vadd.f32 %v1244_v38, %v803_v23  ;;  %v5788_v1 = vor.u32 %v6565_v16, %v5785_v55  ;;  %v6561_v13 = vld [vmem:[#allocation9 + $0xc4] sm:$0xf]  ;;  %v6562_v23 = vld [vmem:[#allocation9 + $0xcc] sm:$0xf]  ;;  %v6547_v44 = vld [vmem:[#allocation9 + $0x4c] sm:$0xf0] }
 0x23f   :  { %v5663_v52 = vmul.f32 -1.442695, %v1245_v7  ;;  %v5665_v57 = vmul.f32 -1.442695, %v1246_v31  ;;  %v5664_v12 = vmul.f32 -1.442695, %v1249_v26  ;;  %v5792_v2 = vor.u32 %v6568_v46, %v5791_v61  ;;  %1652 = vmatpush.bf16.msra.mxu0 %v5784_v59 }
 0x240   :  { %v5666_v37 = vmul.f32 -1.442695, %v1250_v39  ;;  %v5796_v31 = vor.u32 %v6566_v6, %v5793_v51  ;;  %v5767_v26 = vld [vmem:[#allocation9 + $0xc0] sm:$0xf]  ;;  %v6563_v39 = vld [vmem:[#allocation9 + $0xcc] sm:$0xf0]  ;;  %1666 = vmatpush.bf16.msra.mxu1 %v5788_v1 }
 0x241   :  { %6874 = vpow2.f32 %v5663_v52  ;;  %1680 = vmatpush.bf16.msra.mxu2 %v5792_v2  ;;  %v5768_v45 = vor.u32 %v6563_v39, %v5767_v26  ;;  %v5759_v59 = vld [vmem:[#allocation9 + $0xa8] sm:$0xf]  ;;  %v6560_v61 = vld [vmem:[#allocation9 + $0xb4] sm:$0xf0]  ;;  %v6558_v1 = vld [vmem:[#allocation9 + $0xac] sm:$0xf] }
 0x242   :  { %6876 = vpow2.f32 %v5664_v12  ;;  %1694 = vmatpush.bf16.msra.mxu3 %v5796_v31  ;;  %v5735_v2 = vld [vmem:[#allocation9 + $0x80] sm:$0xf]  ;;  %v5760_v10 = vor.u32 %v6560_v61, %v5759_v59 }
 0x243   :  { %6878 = vpow2.f32 %v5665_v57  ;;  %1653 = vmatpush.bf16.msra.mxu0 %v5768_v45  ;;  %v5736_v39 = vor.u32 %v6555_v4, %v5735_v2  ;;  %v6554_v45 = vld [vmem:[#allocation9 + $0x8c] sm:$0xf]  ;;  %v5695_v4 = vld [vmem:[#allocation9 + $0x28] sm:$0xf] }
 0x244   :  { %6880 = vpow2.f32 %v5666_v37 }
 0x247   :  { %v6875_v32 = vpop.eup %6874 }
 0x248   :  { %v6877_v58 = vpop.eup %6876  ;;  %v1259_v5 = vadd.f32 1.0, %v6875_v32  ;;  %v5769_v32 = vld [vmem:[#allocation9 + $0xd0] sm:$0xf0] }
 0x249   :  { %v6879_v17 = vpop.eup %6878  ;;  %v7808_v21 = vadd.f32 1.0, %v6877_v58  ;;  %v5775_v58 = vld [vmem:[#allocation9 + $0xc8] sm:$0xf]  ;;  %v5772_v20 = vor.u32 %v6561_v13, %v5769_v32  ;;  %v5745_v32 = vld [vmem:[#allocation9 + $0x98] sm:$0xf0] }
 0x24a   :  { %v6881_v22 = vpop.eup %6880  ;;  %6882 = vrcp.f32 %v1259_v5  ;;  %v1272_v14 = vand.u32 2147483648, %v1259_v5  ;;  %v7813_v19 = vadd.f32 1.0, %v6879_v17  ;;  %v1270_v34 = vand.u32 2147483647, %v1259_v5 }
 0x24b   :  { %6884 = vrcp.f32 %v7808_v21  ;;  %v1287_v30 = vand.u32 2147483648, %v7808_v21  ;;  %v7815_v33 = vadd.f32 1.0, %v6881_v22  ;;  %v1285_v8 = vand.u32 2147483647, %v7808_v21  ;;  %v6564_v22 = vld [vmem:[#allocation9 + $0xd4] sm:$0xf0]  ;;  %1667 = vmatpush.bf16.msra.mxu1 %v5772_v20 }
 0x24c   :  { %6886 = vrcp.f32 %v7813_v19  ;;  %v7821_v36 = vor.u32 1.1754944e-38, %v1272_v14  ;;  %v1312_v43 = vand.u32 2147483647, %v7813_v19  ;;  %vm1266_vm15 = vweird.f32 %v1259_v5 }
 0x24d   :  { %6888 = vrcp.f32 %v7815_v33  ;;  %v7827_v35 = vor.u32 1.1754944e-38, %v1287_v30  ;;  %v1314_v40 = vand.u32 2147483648, %v7813_v19  ;;  %vm7834_vm1 = vcmp.eq.f32.partialorder %v1270_v34, 8.507059e+37  ;;  %v5777_v34 = vld [vmem:[#allocation9 + $0xd8] sm:$0xf0] }
 0x24e   :  { %6890 = vtanh.f32 %v1248_v50  ;;  %vm1281_vm2 = vweird.f32 %v7808_v21  ;;  %v1327_v54 = vand.u32 2147483647, %v7815_v33  ;;  %vm7842_vm3 = vcmp.eq.f32.partialorder %v1285_v8, 8.507059e+37  ;;  %v5751_v8 = vld [vmem:[#allocation9 + $0xa0] sm:$0xf] }
 0x24f   :  { %vm1308_vm4 = vweird.f32 %v7813_v19  ;;  %v1329_v42 = vand.u32 2147483648, %v7815_v33  ;;  %v7858_v7 = vor.u32 1.1754944e-38, %v1314_v40  ;;  %vm1323_vm7 = vweird.f32 %v7815_v33 }
 0x250   :  { %v7825_v62 = vpop.eup %6882  ;;  %vm7867_vm9 = vcmp.eq.f32.partialorder %v1312_v43, 8.507059e+37  ;;  %v5776_v30 = vor.u32 %v6564_v22, %v5775_v58  ;;  %v5780_v47 = vor.u32 %v6562_v23, %v5777_v34  ;;  %6892 = vtanh.f32 %v7819_v29  ;;  %v5761_v29 = vld [vmem:[#allocation9 + $0xb8] sm:$0xf0]  ;;  %v5719_v58 = vld [vmem:[#allocation9 + $0x60] sm:$0xf] }
 0x251   :  { %v7830_v49 = vpop.eup %6884  ;;  %v1262_v28 = vmul.f32 %v7825_v62, %v1259_v5  ;;  %vm1267_vm0 = vweird.f32 %v7825_v62  ;;  %v5764_v26 = vor.u32 %v6558_v1, %v5761_v29  ;;  %v5748_v20 = vor.u32 %v6554_v45, %v5745_v32  ;;  %v5721_v22 = vld [vmem:[#allocation9 + $0x70] sm:$0xf0]  ;;  %v5727_v23 = vld [vmem:[#allocation9 + $0x68] sm:$0xf]  ;;  %v5729_v34 = vld [vmem:[#allocation9 + $0x78] sm:$0xf0] }
 0x252   :  { %v1277_v27 = vmul.f32 %v7830_v49, %v7808_v21  ;;  %vm1282_vm5 = vweird.f32 %v7830_v49  ;;  %v7849_v56 = vpop.eup %6886  ;;  %vm7854_vm6 = vmor %vm1266_vm15, %vm1267_vm0  ;;  %vm7894_vm0 = vcmp.eq.f32.partialorder %v1327_v54, 8.507059e+37  ;;  %v6557_v54 = vld [vmem:[#allocation9 + $0xa4] sm:$0xf]  ;;  %1681 = vmatpush.bf16.msra.mxu2 %v5776_v30  ;;  %1695 = vmatpush.bf16.msra.mxu3 %v5780_v47  ;;  %v6550_v30 = vld [vmem:[#allocation9 + $0x6c] sm:$0xf] }
 0x253   :  { %v1263_v63 = vsub.f32 1.0, %v1262_v28  ;;  %v7861_v52 = vpop.eup %6888  ;;  %v1304_v12 = vmul.f32 %v7849_v56, %v7813_v19  ;;  %vm1309_vm8 = vweird.f32 %v7849_v56  ;;  %vm7878_vm10 = vmor %vm1281_vm2, %vm1282_vm5  ;;  %v1330_v19 = vor.u32 1.1754944e-38, %v1329_v42  ;;  %v6559_v28 = vld [vmem:[#allocation9 + $0xac] sm:$0xf0]  ;;  %v6545_v47 = vld [vmem:[#allocation9 + $0x44] sm:$0xf] }
 0x254   :  { %v1278_v11 = vsub.f32 1.0, %v1277_v27  ;;  %v7871_v0 = vpop.eup %6890  ;;  %v1319_v17 = vmul.f32 %v7861_v52, %v7815_v33  ;;  %vm1324_vm13 = vweird.f32 %v7861_v52  ;;  %vm7890_vm15 = vmor %vm1308_vm4, %vm1309_vm8  ;;  %v5752_v33 = vor.u32 %v6559_v28, %v5751_v8  ;;  %v5753_v27 = vld [vmem:[#allocation9 + $0xb0] sm:$0xf0]  ;;  %v6541_v1 = vld [vmem:[#allocation9 + $0x24] sm:$0xf] }
 0x255   :  { %v1264_v57 = vmul.f32 %v7825_v62, %v1263_v63  ;;  %v1305_v14 = vsub.f32 1.0, %v1304_v12  ;;  %vm7901_vm2 = vmor %vm1323_vm7, %vm1324_vm13  ;;  %v5756_v63 = vor.u32 %v6557_v54, %v5753_v27  ;;  %v6556_v12 = vld [vmem:[#allocation9 + $0x94] sm:$0xf0]  ;;  %v5732_v50 = vor.u32 %v6550_v30, %v5729_v34  ;;  %v5711_v54 = vld [vmem:[#allocation9 + $0x48] sm:$0xf] }
 0x256   :  { %v1279_v25 = vmul.f32 %v7830_v49, %v1278_v11  ;;  %v1320_v40 = vsub.f32 1.0, %v1319_v17  ;;  %v5737_v11 = vld [vmem:[#allocation9 + $0x90] sm:$0xf0]  ;;  %1654 = vmatpush.bf16.msra.mxu0 %v5752_v33  ;;  %1682 = vmatpush.bf16.msra.mxu2 %v5760_v10  ;;  %v5713_v33 = vld [vmem:[#allocation9 + $0x58] sm:$0xf0] }
 0x257   :  { %v1265_v38 = vadd.f32 %v7825_v62, %v1264_v57  ;;  %v1306_v55 = vmul.f32 %v7849_v56, %v1305_v14  ;;  %v5743_v57 = vld [vmem:[#allocation9 + $0x88] sm:$0xf]  ;;  %1668 = vmatpush.bf16.msra.mxu1 %v5756_v63  ;;  %1696 = vmatpush.bf16.msra.mxu3 %v5764_v26  ;;  %v6543_v63 = vld [vmem:[#allocation9 + $0x2c] sm:$0xf0]  ;;  %v5689_v10 = vld [vmem:[#allocation9 + $0x30] sm:$0xf0] }
 0x258   :  { %v1280_v43 = vadd.f32 %v7830_v49, %v1279_v25  ;;  %v5744_v13 = vor.u32 %v6556_v12, %v5743_v57  ;;  %v6551_v25 = vld [vmem:[#allocation9 + $0x6c] sm:$0xf0]  ;;  %v5671_v57 = vld [vmem:[#allocation9] sm:$0xf]  ;;  %v5692_v12 = vor.u32 %v6541_v1, %v5689_v10 }
 0x259   :  { %v1269_v16 = vsel %vm7854_vm6, %v7825_v62, %v1265_v38  ;;  %v1321_v62 = vmul.f32 %v7861_v52, %v1320_v40  ;;  %v1307_v51 = vadd.f32 %v7849_v56, %v1306_v55  ;;  %v6893_v38 = vpop.eup %6892  ;;  %v5703_v40 = vld [vmem:[#allocation9 + $0x40] sm:$0xf]  ;;  %v6546_v55 = vld [vmem:[#allocation9 + $0x4c] sm:$0xf] }
 0x25a   :  { %v1274_v42 = vsel %vm7834_vm1, %v7821_v36, %v1269_v16  ;;  %v1284_v46 = vsel %vm7878_vm10, %v7830_v49, %v1280_v43  ;;  %v6553_v36 = vld [vmem:[#allocation9 + $0x84] sm:$0xf]  ;;  %1655 = vmatpush.bf16.msra.mxu0 %v5736_v39  ;;  %1683 = vmatpush.bf16.msra.mxu2 %v5744_v13  ;;  %v5704_v59 = vor.u32 %v6547_v44, %v5703_v40  ;;  %v5673_v13 = vld [vmem:[#allocation9 + $0x10] sm:$0xf0] }
 0x25b   :  { %v1289_v6 = vsel %vm7842_vm3, %v7827_v35, %v1284_v46  ;;  %v1293_v31 = vmul.f32 %v1274_v42, %v7698_v60  ;;  %v1322_v49 = vadd.f32 %v7861_v52, %v1321_v62  ;;  %v1311_v35 = vsel %vm7890_vm15, %v7849_v56, %v1307_v51  ;;  %v6549_v56 = vld [vmem:[#allocation9 + $0x64] sm:$0xf]  ;;  %1697 = vmatpush.bf16.msra.mxu3 %v5748_v20  ;;  %v5687_v62 = vld [vmem:[#allocation9 + $0x20] sm:$0xf]  ;;  %v6538_v20 = vld [vmem:[#allocation9 + $0xc] sm:$0xf] }
 0x25c   :  { %v5740_v48 = vor.u32 %v6553_v36, %v5737_v11  ;;  %v1294_v60 = vmul.f32 %v1289_v6, %v7701_v41  ;;  %v1316_v5 = vsel %vm7867_vm9, %v7858_v7, %v1311_v35  ;;  %v6552_v41 = vld [vmem:[#allocation9 + $0x74] sm:$0xf0]  ;;  %v5720_v7 = vor.u32 %v6551_v25, %v5719_v58  ;;  %v6542_v11 = vld [vmem:[#allocation9 + $0x2c] sm:$0xf]  ;;  %v6539_v35 = vld [vmem:[#allocation9 + $0xc] sm:$0xf0] }
 0x25d   :  { %v1326_v17 = vsel %vm7901_vm2, %v7861_v52, %v1322_v49  ;;  %v1335_v21 = vmul.f32 %v7871_v0, %v1316_v5  ;;  %v5724_v52 = vor.u32 %v6549_v56, %v5721_v22  ;;  %v5728_v43 = vor.u32 %v6552_v41, %v5727_v23  ;;  %v6548_v0 = vld [vmem:[#allocation9 + $0x54] sm:$0xf0]  ;;  %v5681_v56 = vld [vmem:[#allocation9 + $0x18] sm:$0xf0] }
 0x25e   :  { %v1331_v14 = vsel %vm7894_vm0, %v1330_v19, %v1326_v17  ;;  %1669 = vmatpush.bf16.msra.mxu1 %v5740_v48  ;;  %v5705_v19 = vld [vmem:[#allocation9 + $0x50] sm:$0xf0]  ;;  %1656 = vmatpush.bf16.msra.mxu0 %v5720_v7  ;;  %v5712_v46 = vor.u32 %v6548_v0, %v5711_v54  ;;  %v5716_v51 = vor.u32 %v6546_v55, %v5713_v33  ;;  %v6544_v36 = vld [vmem:[#allocation9 + $0x34] sm:$0xf0]  ;;  %v6537_v48 = vld [vmem:[#allocation9 + $0x4] sm:$0xf]  ;;  %v798_v17 = vunpack.c.l.bf16 %v7801_v18 }
 0x25f   :  { %v1336_v37 = vmul.f32 %v6893_v38, %v1331_v14  ;;  %v1337_v8 = vadd.f32 %v1335_v21, %v1293_v31  ;;  %1684 = vmatpush.bf16.msra.mxu2 %v5728_v43  ;;  %v5708_v42 = vor.u32 %v6545_v47, %v5705_v19  ;;  %1698 = vmatpush.bf16.msra.mxu3 %v5732_v50  ;;  %v5697_v31 = vld [vmem:[#allocation9 + $0x38] sm:$0xf0]  ;;  %v6540_v5 = vld [vmem:[#allocation9 + $0x14] sm:$0xf0]  ;;  %v802_v22 = vunpack.c.l.bf16 %v7804_v3 }
 0x260   :  { %v5688_v39 = vor.u32 %v6543_v63, %v5687_v62  ;;  %v5696_v45 = vor.u32 %v6544_v36, %v5695_v4  ;;  %v5700_v25 = vor.u32 %v6542_v11, %v5697_v31  ;;  %v5672_v38 = vor.u32 %v6539_v35, %v5671_v57  ;;  %v7162_v4 = vld [vmem:[%s9315_s6] sm:$0x1] }
 0x261   :  { %v1338_v28 = vadd.f32 %v1336_v37, %v1294_v60  ;;  %v7937_v16 = vmul.f32 %v1337_v8, %v7645_v53  ;;  %v5679_v60 = vld [vmem:[#allocation9 + $0x8] sm:$0xf]  ;;  %v5676_v21 = vor.u32 %v6537_v48, %v5673_v13  ;;  %v5684_v34 = vor.u32 %v6538_v20, %v5681_v56 }
 0x262   :  { %1670 = vmatpush.bf16.msra.mxu1 %v5724_v52  ;;  %1657 = vmatpush.bf16.msra.mxu0 %v5704_v59  ;;  %v5680_v41 = vor.u32 %v6540_v5, %v5679_v60  ;;  %v1247_v7 = vadd.f32 %v7797_v9, %v798_v17  ;;  %v1251_v18 = vadd.f32 %v7799_v24, %v802_v22 }
 0x263   :  { %v7940_v27 = vmul.f32 %v1338_v28, %v7695_v15  ;;  %v1349_v61 = vmul.f32 %v7937_v16, %v7937_v16  ;;  %1685 = vmatpush.bf16.msra.mxu2 %v5712_v46  ;;  %1699 = vmatpush.bf16.msra.mxu3 %v5716_v51 }
 0x264   :  { %v5667_v40 = vmul.f32 -1.442695, %v1247_v7  ;;  %v5668_v44 = vmul.f32 -1.442695, %v1251_v18 }
 0x265   :  { %v1341_v29 = vadd.f32 %v7940_v27, %v7937_v16  ;;  %v1350_v2 = vmul.f32 %v7940_v27, %v7940_v27  ;;  %v6747_v6 = vpack.c.bf16 %v7940_v27, %v7937_v16 }
 0x266   :  { %1671 = vmatpush.bf16.msra.mxu1 %v5708_v42  ;;  %1658 = vmatpush.bf16.msra.mxu0 %v5688_v39  ;;  %6894 = vpow2.f32 %v5667_v40  ;;  %v7163_v39 = vld [vmem:[%s9316_s7] sm:$0x1] }
 0x267   :  { %v1342_v49 = vrot.slane %v1341_v29, 4  ;;  %v1351_v26 = vadd.f32 %v1350_v2, %v1349_v61  ;;  %6748 = vst [vmem:[#allocation14 + $0x8] sm:$0xff] %v6747_v6   ;;  %1686 = vmatpush.bf16.msra.mxu2 %v5696_v45  ;;  %1700 = vmatpush.bf16.msra.mxu3 %v5700_v25  ;;  %6896 = vpow2.f32 %v5668_v44 }
 0x269   :  { %v1343_v32 = vadd.f32 %v1342_v49, %v1341_v29  ;;  %v1352_v58 = vrot.slane %v1351_v26, 4 }
 0x26a   :  { %1672 = vmatpush.bf16.msra.mxu1 %v5692_v12  ;;  %1659 = vmatpush.bf16.msra.mxu0 %v5672_v38 }
 0x26b   :  { %v1353_v23 = vadd.f32 %v1352_v58, %v1351_v26  ;;  %v1344_v14 = vrot.slane %v1343_v32, 2  ;;  %1687 = vmatpush.bf16.msra.mxu2 %v5680_v41  ;;  %1701 = vmatpush.bf16.msra.mxu3 %v5684_v34 }
 0x26c   :  { %v6895_v24 = vpop.eup %6894 }
 0x26d   :  { %v1354_v30 = vrot.slane %v1353_v23, 2  ;;  %v1345_v37 = vadd.f32 %v1344_v14, %v1343_v32  ;;  %v6897_v55 = vpop.eup %6896  ;;  %v1392_v33 = vadd.f32 1.0, %v6895_v24 }
 0x26e   :  { %1673 = vmatpush.bf16.msra.mxu1 %v5676_v21  ;;  %v1393_v59 = vadd.f32 1.0, %v6897_v55 }
 0x26f   :  { %v1355_v8 = vadd.f32 %v1354_v30, %v1353_v23  ;;  %v1346_v52 = vrot.slane %v1345_v37, 1  ;;  %v1405_v60 = vand.u32 2147483648, %v1392_v33  ;;  %vm1399_vm7 = vweird.f32 %v1392_v33 }
 0x270   :  { %v1403_v17 = vand.u32 2147483647, %v1392_v33  ;;  %v1420_v20 = vand.u32 2147483648, %v1393_v59  ;;  %vm1414_vm9 = vweird.f32 %v1393_v59  ;;  %v1418_v56 = vand.u32 2147483647, %v1393_v59 }
 0x271   :  { %v1347_v3 = vadd.f32 %v1346_v52, %v1345_v37  ;;  %v1356_v43 = vrot.slane %v1355_v8, 1  ;;  %v1406_v23 = vor.u32 1.1754944e-38, %v1405_v60 }
 0x272   :  { %vm1404_vm13 = vcmp.eq.f32.partialorder %v1403_v17, 8.507059e+37  ;;  %v1421_v14 = vor.u32 1.1754944e-38, %v1420_v20  ;;  %vm1419_vm15 = vcmp.eq.f32.partialorder %v1418_v56, 8.507059e+37 }
 0x273   :  { %v1348_v47 = vmul.f32 0.5, %v1347_v3  ;;  %v1357_v28 = vadd.f32 %v1356_v43, %v1355_v8 }
 0x275   :  { %v1358_v50 = vmul.f32 0.5, %v1357_v28  ;;  %v1359_v19 = vmul.f32 %v1348_v47, %v1348_v47 }
 0x277   :  { %v1360_v54 = vsub.f32 %v1358_v50, %v1359_v19 }
 0x279   :  { %v1361_v9 = vmax.f32 %v1360_v54, 0.0 }
 0x27b   :  { %v1362_v0 = vadd.f32 1e-05, %v1361_v9 }
 0x27d   :  { %6898 = vrsqrt.f32 %v1362_v0  ;;  %vm1369_vm3 = vweird.f32 %v1362_v0 }
 0x27e   :  { %6900 = vrcp.f32 %v1392_v33 }
 0x27f   :  { %6902 = vrcp.f32 %v1393_v59 }
 0x283   :  { %v6899_v61 = vpop.eup %6898 }
 0x284   :  { %v1364_v42 = vmul.f32 %v6899_v61, %v1362_v0  ;;  %v6901_v63 = vpop.eup %6900  ;;  %vm1370_vm1 = vweird.f32 %v6899_v61 }
 0x285   :  { %v6903_v1 = vpop.eup %6902  ;;  %v1395_v6 = vmul.f32 %v6901_v63, %v1392_v33  ;;  %vm1371_vm4 = vmor %vm1369_vm3, %vm1370_vm1  ;;  %vm1400_vm5 = vweird.f32 %v6901_v63 }
 0x286   :  { %v1365_v46 = vmul.f32 %v6899_v61, %v1364_v42  ;;  %v1410_v51 = vmul.f32 %v6903_v1, %v1393_v59  ;;  %vm1415_vm6 = vweird.f32 %v6903_v1  ;;  %vm1401_vm8 = vmor %vm1399_vm7, %vm1400_vm5 }
 0x287   :  { %v1396_v11 = vsub.f32 1.0, %v1395_v6  ;;  %vm1416_vm10 = vmor %vm1414_vm9, %vm1415_vm6 }
 0x288   :  { %v1366_v62 = vmul.f32 0.5, %v1365_v46  ;;  %v1411_v26 = vsub.f32 1.0, %v1410_v51 }
 0x289   :  { %v1397_v12 = vmul.f32 %v6901_v63, %v1396_v11 }
 0x28a   :  { %v1367_v29 = vsub.f32 1.5, %v1366_v62  ;;  %v1412_v13 = vmul.f32 %v6903_v1, %v1411_v26 }
 0x28b   :  { %v1398_v25 = vadd.f32 %v6901_v63, %v1397_v12 }
 0x28c   :  { %v1368_v2 = vmul.f32 %v6899_v61, %v1367_v29  ;;  %v1413_v5 = vadd.f32 %v6903_v1, %v1412_v13 }
 0x28d   :  { %v1402_v22 = vsel %vm1401_vm8, %v6901_v63, %v1398_v25 }
 0x28e   :  { %v1372_v10 = vsel %vm1371_vm4, %v6899_v61, %v1368_v2  ;;  %v1417_v38 = vsel %vm1416_vm10, %v6903_v1, %v1413_v5  ;;  %v1407_v41 = vsel %vm1404_vm13, %v1406_v23, %v1402_v22 }
 0x28f   :  { %v1373_v36 = vmul.f32 %v7162_v4, %v1372_v10  ;;  %v1422_v34 = vsel %vm1419_vm15, %v1421_v14, %v1417_v38 }
 0x291   :  { %v1374_v31 = vmul.f32 %v1373_v36, %v1348_v47  ;;  %v1377_v49 = vperm.slane %v1373_v36, 0 }
 0x293   :  { %v1375_v57 = vsub.f32 %v7163_v39, %v1374_v31  ;;  %v1379_v45 = vmul.f32 %v1377_v49, %v7937_v16  ;;  %v1380_v35 = vmul.f32 %v1377_v49, %v7940_v27 }
 0x295   :  { %v1382_v48 = vperm.slane %v1375_v57, 0 }
 0x297   :  { %v1384_v32 = vadd.f32 %v1382_v48, %v1379_v45  ;;  %v1385_v58 = vadd.f32 %v1382_v48, %v1380_v35 }
 0x299   :  { %6904 = vtanh.f32 %v1384_v32 }
 0x29a   :  { %6906 = vtanh.f32 %v1385_v58 }
 0x29f   :  { %v6905_v21 = vpop.eup %6904 }
 0x2a0   :  { %v6907_v30 = vpop.eup %6906  ;;  %v1426_v37 = vmul.f32 %v6905_v21, %v1407_v41 }
 0x2a1   :  { %v1427_v7 = vmul.f32 %v6907_v30, %v1422_v34 }
 0x2a2   :  { %v1428_v18 = vmul.f32 %v1426_v37, %v7645_v53 }
 0x2a3   :  { %v1429_v8 = vmul.f32 %v1427_v7, %v7695_v15 }
 0x2a5   :  { %v6742_v52 = vpack.c.bf16 %v1429_v8, %v1428_v18 }
 0x2a7   :  { %6743 = vst [vmem:[#allocation13 + $0x8] sm:$0xff] %v6742_v52   ;;  %1660 = vmatmul.bf16.vlgmr.msra.gmra.mxu0 %v6742_v52  ;;  %1674 = vmatmul.bf16.vlgmr.msra.gmra.mxu1 %v6742_v52 }
 0x2a8   :  { %1688 = vmatmul.bf16.vlgmr.msra.gmra.mxu2 %v6742_v52  ;;  %1702 = vmatmul.bf16.vlgmr.msra.gmra.mxu3 %v6742_v52 }
 0x324   :  { %v7964_v3 = vpop.f32.mrf.mxu0  ;;  %v7966_v43 = vpop.f32.mrf.mxu1 }
 0x325   :  { %v1740_v47 = vmul.f32 %v7964_v3, %v7964_v3  ;;  %v1741_v28 = vmul.f32 %v7966_v43, %v7966_v43 }
 0x32b   :  { %v7968_v40 = vpop.f32.mrf.mxu2  ;;  %v7970_v44 = vpop.f32.mrf.mxu3 }
 0x32c   :  { %v7976_v50 = vpop.f32.mrf.mxu0  ;;  %v7978_v19 = vpop.f32.mrf.mxu1  ;;  %v1742_v1 = vmul.f32 %v7968_v40, %v7968_v40  ;;  %v1743_v29 = vmul.f32 %v7970_v44, %v7970_v44 }
 0x32d   :  { %v1708_v54 = vadd.f32 %v7976_v50, %v7964_v3  ;;  %v1744_v9 = vmul.f32 %v7976_v50, %v7976_v50  ;;  %v1715_v0 = vadd.f32 %v7978_v19, %v7966_v43  ;;  %v1745_v24 = vmul.f32 %v7978_v19, %v7978_v19 }
 0x32f   :  { %v1709_v55 = vrot.slane %v1708_v54, 4  ;;  %v1748_v33 = vadd.f32 %v1744_v9, %v1740_v47  ;;  %v1716_v59 = vrot.slane %v1715_v0, 4  ;;  %v1755_v61 = vadd.f32 %v1745_v24, %v1741_v28 }
 0x331   :  { %v1710_v42 = vadd.f32 %v1709_v55, %v1708_v54  ;;  %v1749_v46 = vrot.slane %v1748_v33, 4  ;;  %v1717_v62 = vadd.f32 %v1716_v59, %v1715_v0  ;;  %v1756_v63 = vrot.slane %v1755_v61, 4 }
 0x333   :  { %v1711_v2 = vrot.slane %v1710_v42, 2  ;;  %v1750_v6 = vadd.f32 %v1749_v46, %v1748_v33  ;;  %v1718_v51 = vrot.slane %v1717_v62, 2  ;;  %v1757_v10 = vadd.f32 %v1756_v63, %v1755_v61  ;;  %v7992_v4 = vpop.f32.mrf.mxu2  ;;  %v7994_v36 = vpop.f32.mrf.mxu3 }
 0x334   :  { %v1722_v11 = vadd.f32 %v7992_v4, %v7968_v40  ;;  %v1746_v31 = vmul.f32 %v7992_v4, %v7992_v4  ;;  %v1729_v49 = vadd.f32 %v7994_v36, %v7970_v44  ;;  %v1747_v26 = vmul.f32 %v7994_v36, %v7994_v36 }
 0x335   :  { %v1712_v39 = vadd.f32 %v1711_v2, %v1710_v42  ;;  %v1751_v57 = vrot.slane %v1750_v6, 2  ;;  %v1719_v12 = vadd.f32 %v1718_v51, %v1717_v62  ;;  %v1758_v45 = vrot.slane %v1757_v10, 2 }
 0x336   :  { %v1723_v35 = vrot.slane %v1722_v11, 4  ;;  %v1762_v48 = vadd.f32 %v1746_v31, %v1742_v1  ;;  %v1730_v13 = vrot.slane %v1729_v49, 4  ;;  %v1769_v32 = vadd.f32 %v1747_v26, %v1743_v29 }
 0x337   :  { %v1713_v58 = vrot.slane %v1712_v39, 1  ;;  %v1752_v25 = vadd.f32 %v1751_v57, %v1750_v6  ;;  %v1720_v60 = vrot.slane %v1719_v12, 1  ;;  %v1759_v5 = vadd.f32 %v1758_v45, %v1757_v10 }
 0x338   :  { %v1724_v17 = vadd.f32 %v1723_v35, %v1722_v11  ;;  %v1763_v20 = vrot.slane %v1762_v48, 4  ;;  %v1731_v56 = vadd.f32 %v1730_v13, %v1729_v49  ;;  %v1770_v22 = vrot.slane %v1769_v32, 4 }
 0x339   :  { %v1714_v23 = vadd.f32 %v1713_v58, %v1712_v39  ;;  %v1753_v38 = vrot.slane %v1752_v25, 1  ;;  %v1721_v14 = vadd.f32 %v1720_v60, %v1719_v12  ;;  %v1760_v21 = vrot.slane %v1759_v5, 1 }
 0x33a   :  { %v1725_v41 = vrot.slane %v1724_v17, 2  ;;  %v1764_v30 = vadd.f32 %v1763_v20, %v1762_v48  ;;  %v1732_v34 = vrot.slane %v1731_v56, 2  ;;  %v1771_v37 = vadd.f32 %v1770_v22, %v1769_v32 }
 0x33b   :  { %v8004_v7 = vmul.f32 0.5, %v1714_v23  ;;  %v1754_v18 = vadd.f32 %v1753_v38, %v1752_v25  ;;  %v8006_v8 = vmul.f32 0.5, %v1721_v14  ;;  %v1761_v52 = vadd.f32 %v1760_v21, %v1759_v5 }
 0x33c   :  { %v1726_v47 = vadd.f32 %v1725_v41, %v1724_v17  ;;  %v1765_v28 = vrot.slane %v1764_v30, 2  ;;  %v1733_v54 = vadd.f32 %v1732_v34, %v1731_v56  ;;  %v1772_v9 = vrot.slane %v1771_v37, 2 }
 0x33d   :  { %v1776_v0 = vmul.f32 0.5, %v1754_v18  ;;  %v1780_v24 = vmul.f32 %v8004_v7, %v8004_v7  ;;  %v1777_v55 = vmul.f32 0.5, %v1761_v52  ;;  %v1781_v33 = vmul.f32 %v8006_v8, %v8006_v8 }
 0x33e   :  { %v1727_v59 = vrot.slane %v1726_v47, 1  ;;  %v1766_v61 = vadd.f32 %v1765_v28, %v1764_v30  ;;  %v1734_v62 = vrot.slane %v1733_v54, 1  ;;  %v1773_v63 = vadd.f32 %v1772_v9, %v1771_v37 }
 0x33f   :  { %v1784_v42 = vsub.f32 %v1776_v0, %v1780_v24  ;;  %v1785_v46 = vsub.f32 %v1777_v55, %v1781_v33 }
 0x340   :  { %v1728_v1 = vadd.f32 %v1727_v59, %v1726_v47  ;;  %v1767_v29 = vrot.slane %v1766_v61, 1  ;;  %v1735_v49 = vadd.f32 %v1734_v62, %v1733_v54  ;;  %v1774_v26 = vrot.slane %v1773_v63, 1 }
 0x341   :  { %v1788_v2 = vmax.f32 %v1784_v42, 0.0  ;;  %v1789_v6 = vmax.f32 %v1785_v46, 0.0 }
 0x342   :  { %v8012_v51 = vmul.f32 0.5, %v1728_v1  ;;  %v1768_v10 = vadd.f32 %v1767_v29, %v1766_v61  ;;  %v8016_v12 = vmul.f32 0.5, %v1735_v49  ;;  %v1775_v35 = vadd.f32 %v1774_v26, %v1773_v63  ;;  %v7164_v49 = vld [vmem:[#allocation10] sm:$0xf] }
 0x343   :  { %v1792_v11 = vadd.f32 1e-05, %v1788_v2  ;;  %v1793_v31 = vadd.f32 1e-05, %v1789_v6 }
 0x344   :  { %v1778_v39 = vmul.f32 0.5, %v1768_v10  ;;  %v1782_v57 = vmul.f32 %v8012_v51, %v8012_v51  ;;  %v1783_v48 = vmul.f32 %v8016_v12, %v8016_v12  ;;  %v1779_v32 = vmul.f32 0.5, %v1775_v35 }
 0x345   :  { %6908 = vrsqrt.f32 %v1793_v31  ;;  %vm1812_vm1 = vweird.f32 %v1793_v31  ;;  %vm1802_vm10 = vweird.f32 %v1792_v11 }
 0x346   :  { %v1786_v45 = vsub.f32 %v1778_v39, %v1782_v57  ;;  %6910 = vrsqrt.f32 %v1792_v11  ;;  %v1787_v25 = vsub.f32 %v1779_v32, %v1783_v48 }
 0x348   :  { %v1790_v13 = vmax.f32 %v1786_v45, 0.0  ;;  %v1791_v20 = vmax.f32 %v1787_v25, 0.0 }
 0x34a   :  { %v1794_v58 = vadd.f32 1e-05, %v1790_v13  ;;  %v1795_v22 = vadd.f32 1e-05, %v1791_v20  ;;  %v1447_v20 = vld [vmem:[#allocation4 + $0x50] sm:$0xff] }
 0x34b   :  { %v6909_v60 = vpop.eup %6908 }
 0x34c   :  { %6912 = vrsqrt.f32 %v1794_v58  ;;  %v6911_v5 = vpop.eup %6910  ;;  %v1807_v17 = vmul.f32 %v6909_v60, %v1793_v31  ;;  %vm1813_vm0 = vweird.f32 %v6909_v60  ;;  %vm1822_vm4 = vweird.f32 %v1794_v58 }
 0x34d   :  { %v1797_v23 = vmul.f32 %v6911_v5, %v1792_v11  ;;  %6914 = vrsqrt.f32 %v1795_v22  ;;  %vm1814_vm3 = vmor %vm1812_vm1, %vm1813_vm0  ;;  %vm1803_vm7 = vweird.f32 %v6911_v5  ;;  %vm1832_vm8 = vweird.f32 %v1795_v22 }
 0x34e   :  { %v1808_v56 = vmul.f32 %v6909_v60, %v1807_v17  ;;  %vm1804_vm13 = vmor %vm1802_vm10, %vm1803_vm7  ;;  %v1445_v17 = vld [vmem:[#allocation4 + $0x40] sm:$0xff] }
 0x34f   :  { %v1798_v41 = vmul.f32 %v6911_v5, %v1797_v23 }
 0x350   :  { %v1809_v14 = vmul.f32 0.5, %v1808_v56 }
 0x351   :  { %v1799_v52 = vmul.f32 0.5, %v1798_v41 }
 0x352   :  { %v6913_v38 = vpop.eup %6912  ;;  %v1810_v34 = vsub.f32 1.5, %v1809_v14  ;;  %v1450_v14 = vunpack.c.h.bf16 %v1445_v17 }
 0x353   :  { %v1817_v21 = vmul.f32 %v6913_v38, %v1794_v58  ;;  %v6915_v37 = vpop.eup %6914  ;;  %vm1823_vm2 = vweird.f32 %v6913_v38  ;;  %v1800_v24 = vsub.f32 1.5, %v1799_v52 }
 0x354   :  { %v1827_v47 = vmul.f32 %v6915_v37, %v1795_v22  ;;  %v1811_v54 = vmul.f32 %v6909_v60, %v1810_v34  ;;  %vm1824_vm5 = vmor %vm1822_vm4, %vm1823_vm2  ;;  %vm1833_vm6 = vweird.f32 %v6915_v37  ;;  %v1454_v34 = vunpack.c.h.bf16 %v1447_v20 }
 0x355   :  { %v1818_v30 = vmul.f32 %v6913_v38, %v1817_v21  ;;  %v1801_v42 = vmul.f32 %v6911_v5, %v1800_v24  ;;  %vm1834_vm9 = vmor %vm1832_vm8, %vm1833_vm6 }
 0x356   :  { %v1828_v9 = vmul.f32 %v6915_v37, %v1827_v47  ;;  %v1815_v33 = vsel %vm1814_vm3, %v6909_v60, %v1811_v54 }
 0x357   :  { %v1819_v18 = vmul.f32 0.5, %v1818_v30  ;;  %v1840_v62 = vrot.slane %v1815_v33, 7  ;;  %v1805_v2 = vsel %vm1804_vm13, %v6911_v5, %v1801_v42 }
 0x358   :  { %v1829_v55 = vmul.f32 0.5, %v1828_v9 }
 0x359   :  { %v1820_v28 = vsub.f32 1.5, %v1819_v18  ;;  %v1843_v6 = vsel %vm526_vm11, %v1805_v2, %v1840_v62 }
 0x35a   :  { %v1830_v61 = vsub.f32 1.5, %v1829_v55 }
 0x35b   :  { %v1821_v0 = vmul.f32 %v6913_v38, %v1820_v28 }
 0x35c   :  { %v1831_v46 = vmul.f32 %v6915_v37, %v1830_v61 }
 0x35d   :  { %v1825_v59 = vsel %vm1824_vm5, %v6913_v38, %v1821_v0 }
 0x35e   :  { %v1841_v63 = vrot.slane %v1825_v59, 6  ;;  %v1835_v1 = vsel %vm1834_vm9, %v6915_v37, %v1831_v46 }
 0x35f   :  { %v1842_v29 = vrot.slane %v1835_v1, 5  ;;  %v8043_v1 = vld [vmem:[#allocation4 + $0x58] sm:$0xff] }
 0x361   :  { %v1844_v10 = vsel %vm528_vm12, %v1841_v63, %v1842_v29 }
 0x362   :  { %v1845_v31 = vsel %vm530_vm14, %v1843_v6, %v1844_v10 }
 0x363   :  { %v1847_v26 = vmul.f32 %v7164_v49, %v1845_v31 }
 0x365   :  { %v1849_v39 = vperm.slane %v1847_v26, 0  ;;  %v1850_v57 = vperm.slane %v1847_v26, 1  ;;  %v1851_v45 = vperm.slane %v1847_v26, 2  ;;  %v1852_v35 = vperm.slane %v1847_v26, 3 }
 0x367   :  { %v1858_v48 = vmul.f32 %v1850_v57, %v8006_v8  ;;  %v1859_v11 = vmul.f32 %v1851_v45, %v8012_v51  ;;  %v1860_v13 = vmul.f32 %v1852_v35, %v8016_v12  ;;  %v1875_v32 = vmul.f32 %v1851_v45, %v7968_v40  ;;  %v7165_v8 = vld [vmem:[#allocation12] sm:$0xf] }
 0x368   :  { %v1857_v58 = vmul.f32 %v1849_v39, %v8004_v7  ;;  %v1449_v51 = vunpack.c.l.bf16 %v1445_v17  ;;  %v1453_v12 = vunpack.c.l.bf16 %v1447_v20  ;;  %v1873_v40 = vmul.f32 %v1849_v39, %v7964_v3  ;;  %v5917_v20 = vld [vmem:[#allocation9 + $0xe0] sm:$0xf] }
 0x369   :  { %v1865_v25 = vrot.slane %v1858_v48, 7  ;;  %v1866_v60 = vrot.slane %v1859_v11, 6  ;;  %v1867_v5 = vrot.slane %v1860_v13, 5  ;;  %v1874_v7 = vmul.f32 %v1850_v57, %v7966_v43 }
 0x36a   :  { %v1877_v37 = vmul.f32 %v1849_v39, %v7976_v50  ;;  %v1878_v18 = vmul.f32 %v1850_v57, %v7978_v19  ;;  %v1879_v52 = vmul.f32 %v1851_v45, %v7992_v4  ;;  %v8040_v4 = vld [vmem:[#allocation4 + $0x48] sm:$0xff]  ;;  %v1876_v46 = vmul.f32 %v1852_v35, %v7970_v44 }
 0x36b   :  { %v1868_v56 = vsel %vm526_vm11, %v1857_v58, %v1865_v25  ;;  %v1869_v22 = vsel %vm528_vm12, %v1866_v60, %v1867_v5  ;;  %v1452_v29 = vunpack.c.h.bf16 %v8040_v4  ;;  %v1880_v31 = vmul.f32 %v1852_v35, %v7994_v36 }
 0x36c   :  { %v1870_v23 = vsel %vm530_vm14, %v1868_v56, %v1869_v22  ;;  %v1456_v39 = vunpack.c.h.bf16 %v8043_v1  ;;  %v6599_v56 = vld [vmem:[#allocation9 + $0xec] sm:$0xf0] }
 0x36d   :  { %v1872_v38 = vsub.f32 %v7165_v8, %v1870_v23  ;;  %v6587_v8 = vld [vmem:[#allocation9 + $0x8c] sm:$0xf0] }
 0x36f   :  { %v1882_v21 = vperm.slane %v1872_v38, 0  ;;  %v1883_v41 = vperm.slane %v1872_v38, 1  ;;  %v1884_v30 = vperm.slane %v1872_v38, 2  ;;  %v1885_v19 = vperm.slane %v1872_v38, 3 }
 0x371   :  { %v1890_v47 = vadd.f32 %v1882_v21, %v1873_v40  ;;  %v1891_v28 = vadd.f32 %v1883_v41, %v1874_v7  ;;  %v8036_v54 = vadd.f32 %v1884_v30, %v1875_v32  ;;  %v1894_v9 = vadd.f32 %v1882_v21, %v1877_v37 }
 0x372   :  { %v1895_v0 = vadd.f32 %v1883_v41, %v1878_v18  ;;  %v8038_v24 = vadd.f32 %v1884_v30, %v1879_v52  ;;  %v1893_v2 = vadd.f32 %v1885_v19, %v1876_v46  ;;  %v1897_v57 = vadd.f32 %v1885_v19, %v1880_v31  ;;  %v5925_v41 = vld [vmem:[#allocation9 + $0xe8] sm:$0xf]  ;;  %v6600_v30 = vld [vmem:[#allocation9 + $0xf4] sm:$0xf0]  ;;  %v6598_v52 = vld [vmem:[#allocation9 + $0xec] sm:$0xf] }
 0x373   :  { %v1898_v3 = vadd.f32 %v1890_v47, %v1449_v51  ;;  %v1899_v43 = vadd.f32 %v1891_v28, %v1450_v14  ;;  %v1902_v55 = vadd.f32 %v1894_v9, %v1453_v12  ;;  %v6597_v51 = vld [vmem:[#allocation9 + $0xe4] sm:$0xf]  ;;  %v5919_v14 = vld [vmem:[#allocation9 + $0xf0] sm:$0xf0]  ;;  %v5918_v21 = vor.u32 %v6599_v56, %v5917_v20  ;;  %v5927_v47 = vld [vmem:[#allocation9 + $0xf8] sm:$0xf0] }
 0x374   :  { %v1903_v33 = vadd.f32 %v1895_v0, %v1454_v34  ;;  %v1901_v44 = vadd.f32 %v1893_v2, %v1452_v29  ;;  %v8058_v35 = vadd.f32 %v1897_v57, %v1456_v39  ;;  %v5922_v37 = vor.u32 %v6597_v51, %v5919_v14  ;;  %v6593_v46 = vld [vmem:[#allocation9 + $0xc4] sm:$0xf]  ;;  %v6594_v39 = vld [vmem:[#allocation9 + $0xcc] sm:$0xf]  ;;  %v6579_v20 = vld [vmem:[#allocation9 + $0x4c] sm:$0xf0] }
 0x375   :  { %v5797_v59 = vmul.f32 -1.442695, %v1898_v3  ;;  %v5799_v61 = vmul.f32 -1.442695, %v1899_v43  ;;  %v5798_v42 = vmul.f32 -1.442695, %v1902_v55  ;;  %v5926_v18 = vor.u32 %v6600_v30, %v5925_v41  ;;  %2305 = vmatpush.bf16.msrb.mxu0 %v5918_v21 }
 0x376   :  { %v5800_v50 = vmul.f32 -1.442695, %v1903_v33  ;;  %v5930_v43 = vor.u32 %v6598_v52, %v5927_v47  ;;  %v5901_v55 = vld [vmem:[#allocation9 + $0xc0] sm:$0xf]  ;;  %v6595_v33 = vld [vmem:[#allocation9 + $0xcc] sm:$0xf0]  ;;  %2319 = vmatpush.bf16.msrb.mxu1 %v5922_v37 }
 0x377   :  { %6916 = vpow2.f32 %v5797_v59  ;;  %2333 = vmatpush.bf16.msrb.mxu2 %v5926_v18  ;;  %v5902_v19 = vor.u32 %v6595_v33, %v5901_v55  ;;  %v5893_v21 = vld [vmem:[#allocation9 + $0xa8] sm:$0xf]  ;;  %v6592_v41 = vld [vmem:[#allocation9 + $0xb4] sm:$0xf0]  ;;  %v6590_v37 = vld [vmem:[#allocation9 + $0xac] sm:$0xf] }
 0x378   :  { %6918 = vpow2.f32 %v5798_v42  ;;  %2347 = vmatpush.bf16.msrb.mxu3 %v5930_v43  ;;  %v5869_v18 = vld [vmem:[#allocation9 + $0x80] sm:$0xf]  ;;  %v5894_v9 = vor.u32 %v6592_v41, %v5893_v21 }
 0x379   :  { %6920 = vpow2.f32 %v5799_v61  ;;  %2306 = vmatpush.bf16.msrb.mxu0 %v5902_v19  ;;  %v5870_v33 = vor.u32 %v6587_v8, %v5869_v18  ;;  %v6586_v19 = vld [vmem:[#allocation9 + $0x8c] sm:$0xf]  ;;  %v5829_v8 = vld [vmem:[#allocation9 + $0x28] sm:$0xf] }
 0x37a   :  { %6922 = vpow2.f32 %v5800_v50 }
 0x37d   :  { %v6917_v62 = vpop.eup %6916 }
 0x37e   :  { %v6919_v63 = vpop.eup %6918  ;;  %v1912_v6 = vadd.f32 1.0, %v6917_v62  ;;  %v5903_v62 = vld [vmem:[#allocation9 + $0xd0] sm:$0xf0] }
 0x37f   :  { %v6921_v10 = vpop.eup %6920  ;;  %v8047_v49 = vadd.f32 1.0, %v6919_v63  ;;  %v5909_v63 = vld [vmem:[#allocation9 + $0xc8] sm:$0xf]  ;;  %v5906_v31 = vor.u32 %v6593_v46, %v5903_v62  ;;  %v5879_v62 = vld [vmem:[#allocation9 + $0x98] sm:$0xf0] }
 0x380   :  { %v6923_v26 = vpop.eup %6922  ;;  %6924 = vrcp.f32 %v1912_v6  ;;  %v1925_v45 = vand.u32 2147483648, %v1912_v6  ;;  %v8052_v11 = vadd.f32 1.0, %v6921_v10  ;;  %v1923_v32 = vand.u32 2147483647, %v1912_v6 }
 0x381   :  { %6926 = vrcp.f32 %v8047_v49  ;;  %v1940_v48 = vand.u32 2147483648, %v8047_v49  ;;  %v8054_v13 = vadd.f32 1.0, %v6923_v26  ;;  %v1938_v36 = vand.u32 2147483647, %v8047_v49  ;;  %v6596_v26 = vld [vmem:[#allocation9 + $0xd4] sm:$0xf0]  ;;  %2320 = vmatpush.bf16.msrb.mxu1 %v5906_v31 }
 0x382   :  { %6928 = vrcp.f32 %v8052_v11  ;;  %v8060_v58 = vor.u32 1.1754944e-38, %v1925_v45  ;;  %v1965_v25 = vand.u32 2147483647, %v8052_v11  ;;  %vm1919_vm15 = vweird.f32 %v1912_v6 }
 0x383   :  { %6930 = vrcp.f32 %v8054_v13  ;;  %v8066_v5 = vor.u32 1.1754944e-38, %v1940_v48  ;;  %v1967_v17 = vand.u32 2147483648, %v8052_v11  ;;  %vm8073_vm2 = vcmp.eq.f32.partialorder %v1923_v32, 8.507059e+37  ;;  %v5911_v32 = vld [vmem:[#allocation9 + $0xd8] sm:$0xf0] }
 0x384   :  { %6932 = vtanh.f32 %v1901_v44  ;;  %vm1934_vm1 = vweird.f32 %v8047_v49  ;;  %v1980_v38 = vand.u32 2147483647, %v8054_v13  ;;  %vm8081_vm3 = vcmp.eq.f32.partialorder %v1938_v36, 8.507059e+37  ;;  %v5885_v36 = vld [vmem:[#allocation9 + $0xa0] sm:$0xf] }
 0x385   :  { %vm1961_vm4 = vweird.f32 %v8052_v11  ;;  %v1982_v7 = vand.u32 2147483648, %v8054_v13  ;;  %v8097_v3 = vor.u32 1.1754944e-38, %v1967_v17  ;;  %vm1976_vm7 = vweird.f32 %v8054_v13 }
 0x386   :  { %v8064_v60 = vpop.eup %6924  ;;  %vm8106_vm9 = vcmp.eq.f32.partialorder %v1965_v25, 8.507059e+37  ;;  %v5910_v48 = vor.u32 %v6596_v26, %v5909_v63  ;;  %v5914_v56 = vor.u32 %v6594_v39, %v5911_v32  ;;  %6934 = vtanh.f32 %v8058_v35  ;;  %v5895_v35 = vld [vmem:[#allocation9 + $0xb8] sm:$0xf0]  ;;  %v5853_v63 = vld [vmem:[#allocation9 + $0x60] sm:$0xf] }
 0x387   :  { %v8069_v22 = vpop.eup %6926  ;;  %v1915_v23 = vmul.f32 %v8064_v60, %v1912_v6  ;;  %vm1920_vm0 = vweird.f32 %v8064_v60  ;;  %v5898_v55 = vor.u32 %v6590_v37, %v5895_v35  ;;  %v5882_v31 = vor.u32 %v6586_v19, %v5879_v62  ;;  %v5855_v26 = vld [vmem:[#allocation9 + $0x70] sm:$0xf0]  ;;  %v5861_v39 = vld [vmem:[#allocation9 + $0x68] sm:$0xf]  ;;  %v5863_v32 = vld [vmem:[#allocation9 + $0x78] sm:$0xf0] }
 0x388   :  { %v1930_v12 = vmul.f32 %v8069_v22, %v8047_v49  ;;  %vm1935_vm5 = vweird.f32 %v8069_v22  ;;  %v8088_v28 = vpop.eup %6928  ;;  %vm8093_vm6 = vmor %vm1919_vm15, %vm1920_vm0  ;;  %vm8133_vm0 = vcmp.eq.f32.partialorder %v1980_v38, 8.507059e+37  ;;  %v6589_v38 = vld [vmem:[#allocation9 + $0xa4] sm:$0xf]  ;;  %2334 = vmatpush.bf16.msrb.mxu2 %v5910_v48  ;;  %2348 = vmatpush.bf16.msrb.mxu3 %v5914_v56  ;;  %v6582_v48 = vld [vmem:[#allocation9 + $0x6c] sm:$0xf] }
 0x389   :  { %v1916_v34 = vsub.f32 1.0, %v1915_v23  ;;  %v8100_v59 = vpop.eup %6930  ;;  %v1957_v42 = vmul.f32 %v8088_v28, %v8052_v11  ;;  %vm1962_vm8 = vweird.f32 %v8088_v28  ;;  %vm8117_vm10 = vmor %vm1934_vm1, %vm1935_vm5  ;;  %v1983_v11 = vor.u32 1.1754944e-38, %v1982_v7  ;;  %v6591_v23 = vld [vmem:[#allocation9 + $0xac] sm:$0xf0]  ;;  %v6577_v56 = vld [vmem:[#allocation9 + $0x44] sm:$0xf] }
 0x38a   :  { %v1931_v0 = vsub.f32 1.0, %v1930_v12  ;;  %v8110_v29 = vpop.eup %6932  ;;  %v1972_v10 = vmul.f32 %v8100_v59, %v8054_v13  ;;  %vm1977_vm13 = vweird.f32 %v8100_v59  ;;  %vm8129_vm15 = vmor %vm1961_vm4, %vm1962_vm8  ;;  %v5886_v13 = vor.u32 %v6591_v23, %v5885_v36  ;;  %v5887_v12 = vld [vmem:[#allocation9 + $0xb0] sm:$0xf0]  ;;  %v6573_v37 = vld [vmem:[#allocation9 + $0x24] sm:$0xf] }
 0x38b   :  { %v1917_v61 = vmul.f32 %v8064_v60, %v1916_v34  ;;  %v1958_v45 = vsub.f32 1.0, %v1957_v42  ;;  %vm8140_vm1 = vmor %vm1976_vm7, %vm1977_vm13  ;;  %v5890_v34 = vor.u32 %v6589_v38, %v5887_v12  ;;  %v6588_v42 = vld [vmem:[#allocation9 + $0x94] sm:$0xf0]  ;;  %v5866_v44 = vor.u32 %v6582_v48, %v5863_v32  ;;  %v5845_v38 = vld [vmem:[#allocation9 + $0x48] sm:$0xf] }
 0x38c   :  { %v1932_v2 = vmul.f32 %v8069_v22, %v1931_v0  ;;  %v1973_v17 = vsub.f32 1.0, %v1972_v10  ;;  %v5871_v0 = vld [vmem:[#allocation9 + $0x90] sm:$0xf0]  ;;  %2307 = vmatpush.bf16.msrb.mxu0 %v5886_v13  ;;  %2335 = vmatpush.bf16.msrb.mxu2 %v5894_v9  ;;  %v5847_v13 = vld [vmem:[#allocation9 + $0x58] sm:$0xf0] }
 0x38d   :  { %v1918_v57 = vadd.f32 %v8064_v60, %v1917_v61  ;;  %v1959_v14 = vmul.f32 %v8088_v28, %v1958_v45  ;;  %v5877_v61 = vld [vmem:[#allocation9 + $0x88] sm:$0xf]  ;;  %2321 = vmatpush.bf16.msrb.mxu1 %v5890_v34  ;;  %2349 = vmatpush.bf16.msrb.mxu3 %v5898_v55  ;;  %v6575_v34 = vld [vmem:[#allocation9 + $0x2c] sm:$0xf0]  ;;  %v5823_v9 = vld [vmem:[#allocation9 + $0x30] sm:$0xf0] }
 0x38e   :  { %v1933_v25 = vadd.f32 %v8069_v22, %v1932_v2  ;;  %v5878_v46 = vor.u32 %v6588_v42, %v5877_v61  ;;  %v6583_v2 = vld [vmem:[#allocation9 + $0x6c] sm:$0xf0]  ;;  %v5805_v61 = vld [vmem:[#allocation9] sm:$0xf]  ;;  %v5826_v42 = vor.u32 %v6573_v37, %v5823_v9 }
 0x38f   :  { %v1922_v51 = vsel %vm8093_vm6, %v8064_v60, %v1918_v57  ;;  %v1974_v60 = vmul.f32 %v8100_v59, %v1973_v17  ;;  %v1960_v47 = vadd.f32 %v8088_v28, %v1959_v14  ;;  %v6935_v57 = vpop.eup %6934  ;;  %v5837_v17 = vld [vmem:[#allocation9 + $0x40] sm:$0xf]  ;;  %v6578_v14 = vld [vmem:[#allocation9 + $0x4c] sm:$0xf] }
 0x390   :  { %v1927_v7 = vsel %vm8073_vm2, %v8060_v58, %v1922_v51  ;;  %v1937_v30 = vsel %vm8117_vm10, %v8069_v22, %v1933_v25  ;;  %v6585_v58 = vld [vmem:[#allocation9 + $0x84] sm:$0xf]  ;;  %2308 = vmatpush.bf16.msrb.mxu0 %v5870_v33  ;;  %2336 = vmatpush.bf16.msrb.mxu2 %v5878_v46  ;;  %v5838_v21 = vor.u32 %v6579_v20, %v5837_v17  ;;  %v5807_v46 = vld [vmem:[#allocation9 + $0x10] sm:$0xf0] }
 0x391   :  { %v1942_v52 = vsel %vm8081_vm3, %v8066_v5, %v1937_v30  ;;  %v1946_v43 = vmul.f32 %v1927_v7, %v7937_v16  ;;  %v1975_v22 = vadd.f32 %v8100_v59, %v1974_v60  ;;  %v1964_v5 = vsel %vm8129_vm15, %v8088_v28, %v1960_v47  ;;  %v6581_v28 = vld [vmem:[#allocation9 + $0x64] sm:$0xf]  ;;  %2350 = vmatpush.bf16.msrb.mxu3 %v5882_v31  ;;  %v5821_v60 = vld [vmem:[#allocation9 + $0x20] sm:$0xf]  ;;  %v6570_v31 = vld [vmem:[#allocation9 + $0xc] sm:$0xf] }
 0x392   :  { %v5874_v40 = vor.u32 %v6585_v58, %v5871_v0  ;;  %v1947_v16 = vmul.f32 %v1942_v52, %v7940_v27  ;;  %v1969_v6 = vsel %vm8106_vm9, %v8097_v3, %v1964_v5  ;;  %v6584_v27 = vld [vmem:[#allocation9 + $0x74] sm:$0xf0]  ;;  %v5854_v3 = vor.u32 %v6583_v2, %v5853_v63  ;;  %v6574_v0 = vld [vmem:[#allocation9 + $0x2c] sm:$0xf]  ;;  %v6571_v5 = vld [vmem:[#allocation9 + $0xc] sm:$0xf0] }
 0x393   :  { %v1979_v10 = vsel %vm8140_vm1, %v8100_v59, %v1975_v22  ;;  %v1988_v49 = vmul.f32 %v8110_v29, %v1969_v6  ;;  %v5858_v59 = vor.u32 %v6581_v28, %v5855_v26  ;;  %v5862_v25 = vor.u32 %v6584_v27, %v5861_v39  ;;  %v6580_v29 = vld [vmem:[#allocation9 + $0x54] sm:$0xf0]  ;;  %v5815_v28 = vld [vmem:[#allocation9 + $0x18] sm:$0xf0] }
 0x394   :  { %v1984_v45 = vsel %vm8133_vm0, %v1983_v11, %v1979_v10  ;;  %2322 = vmatpush.bf16.msrb.mxu1 %v5874_v40  ;;  %v5839_v11 = vld [vmem:[#allocation9 + $0x50] sm:$0xf0]  ;;  %2309 = vmatpush.bf16.msrb.mxu0 %v5854_v3  ;;  %v5846_v30 = vor.u32 %v6580_v29, %v5845_v38  ;;  %v5850_v47 = vor.u32 %v6578_v14, %v5847_v13  ;;  %v6576_v58 = vld [vmem:[#allocation9 + $0x34] sm:$0xf0]  ;;  %v6569_v40 = vld [vmem:[#allocation9 + $0x4] sm:$0xf]  ;;  %v1451_v10 = vunpack.c.l.bf16 %v8040_v4 }
 0x395   :  { %v1989_v50 = vmul.f32 %v6935_v57, %v1984_v45  ;;  %v1990_v36 = vadd.f32 %v1988_v49, %v1946_v43  ;;  %2337 = vmatpush.bf16.msrb.mxu2 %v5862_v25  ;;  %v5842_v7 = vor.u32 %v6577_v56, %v5839_v11  ;;  %2351 = vmatpush.bf16.msrb.mxu3 %v5866_v44  ;;  %v5831_v43 = vld [vmem:[#allocation9 + $0x38] sm:$0xf0]  ;;  %v6572_v6 = vld [vmem:[#allocation9 + $0x14] sm:$0xf0]  ;;  %v1455_v26 = vunpack.c.l.bf16 %v8043_v1 }
 0x396   :  { %v5822_v33 = vor.u32 %v6575_v34, %v5821_v60  ;;  %v5830_v19 = vor.u32 %v6576_v58, %v5829_v8  ;;  %v5834_v2 = vor.u32 %v6574_v0, %v5831_v43  ;;  %v5806_v57 = vor.u32 %v6571_v5, %v5805_v61  ;;  %v7166_v8 = vld [vmem:[%s9315_s6] sm:$0x1] }
 0x397   :  { %v1991_v23 = vadd.f32 %v1989_v50, %v1947_v16  ;;  %v8176_v51 = vmul.f32 %v1990_v36, %v7645_v53  ;;  %v5813_v16 = vld [vmem:[#allocation9 + $0x8] sm:$0xf]  ;;  %v5810_v49 = vor.u32 %v6569_v40, %v5807_v46  ;;  %v5818_v32 = vor.u32 %v6570_v31, %v5815_v28 }
 0x398   :  { %2323 = vmatpush.bf16.msrb.mxu1 %v5858_v59  ;;  %2310 = vmatpush.bf16.msrb.mxu0 %v5838_v21  ;;  %v5814_v27 = vor.u32 %v6572_v6, %v5813_v16  ;;  %v1900_v3 = vadd.f32 %v8036_v54, %v1451_v10  ;;  %v1904_v4 = vadd.f32 %v8038_v24, %v1455_v26 }
 0x399   :  { %v8179_v12 = vmul.f32 %v1991_v23, %v7695_v15  ;;  %v2002_v41 = vmul.f32 %v8176_v51, %v8176_v51  ;;  %2338 = vmatpush.bf16.msrb.mxu2 %v5846_v30  ;;  %2352 = vmatpush.bf16.msrb.mxu3 %v5850_v47 }
 0x39a   :  { %v5801_v17 = vmul.f32 -1.442695, %v1900_v3  ;;  %v5802_v20 = vmul.f32 -1.442695, %v1904_v4 }
 0x39b   :  { %v1994_v35 = vadd.f32 %v8179_v12, %v8176_v51  ;;  %v2003_v18 = vmul.f32 %v8179_v12, %v8179_v12  ;;  %v6757_v52 = vpack.c.bf16 %v8179_v12, %v8176_v51 }
 0x39c   :  { %2324 = vmatpush.bf16.msrb.mxu1 %v5842_v7  ;;  %2311 = vmatpush.bf16.msrb.mxu0 %v5822_v33  ;;  %6936 = vpow2.f32 %v5801_v17  ;;  %v7167_v33 = vld [vmem:[%s9316_s7] sm:$0x1] }
 0x39d   :  { %v1995_v22 = vrot.slane %v1994_v35, 4  ;;  %v2004_v55 = vadd.f32 %v2003_v18, %v2002_v41  ;;  %6758 = vst [vmem:[#allocation14 + $0x10] sm:$0xff] %v6757_v52   ;;  %2339 = vmatpush.bf16.msrb.mxu2 %v5830_v19  ;;  %2353 = vmatpush.bf16.msrb.mxu3 %v5834_v2  ;;  %6938 = vpow2.f32 %v5802_v20 }
 0x39f   :  { %v1996_v62 = vadd.f32 %v1995_v22, %v1994_v35  ;;  %v2005_v63 = vrot.slane %v2004_v55, 4 }
 0x3a0   :  { %2325 = vmatpush.bf16.msrb.mxu1 %v5826_v42  ;;  %2312 = vmatpush.bf16.msrb.mxu0 %v5806_v57 }
 0x3a1   :  { %v2006_v39 = vadd.f32 %v2005_v63, %v2004_v55  ;;  %v1997_v45 = vrot.slane %v1996_v62, 2  ;;  %2340 = vmatpush.bf16.msrb.mxu2 %v5814_v27  ;;  %2354 = vmatpush.bf16.msrb.mxu3 %v5818_v32 }
 0x3a2   :  { %v6937_v24 = vpop.eup %6936 }
 0x3a3   :  { %v2007_v48 = vrot.slane %v2006_v39, 2  ;;  %v1998_v50 = vadd.f32 %v1997_v45, %v1996_v62  ;;  %v6939_v14 = vpop.eup %6938  ;;  %v2045_v13 = vadd.f32 1.0, %v6937_v24 }
 0x3a4   :  { %2326 = vmatpush.bf16.msrb.mxu1 %v5810_v49  ;;  %v2046_v21 = vadd.f32 1.0, %v6939_v14 }
 0x3a5   :  { %v2008_v36 = vadd.f32 %v2007_v48, %v2006_v39  ;;  %v1999_v59 = vrot.slane %v1998_v50, 1  ;;  %v2058_v16 = vand.u32 2147483648, %v2045_v13  ;;  %vm2052_vm7 = vweird.f32 %v2045_v13 }
 0x3a6   :  { %v2056_v10 = vand.u32 2147483647, %v2045_v13  ;;  %v2073_v31 = vand.u32 2147483648, %v2046_v21  ;;  %vm2067_vm9 = vweird.f32 %v2046_v21  ;;  %v2071_v28 = vand.u32 2147483647, %v2046_v21 }
 0x3a7   :  { %v2000_v1 = vadd.f32 %v1999_v59, %v1998_v50  ;;  %v2009_v25 = vrot.slane %v2008_v36, 1  ;;  %v2059_v39 = vor.u32 1.1754944e-38, %v2058_v16 }
 0x3a8   :  { %vm2057_vm13 = vcmp.eq.f32.partialorder %v2056_v10, 8.507059e+37  ;;  %v2074_v45 = vor.u32 1.1754944e-38, %v2073_v31  ;;  %vm2072_vm15 = vcmp.eq.f32.partialorder %v2071_v28, 8.507059e+37 }
 0x3a9   :  { %v2001_v56 = vmul.f32 0.5, %v2000_v1  ;;  %v2010_v23 = vadd.f32 %v2009_v25, %v2008_v36 }
 0x3ab   :  { %v2011_v44 = vmul.f32 0.5, %v2010_v23  ;;  %v2012_v11 = vmul.f32 %v2001_v56, %v2001_v56 }
 0x3ad   :  { %v2013_v38 = vsub.f32 %v2011_v44, %v2012_v11 }
 0x3af   :  { %v2014_v54 = vmax.f32 %v2013_v38, 0.0 }
 0x3b1   :  { %v2015_v29 = vadd.f32 1e-05, %v2014_v54 }
 0x3b3   :  { %6940 = vrsqrt.f32 %v2015_v29  ;;  %vm2022_vm3 = vweird.f32 %v2015_v29 }
 0x3b4   :  { %6942 = vrcp.f32 %v2045_v13 }
 0x3b5   :  { %6944 = vrcp.f32 %v2046_v21 }
 0x3b9   :  { %v6941_v41 = vpop.eup %6940 }
 0x3ba   :  { %v2017_v7 = vmul.f32 %v6941_v41, %v2015_v29  ;;  %v6943_v34 = vpop.eup %6942  ;;  %vm2023_vm2 = vweird.f32 %v6941_v41 }
 0x3bb   :  { %v6945_v37 = vpop.eup %6944  ;;  %v2048_v52 = vmul.f32 %v6943_v34, %v2045_v13  ;;  %vm2024_vm4 = vmor %vm2022_vm3, %vm2023_vm2  ;;  %vm2053_vm5 = vweird.f32 %v6943_v34 }
 0x3bc   :  { %v2018_v30 = vmul.f32 %v6941_v41, %v2017_v7  ;;  %v2063_v47 = vmul.f32 %v6945_v37, %v2046_v21  ;;  %vm2068_vm6 = vweird.f32 %v6945_v37  ;;  %vm2054_vm8 = vmor %vm2052_vm7, %vm2053_vm5 }
 0x3bd   :  { %v2049_v0 = vsub.f32 1.0, %v2048_v52  ;;  %vm2069_vm10 = vmor %vm2067_vm9, %vm2068_vm6 }
 0x3be   :  { %v2019_v60 = vmul.f32 0.5, %v2018_v30  ;;  %v2064_v55 = vsub.f32 1.0, %v2063_v47 }
 0x3bf   :  { %v2050_v42 = vmul.f32 %v6943_v34, %v2049_v0 }
 0x3c0   :  { %v2020_v35 = vsub.f32 1.5, %v2019_v60  ;;  %v2065_v46 = vmul.f32 %v6945_v37, %v2064_v55 }
 0x3c1   :  { %v2051_v2 = vadd.f32 %v6943_v34, %v2050_v42 }
 0x3c2   :  { %v2021_v18 = vmul.f32 %v6941_v41, %v2020_v35  ;;  %v2066_v6 = vadd.f32 %v6945_v37, %v2065_v46 }
 0x3c3   :  { %v2055_v26 = vsel %vm2054_vm8, %v6943_v34, %v2051_v2 }
 0x3c4   :  { %v2025_v9 = vsel %vm2024_vm4, %v6941_v41, %v2021_v18  ;;  %v2070_v57 = vsel %vm2069_vm10, %v6945_v37, %v2066_v6  ;;  %v2060_v27 = vsel %vm2057_vm13, %v2059_v39, %v2055_v26 }
 0x3c5   :  { %v2026_v58 = vmul.f32 %v7166_v8, %v2025_v9  ;;  %v2075_v32 = vsel %vm2072_vm15, %v2074_v45, %v2070_v57 }
 0x3c7   :  { %v2027_v43 = vmul.f32 %v2026_v58, %v2001_v56  ;;  %v2030_v22 = vperm.slane %v2026_v58, 0 }
 0x3c9   :  { %v2028_v61 = vsub.f32 %v7167_v33, %v2027_v43  ;;  %v2032_v19 = vmul.f32 %v2030_v22, %v8176_v51  ;;  %v2033_v5 = vmul.f32 %v2030_v22, %v8179_v12 }
 0x3cb   :  { %v2035_v40 = vperm.slane %v2028_v61, 0 }
 0x3cd   :  { %v2037_v62 = vadd.f32 %v2035_v40, %v2032_v19  ;;  %v2038_v63 = vadd.f32 %v2035_v40, %v2033_v5 }
 0x3cf   :  { %6946 = vtanh.f32 %v2037_v62 }
 0x3d0   :  { %6948 = vtanh.f32 %v2038_v63 }
 0x3d5   :  { %v6947_v49 = vpop.eup %6946 }
 0x3d6   :  { %v6949_v48 = vpop.eup %6948  ;;  %v2079_v50 = vmul.f32 %v6947_v49, %v2060_v27 }
 0x3d7   :  { %v2080_v3 = vmul.f32 %v6949_v48, %v2075_v32 }
 0x3d8   :  { %v2081_v4 = vmul.f32 %v2079_v50, %v7645_v53 }
 0x3d9   :  { %v2082_v36 = vmul.f32 %v2080_v3, %v7695_v15 }
 0x3db   :  { %v6752_v59 = vpack.c.bf16 %v2082_v36, %v2081_v4 }
 0x3dd   :  { %6753 = vst [vmem:[#allocation13 + $0x10] sm:$0xff] %v6752_v59   ;;  %2313 = vmatmul.bf16.vlgmr.msrb.gmra.mxu0 %v6752_v59  ;;  %2327 = vmatmul.bf16.vlgmr.msrb.gmra.mxu1 %v6752_v59 }
 0x3de   :  { %2341 = vmatmul.bf16.vlgmr.msrb.gmra.mxu2 %v6752_v59  ;;  %2355 = vmatmul.bf16.vlgmr.msrb.gmra.mxu3 %v6752_v59 }
 0x45a   :  { %v8203_v1 = vpop.f32.mrf.mxu0  ;;  %v8205_v25 = vpop.f32.mrf.mxu1 }
 0x45b   :  { %v2393_v56 = vmul.f32 %v8203_v1, %v8203_v1  ;;  %v2394_v23 = vmul.f32 %v8205_v25, %v8205_v25 }
 0x461   :  { %v8207_v17 = vpop.f32.mrf.mxu2  ;;  %v8209_v20 = vpop.f32.mrf.mxu3 }
 0x462   :  { %v8215_v44 = vpop.f32.mrf.mxu0  ;;  %v8217_v11 = vpop.f32.mrf.mxu1  ;;  %v2395_v37 = vmul.f32 %v8207_v17, %v8207_v17  ;;  %v2396_v35 = vmul.f32 %v8209_v20, %v8209_v20 }
 0x463   :  { %v2361_v38 = vadd.f32 %v8215_v44, %v8203_v1  ;;  %v2397_v54 = vmul.f32 %v8215_v44, %v8215_v44  ;;  %v2368_v29 = vadd.f32 %v8217_v11, %v8205_v25  ;;  %v2398_v24 = vmul.f32 %v8217_v11, %v8217_v11 }
 0x465   :  { %v2362_v14 = vrot.slane %v2361_v38, 4  ;;  %v2401_v13 = vadd.f32 %v2397_v54, %v2393_v56  ;;  %v2369_v21 = vrot.slane %v2368_v29, 4  ;;  %v2408_v41 = vadd.f32 %v2398_v24, %v2394_v23 }
 0x467   :  { %v2363_v7 = vadd.f32 %v2362_v14, %v2361_v38  ;;  %v2402_v30 = vrot.slane %v2401_v13, 4  ;;  %v2370_v60 = vadd.f32 %v2369_v21, %v2368_v29  ;;  %v2409_v34 = vrot.slane %v2408_v41, 4 }
 0x469   :  { %v2364_v18 = vrot.slane %v2363_v7, 2  ;;  %v2403_v52 = vadd.f32 %v2402_v30, %v2401_v13  ;;  %v2371_v47 = vrot.slane %v2370_v60, 2  ;;  %v2410_v9 = vadd.f32 %v2409_v34, %v2408_v41  ;;  %v8231_v8 = vpop.f32.mrf.mxu2  ;;  %v8233_v58 = vpop.f32.mrf.mxu3 }
 0x46a   :  { %v2375_v0 = vadd.f32 %v8231_v8, %v8207_v17  ;;  %v2399_v43 = vmul.f32 %v8231_v8, %v8231_v8  ;;  %v2382_v22 = vadd.f32 %v8233_v58, %v8209_v20  ;;  %v2400_v55 = vmul.f32 %v8233_v58, %v8233_v58 }
 0x46b   :  { %v2365_v33 = vadd.f32 %v2364_v18, %v2363_v7  ;;  %v2404_v61 = vrot.slane %v2403_v52, 2  ;;  %v2372_v42 = vadd.f32 %v2371_v47, %v2370_v60  ;;  %v2411_v19 = vrot.slane %v2410_v9, 2 }
 0x46c   :  { %v2376_v5 = vrot.slane %v2375_v0, 4  ;;  %v2415_v40 = vadd.f32 %v2399_v43, %v2395_v37  ;;  %v2383_v46 = vrot.slane %v2382_v22, 4  ;;  %v2422_v62 = vadd.f32 %v2400_v55, %v2396_v35 }
 0x46d   :  { %v2366_v63 = vrot.slane %v2365_v33, 1  ;;  %v2405_v2 = vadd.f32 %v2404_v61, %v2403_v52  ;;  %v2373_v16 = vrot.slane %v2372_v42, 1  ;;  %v2412_v6 = vadd.f32 %v2411_v19, %v2410_v9 }
 0x46e   :  { %v2377_v10 = vadd.f32 %v2376_v5, %v2375_v0  ;;  %v2416_v31 = vrot.slane %v2415_v40, 4  ;;  %v2384_v28 = vadd.f32 %v2383_v46, %v2382_v22  ;;  %v2423_v26 = vrot.slane %v2422_v62, 4 }
 0x46f   :  { %v2367_v39 = vadd.f32 %v2366_v63, %v2365_v33  ;;  %v2406_v57 = vrot.slane %v2405_v2, 1  ;;  %v2374_v45 = vadd.f32 %v2373_v16, %v2372_v42  ;;  %v2413_v49 = vrot.slane %v2412_v6, 1 }
 0x470   :  { %v2378_v27 = vrot.slane %v2377_v10, 2  ;;  %v2417_v48 = vadd.f32 %v2416_v31, %v2415_v40  ;;  %v2385_v32 = vrot.slane %v2384_v28, 2  ;;  %v2424_v50 = vadd.f32 %v2423_v26, %v2422_v62 }
 0x471   :  { %v8243_v3 = vmul.f32 0.5, %v2367_v39  ;;  %v2407_v4 = vadd.f32 %v2406_v57, %v2405_v2  ;;  %v8245_v36 = vmul.f32 0.5, %v2374_v45  ;;  %v2414_v59 = vadd.f32 %v2413_v49, %v2412_v6 }
 0x472   :  { %v2379_v56 = vadd.f32 %v2378_v27, %v2377_v10  ;;  %v2418_v23 = vrot.slane %v2417_v48, 2  ;;  %v2386_v38 = vadd.f32 %v2385_v32, %v2384_v28  ;;  %v2425_v54 = vrot.slane %v2424_v50, 2 }
 0x473   :  { %v2429_v29 = vmul.f32 0.5, %v2407_v4  ;;  %v2433_v24 = vmul.f32 %v8243_v3, %v8243_v3  ;;  %v2430_v14 = vmul.f32 0.5, %v2414_v59  ;;  %v2434_v13 = vmul.f32 %v8245_v36, %v8245_v36 }
 0x474   :  { %v2380_v21 = vrot.slane %v2379_v56, 1  ;;  %v2419_v41 = vadd.f32 %v2418_v23, %v2417_v48  ;;  %v2387_v60 = vrot.slane %v2386_v38, 1  ;;  %v2426_v34 = vadd.f32 %v2425_v54, %v2424_v50 }
 0x475   :  { %v2437_v7 = vsub.f32 %v2429_v29, %v2433_v24  ;;  %v2438_v30 = vsub.f32 %v2430_v14, %v2434_v13 }
 0x476   :  { %v2381_v37 = vadd.f32 %v2380_v21, %v2379_v56  ;;  %v2420_v35 = vrot.slane %v2419_v41, 1  ;;  %v2388_v22 = vadd.f32 %v2387_v60, %v2386_v38  ;;  %v2427_v55 = vrot.slane %v2426_v34, 1 }
 0x477   :  { %v2441_v18 = vmax.f32 %v2437_v7, 0.0  ;;  %v2442_v52 = vmax.f32 %v2438_v30, 0.0 }
 0x478   :  { %v8251_v47 = vmul.f32 0.5, %v2381_v37  ;;  %v2421_v9 = vadd.f32 %v2420_v35, %v2419_v41  ;;  %v8255_v42 = vmul.f32 0.5, %v2388_v22  ;;  %v2428_v5 = vadd.f32 %v2427_v55, %v2426_v34  ;;  %v7168_v22 = vld [vmem:[#allocation10] sm:$0xf] }
 0x479   :  { %v2445_v0 = vadd.f32 1e-05, %v2441_v18  ;;  %v2446_v43 = vadd.f32 1e-05, %v2442_v52 }
 0x47a   :  { %v2431_v33 = vmul.f32 0.5, %v2421_v9  ;;  %v2435_v61 = vmul.f32 %v8251_v47, %v8251_v47  ;;  %v2436_v40 = vmul.f32 %v8255_v42, %v8255_v42  ;;  %v2432_v62 = vmul.f32 0.5, %v2428_v5 }
 0x47b   :  { %6950 = vrsqrt.f32 %v2446_v43  ;;  %vm2465_vm2 = vweird.f32 %v2446_v43  ;;  %vm2455_vm10 = vweird.f32 %v2445_v0 }
 0x47c   :  { %v2439_v19 = vsub.f32 %v2431_v33, %v2435_v61  ;;  %6952 = vrsqrt.f32 %v2445_v0  ;;  %v2440_v2 = vsub.f32 %v2432_v62, %v2436_v40 }
 0x47e   :  { %v2443_v46 = vmax.f32 %v2439_v19, 0.0  ;;  %v2444_v31 = vmax.f32 %v2440_v2, 0.0 }
 0x480   :  { %v2447_v63 = vadd.f32 1e-05, %v2443_v46  ;;  %v2448_v26 = vadd.f32 1e-05, %v2444_v31  ;;  %v2100_v31 = vld [vmem:[#allocation4 + $0x70] sm:$0xff] }
 0x481   :  { %v6951_v16 = vpop.eup %6950 }
 0x482   :  { %6954 = vrsqrt.f32 %v2447_v63  ;;  %v6953_v6 = vpop.eup %6952  ;;  %v2460_v10 = vmul.f32 %v6951_v16, %v2446_v43  ;;  %vm2466_vm0 = vweird.f32 %v6951_v16  ;;  %vm2475_vm4 = vweird.f32 %v2447_v63 }
 0x483   :  { %v2450_v39 = vmul.f32 %v6953_v6, %v2445_v0  ;;  %6956 = vrsqrt.f32 %v2448_v26  ;;  %vm2467_vm3 = vmor %vm2465_vm2, %vm2466_vm0  ;;  %vm2456_vm7 = vweird.f32 %v6953_v6  ;;  %vm2485_vm8 = vweird.f32 %v2448_v26 }
 0x484   :  { %v2461_v28 = vmul.f32 %v6951_v16, %v2460_v10  ;;  %vm2457_vm13 = vmor %vm2455_vm10, %vm2456_vm7  ;;  %v2098_v10 = vld [vmem:[#allocation4 + $0x60] sm:$0xff] }
 0x485   :  { %v2451_v27 = vmul.f32 %v6953_v6, %v2450_v39 }
 0x486   :  { %v2462_v45 = vmul.f32 0.5, %v2461_v28 }
 0x487   :  { %v2452_v59 = vmul.f32 0.5, %v2451_v27 }
 0x488   :  { %v6955_v57 = vpop.eup %6954  ;;  %v2463_v32 = vsub.f32 1.5, %v2462_v45  ;;  %v2103_v45 = vunpack.c.h.bf16 %v2098_v10 }
 0x489   :  { %v2470_v49 = vmul.f32 %v6955_v57, %v2447_v63  ;;  %v6957_v50 = vpop.eup %6956  ;;  %vm2476_vm1 = vweird.f32 %v6955_v57  ;;  %v2453_v24 = vsub.f32 1.5, %v2452_v59 }
 0x48a   :  { %v2480_v56 = vmul.f32 %v6957_v50, %v2448_v26  ;;  %v2464_v38 = vmul.f32 %v6951_v16, %v2463_v32  ;;  %vm2477_vm5 = vmor %vm2475_vm4, %vm2476_vm1  ;;  %vm2486_vm6 = vweird.f32 %v6957_v50  ;;  %v2107_v32 = vunpack.c.h.bf16 %v2100_v31 }
 0x48b   :  { %v2471_v48 = vmul.f32 %v6955_v57, %v2470_v49  ;;  %v2454_v7 = vmul.f32 %v6953_v6, %v2453_v24  ;;  %vm2487_vm9 = vmor %vm2485_vm8, %vm2486_vm6 }
 0x48c   :  { %v2481_v54 = vmul.f32 %v6957_v50, %v2480_v56  ;;  %v2468_v13 = vsel %vm2467_vm3, %v6951_v16, %v2464_v38 }
 0x48d   :  { %v2472_v4 = vmul.f32 0.5, %v2471_v48  ;;  %v2493_v60 = vrot.slane %v2468_v13, 7  ;;  %v2458_v18 = vsel %vm2457_vm13, %v6953_v6, %v2454_v7 }
 0x48e   :  { %v2482_v14 = vmul.f32 0.5, %v2481_v54 }
 0x48f   :  { %v2473_v23 = vsub.f32 1.5, %v2472_v4  ;;  %v2496_v52 = vsel %vm526_vm11, %v2458_v18, %v2493_v60 }
 0x490   :  { %v2483_v41 = vsub.f32 1.5, %v2482_v14 }
 0x491   :  { %v2474_v29 = vmul.f32 %v6955_v57, %v2473_v23 }
 0x492   :  { %v2484_v30 = vmul.f32 %v6957_v50, %v2483_v41 }
 0x493   :  { %v2478_v21 = vsel %vm2477_vm5, %v6955_v57, %v2474_v29 }
 0x494   :  { %v2494_v34 = vrot.slane %v2478_v21, 6  ;;  %v2488_v37 = vsel %vm2487_vm9, %v6957_v50, %v2484_v30 }
 0x495   :  { %v2495_v35 = vrot.slane %v2488_v37, 5  ;;  %v8282_v37 = vld [vmem:[#allocation4 + $0x78] sm:$0xff] }
 0x497   :  { %v2497_v9 = vsel %vm528_vm12, %v2494_v34, %v2495_v35 }
 0x498   :  { %v2498_v43 = vsel %vm530_vm14, %v2496_v52, %v2497_v9 }
 0x499   :  { %v2500_v55 = vmul.f32 %v7168_v22, %v2498_v43 }
 0x49b   :  { %v2502_v33 = vperm.slane %v2500_v55, 0  ;;  %v2503_v61 = vperm.slane %v2500_v55, 1  ;;  %v2504_v19 = vperm.slane %v2500_v55, 2  ;;  %v2505_v5 = vperm.slane %v2500_v55, 3 }
 0x49d   :  { %v2511_v40 = vmul.f32 %v2503_v61, %v8245_v36  ;;  %v2512_v0 = vmul.f32 %v2504_v19, %v8251_v47  ;;  %v2513_v46 = vmul.f32 %v2505_v5, %v8255_v42  ;;  %v2528_v62 = vmul.f32 %v2504_v19, %v8207_v17  ;;  %v7169_v36 = vld [vmem:[#allocation12] sm:$0xf] }
 0x49e   :  { %v2510_v63 = vmul.f32 %v2502_v33, %v8243_v3  ;;  %v2102_v47 = vunpack.c.l.bf16 %v2098_v10  ;;  %v2106_v42 = vunpack.c.l.bf16 %v2100_v31  ;;  %v2526_v17 = vmul.f32 %v2502_v33, %v8203_v1  ;;  %v6051_v31 = vld [vmem:[#allocation9 + $0xe0] sm:$0xf] }
 0x49f   :  { %v2518_v2 = vrot.slane %v2511_v40, 7  ;;  %v2519_v16 = vrot.slane %v2512_v0, 6  ;;  %v2520_v6 = vrot.slane %v2513_v46, 5  ;;  %v2527_v3 = vmul.f32 %v2503_v61, %v8205_v25 }
 0x4a0   :  { %v2530_v50 = vmul.f32 %v2502_v33, %v8215_v44  ;;  %v2531_v4 = vmul.f32 %v2503_v61, %v8217_v11  ;;  %v2532_v59 = vmul.f32 %v2504_v19, %v8231_v8  ;;  %v8279_v8 = vld [vmem:[#allocation4 + $0x68] sm:$0xff]  ;;  %v2529_v30 = vmul.f32 %v2505_v5, %v8209_v20 }
 0x4a1   :  { %v2521_v28 = vsel %vm526_vm11, %v2510_v63, %v2518_v2  ;;  %v2522_v26 = vsel %vm528_vm12, %v2519_v16, %v2520_v6  ;;  %v2105_v35 = vunpack.c.h.bf16 %v8279_v8  ;;  %v2533_v43 = vmul.f32 %v2505_v5, %v8233_v58 }
 0x4a2   :  { %v2523_v39 = vsel %vm530_vm14, %v2521_v28, %v2522_v26  ;;  %v2109_v33 = vunpack.c.h.bf16 %v8282_v37  ;;  %v6631_v28 = vld [vmem:[#allocation9 + $0xec] sm:$0xf0] }
 0x4a3   :  { %v2525_v57 = vsub.f32 %v7169_v36, %v2523_v39  ;;  %v6619_v36 = vld [vmem:[#allocation9 + $0x8c] sm:$0xf0] }
 0x4a5   :  { %v2535_v49 = vperm.slane %v2525_v57, 0  ;;  %v2536_v27 = vperm.slane %v2525_v57, 1  ;;  %v2537_v48 = vperm.slane %v2525_v57, 2  ;;  %v2538_v11 = vperm.slane %v2525_v57, 3 }
 0x4a7   :  { %v2543_v56 = vadd.f32 %v2535_v49, %v2526_v17  ;;  %v2544_v23 = vadd.f32 %v2536_v27, %v2527_v3  ;;  %v8275_v38 = vadd.f32 %v2537_v48, %v2528_v62  ;;  %v2547_v54 = vadd.f32 %v2535_v49, %v2530_v50 }
 0x4a8   :  { %v2548_v29 = vadd.f32 %v2536_v27, %v2531_v4  ;;  %v8277_v24 = vadd.f32 %v2537_v48, %v2532_v59  ;;  %v2546_v18 = vadd.f32 %v2538_v11, %v2529_v30  ;;  %v2550_v61 = vadd.f32 %v2538_v11, %v2533_v43  ;;  %v6059_v27 = vld [vmem:[#allocation9 + $0xe8] sm:$0xf]  ;;  %v6632_v48 = vld [vmem:[#allocation9 + $0xf4] sm:$0xf0]  ;;  %v6630_v59 = vld [vmem:[#allocation9 + $0xec] sm:$0xf] }
 0x4a9   :  { %v2551_v1 = vadd.f32 %v2543_v56, %v2102_v47  ;;  %v2552_v25 = vadd.f32 %v2544_v23, %v2103_v45  ;;  %v2555_v14 = vadd.f32 %v2547_v54, %v2106_v42  ;;  %v6629_v47 = vld [vmem:[#allocation9 + $0xe4] sm:$0xf]  ;;  %v6053_v45 = vld [vmem:[#allocation9 + $0xf0] sm:$0xf0]  ;;  %v6052_v49 = vor.u32 %v6631_v28, %v6051_v31  ;;  %v6061_v56 = vld [vmem:[#allocation9 + $0xf8] sm:$0xf0] }
 0x4aa   :  { %v2556_v13 = vadd.f32 %v2548_v29, %v2107_v32  ;;  %v2554_v20 = vadd.f32 %v2546_v18, %v2105_v35  ;;  %v8297_v5 = vadd.f32 %v2550_v61, %v2109_v33  ;;  %v6056_v50 = vor.u32 %v6629_v47, %v6053_v45  ;;  %v6625_v30 = vld [vmem:[#allocation9 + $0xc4] sm:$0xf]  ;;  %v6626_v33 = vld [vmem:[#allocation9 + $0xcc] sm:$0xf]  ;;  %v6611_v31 = vld [vmem:[#allocation9 + $0x4c] sm:$0xf0] }
 0x4ab   :  { %v5931_v21 = vmul.f32 -1.442695, %v2551_v1  ;;  %v5933_v41 = vmul.f32 -1.442695, %v2552_v25  ;;  %v5932_v7 = vmul.f32 -1.442695, %v2555_v14  ;;  %v6060_v4 = vor.u32 %v6632_v48, %v6059_v27  ;;  %2958 = vmatpush.bf16.msra.mxu0 %v6052_v49 }
 0x4ac   :  { %v5934_v44 = vmul.f32 -1.442695, %v2556_v13  ;;  %v6064_v25 = vor.u32 %v6630_v59, %v6061_v56  ;;  %v6035_v14 = vld [vmem:[#allocation9 + $0xc0] sm:$0xf]  ;;  %v6627_v13 = vld [vmem:[#allocation9 + $0xcc] sm:$0xf0]  ;;  %2972 = vmatpush.bf16.msra.mxu1 %v6056_v50 }
 0x4ad   :  { %6958 = vpow2.f32 %v5931_v21  ;;  %2986 = vmatpush.bf16.msra.mxu2 %v6060_v4  ;;  %v6036_v11 = vor.u32 %v6627_v13, %v6035_v14  ;;  %v6027_v49 = vld [vmem:[#allocation9 + $0xa8] sm:$0xf]  ;;  %v6624_v27 = vld [vmem:[#allocation9 + $0xb4] sm:$0xf0]  ;;  %v6622_v50 = vld [vmem:[#allocation9 + $0xac] sm:$0xf] }
 0x4ae   :  { %6960 = vpow2.f32 %v5932_v7  ;;  %3000 = vmatpush.bf16.msra.mxu3 %v6064_v25  ;;  %v6003_v4 = vld [vmem:[#allocation9 + $0x80] sm:$0xf]  ;;  %v6028_v54 = vor.u32 %v6624_v27, %v6027_v49 }
 0x4af   :  { %6962 = vpow2.f32 %v5933_v41  ;;  %2959 = vmatpush.bf16.msra.mxu0 %v6036_v11  ;;  %v6004_v13 = vor.u32 %v6619_v36, %v6003_v4  ;;  %v6618_v11 = vld [vmem:[#allocation9 + $0x8c] sm:$0xf]  ;;  %v5963_v36 = vld [vmem:[#allocation9 + $0x28] sm:$0xf] }
 0x4b0   :  { %6964 = vpow2.f32 %v5934_v44 }
 0x4b3   :  { %v6959_v60 = vpop.eup %6958 }
 0x4b4   :  { %v6961_v34 = vpop.eup %6960  ;;  %v2565_v52 = vadd.f32 1.0, %v6959_v60  ;;  %v6037_v60 = vld [vmem:[#allocation9 + $0xd0] sm:$0xf0] }
 0x4b5   :  { %v6963_v9 = vpop.eup %6962  ;;  %v8286_v22 = vadd.f32 1.0, %v6961_v34  ;;  %v6043_v34 = vld [vmem:[#allocation9 + $0xc8] sm:$0xf]  ;;  %v6040_v43 = vor.u32 %v6625_v30, %v6037_v60  ;;  %v6013_v60 = vld [vmem:[#allocation9 + $0x98] sm:$0xf0] }
 0x4b6   :  { %v6965_v55 = vpop.eup %6964  ;;  %6966 = vrcp.f32 %v2565_v52  ;;  %v2578_v19 = vand.u32 2147483648, %v2565_v52  ;;  %v8291_v0 = vadd.f32 1.0, %v6963_v9  ;;  %v2576_v62 = vand.u32 2147483647, %v2565_v52 }
 0x4b7   :  { %6968 = vrcp.f32 %v8286_v22  ;;  %v2593_v40 = vand.u32 2147483648, %v8286_v22  ;;  %v8293_v46 = vadd.f32 1.0, %v6965_v55  ;;  %v2591_v58 = vand.u32 2147483647, %v8286_v22  ;;  %v6628_v55 = vld [vmem:[#allocation9 + $0xd4] sm:$0xf0]  ;;  %2973 = vmatpush.bf16.msra.mxu1 %v6040_v43 }
 0x4b8   :  { %6970 = vrcp.f32 %v8291_v0  ;;  %v8299_v63 = vor.u32 1.1754944e-38, %v2578_v19  ;;  %v2618_v2 = vand.u32 2147483647, %v8291_v0  ;;  %vm2572_vm15 = vweird.f32 %v2565_v52 }
 0x4b9   :  { %6972 = vrcp.f32 %v8293_v46  ;;  %v8305_v6 = vor.u32 1.1754944e-38, %v2593_v40  ;;  %v2620_v10 = vand.u32 2147483648, %v8291_v0  ;;  %vm8312_vm1 = vcmp.eq.f32.partialorder %v2576_v62, 8.507059e+37  ;;  %v6045_v62 = vld [vmem:[#allocation9 + $0xd8] sm:$0xf0] }
 0x4ba   :  { %6974 = vtanh.f32 %v2554_v20  ;;  %vm2587_vm2 = vweird.f32 %v8286_v22  ;;  %v2633_v57 = vand.u32 2147483647, %v8293_v46  ;;  %vm8320_vm3 = vcmp.eq.f32.partialorder %v2591_v58, 8.507059e+37  ;;  %v6019_v58 = vld [vmem:[#allocation9 + $0xa0] sm:$0xf] }
 0x4bb   :  { %vm2614_vm4 = vweird.f32 %v8291_v0  ;;  %v2635_v3 = vand.u32 2147483648, %v8293_v46  ;;  %v8336_v1 = vor.u32 1.1754944e-38, %v2620_v10  ;;  %vm2629_vm7 = vweird.f32 %v8293_v46 }
 0x4bc   :  { %v8303_v16 = vpop.eup %6966  ;;  %vm8345_vm9 = vcmp.eq.f32.partialorder %v2618_v2, 8.507059e+37  ;;  %v6044_v40 = vor.u32 %v6628_v55, %v6043_v34  ;;  %v6048_v28 = vor.u32 %v6626_v33, %v6045_v62  ;;  %6976 = vtanh.f32 %v8297_v5  ;;  %v6029_v5 = vld [vmem:[#allocation9 + $0xb8] sm:$0xf0]  ;;  %v5987_v34 = vld [vmem:[#allocation9 + $0x60] sm:$0xf] }
 0x4bd   :  { %v8308_v26 = vpop.eup %6968  ;;  %v2568_v39 = vmul.f32 %v8303_v16, %v2565_v52  ;;  %vm2573_vm0 = vweird.f32 %v8303_v16  ;;  %v6032_v14 = vor.u32 %v6622_v50, %v6029_v5  ;;  %v6016_v43 = vor.u32 %v6618_v11, %v6013_v60  ;;  %v5989_v55 = vld [vmem:[#allocation9 + $0x70] sm:$0xf0]  ;;  %v5995_v33 = vld [vmem:[#allocation9 + $0x68] sm:$0xf]  ;;  %v5997_v62 = vld [vmem:[#allocation9 + $0x78] sm:$0xf0] }
 0x4be   :  { %v2583_v42 = vmul.f32 %v8308_v26, %v8286_v22  ;;  %vm2588_vm5 = vweird.f32 %v8308_v26  ;;  %v8327_v23 = vpop.eup %6970  ;;  %vm8332_vm6 = vmor %vm2572_vm15, %vm2573_vm0  ;;  %vm8372_vm0 = vcmp.eq.f32.partialorder %v2633_v57, 8.507059e+37  ;;  %v6621_v57 = vld [vmem:[#allocation9 + $0xa4] sm:$0xf]  ;;  %2987 = vmatpush.bf16.msra.mxu2 %v6044_v40  ;;  %3001 = vmatpush.bf16.msra.mxu3 %v6048_v28  ;;  %v6614_v40 = vld [vmem:[#allocation9 + $0x6c] sm:$0xf] }
 0x4bf   :  { %v2569_v32 = vsub.f32 1.0, %v2568_v39  ;;  %v8339_v21 = vpop.eup %6972  ;;  %v2610_v7 = vmul.f32 %v8327_v23, %v8291_v0  ;;  %vm2615_vm8 = vweird.f32 %v8327_v23  ;;  %vm8356_vm10 = vmor %vm2587_vm2, %vm2588_vm5  ;;  %v2636_v0 = vor.u32 1.1754944e-38, %v2635_v3  ;;  %v6623_v39 = vld [vmem:[#allocation9 + $0xac] sm:$0xf0]  ;;  %v6609_v28 = vld [vmem:[#allocation9 + $0x44] sm:$0xf] }
 0x4c0   :  { %v2584_v29 = vsub.f32 1.0, %v2583_v42  ;;  %v8349_v35 = vpop.eup %6974  ;;  %v2625_v9 = vmul.f32 %v8339_v21, %v8293_v46  ;;  %vm2630_vm13 = vweird.f32 %v8339_v21  ;;  %vm8368_vm15 = vmor %vm2614_vm4, %vm2615_vm8  ;;  %v6020_v46 = vor.u32 %v6623_v39, %v6019_v58  ;;  %v6021_v42 = vld [vmem:[#allocation9 + $0xb0] sm:$0xf0]  ;;  %v6605_v50 = vld [vmem:[#allocation9 + $0x24] sm:$0xf] }
 0x4c1   :  { %v2570_v41 = vmul.f32 %v8303_v16, %v2569_v32  ;;  %v2611_v19 = vsub.f32 1.0, %v2610_v7  ;;  %vm8379_vm2 = vmor %vm2629_vm7, %vm2630_vm13  ;;  %v6024_v32 = vor.u32 %v6621_v57, %v6021_v42  ;;  %v6620_v7 = vld [vmem:[#allocation9 + $0x94] sm:$0xf0]  ;;  %v6000_v20 = vor.u32 %v6614_v40, %v5997_v62  ;;  %v5979_v57 = vld [vmem:[#allocation9 + $0x48] sm:$0xf] }
 0x4c2   :  { %v2585_v18 = vmul.f32 %v8308_v26, %v2584_v29  ;;  %v2626_v10 = vsub.f32 1.0, %v2625_v9  ;;  %v6005_v29 = vld [vmem:[#allocation9 + $0x90] sm:$0xf0]  ;;  %2960 = vmatpush.bf16.msra.mxu0 %v6020_v46  ;;  %2988 = vmatpush.bf16.msra.mxu2 %v6028_v54  ;;  %v5981_v46 = vld [vmem:[#allocation9 + $0x58] sm:$0xf0] }
 0x4c3   :  { %v2571_v61 = vadd.f32 %v8303_v16, %v2570_v41  ;;  %v2612_v45 = vmul.f32 %v8327_v23, %v2611_v19  ;;  %v6011_v41 = vld [vmem:[#allocation9 + $0x88] sm:$0xf]  ;;  %2974 = vmatpush.bf16.msra.mxu1 %v6024_v32  ;;  %3002 = vmatpush.bf16.msra.mxu3 %v6032_v14  ;;  %v6607_v32 = vld [vmem:[#allocation9 + $0x2c] sm:$0xf0]  ;;  %v5957_v54 = vld [vmem:[#allocation9 + $0x30] sm:$0xf0] }
 0x4c4   :  { %v2586_v2 = vadd.f32 %v8308_v26, %v2585_v18  ;;  %v6012_v30 = vor.u32 %v6620_v7, %v6011_v41  ;;  %v6615_v18 = vld [vmem:[#allocation9 + $0x6c] sm:$0xf0]  ;;  %v5939_v41 = vld [vmem:[#allocation9] sm:$0xf]  ;;  %v5960_v7 = vor.u32 %v6605_v50, %v5957_v54 }
 0x4c5   :  { %v2575_v47 = vsel %vm8332_vm6, %v8303_v16, %v2571_v61  ;;  %v2627_v16 = vmul.f32 %v8339_v21, %v2626_v10  ;;  %v2613_v56 = vadd.f32 %v8327_v23, %v2612_v45  ;;  %v6977_v61 = vpop.eup %6976  ;;  %v5971_v10 = vld [vmem:[#allocation9 + $0x40] sm:$0xf]  ;;  %v6610_v45 = vld [vmem:[#allocation9 + $0x4c] sm:$0xf] }
 0x4c6   :  { %v2580_v3 = vsel %vm8312_vm1, %v8299_v63, %v2575_v47  ;;  %v2590_v48 = vsel %vm8356_vm10, %v8308_v26, %v2586_v2  ;;  %v6617_v63 = vld [vmem:[#allocation9 + $0x84] sm:$0xf]  ;;  %2961 = vmatpush.bf16.msra.mxu0 %v6004_v13  ;;  %2989 = vmatpush.bf16.msra.mxu2 %v6012_v30  ;;  %v5972_v49 = vor.u32 %v6611_v31, %v5971_v10  ;;  %v5941_v30 = vld [vmem:[#allocation9 + $0x10] sm:$0xf0] }
 0x4c7   :  { %v2595_v59 = vsel %vm8320_vm3, %v8305_v6, %v2590_v48  ;;  %v2599_v25 = vmul.f32 %v2580_v3, %v8176_v51  ;;  %v2628_v26 = vadd.f32 %v8339_v21, %v2627_v16  ;;  %v2617_v6 = vsel %vm8368_vm15, %v8327_v23, %v2613_v56  ;;  %v6613_v23 = vld [vmem:[#allocation9 + $0x64] sm:$0xf]  ;;  %3003 = vmatpush.bf16.msra.mxu3 %v6016_v43  ;;  %v5955_v16 = vld [vmem:[#allocation9 + $0x20] sm:$0xf]  ;;  %v6602_v43 = vld [vmem:[#allocation9 + $0xc] sm:$0xf] }
 0x4c8   :  { %v6008_v17 = vor.u32 %v6617_v63, %v6005_v29  ;;  %v2600_v51 = vmul.f32 %v2595_v59, %v8179_v12  ;;  %v2622_v52 = vsel %vm8345_vm9, %v8336_v1, %v2617_v6  ;;  %v6616_v12 = vld [vmem:[#allocation9 + $0x74] sm:$0xf0]  ;;  %v5988_v1 = vor.u32 %v6615_v18, %v5987_v34  ;;  %v6606_v29 = vld [vmem:[#allocation9 + $0x2c] sm:$0xf]  ;;  %v6603_v6 = vld [vmem:[#allocation9 + $0xc] sm:$0xf0] }
 0x4c9   :  { %v2632_v9 = vsel %vm8379_vm2, %v8339_v21, %v2628_v26  ;;  %v2641_v22 = vmul.f32 %v8349_v35, %v2622_v52  ;;  %v5992_v21 = vor.u32 %v6613_v23, %v5989_v55  ;;  %v5996_v2 = vor.u32 %v6616_v12, %v5995_v33  ;;  %v6612_v35 = vld [vmem:[#allocation9 + $0x54] sm:$0xf0]  ;;  %v5949_v23 = vld [vmem:[#allocation9 + $0x18] sm:$0xf0] }
 0x4ca   :  { %v2637_v19 = vsel %vm8372_vm0, %v2636_v0, %v2632_v9  ;;  %2975 = vmatpush.bf16.msra.mxu1 %v6008_v17  ;;  %v5973_v0 = vld [vmem:[#allocation9 + $0x50] sm:$0xf0]  ;;  %2962 = vmatpush.bf16.msra.mxu0 %v5988_v1  ;;  %v5980_v48 = vor.u32 %v6612_v35, %v5979_v57  ;;  %v5984_v56 = vor.u32 %v6610_v45, %v5981_v46  ;;  %v6608_v63 = vld [vmem:[#allocation9 + $0x34] sm:$0xf0]  ;;  %v6601_v17 = vld [vmem:[#allocation9 + $0x4] sm:$0xf]  ;;  %v2104_v9 = vunpack.c.l.bf16 %v8279_v8 }
 0x4cb   :  { %v2642_v44 = vmul.f32 %v6977_v61, %v2637_v19  ;;  %v2643_v58 = vadd.f32 %v2641_v22, %v2599_v25  ;;  %2990 = vmatpush.bf16.msra.mxu2 %v5996_v2  ;;  %v5976_v3 = vor.u32 %v6609_v28, %v5973_v0  ;;  %3004 = vmatpush.bf16.msra.mxu3 %v6000_v20  ;;  %v5965_v25 = vld [vmem:[#allocation9 + $0x38] sm:$0xf0]  ;;  %v6604_v52 = vld [vmem:[#allocation9 + $0x14] sm:$0xf0]  ;;  %v2108_v55 = vunpack.c.l.bf16 %v8282_v37 }
 0x4cc   :  { %v5956_v13 = vor.u32 %v6607_v32, %v5955_v16  ;;  %v5964_v11 = vor.u32 %v6608_v63, %v5963_v36  ;;  %v5968_v18 = vor.u32 %v6606_v29, %v5965_v25  ;;  %v5940_v61 = vor.u32 %v6603_v6, %v5939_v41  ;;  %v7170_v36 = vld [vmem:[%s9315_s6] sm:$0x1] }
 0x4cd   :  { %v2644_v39 = vadd.f32 %v2642_v44, %v2600_v51  ;;  %v8415_v47 = vmul.f32 %v2643_v58, %v7645_v53  ;;  %v5947_v51 = vld [vmem:[#allocation9 + $0x8] sm:$0xf]  ;;  %v5944_v22 = vor.u32 %v6601_v17, %v5941_v30  ;;  %v5952_v62 = vor.u32 %v6602_v43, %v5949_v23 }
 0x4ce   :  { %2976 = vmatpush.bf16.msra.mxu1 %v5992_v21  ;;  %2963 = vmatpush.bf16.msra.mxu0 %v5972_v49  ;;  %v5948_v12 = vor.u32 %v6604_v52, %v5947_v51  ;;  %v2553_v1 = vadd.f32 %v8275_v38, %v2104_v9  ;;  %v2557_v8 = vadd.f32 %v8277_v24, %v2108_v55 }
 0x4cf   :  { %v8418_v42 = vmul.f32 %v2644_v39, %v7695_v15  ;;  %v2655_v27 = vmul.f32 %v8415_v47, %v8415_v47  ;;  %2991 = vmatpush.bf16.msra.mxu2 %v5980_v48  ;;  %3005 = vmatpush.bf16.msra.mxu3 %v5984_v56 }
 0x4d0   :  { %v5935_v10 = vmul.f32 -1.442695, %v2553_v1  ;;  %v5936_v31 = vmul.f32 -1.442695, %v2557_v8 }
 0x4d1   :  { %v2647_v5 = vadd.f32 %v8418_v42, %v8415_v47  ;;  %v2656_v4 = vmul.f32 %v8418_v42, %v8418_v42  ;;  %v6767_v59 = vpack.c.bf16 %v8418_v42, %v8415_v47 }
 0x4d2   :  { %2977 = vmatpush.bf16.msra.mxu1 %v5976_v3  ;;  %2964 = vmatpush.bf16.msra.mxu0 %v5956_v13  ;;  %6978 = vpow2.f32 %v5935_v10  ;;  %v7171_v13 = vld [vmem:[%s9316_s7] sm:$0x1] }
 0x4d3   :  { %v2648_v26 = vrot.slane %v2647_v5, 4  ;;  %v2657_v14 = vadd.f32 %v2656_v4, %v2655_v27  ;;  %6768 = vst [vmem:[#allocation14 + $0x18] sm:$0xff] %v6767_v59   ;;  %2992 = vmatpush.bf16.msra.mxu2 %v5964_v11  ;;  %3006 = vmatpush.bf16.msra.mxu3 %v5968_v18  ;;  %6980 = vpow2.f32 %v5936_v31 }
 0x4d5   :  { %v2649_v60 = vadd.f32 %v2648_v26, %v2647_v5  ;;  %v2658_v34 = vrot.slane %v2657_v14, 4 }
 0x4d6   :  { %2978 = vmatpush.bf16.msra.mxu1 %v5960_v7  ;;  %2965 = vmatpush.bf16.msra.mxu0 %v5940_v61 }
 0x4d7   :  { %v2659_v33 = vadd.f32 %v2658_v34, %v2657_v14  ;;  %v2650_v19 = vrot.slane %v2649_v60, 2  ;;  %2993 = vmatpush.bf16.msra.mxu2 %v5948_v12  ;;  %3007 = vmatpush.bf16.msra.mxu3 %v5952_v62 }
 0x4d8   :  { %v6979_v24 = vpop.eup %6978 }
 0x4d9   :  { %v2660_v40 = vrot.slane %v2659_v33, 2  ;;  %v2651_v44 = vadd.f32 %v2650_v19, %v2649_v60  ;;  %v6981_v45 = vpop.eup %6980  ;;  %v2698_v46 = vadd.f32 1.0, %v6979_v24 }
 0x4da   :  { %2979 = vmatpush.bf16.msra.mxu1 %v5944_v22  ;;  %v2699_v49 = vadd.f32 1.0, %v6981_v45 }
 0x4db   :  { %v2661_v58 = vadd.f32 %v2660_v40, %v2659_v33  ;;  %v2652_v21 = vrot.slane %v2651_v44, 1  ;;  %v2711_v51 = vand.u32 2147483648, %v2698_v46  ;;  %vm2705_vm7 = vweird.f32 %v2698_v46 }
 0x4dc   :  { %v2709_v9 = vand.u32 2147483647, %v2698_v46  ;;  %v2726_v43 = vand.u32 2147483648, %v2699_v49  ;;  %vm2720_vm9 = vweird.f32 %v2699_v49  ;;  %v2724_v23 = vand.u32 2147483647, %v2699_v49 }
 0x4dd   :  { %v2653_v37 = vadd.f32 %v2652_v21, %v2651_v44  ;;  %v2662_v2 = vrot.slane %v2661_v58, 1  ;;  %v2712_v33 = vor.u32 1.1754944e-38, %v2711_v51 }
 0x4de   :  { %vm2710_vm13 = vcmp.eq.f32.partialorder %v2709_v9, 8.507059e+37  ;;  %v2727_v19 = vor.u32 1.1754944e-38, %v2726_v43  ;;  %vm2725_vm15 = vcmp.eq.f32.partialorder %v2724_v23, 8.507059e+37 }
 0x4df   :  { %v2654_v28 = vmul.f32 0.5, %v2653_v37  ;;  %v2663_v39 = vadd.f32 %v2662_v2, %v2661_v58 }
 0x4e1   :  { %v2664_v20 = vmul.f32 0.5, %v2663_v39  ;;  %v2665_v0 = vmul.f32 %v2654_v28, %v2654_v28 }
 0x4e3   :  { %v2666_v57 = vsub.f32 %v2664_v20, %v2665_v0 }
 0x4e5   :  { %v2667_v38 = vmax.f32 %v2666_v57, 0.0 }
 0x4e7   :  { %v2668_v35 = vadd.f32 1e-05, %v2667_v38 }
 0x4e9   :  { %6982 = vrsqrt.f32 %v2668_v35  ;;  %vm2675_vm3 = vweird.f32 %v2668_v35 }
 0x4ea   :  { %6984 = vrcp.f32 %v2698_v46 }
 0x4eb   :  { %6986 = vrcp.f32 %v2699_v49 }
 0x4ef   :  { %v6983_v27 = vpop.eup %6982 }
 0x4f0   :  { %v2670_v3 = vmul.f32 %v6983_v27, %v2668_v35  ;;  %v6985_v32 = vpop.eup %6984  ;;  %vm2676_vm1 = vweird.f32 %v6983_v27 }
 0x4f1   :  { %v6987_v50 = vpop.eup %6986  ;;  %v2701_v59 = vmul.f32 %v6985_v32, %v2698_v46  ;;  %vm2677_vm4 = vmor %vm2675_vm3, %vm2676_vm1  ;;  %vm2706_vm5 = vweird.f32 %v6985_v32 }
 0x4f2   :  { %v2671_v48 = vmul.f32 %v6983_v27, %v2670_v3  ;;  %v2716_v56 = vmul.f32 %v6987_v50, %v2699_v49  ;;  %vm2721_vm6 = vweird.f32 %v6987_v50  ;;  %vm2707_vm8 = vmor %vm2705_vm7, %vm2706_vm5 }
 0x4f3   :  { %v2702_v29 = vsub.f32 1.0, %v2701_v59  ;;  %vm2722_vm10 = vmor %vm2720_vm9, %vm2721_vm6 }
 0x4f4   :  { %v2672_v16 = vmul.f32 0.5, %v2671_v48  ;;  %v2717_v14 = vsub.f32 1.0, %v2716_v56 }
 0x4f5   :  { %v2703_v7 = vmul.f32 %v6985_v32, %v2702_v29 }
 0x4f6   :  { %v2673_v5 = vsub.f32 1.5, %v2672_v16  ;;  %v2718_v30 = vmul.f32 %v6987_v50, %v2717_v14 }
 0x4f7   :  { %v2704_v18 = vadd.f32 %v6985_v32, %v2703_v7 }
 0x4f8   :  { %v2674_v4 = vmul.f32 %v6983_v27, %v2673_v5  ;;  %v2719_v52 = vadd.f32 %v6987_v50, %v2718_v30 }
 0x4f9   :  { %v2708_v55 = vsel %vm2707_vm8, %v6985_v32, %v2704_v18 }
 0x4fa   :  { %v2678_v54 = vsel %vm2677_vm4, %v6983_v27, %v2674_v4  ;;  %v2723_v61 = vsel %vm2722_vm10, %v6987_v50, %v2719_v52  ;;  %v2713_v12 = vsel %vm2710_vm13, %v2712_v33, %v2708_v55 }
 0x4fb   :  { %v2679_v63 = vmul.f32 %v7170_v36, %v2678_v54  ;;  %v2728_v62 = vsel %vm2725_vm15, %v2727_v19, %v2723_v61 }
 0x4fd   :  { %v2680_v25 = vmul.f32 %v2679_v63, %v2654_v28  ;;  %v2683_v26 = vperm.slane %v2679_v63, 0 }
 0x4ff   :  { %v2681_v41 = vsub.f32 %v7171_v13, %v2680_v25  ;;  %v2685_v11 = vmul.f32 %v2683_v26, %v8415_v47  ;;  %v2686_v6 = vmul.f32 %v2683_v26, %v8418_v42 }
 0x501   :  { %v2688_v17 = vperm.slane %v2681_v41, 0 }
 0x503   :  { %v2690_v60 = vadd.f32 %v2688_v17, %v2685_v11  ;;  %v2691_v34 = vadd.f32 %v2688_v17, %v2686_v6 }
 0x505   :  { %6988 = vtanh.f32 %v2690_v60 }
 0x506   :  { %6990 = vtanh.f32 %v2691_v34 }
 0x50b   :  { %v6989_v22 = vpop.eup %6988 }
 0x50c   :  { %v6991_v40 = vpop.eup %6990  ;;  %v2732_v44 = vmul.f32 %v6989_v22, %v2713_v12 }
 0x50d   :  { %v2733_v1 = vmul.f32 %v6991_v40, %v2728_v62 }
 0x50e   :  { %v2734_v8 = vmul.f32 %v2732_v44, %v7645_v53 }
 0x50f   :  { %v2735_v58 = vmul.f32 %v2733_v1, %v7695_v15 }
 0x511   :  { %v6762_v21 = vpack.c.bf16 %v2735_v58, %v2734_v8 }
 0x513   :  { %6763 = vst [vmem:[#allocation13 + $0x18] sm:$0xff] %v6762_v21   ;;  %2966 = vmatmul.bf16.vlgmr.msra.gmra.mxu0 %v6762_v21  ;;  %2980 = vmatmul.bf16.vlgmr.msra.gmra.mxu1 %v6762_v21 }
 0x514   :  { %2994 = vmatmul.bf16.vlgmr.msra.gmra.mxu2 %v6762_v21  ;;  %3008 = vmatmul.bf16.vlgmr.msra.gmra.mxu3 %v6762_v21 }
 0x590   :  { %v8442_v37 = vpop.f32.mrf.mxu0  ;;  %v8444_v2 = vpop.f32.mrf.mxu1 }
 0x591   :  { %v3046_v28 = vmul.f32 %v8442_v37, %v8442_v37  ;;  %v3047_v39 = vmul.f32 %v8444_v2, %v8444_v2 }
 0x597   :  { %v8446_v10 = vpop.f32.mrf.mxu2  ;;  %v8448_v31 = vpop.f32.mrf.mxu3 }
 0x598   :  { %v8454_v20 = vpop.f32.mrf.mxu0  ;;  %v8456_v0 = vpop.f32.mrf.mxu1  ;;  %v3048_v50 = vmul.f32 %v8446_v10, %v8446_v10  ;;  %v3049_v5 = vmul.f32 %v8448_v31, %v8448_v31 }
 0x599   :  { %v3014_v57 = vadd.f32 %v8454_v20, %v8442_v37  ;;  %v3050_v38 = vmul.f32 %v8454_v20, %v8454_v20  ;;  %v3021_v35 = vadd.f32 %v8456_v0, %v8444_v2  ;;  %v3051_v24 = vmul.f32 %v8456_v0, %v8456_v0 }
 0x59b   :  { %v3015_v45 = vrot.slane %v3014_v57, 4  ;;  %v3054_v46 = vadd.f32 %v3050_v38, %v3046_v28  ;;  %v3022_v49 = vrot.slane %v3021_v35, 4  ;;  %v3061_v27 = vadd.f32 %v3051_v24, %v3047_v39 }
 0x59d   :  { %v3016_v3 = vadd.f32 %v3015_v45, %v3014_v57  ;;  %v3055_v48 = vrot.slane %v3054_v46, 4  ;;  %v3023_v16 = vadd.f32 %v3022_v49, %v3021_v35  ;;  %v3062_v32 = vrot.slane %v3061_v27, 4 }
 0x59f   :  { %v3017_v4 = vrot.slane %v3016_v3, 2  ;;  %v3056_v59 = vadd.f32 %v3055_v48, %v3054_v46  ;;  %v3024_v56 = vrot.slane %v3023_v16, 2  ;;  %v3063_v54 = vadd.f32 %v3062_v32, %v3061_v27  ;;  %v8470_v36 = vpop.f32.mrf.mxu2  ;;  %v8472_v63 = vpop.f32.mrf.mxu3 }
 0x5a0   :  { %v3028_v29 = vadd.f32 %v8470_v36, %v8446_v10  ;;  %v3052_v25 = vmul.f32 %v8470_v36, %v8470_v36  ;;  %v3035_v26 = vadd.f32 %v8472_v63, %v8448_v31  ;;  %v3053_v14 = vmul.f32 %v8472_v63, %v8472_v63 }
 0x5a1   :  { %v3018_v13 = vadd.f32 %v3017_v4, %v3016_v3  ;;  %v3057_v41 = vrot.slane %v3056_v59, 2  ;;  %v3025_v7 = vadd.f32 %v3024_v56, %v3023_v16  ;;  %v3064_v11 = vrot.slane %v3063_v54, 2 }
 0x5a2   :  { %v3029_v6 = vrot.slane %v3028_v29, 4  ;;  %v3068_v17 = vadd.f32 %v3052_v25, %v3048_v50  ;;  %v3036_v30 = vrot.slane %v3035_v26, 4  ;;  %v3075_v60 = vadd.f32 %v3053_v14, %v3049_v5 }
 0x5a3   :  { %v3019_v34 = vrot.slane %v3018_v13, 1  ;;  %v3058_v18 = vadd.f32 %v3057_v41, %v3056_v59  ;;  %v3026_v51 = vrot.slane %v3025_v7, 1  ;;  %v3065_v52 = vadd.f32 %v3064_v11, %v3063_v54 }
 0x5a4   :  { %v3030_v9 = vadd.f32 %v3029_v6, %v3028_v29  ;;  %v3069_v43 = vrot.slane %v3068_v17, 4  ;;  %v3037_v23 = vadd.f32 %v3036_v30, %v3035_v26  ;;  %v3076_v55 = vrot.slane %v3075_v60, 4 }
 0x5a5   :  { %v3020_v33 = vadd.f32 %v3019_v34, %v3018_v13  ;;  %v3059_v61 = vrot.slane %v3058_v18, 1  ;;  %v3027_v19 = vadd.f32 %v3026_v51, %v3025_v7  ;;  %v3066_v22 = vrot.slane %v3065_v52, 1 }
 0x5a6   :  { %v3031_v12 = vrot.slane %v3030_v9, 2  ;;  %v3070_v40 = vadd.f32 %v3069_v43, %v3068_v17  ;;  %v3038_v62 = vrot.slane %v3037_v23, 2  ;;  %v3077_v44 = vadd.f32 %v3076_v55, %v3075_v60 }
 0x5a7   :  { %v8482_v1 = vmul.f32 0.5, %v3020_v33  ;;  %v3060_v8 = vadd.f32 %v3059_v61, %v3058_v18  ;;  %v8484_v58 = vmul.f32 0.5, %v3027_v19  ;;  %v3067_v21 = vadd.f32 %v3066_v22, %v3065_v52 }
 0x5a8   :  { %v3032_v28 = vadd.f32 %v3031_v12, %v3030_v9  ;;  %v3071_v39 = vrot.slane %v3070_v40, 2  ;;  %v3039_v57 = vadd.f32 %v3038_v62, %v3037_v23  ;;  %v3078_v38 = vrot.slane %v3077_v44, 2 }
 0x5a9   :  { %v3082_v35 = vmul.f32 0.5, %v3060_v8  ;;  %v3086_v24 = vmul.f32 %v8482_v1, %v8482_v1  ;;  %v3083_v45 = vmul.f32 0.5, %v3067_v21  ;;  %v3087_v46 = vmul.f32 %v8484_v58, %v8484_v58 }
 0x5aa   :  { %v3033_v49 = vrot.slane %v3032_v28, 1  ;;  %v3072_v27 = vadd.f32 %v3071_v39, %v3070_v40  ;;  %v3040_v16 = vrot.slane %v3039_v57, 1  ;;  %v3079_v32 = vadd.f32 %v3078_v38, %v3077_v44 }
 0x5ab   :  { %v3090_v3 = vsub.f32 %v3082_v35, %v3086_v24  ;;  %v3091_v48 = vsub.f32 %v3083_v45, %v3087_v46 }
 0x5ac   :  { %v3034_v50 = vadd.f32 %v3033_v49, %v3032_v28  ;;  %v3073_v5 = vrot.slane %v3072_v27, 1  ;;  %v3041_v26 = vadd.f32 %v3040_v16, %v3039_v57  ;;  %v3080_v14 = vrot.slane %v3079_v32, 1 }
 0x5ad   :  { %v3094_v4 = vmax.f32 %v3090_v3, 0.0  ;;  %v3095_v59 = vmax.f32 %v3091_v48, 0.0 }
 0x5ae   :  { %v8490_v56 = vmul.f32 0.5, %v3034_v50  ;;  %v3074_v54 = vadd.f32 %v3073_v5, %v3072_v27  ;;  %v8494_v7 = vmul.f32 0.5, %v3041_v26  ;;  %v3081_v6 = vadd.f32 %v3080_v14, %v3079_v32  ;;  %v7172_v26 = vld [vmem:[#allocation10] sm:$0xf] }
 0x5af   :  { %v3098_v29 = vadd.f32 1e-05, %v3094_v4  ;;  %v3099_v25 = vadd.f32 1e-05, %v3095_v59 }
 0x5b0   :  { %v3084_v13 = vmul.f32 0.5, %v3074_v54  ;;  %v3088_v41 = vmul.f32 %v8490_v56, %v8490_v56  ;;  %v3089_v17 = vmul.f32 %v8494_v7, %v8494_v7  ;;  %v3085_v60 = vmul.f32 0.5, %v3081_v6 }
 0x5b1   :  { %6992 = vrsqrt.f32 %v3099_v25  ;;  %vm3118_vm1 = vweird.f32 %v3099_v25  ;;  %vm3108_vm10 = vweird.f32 %v3098_v29 }
 0x5b2   :  { %v3092_v11 = vsub.f32 %v3084_v13, %v3088_v41  ;;  %6994 = vrsqrt.f32 %v3098_v29  ;;  %v3093_v18 = vsub.f32 %v3085_v60, %v3089_v17 }
 0x5b4   :  { %v3096_v30 = vmax.f32 %v3092_v11, 0.0  ;;  %v3097_v43 = vmax.f32 %v3093_v18, 0.0 }
 0x5b6   :  { %v3100_v34 = vadd.f32 1e-05, %v3096_v30  ;;  %v3101_v55 = vadd.f32 1e-05, %v3097_v43  ;;  %v2753_v43 = vld [vmem:[#allocation4 + $0x90] sm:$0xff] }
 0x5b7   :  { %v6993_v51 = vpop.eup %6992 }
 0x5b8   :  { %6996 = vrsqrt.f32 %v3100_v34  ;;  %v6995_v52 = vpop.eup %6994  ;;  %v3113_v9 = vmul.f32 %v6993_v51, %v3099_v25  ;;  %vm3119_vm0 = vweird.f32 %v6993_v51  ;;  %vm3128_vm4 = vweird.f32 %v3100_v34 }
 0x5b9   :  { %v3103_v33 = vmul.f32 %v6995_v52, %v3098_v29  ;;  %6998 = vrsqrt.f32 %v3101_v55  ;;  %vm3120_vm3 = vmor %vm3118_vm1, %vm3119_vm0  ;;  %vm3109_vm7 = vweird.f32 %v6995_v52  ;;  %vm3138_vm8 = vweird.f32 %v3101_v55 }
 0x5ba   :  { %v3114_v23 = vmul.f32 %v6993_v51, %v3113_v9  ;;  %vm3110_vm13 = vmor %vm3108_vm10, %vm3109_vm7  ;;  %v2751_v9 = vld [vmem:[#allocation4 + $0x80] sm:$0xff] }
 0x5bb   :  { %v3104_v12 = vmul.f32 %v6995_v52, %v3103_v33 }
 0x5bc   :  { %v3115_v19 = vmul.f32 0.5, %v3114_v23 }
 0x5bd   :  { %v3105_v21 = vmul.f32 0.5, %v3104_v12 }
 0x5be   :  { %v6997_v61 = vpop.eup %6996  ;;  %v3116_v62 = vsub.f32 1.5, %v3115_v19  ;;  %v2756_v19 = vunpack.c.h.bf16 %v2751_v9 }
 0x5bf   :  { %v3123_v22 = vmul.f32 %v6997_v61, %v3100_v34  ;;  %v6999_v44 = vpop.eup %6998  ;;  %vm3129_vm2 = vweird.f32 %v6997_v61  ;;  %v3106_v24 = vsub.f32 1.5, %v3105_v21 }
 0x5c0   :  { %v3133_v28 = vmul.f32 %v6999_v44, %v3101_v55  ;;  %v3117_v57 = vmul.f32 %v6993_v51, %v3116_v62  ;;  %vm3130_vm5 = vmor %vm3128_vm4, %vm3129_vm2  ;;  %vm3139_vm6 = vweird.f32 %v6999_v44  ;;  %v2760_v62 = vunpack.c.h.bf16 %v2753_v43 }
 0x5c1   :  { %v3124_v40 = vmul.f32 %v6997_v61, %v3123_v22  ;;  %v3107_v3 = vmul.f32 %v6995_v52, %v3106_v24  ;;  %vm3140_vm9 = vmor %vm3138_vm8, %vm3139_vm6 }
 0x5c2   :  { %v3134_v38 = vmul.f32 %v6999_v44, %v3133_v28  ;;  %v3121_v46 = vsel %vm3120_vm3, %v6993_v51, %v3117_v57 }
 0x5c3   :  { %v3125_v8 = vmul.f32 0.5, %v3124_v40  ;;  %v3146_v16 = vrot.slane %v3121_v46, 7  ;;  %v3111_v4 = vsel %vm3110_vm13, %v6995_v52, %v3107_v3 }
 0x5c4   :  { %v3135_v45 = vmul.f32 0.5, %v3134_v38 }
 0x5c5   :  { %v3126_v39 = vsub.f32 1.5, %v3125_v8  ;;  %v3149_v59 = vsel %vm526_vm11, %v3111_v4, %v3146_v16 }
 0x5c6   :  { %v3136_v27 = vsub.f32 1.5, %v3135_v45 }
 0x5c7   :  { %v3127_v35 = vmul.f32 %v6997_v61, %v3126_v39 }
 0x5c8   :  { %v3137_v48 = vmul.f32 %v6999_v44, %v3136_v27 }
 0x5c9   :  { %v3131_v49 = vsel %vm3130_vm5, %v6997_v61, %v3127_v35 }
 0x5ca   :  { %v3147_v32 = vrot.slane %v3131_v49, 6  ;;  %v3141_v50 = vsel %vm3140_vm9, %v6999_v44, %v3137_v48 }
 0x5cb   :  { %v3148_v5 = vrot.slane %v3141_v50, 5  ;;  %v8521_v50 = vld [vmem:[#allocation4 + $0x98] sm:$0xff] }
 0x5cd   :  { %v3150_v54 = vsel %vm528_vm12, %v3147_v32, %v3148_v5 }
 0x5ce   :  { %v3151_v25 = vsel %vm530_vm14, %v3149_v59, %v3150_v54 }
 0x5cf   :  { %v3153_v14 = vmul.f32 %v7172_v26, %v3151_v25 }
 0x5d1   :  { %v3155_v13 = vperm.slane %v3153_v14, 0  ;;  %v3156_v41 = vperm.slane %v3153_v14, 1  ;;  %v3157_v11 = vperm.slane %v3153_v14, 2  ;;  %v3158_v6 = vperm.slane %v3153_v14, 3 }
 0x5d3   :  { %v3164_v17 = vmul.f32 %v3156_v41, %v8484_v58  ;;  %v3165_v29 = vmul.f32 %v3157_v11, %v8490_v56  ;;  %v3166_v30 = vmul.f32 %v3158_v6, %v8494_v7  ;;  %v3181_v60 = vmul.f32 %v3157_v11, %v8446_v10  ;;  %v7173_v58 = vld [vmem:[#allocation12] sm:$0xf] }
 0x5d4   :  { %v3163_v34 = vmul.f32 %v3155_v13, %v8482_v1  ;;  %v2755_v56 = vunpack.c.l.bf16 %v2751_v9  ;;  %v2759_v7 = vunpack.c.l.bf16 %v2753_v43  ;;  %v3179_v10 = vmul.f32 %v3155_v13, %v8442_v37  ;;  %v6185_v43 = vld [vmem:[#allocation9 + $0xe0] sm:$0xf] }
 0x5d5   :  { %v3171_v18 = vrot.slane %v3164_v17, 7  ;;  %v3172_v51 = vrot.slane %v3165_v29, 6  ;;  %v3173_v52 = vrot.slane %v3166_v30, 5  ;;  %v3180_v1 = vmul.f32 %v3156_v41, %v8444_v2 }
 0x5d6   :  { %v3183_v44 = vmul.f32 %v3155_v13, %v8454_v20  ;;  %v3184_v8 = vmul.f32 %v3156_v41, %v8456_v0  ;;  %v3185_v21 = vmul.f32 %v3157_v11, %v8470_v36  ;;  %v8518_v36 = vld [vmem:[#allocation4 + $0x88] sm:$0xff]  ;;  %v3182_v48 = vmul.f32 %v3158_v6, %v8448_v31 }
 0x5d7   :  { %v3174_v23 = vsel %vm526_vm11, %v3163_v34, %v3171_v18  ;;  %v3175_v55 = vsel %vm528_vm12, %v3172_v51, %v3173_v52  ;;  %v2758_v5 = vunpack.c.h.bf16 %v8518_v36  ;;  %v3186_v25 = vmul.f32 %v3158_v6, %v8472_v63 }
 0x5d8   :  { %v3176_v33 = vsel %vm530_vm14, %v3174_v23, %v3175_v55  ;;  %v2762_v13 = vunpack.c.h.bf16 %v8521_v50  ;;  %v6663_v23 = vld [vmem:[#allocation9 + $0xec] sm:$0xf0] }
 0x5d9   :  { %v3178_v61 = vsub.f32 %v7173_v58, %v3176_v33  ;;  %v6651_v58 = vld [vmem:[#allocation9 + $0x8c] sm:$0xf0] }
 0x5db   :  { %v3188_v22 = vperm.slane %v3178_v61, 0  ;;  %v3189_v12 = vperm.slane %v3178_v61, 1  ;;  %v3190_v40 = vperm.slane %v3178_v61, 2  ;;  %v3191_v0 = vperm.slane %v3178_v61, 3 }
 0x5dd   :  { %v3196_v28 = vadd.f32 %v3188_v22, %v3179_v10  ;;  %v3197_v39 = vadd.f32 %v3189_v12, %v3180_v1  ;;  %v8514_v57 = vadd.f32 %v3190_v40, %v3181_v60  ;;  %v3200_v38 = vadd.f32 %v3188_v22, %v3183_v44 }
 0x5de   :  { %v3201_v35 = vadd.f32 %v3189_v12, %v3184_v8  ;;  %v8516_v24 = vadd.f32 %v3190_v40, %v3185_v21  ;;  %v3199_v4 = vadd.f32 %v3191_v0, %v3182_v48  ;;  %v3203_v41 = vadd.f32 %v3191_v0, %v3186_v25  ;;  %v6193_v12 = vld [vmem:[#allocation9 + $0xe8] sm:$0xf]  ;;  %v6664_v40 = vld [vmem:[#allocation9 + $0xf4] sm:$0xf0]  ;;  %v6662_v21 = vld [vmem:[#allocation9 + $0xec] sm:$0xf] }
 0x5df   :  { %v3204_v37 = vadd.f32 %v3196_v28, %v2755_v56  ;;  %v3205_v2 = vadd.f32 %v3197_v39, %v2756_v19  ;;  %v3208_v45 = vadd.f32 %v3200_v38, %v2759_v7  ;;  %v6661_v56 = vld [vmem:[#allocation9 + $0xe4] sm:$0xf]  ;;  %v6187_v19 = vld [vmem:[#allocation9 + $0xf0] sm:$0xf0]  ;;  %v6186_v22 = vor.u32 %v6663_v23, %v6185_v43  ;;  %v6195_v28 = vld [vmem:[#allocation9 + $0xf8] sm:$0xf0] }
 0x5e0   :  { %v3209_v46 = vadd.f32 %v3201_v35, %v2760_v62  ;;  %v3207_v31 = vadd.f32 %v3199_v4, %v2758_v5  ;;  %v8536_v6 = vadd.f32 %v3203_v41, %v2762_v13  ;;  %v6190_v44 = vor.u32 %v6661_v56, %v6187_v19  ;;  %v6657_v48 = vld [vmem:[#allocation9 + $0xc4] sm:$0xf]  ;;  %v6658_v13 = vld [vmem:[#allocation9 + $0xcc] sm:$0xf]  ;;  %v6643_v43 = vld [vmem:[#allocation9 + $0x4c] sm:$0xf0] }
 0x5e1   :  { %v6065_v49 = vmul.f32 -1.442695, %v3204_v37  ;;  %v6067_v27 = vmul.f32 -1.442695, %v3205_v2  ;;  %v6066_v3 = vmul.f32 -1.442695, %v3208_v45  ;;  %v6194_v8 = vor.u32 %v6664_v40, %v6193_v12  ;;  %3611 = vmatpush.bf16.msrb.mxu0 %v6186_v22 }
 0x5e2   :  { %v6068_v20 = vmul.f32 -1.442695, %v3209_v46  ;;  %v6198_v2 = vor.u32 %v6662_v21, %v6195_v28  ;;  %v6169_v45 = vld [vmem:[#allocation9 + $0xc0] sm:$0xf]  ;;  %v6659_v46 = vld [vmem:[#allocation9 + $0xcc] sm:$0xf0]  ;;  %3625 = vmatpush.bf16.msrb.mxu1 %v6190_v44 }
 0x5e3   :  { %7000 = vpow2.f32 %v6065_v49  ;;  %3639 = vmatpush.bf16.msrb.mxu2 %v6194_v8  ;;  %v6170_v0 = vor.u32 %v6659_v46, %v6169_v45  ;;  %v6161_v22 = vld [vmem:[#allocation9 + $0xa8] sm:$0xf]  ;;  %v6656_v12 = vld [vmem:[#allocation9 + $0xb4] sm:$0xf0]  ;;  %v6654_v44 = vld [vmem:[#allocation9 + $0xac] sm:$0xf] }
 0x5e4   :  { %7002 = vpow2.f32 %v6066_v3  ;;  %3653 = vmatpush.bf16.msrb.mxu3 %v6198_v2  ;;  %v6137_v8 = vld [vmem:[#allocation9 + $0x80] sm:$0xf]  ;;  %v6162_v38 = vor.u32 %v6656_v12, %v6161_v22 }
 0x5e5   :  { %7004 = vpow2.f32 %v6067_v27  ;;  %3612 = vmatpush.bf16.msrb.mxu0 %v6170_v0  ;;  %v6138_v46 = vor.u32 %v6651_v58, %v6137_v8  ;;  %v6650_v0 = vld [vmem:[#allocation9 + $0x8c] sm:$0xf]  ;;  %v6097_v58 = vld [vmem:[#allocation9 + $0x28] sm:$0xf] }
 0x5e6   :  { %7006 = vpow2.f32 %v6068_v20 }
 0x5e9   :  { %v7001_v16 = vpop.eup %7000 }
 0x5ea   :  { %v7003_v32 = vpop.eup %7002  ;;  %v3218_v59 = vadd.f32 1.0, %v7001_v16  ;;  %v6171_v16 = vld [vmem:[#allocation9 + $0xd0] sm:$0xf0] }
 0x5eb   :  { %v7005_v54 = vpop.eup %7004  ;;  %v8525_v26 = vadd.f32 1.0, %v7003_v32  ;;  %v6177_v32 = vld [vmem:[#allocation9 + $0xc8] sm:$0xf]  ;;  %v6174_v25 = vor.u32 %v6657_v48, %v6171_v16  ;;  %v6147_v16 = vld [vmem:[#allocation9 + $0x98] sm:$0xf0] }
 0x5ec   :  { %v7007_v14 = vpop.eup %7006  ;;  %7008 = vrcp.f32 %v3218_v59  ;;  %v3231_v11 = vand.u32 2147483648, %v3218_v59  ;;  %v8530_v29 = vadd.f32 1.0, %v7005_v54  ;;  %v3229_v60 = vand.u32 2147483647, %v3218_v59 }
 0x5ed   :  { %7010 = vrcp.f32 %v8525_v26  ;;  %v3246_v17 = vand.u32 2147483648, %v8525_v26  ;;  %v8532_v30 = vadd.f32 1.0, %v7007_v14  ;;  %v3244_v63 = vand.u32 2147483647, %v8525_v26  ;;  %v6660_v14 = vld [vmem:[#allocation9 + $0xd4] sm:$0xf0]  ;;  %3626 = vmatpush.bf16.msrb.mxu1 %v6174_v25 }
 0x5ee   :  { %7012 = vrcp.f32 %v8530_v29  ;;  %v8538_v34 = vor.u32 1.1754944e-38, %v3231_v11  ;;  %v3271_v18 = vand.u32 2147483647, %v8530_v29  ;;  %vm3225_vm15 = vweird.f32 %v3218_v59 }
 0x5ef   :  { %7014 = vrcp.f32 %v8532_v30  ;;  %v8544_v52 = vor.u32 1.1754944e-38, %v3246_v17  ;;  %v3273_v9 = vand.u32 2147483648, %v8530_v29  ;;  %vm8551_vm2 = vcmp.eq.f32.partialorder %v3229_v60, 8.507059e+37  ;;  %v6179_v60 = vld [vmem:[#allocation9 + $0xd8] sm:$0xf0] }
 0x5f0   :  { %7016 = vtanh.f32 %v3207_v31  ;;  %vm3240_vm1 = vweird.f32 %v8525_v26  ;;  %v3286_v61 = vand.u32 2147483647, %v8532_v30  ;;  %vm8559_vm3 = vcmp.eq.f32.partialorder %v3244_v63, 8.507059e+37  ;;  %v6153_v63 = vld [vmem:[#allocation9 + $0xa0] sm:$0xf] }
 0x5f1   :  { %vm3267_vm4 = vweird.f32 %v8530_v29  ;;  %v3288_v1 = vand.u32 2147483648, %v8532_v30  ;;  %v8575_v37 = vor.u32 1.1754944e-38, %v3273_v9  ;;  %vm3282_vm7 = vweird.f32 %v8532_v30 }
 0x5f2   :  { %v8542_v51 = vpop.eup %7008  ;;  %vm8584_vm9 = vcmp.eq.f32.partialorder %v3271_v18, 8.507059e+37  ;;  %v6178_v17 = vor.u32 %v6660_v14, %v6177_v32  ;;  %v6182_v23 = vor.u32 %v6658_v13, %v6179_v60  ;;  %7018 = vtanh.f32 %v8536_v6  ;;  %v6163_v6 = vld [vmem:[#allocation9 + $0xb8] sm:$0xf0]  ;;  %v6121_v32 = vld [vmem:[#allocation9 + $0x60] sm:$0xf] }
 0x5f3   :  { %v8547_v55 = vpop.eup %7010  ;;  %v3221_v33 = vmul.f32 %v8542_v51, %v3218_v59  ;;  %vm3226_vm0 = vweird.f32 %v8542_v51  ;;  %v6166_v45 = vor.u32 %v6654_v44, %v6163_v6  ;;  %v6150_v25 = vor.u32 %v6650_v0, %v6147_v16  ;;  %v6123_v14 = vld [vmem:[#allocation9 + $0x70] sm:$0xf0]  ;;  %v6129_v13 = vld [vmem:[#allocation9 + $0x68] sm:$0xf]  ;;  %v6131_v60 = vld [vmem:[#allocation9 + $0x78] sm:$0xf0] }
 0x5f4   :  { %v3236_v7 = vmul.f32 %v8547_v55, %v8525_v26  ;;  %vm3241_vm5 = vweird.f32 %v8547_v55  ;;  %v8566_v39 = vpop.eup %7012  ;;  %vm8571_vm6 = vmor %vm3225_vm15, %vm3226_vm0  ;;  %vm8611_vm0 = vcmp.eq.f32.partialorder %v3286_v61, 8.507059e+37  ;;  %v6653_v61 = vld [vmem:[#allocation9 + $0xa4] sm:$0xf]  ;;  %3640 = vmatpush.bf16.msrb.mxu2 %v6178_v17  ;;  %3654 = vmatpush.bf16.msrb.mxu3 %v6182_v23  ;;  %v6646_v17 = vld [vmem:[#allocation9 + $0x6c] sm:$0xf] }
 0x5f5   :  { %v3222_v62 = vsub.f32 1.0, %v3221_v33  ;;  %v8578_v49 = vpop.eup %7014  ;;  %v3263_v3 = vmul.f32 %v8566_v39, %v8530_v29  ;;  %vm3268_vm8 = vweird.f32 %v8566_v39  ;;  %vm8595_vm10 = vmor %vm3240_vm1, %vm3241_vm5  ;;  %v3289_v29 = vor.u32 1.1754944e-38, %v3288_v1  ;;  %v6655_v33 = vld [vmem:[#allocation9 + $0xac] sm:$0xf0]  ;;  %v6641_v23 = vld [vmem:[#allocation9 + $0x44] sm:$0xf] }
 0x5f6   :  { %v3237_v35 = vsub.f32 1.0, %v3236_v7  ;;  %v8588_v5 = vpop.eup %7016  ;;  %v3278_v54 = vmul.f32 %v8578_v49, %v8532_v30  ;;  %vm3283_vm13 = vweird.f32 %v8578_v49  ;;  %vm8607_vm15 = vmor %vm3267_vm4, %vm3268_vm8  ;;  %v6154_v30 = vor.u32 %v6655_v33, %v6153_v63  ;;  %v6155_v7 = vld [vmem:[#allocation9 + $0xb0] sm:$0xf0]  ;;  %v6637_v44 = vld [vmem:[#allocation9 + $0x24] sm:$0xf] }
 0x5f7   :  { %v3223_v27 = vmul.f32 %v8542_v51, %v3222_v62  ;;  %v3264_v11 = vsub.f32 1.0, %v3263_v3  ;;  %vm8618_vm1 = vmor %vm3282_vm7, %vm3283_vm13  ;;  %v6158_v62 = vor.u32 %v6653_v61, %v6155_v7  ;;  %v6652_v3 = vld [vmem:[#allocation9 + $0x94] sm:$0xf0]  ;;  %v6134_v31 = vor.u32 %v6646_v17, %v6131_v60  ;;  %v6113_v61 = vld [vmem:[#allocation9 + $0x48] sm:$0xf] }
 0x5f8   :  { %v3238_v4 = vmul.f32 %v8547_v55, %v3237_v35  ;;  %v3279_v9 = vsub.f32 1.0, %v3278_v54  ;;  %v6139_v35 = vld [vmem:[#allocation9 + $0x90] sm:$0xf0]  ;;  %3613 = vmatpush.bf16.msrb.mxu0 %v6154_v30  ;;  %3641 = vmatpush.bf16.msrb.mxu2 %v6162_v38  ;;  %v6115_v30 = vld [vmem:[#allocation9 + $0x58] sm:$0xf0] }
 0x5f9   :  { %v3224_v41 = vadd.f32 %v8542_v51, %v3223_v27  ;;  %v3265_v19 = vmul.f32 %v8566_v39, %v3264_v11  ;;  %v6145_v27 = vld [vmem:[#allocation9 + $0x88] sm:$0xf]  ;;  %3627 = vmatpush.bf16.msrb.mxu1 %v6158_v62  ;;  %3655 = vmatpush.bf16.msrb.mxu3 %v6166_v45  ;;  %v6639_v62 = vld [vmem:[#allocation9 + $0x2c] sm:$0xf0]  ;;  %v6091_v38 = vld [vmem:[#allocation9 + $0x30] sm:$0xf0] }
 0x5fa   :  { %v3239_v18 = vadd.f32 %v8547_v55, %v3238_v4  ;;  %v6146_v48 = vor.u32 %v6652_v3, %v6145_v27  ;;  %v6647_v4 = vld [vmem:[#allocation9 + $0x6c] sm:$0xf0]  ;;  %v6073_v27 = vld [vmem:[#allocation9] sm:$0xf]  ;;  %v6094_v3 = vor.u32 %v6637_v44, %v6091_v38 }
 0x5fb   :  { %v3228_v56 = vsel %vm8571_vm6, %v8542_v51, %v3224_v41  ;;  %v3280_v51 = vmul.f32 %v8578_v49, %v3279_v9  ;;  %v3266_v28 = vadd.f32 %v8566_v39, %v3265_v19  ;;  %v7019_v41 = vpop.eup %7018  ;;  %v6105_v9 = vld [vmem:[#allocation9 + $0x40] sm:$0xf]  ;;  %v6642_v19 = vld [vmem:[#allocation9 + $0x4c] sm:$0xf] }
 0x5fc   :  { %v3233_v1 = vsel %vm8551_vm2, %v8538_v34, %v3228_v56  ;;  %v3243_v40 = vsel %vm8595_vm10, %v8547_v55, %v3239_v18  ;;  %v6649_v34 = vld [vmem:[#allocation9 + $0x84] sm:$0xf]  ;;  %3614 = vmatpush.bf16.msrb.mxu0 %v6138_v46  ;;  %3642 = vmatpush.bf16.msrb.mxu2 %v6146_v48  ;;  %v6106_v22 = vor.u32 %v6643_v43, %v6105_v9  ;;  %v6075_v48 = vld [vmem:[#allocation9 + $0x10] sm:$0xf0] }
 0x5fd   :  { %v3248_v21 = vsel %vm8559_vm3, %v8544_v52, %v3243_v40  ;;  %v3252_v2 = vmul.f32 %v3233_v1, %v8415_v47  ;;  %v3281_v55 = vadd.f32 %v8578_v49, %v3280_v51  ;;  %v3270_v52 = vsel %vm8607_vm15, %v8566_v39, %v3266_v28  ;;  %v6645_v39 = vld [vmem:[#allocation9 + $0x64] sm:$0xf]  ;;  %3656 = vmatpush.bf16.msrb.mxu3 %v6150_v25  ;;  %v6089_v51 = vld [vmem:[#allocation9 + $0x20] sm:$0xf]  ;;  %v6634_v25 = vld [vmem:[#allocation9 + $0xc] sm:$0xf] }
 0x5fe   :  { %v6142_v10 = vor.u32 %v6649_v34, %v6139_v35  ;;  %v3253_v47 = vmul.f32 %v3248_v21, %v8418_v42  ;;  %v3275_v59 = vsel %vm8584_vm9, %v8575_v37, %v3270_v52  ;;  %v6648_v42 = vld [vmem:[#allocation9 + $0x74] sm:$0xf0]  ;;  %v6122_v37 = vor.u32 %v6647_v4, %v6121_v32  ;;  %v6638_v35 = vld [vmem:[#allocation9 + $0x2c] sm:$0xf]  ;;  %v6635_v52 = vld [vmem:[#allocation9 + $0xc] sm:$0xf0] }
 0x5ff   :  { %v3285_v54 = vsel %vm8618_vm1, %v8578_v49, %v3281_v55  ;;  %v3294_v26 = vmul.f32 %v8588_v5, %v3275_v59  ;;  %v6126_v49 = vor.u32 %v6645_v39, %v6123_v14  ;;  %v6130_v18 = vor.u32 %v6648_v42, %v6129_v13  ;;  %v6644_v5 = vld [vmem:[#allocation9 + $0x54] sm:$0xf0]  ;;  %v6083_v39 = vld [vmem:[#allocation9 + $0x18] sm:$0xf0] }
 0x600   :  { %v3290_v11 = vsel %vm8611_vm0, %v3289_v29, %v3285_v54  ;;  %3628 = vmatpush.bf16.msrb.mxu1 %v6142_v10  ;;  %v6107_v29 = vld [vmem:[#allocation9 + $0x50] sm:$0xf0]  ;;  %3615 = vmatpush.bf16.msrb.mxu0 %v6122_v37  ;;  %v6114_v40 = vor.u32 %v6644_v5, %v6113_v61  ;;  %v6118_v28 = vor.u32 %v6642_v19, %v6115_v30  ;;  %v6640_v34 = vld [vmem:[#allocation9 + $0x34] sm:$0xf0]  ;;  %v6633_v10 = vld [vmem:[#allocation9 + $0x4] sm:$0xf]  ;;  %v2757_v54 = vunpack.c.l.bf16 %v8518_v36 }
 0x601   :  { %v3295_v20 = vmul.f32 %v7019_v41, %v3290_v11  ;;  %v3296_v63 = vadd.f32 %v3294_v26, %v3252_v2  ;;  %3643 = vmatpush.bf16.msrb.mxu2 %v6130_v18  ;;  %v6110_v1 = vor.u32 %v6641_v23, %v6107_v29  ;;  %3657 = vmatpush.bf16.msrb.mxu3 %v6134_v31  ;;  %v6099_v2 = vld [vmem:[#allocation9 + $0x38] sm:$0xf0]  ;;  %v6636_v59 = vld [vmem:[#allocation9 + $0x14] sm:$0xf0]  ;;  %v2761_v14 = vunpack.c.l.bf16 %v8521_v50 }
 0x602   :  { %v6090_v46 = vor.u32 %v6639_v62, %v6089_v51  ;;  %v6098_v0 = vor.u32 %v6640_v34, %v6097_v58  ;;  %v6102_v4 = vor.u32 %v6638_v35, %v6099_v2  ;;  %v6074_v41 = vor.u32 %v6635_v52, %v6073_v27  ;;  %v7174_v58 = vld [vmem:[%s9315_s6] sm:$0x1] }
 0x603   :  { %v3297_v33 = vadd.f32 %v3295_v20, %v3253_v47  ;;  %v8654_v56 = vmul.f32 %v3296_v63, %v7645_v53  ;;  %v6081_v47 = vld [vmem:[#allocation9 + $0x8] sm:$0xf]  ;;  %v6078_v26 = vor.u32 %v6633_v10, %v6075_v48  ;;  %v6086_v60 = vor.u32 %v6634_v25, %v6083_v39 }
 0x604   :  { %3629 = vmatpush.bf16.msrb.mxu1 %v6126_v49  ;;  %3616 = vmatpush.bf16.msrb.mxu0 %v6106_v22  ;;  %v6082_v42 = vor.u32 %v6636_v59, %v6081_v47  ;;  %v3206_v37 = vadd.f32 %v8514_v57, %v2757_v54  ;;  %v3210_v36 = vadd.f32 %v8516_v24, %v2761_v14 }
 0x605   :  { %v8657_v7 = vmul.f32 %v3297_v33, %v7695_v15  ;;  %v3308_v12 = vmul.f32 %v8654_v56, %v8654_v56  ;;  %3644 = vmatpush.bf16.msrb.mxu2 %v6114_v40  ;;  %3658 = vmatpush.bf16.msrb.mxu3 %v6118_v28 }
 0x606   :  { %v6069_v9 = vmul.f32 -1.442695, %v3206_v37  ;;  %v6070_v43 = vmul.f32 -1.442695, %v3210_v36 }
 0x607   :  { %v3300_v6 = vadd.f32 %v8657_v7, %v8654_v56  ;;  %v3309_v8 = vmul.f32 %v8657_v7, %v8657_v7  ;;  %v6777_v21 = vpack.c.bf16 %v8657_v7, %v8654_v56 }
 0x608   :  { %3630 = vmatpush.bf16.msrb.mxu1 %v6110_v1  ;;  %3617 = vmatpush.bf16.msrb.mxu0 %v6090_v46  ;;  %7020 = vpow2.f32 %v6069_v9  ;;  %v7175_v46 = vld [vmem:[%s9316_s7] sm:$0x1] }
 0x609   :  { %v3301_v55 = vrot.slane %v3300_v6, 4  ;;  %v3310_v45 = vadd.f32 %v3309_v8, %v3308_v12  ;;  %6778 = vst [vmem:[#allocation14 + $0x20] sm:$0xff] %v6777_v21   ;;  %3645 = vmatpush.bf16.msrb.mxu2 %v6098_v0  ;;  %3659 = vmatpush.bf16.msrb.mxu3 %v6102_v4  ;;  %7022 = vpow2.f32 %v6070_v43 }
 0x60b   :  { %v3302_v16 = vadd.f32 %v3301_v55, %v3300_v6  ;;  %v3311_v32 = vrot.slane %v3310_v45, 4 }
 0x60c   :  { %3631 = vmatpush.bf16.msrb.mxu1 %v6094_v3  ;;  %3618 = vmatpush.bf16.msrb.mxu0 %v6074_v41 }
 0x60d   :  { %v3312_v13 = vadd.f32 %v3311_v32, %v3310_v45  ;;  %v3303_v11 = vrot.slane %v3302_v16, 2  ;;  %3646 = vmatpush.bf16.msrb.mxu2 %v6082_v42  ;;  %3660 = vmatpush.bf16.msrb.mxu3 %v6086_v60 }
 0x60e   :  { %v7021_v24 = vpop.eup %7020 }
 0x60f   :  { %v3313_v17 = vrot.slane %v3312_v13, 2  ;;  %v3304_v20 = vadd.f32 %v3303_v11, %v3302_v16  ;;  %v7023_v19 = vpop.eup %7022  ;;  %v3351_v30 = vadd.f32 1.0, %v7021_v24 }
 0x610   :  { %3632 = vmatpush.bf16.msrb.mxu1 %v6078_v26  ;;  %v3352_v22 = vadd.f32 1.0, %v7023_v19 }
 0x611   :  { %v3314_v63 = vadd.f32 %v3313_v17, %v3312_v13  ;;  %v3305_v49 = vrot.slane %v3304_v20, 1  ;;  %v3364_v47 = vand.u32 2147483648, %v3351_v30  ;;  %vm3358_vm7 = vweird.f32 %v3351_v30 }
 0x612   :  { %v3362_v54 = vand.u32 2147483647, %v3351_v30  ;;  %v3379_v25 = vand.u32 2147483648, %v3352_v22  ;;  %vm3373_vm9 = vweird.f32 %v3352_v22  ;;  %v3377_v39 = vand.u32 2147483647, %v3352_v22 }
 0x613   :  { %v3306_v50 = vadd.f32 %v3305_v49, %v3304_v20  ;;  %v3315_v18 = vrot.slane %v3314_v63, 1  ;;  %v3365_v13 = vor.u32 1.1754944e-38, %v3364_v47 }
 0x614   :  { %vm3363_vm13 = vcmp.eq.f32.partialorder %v3362_v54, 8.507059e+37  ;;  %v3380_v11 = vor.u32 1.1754944e-38, %v3379_v25  ;;  %vm3378_vm15 = vcmp.eq.f32.partialorder %v3377_v39, 8.507059e+37 }
 0x615   :  { %v3307_v23 = vmul.f32 0.5, %v3306_v50  ;;  %v3316_v33 = vadd.f32 %v3315_v18, %v3314_v63 }
 0x617   :  { %v3317_v31 = vmul.f32 0.5, %v3316_v33  ;;  %v3318_v29 = vmul.f32 %v3307_v23, %v3307_v23 }
 0x619   :  { %v3319_v61 = vsub.f32 %v3317_v31, %v3318_v29 }
 0x61b   :  { %v3320_v57 = vmax.f32 %v3319_v61, 0.0 }
 0x61d   :  { %v3321_v5 = vadd.f32 1e-05, %v3320_v57 }
 0x61f   :  { %7024 = vrsqrt.f32 %v3321_v5  ;;  %vm3328_vm3 = vweird.f32 %v3321_v5 }
 0x620   :  { %7026 = vrcp.f32 %v3351_v30 }
 0x621   :  { %7028 = vrcp.f32 %v3352_v22 }
 0x625   :  { %v7025_v12 = vpop.eup %7024 }
 0x626   :  { %v3323_v1 = vmul.f32 %v7025_v12, %v3321_v5  ;;  %v7027_v62 = vpop.eup %7026  ;;  %vm3329_vm2 = vweird.f32 %v7025_v12 }
 0x627   :  { %v7029_v44 = vpop.eup %7028  ;;  %v3354_v21 = vmul.f32 %v7027_v62, %v3351_v30  ;;  %vm3330_vm4 = vmor %vm3328_vm3, %vm3329_vm2  ;;  %vm3359_vm5 = vweird.f32 %v7027_v62 }
 0x628   :  { %v3324_v40 = vmul.f32 %v7025_v12, %v3323_v1  ;;  %v3369_v28 = vmul.f32 %v7029_v44, %v3352_v22  ;;  %vm3374_vm6 = vweird.f32 %v7029_v44  ;;  %vm3360_vm8 = vmor %vm3358_vm7, %vm3359_vm5 }
 0x629   :  { %v3355_v35 = vsub.f32 1.0, %v3354_v21  ;;  %vm3375_vm10 = vmor %vm3373_vm9, %vm3374_vm6 }
 0x62a   :  { %v3325_v51 = vmul.f32 0.5, %v3324_v40  ;;  %v3370_v45 = vsub.f32 1.0, %v3369_v28 }
 0x62b   :  { %v3356_v3 = vmul.f32 %v7027_v62, %v3355_v35 }
 0x62c   :  { %v3326_v6 = vsub.f32 1.5, %v3325_v51  ;;  %v3371_v48 = vmul.f32 %v7029_v44, %v3370_v45 }
 0x62d   :  { %v3357_v4 = vadd.f32 %v7027_v62, %v3356_v3 }
 0x62e   :  { %v3327_v8 = vmul.f32 %v7025_v12, %v3326_v6  ;;  %v3372_v59 = vadd.f32 %v7029_v44, %v3371_v48 }
 0x62f   :  { %v3361_v14 = vsel %vm3360_vm8, %v7027_v62, %v3357_v4 }
 0x630   :  { %v3331_v38 = vsel %vm3330_vm4, %v7025_v12, %v3327_v8  ;;  %v3376_v41 = vsel %vm3375_vm10, %v7029_v44, %v3372_v59  ;;  %v3366_v42 = vsel %vm3363_vm13, %v3365_v13, %v3361_v14 }
 0x631   :  { %v3332_v34 = vmul.f32 %v7174_v58, %v3331_v38  ;;  %v3381_v60 = vsel %vm3378_vm15, %v3380_v11, %v3376_v41 }
 0x633   :  { %v3333_v2 = vmul.f32 %v3332_v34, %v3307_v23  ;;  %v3336_v55 = vperm.slane %v3332_v34, 0 }
 0x635   :  { %v3334_v27 = vsub.f32 %v7175_v46, %v3333_v2  ;;  %v3338_v0 = vmul.f32 %v3336_v55, %v8654_v56  ;;  %v3339_v52 = vmul.f32 %v3336_v55, %v8657_v7 }
 0x637   :  { %v3341_v10 = vperm.slane %v3334_v27, 0 }
 0x639   :  { %v3343_v16 = vadd.f32 %v3341_v10, %v3338_v0  ;;  %v3344_v32 = vadd.f32 %v3341_v10, %v3339_v52 }
 0x63b   :  { %7030 = vtanh.f32 %v3343_v16 }
 0x63c   :  { %7032 = vtanh.f32 %v3344_v32 }
 0x641   :  { %v7031_v26 = vpop.eup %7030 }
 0x642   :  { %v7033_v17 = vpop.eup %7032  ;;  %v3385_v20 = vmul.f32 %v7031_v26, %v3366_v42 }
 0x643   :  { %v3386_v37 = vmul.f32 %v7033_v17, %v3381_v60 }
 0x644   :  { %v3387_v36 = vmul.f32 %v3385_v20, %v7645_v53 }
 0x645   :  { %v3388_v63 = vmul.f32 %v3386_v37, %v7695_v15 }
 0x647   :  { %v6772_v49 = vpack.c.bf16 %v3388_v63, %v3387_v36 }
 0x649   :  { %6773 = vst [vmem:[#allocation13 + $0x20] sm:$0xff] %v6772_v49   ;;  %3619 = vmatmul.bf16.vlgmr.msrb.gmra.mxu0 %v6772_v49  ;;  %3633 = vmatmul.bf16.vlgmr.msrb.gmra.mxu1 %v6772_v49 }
 0x64a   :  { %3647 = vmatmul.bf16.vlgmr.msrb.gmra.mxu2 %v6772_v49  ;;  %3661 = vmatmul.bf16.vlgmr.msrb.gmra.mxu3 %v6772_v49 }
 0x6c6   :  { %v8681_v50 = vpop.f32.mrf.mxu0  ;;  %v8683_v18 = vpop.f32.mrf.mxu1 }
 0x6c7   :  { %v3699_v23 = vmul.f32 %v8681_v50, %v8681_v50  ;;  %v3700_v33 = vmul.f32 %v8683_v18, %v8683_v18 }
 0x6cd   :  { %v8685_v9 = vpop.f32.mrf.mxu2  ;;  %v8687_v43 = vpop.f32.mrf.mxu3 }
 0x6ce   :  { %v8693_v31 = vpop.f32.mrf.mxu0  ;;  %v8695_v29 = vpop.f32.mrf.mxu1  ;;  %v3701_v44 = vmul.f32 %v8685_v9, %v8685_v9  ;;  %v3702_v6 = vmul.f32 %v8687_v43, %v8687_v43 }
 0x6cf   :  { %v3667_v61 = vadd.f32 %v8693_v31, %v8681_v50  ;;  %v3703_v57 = vmul.f32 %v8693_v31, %v8693_v31  ;;  %v3674_v5 = vadd.f32 %v8695_v29, %v8683_v18  ;;  %v3704_v24 = vmul.f32 %v8695_v29, %v8695_v29 }
 0x6d1   :  { %v3668_v19 = vrot.slane %v3667_v61, 4  ;;  %v3707_v30 = vadd.f32 %v3703_v57, %v3699_v23  ;;  %v3675_v22 = vrot.slane %v3674_v5, 4  ;;  %v3714_v12 = vadd.f32 %v3704_v24, %v3700_v33 }
 0x6d3   :  { %v3669_v1 = vadd.f32 %v3668_v19, %v3667_v61  ;;  %v3708_v40 = vrot.slane %v3707_v30, 4  ;;  %v3676_v51 = vadd.f32 %v3675_v22, %v3674_v5  ;;  %v3715_v62 = vrot.slane %v3714_v12, 4 }
 0x6d5   :  { %v3670_v8 = vrot.slane %v3669_v1, 2  ;;  %v3709_v21 = vadd.f32 %v3708_v40, %v3707_v30  ;;  %v3677_v28 = vrot.slane %v3676_v51, 2  ;;  %v3716_v38 = vadd.f32 %v3715_v62, %v3714_v12  ;;  %v8709_v58 = vpop.f32.mrf.mxu2  ;;  %v8711_v34 = vpop.f32.mrf.mxu3 }
 0x6d6   :  { %v3681_v35 = vadd.f32 %v8709_v58, %v8685_v9  ;;  %v3705_v2 = vmul.f32 %v8709_v58, %v8709_v58  ;;  %v3688_v55 = vadd.f32 %v8711_v34, %v8687_v43  ;;  %v3706_v45 = vmul.f32 %v8711_v34, %v8711_v34 }
 0x6d7   :  { %v3671_v46 = vadd.f32 %v3670_v8, %v3669_v1  ;;  %v3710_v27 = vrot.slane %v3709_v21, 2  ;;  %v3678_v3 = vadd.f32 %v3677_v28, %v3676_v51  ;;  %v3717_v0 = vrot.slane %v3716_v38, 2 }
 0x6d8   :  { %v3682_v52 = vrot.slane %v3681_v35, 4  ;;  %v3721_v10 = vadd.f32 %v3705_v2, %v3701_v44  ;;  %v3689_v48 = vrot.slane %v3688_v55, 4  ;;  %v3728_v16 = vadd.f32 %v3706_v45, %v3702_v6 }
 0x6d9   :  { %v3672_v32 = vrot.slane %v3671_v46, 1  ;;  %v3711_v4 = vadd.f32 %v3710_v27, %v3709_v21  ;;  %v3679_v47 = vrot.slane %v3678_v3, 1  ;;  %v3718_v59 = vadd.f32 %v3717_v0, %v3716_v38 }
 0x6da   :  { %v3683_v54 = vadd.f32 %v3682_v52, %v3681_v35  ;;  %v3722_v25 = vrot.slane %v3721_v10, 4  ;;  %v3690_v39 = vadd.f32 %v3689_v48, %v3688_v55  ;;  %v3729_v14 = vrot.slane %v3728_v16, 4 }
 0x6db   :  { %v3673_v13 = vadd.f32 %v3672_v32, %v3671_v46  ;;  %v3712_v41 = vrot.slane %v3711_v4, 1  ;;  %v3680_v11 = vadd.f32 %v3679_v47, %v3678_v3  ;;  %v3719_v26 = vrot.slane %v3718_v59, 1 }
 0x6dc   :  { %v3684_v42 = vrot.slane %v3683_v54, 2  ;;  %v3723_v17 = vadd.f32 %v3722_v25, %v3721_v10  ;;  %v3691_v60 = vrot.slane %v3690_v39, 2  ;;  %v3730_v20 = vadd.f32 %v3729_v14, %v3728_v16 }
 0x6dd   :  { %v8721_v37 = vmul.f32 0.5, %v3673_v13  ;;  %v3713_v36 = vadd.f32 %v3712_v41, %v3711_v4  ;;  %v8723_v63 = vmul.f32 0.5, %v3680_v11  ;;  %v3720_v49 = vadd.f32 %v3719_v26, %v3718_v59 }
 0x6de   :  { %v3685_v23 = vadd.f32 %v3684_v42, %v3683_v54  ;;  %v3724_v33 = vrot.slane %v3723_v17, 2  ;;  %v3692_v61 = vadd.f32 %v3691_v60, %v3690_v39  ;;  %v3731_v57 = vrot.slane %v3730_v20, 2 }
 0x6df   :  { %v3735_v5 = vmul.f32 0.5, %v3713_v36  ;;  %v3739_v24 = vmul.f32 %v8721_v37, %v8721_v37  ;;  %v3736_v19 = vmul.f32 0.5, %v3720_v49  ;;  %v3740_v30 = vmul.f32 %v8723_v63, %v8723_v63 }
 0x6e0   :  { %v3686_v22 = vrot.slane %v3685_v23, 1  ;;  %v3725_v12 = vadd.f32 %v3724_v33, %v3723_v17  ;;  %v3693_v51 = vrot.slane %v3692_v61, 1  ;;  %v3732_v62 = vadd.f32 %v3731_v57, %v3730_v20 }
 0x6e1   :  { %v3743_v1 = vsub.f32 %v3735_v5, %v3739_v24  ;;  %v3744_v40 = vsub.f32 %v3736_v19, %v3740_v30 }
 0x6e2   :  { %v3687_v44 = vadd.f32 %v3686_v22, %v3685_v23  ;;  %v3726_v6 = vrot.slane %v3725_v12, 1  ;;  %v3694_v55 = vadd.f32 %v3693_v51, %v3692_v61  ;;  %v3733_v45 = vrot.slane %v3732_v62, 1 }
 0x6e3   :  { %v3747_v8 = vmax.f32 %v3743_v1, 0.0  ;;  %v3748_v21 = vmax.f32 %v3744_v40, 0.0 }
 0x6e4   :  { %v8729_v28 = vmul.f32 0.5, %v3687_v44  ;;  %v3727_v38 = vadd.f32 %v3726_v6, %v3725_v12  ;;  %v8733_v3 = vmul.f32 0.5, %v3694_v55  ;;  %v3734_v52 = vadd.f32 %v3733_v45, %v3732_v62  ;;  %v7176_v55 = vld [vmem:[#allocation10] sm:$0xf] }
 0x6e5   :  { %v3751_v35 = vadd.f32 1e-05, %v3747_v8  ;;  %v3752_v2 = vadd.f32 1e-05, %v3748_v21 }
 0x6e6   :  { %v3737_v46 = vmul.f32 0.5, %v3727_v38  ;;  %v3741_v27 = vmul.f32 %v8729_v28, %v8729_v28  ;;  %v3742_v10 = vmul.f32 %v8733_v3, %v8733_v3  ;;  %v3738_v16 = vmul.f32 0.5, %v3734_v52 }
 0x6e7   :  { %7034 = vrsqrt.f32 %v3752_v2  ;;  %vm3771_vm2 = vweird.f32 %v3752_v2  ;;  %vm3761_vm10 = vweird.f32 %v3751_v35 }
 0x6e8   :  { %v3745_v0 = vsub.f32 %v3737_v46, %v3741_v27  ;;  %7036 = vrsqrt.f32 %v3751_v35  ;;  %v3746_v4 = vsub.f32 %v3738_v16, %v3742_v10 }
 0x6ea   :  { %v3749_v48 = vmax.f32 %v3745_v0, 0.0  ;;  %v3750_v25 = vmax.f32 %v3746_v4, 0.0 }
 0x6ec   :  { %v3753_v32 = vadd.f32 1e-05, %v3749_v48  ;;  %v3754_v14 = vadd.f32 1e-05, %v3750_v25  ;;  %v3406_v25 = vld [vmem:[#allocation4 + $0xb0] sm:$0xff] }
 0x6ed   :  { %v7035_v47 = vpop.eup %7034 }
 0x6ee   :  { %7038 = vrsqrt.f32 %v3753_v32  ;;  %v7037_v59 = vpop.eup %7036  ;;  %v3766_v54 = vmul.f32 %v7035_v47, %v3752_v2  ;;  %vm3772_vm0 = vweird.f32 %v7035_v47  ;;  %vm3781_vm4 = vweird.f32 %v3753_v32 }
 0x6ef   :  { %v3756_v13 = vmul.f32 %v7037_v59, %v3751_v35  ;;  %7040 = vrsqrt.f32 %v3754_v14  ;;  %vm3773_vm3 = vmor %vm3771_vm2, %vm3772_vm0  ;;  %vm3762_vm7 = vweird.f32 %v7037_v59  ;;  %vm3791_vm8 = vweird.f32 %v3754_v14 }
 0x6f0   :  { %v3767_v39 = vmul.f32 %v7035_v47, %v3766_v54  ;;  %vm3763_vm13 = vmor %vm3761_vm10, %vm3762_vm7  ;;  %v3404_v54 = vld [vmem:[#allocation4 + $0xa0] sm:$0xff] }
 0x6f1   :  { %v3757_v42 = vmul.f32 %v7037_v59, %v3756_v13 }
 0x6f2   :  { %v3768_v11 = vmul.f32 0.5, %v3767_v39 }
 0x6f3   :  { %v3758_v49 = vmul.f32 0.5, %v3757_v42 }
 0x6f4   :  { %v7039_v41 = vpop.eup %7038  ;;  %v3769_v60 = vsub.f32 1.5, %v3768_v11  ;;  %v3409_v11 = vunpack.c.h.bf16 %v3404_v54 }
 0x6f5   :  { %v3776_v26 = vmul.f32 %v7039_v41, %v3753_v32  ;;  %v7041_v20 = vpop.eup %7040  ;;  %vm3782_vm1 = vweird.f32 %v7039_v41  ;;  %v3759_v24 = vsub.f32 1.5, %v3758_v49 }
 0x6f6   :  { %v3786_v23 = vmul.f32 %v7041_v20, %v3754_v14  ;;  %v3770_v61 = vmul.f32 %v7035_v47, %v3769_v60  ;;  %vm3783_vm5 = vmor %vm3781_vm4, %vm3782_vm1  ;;  %vm3792_vm6 = vweird.f32 %v7041_v20  ;;  %v3413_v60 = vunpack.c.h.bf16 %v3406_v25 }
 0x6f7   :  { %v3777_v17 = vmul.f32 %v7039_v41, %v3776_v26  ;;  %v3760_v1 = vmul.f32 %v7037_v59, %v3759_v24  ;;  %vm3793_vm9 = vmor %vm3791_vm8, %vm3792_vm6 }
 0x6f8   :  { %v3787_v57 = vmul.f32 %v7041_v20, %v3786_v23  ;;  %v3774_v30 = vsel %vm3773_vm3, %v7035_v47, %v3770_v61 }
 0x6f9   :  { %v3778_v36 = vmul.f32 0.5, %v3777_v17  ;;  %v3799_v51 = vrot.slane %v3774_v30, 7  ;;  %v3764_v8 = vsel %vm3763_vm13, %v7037_v59, %v3760_v1 }
 0x6fa   :  { %v3788_v19 = vmul.f32 0.5, %v3787_v57 }
 0x6fb   :  { %v3779_v33 = vsub.f32 1.5, %v3778_v36  ;;  %v3802_v21 = vsel %vm526_vm11, %v3764_v8, %v3799_v51 }
 0x6fc   :  { %v3789_v12 = vsub.f32 1.5, %v3788_v19 }
 0x6fd   :  { %v3780_v5 = vmul.f32 %v7039_v41, %v3779_v33 }
 0x6fe   :  { %v3790_v40 = vmul.f32 %v7041_v20, %v3789_v12 }
 0x6ff   :  { %v3784_v22 = vsel %vm3783_vm5, %v7039_v41, %v3780_v5 }
 0x700   :  { %v3800_v62 = vrot.slane %v3784_v22, 6  ;;  %v3794_v44 = vsel %vm3793_vm9, %v7041_v20, %v3790_v40 }
 0x701   :  { %v3801_v6 = vrot.slane %v3794_v44, 5  ;;  %v8760_v44 = vld [vmem:[#allocation4 + $0xb8] sm:$0xff] }
 0x703   :  { %v3803_v38 = vsel %vm528_vm12, %v3800_v62, %v3801_v6 }
 0x704   :  { %v3804_v2 = vsel %vm530_vm14, %v3802_v21, %v3803_v38 }
 0x705   :  { %v3806_v45 = vmul.f32 %v7176_v55, %v3804_v2 }
 0x707   :  { %v3808_v46 = vperm.slane %v3806_v45, 0  ;;  %v3809_v27 = vperm.slane %v3806_v45, 1  ;;  %v3810_v0 = vperm.slane %v3806_v45, 2  ;;  %v3811_v52 = vperm.slane %v3806_v45, 3 }
 0x709   :  { %v3817_v10 = vmul.f32 %v3809_v27, %v8723_v63  ;;  %v3818_v35 = vmul.f32 %v3810_v0, %v8729_v28  ;;  %v3819_v48 = vmul.f32 %v3811_v52, %v8733_v3  ;;  %v3834_v16 = vmul.f32 %v3810_v0, %v8685_v9  ;;  %v7177_v63 = vld [vmem:[#allocation12] sm:$0xf] }
 0x70a   :  { %v3816_v32 = vmul.f32 %v3808_v46, %v8721_v37  ;;  %v3408_v28 = vunpack.c.l.bf16 %v3404_v54  ;;  %v3412_v3 = vunpack.c.l.bf16 %v3406_v25  ;;  %v3832_v9 = vmul.f32 %v3808_v46, %v8681_v50  ;;  %v6319_v25 = vld [vmem:[#allocation9 + $0xe0] sm:$0xf] }
 0x70b   :  { %v3824_v4 = vrot.slane %v3817_v10, 7  ;;  %v3825_v47 = vrot.slane %v3818_v35, 6  ;;  %v3826_v59 = vrot.slane %v3819_v48, 5  ;;  %v3833_v37 = vmul.f32 %v3809_v27, %v8683_v18 }
 0x70c   :  { %v3836_v20 = vmul.f32 %v3808_v46, %v8693_v31  ;;  %v3837_v36 = vmul.f32 %v3809_v27, %v8695_v29  ;;  %v3838_v49 = vmul.f32 %v3810_v0, %v8709_v58  ;;  %v8757_v58 = vld [vmem:[#allocation4 + $0xa8] sm:$0xff]  ;;  %v3835_v40 = vmul.f32 %v3811_v52, %v8687_v43 }
 0x70d   :  { %v3827_v39 = vsel %vm526_vm11, %v3816_v32, %v3824_v4  ;;  %v3828_v14 = vsel %vm528_vm12, %v3825_v47, %v3826_v59  ;;  %v3411_v6 = vunpack.c.h.bf16 %v8757_v58  ;;  %v3839_v2 = vmul.f32 %v3811_v52, %v8711_v34 }
 0x70e   :  { %v3829_v13 = vsel %vm530_vm14, %v3827_v39, %v3828_v14  ;;  %v3415_v46 = vunpack.c.h.bf16 %v8760_v44  ;;  %v6695_v39 = vld [vmem:[#allocation9 + $0xec] sm:$0xf0] }
 0x70f   :  { %v3831_v41 = vsub.f32 %v7177_v63, %v3829_v13  ;;  %v6683_v63 = vld [vmem:[#allocation9 + $0x8c] sm:$0xf0] }
 0x711   :  { %v3841_v26 = vperm.slane %v3831_v41, 0  ;;  %v3842_v42 = vperm.slane %v3831_v41, 1  ;;  %v3843_v17 = vperm.slane %v3831_v41, 2  ;;  %v3844_v29 = vperm.slane %v3831_v41, 3 }
 0x713   :  { %v3849_v23 = vadd.f32 %v3841_v26, %v3832_v9  ;;  %v3850_v33 = vadd.f32 %v3842_v42, %v3833_v37  ;;  %v8753_v61 = vadd.f32 %v3843_v17, %v3834_v16  ;;  %v3853_v57 = vadd.f32 %v3841_v26, %v3836_v20 }
 0x714   :  { %v3854_v5 = vadd.f32 %v3842_v42, %v3837_v36  ;;  %v8755_v24 = vadd.f32 %v3843_v17, %v3838_v49  ;;  %v3852_v8 = vadd.f32 %v3844_v29, %v3835_v40  ;;  %v3856_v27 = vadd.f32 %v3844_v29, %v3839_v2  ;;  %v6327_v42 = vld [vmem:[#allocation9 + $0xe8] sm:$0xf]  ;;  %v6696_v17 = vld [vmem:[#allocation9 + $0xf4] sm:$0xf0]  ;;  %v6694_v49 = vld [vmem:[#allocation9 + $0xec] sm:$0xf] }
 0x715   :  { %v3857_v50 = vadd.f32 %v3849_v23, %v3408_v28  ;;  %v3858_v18 = vadd.f32 %v3850_v33, %v3409_v11  ;;  %v3861_v19 = vadd.f32 %v3853_v57, %v3412_v3  ;;  %v6693_v28 = vld [vmem:[#allocation9 + $0xe4] sm:$0xf]  ;;  %v6321_v11 = vld [vmem:[#allocation9 + $0xf0] sm:$0xf0]  ;;  %v6320_v26 = vor.u32 %v6695_v39, %v6319_v25  ;;  %v6329_v23 = vld [vmem:[#allocation9 + $0xf8] sm:$0xf0] }
 0x716   :  { %v3862_v30 = vadd.f32 %v3854_v5, %v3413_v60  ;;  %v3860_v43 = vadd.f32 %v3852_v8, %v3411_v6  ;;  %v8775_v52 = vadd.f32 %v3856_v27, %v3415_v46  ;;  %v6324_v20 = vor.u32 %v6693_v28, %v6321_v11  ;;  %v6689_v40 = vld [vmem:[#allocation9 + $0xc4] sm:$0xf]  ;;  %v6690_v46 = vld [vmem:[#allocation9 + $0xcc] sm:$0xf]  ;;  %v6675_v25 = vld [vmem:[#allocation9 + $0x4c] sm:$0xf0] }
 0x717   :  { %v6199_v22 = vmul.f32 -1.442695, %v3857_v50  ;;  %v6201_v12 = vmul.f32 -1.442695, %v3858_v18  ;;  %v6200_v1 = vmul.f32 -1.442695, %v3861_v19  ;;  %v6328_v36 = vor.u32 %v6696_v17, %v6327_v42  ;;  %4264 = vmatpush.bf16.msra.mxu0 %v6320_v26 }
 0x718   :  { %v6202_v31 = vmul.f32 -1.442695, %v3862_v30  ;;  %v6332_v18 = vor.u32 %v6694_v49, %v6329_v23  ;;  %v6303_v19 = vld [vmem:[#allocation9 + $0xc0] sm:$0xf]  ;;  %v6691_v30 = vld [vmem:[#allocation9 + $0xcc] sm:$0xf0]  ;;  %4278 = vmatpush.bf16.msra.mxu1 %v6324_v20 }
 0x719   :  { %7042 = vpow2.f32 %v6199_v22  ;;  %4292 = vmatpush.bf16.msra.mxu2 %v6328_v36  ;;  %v6304_v29 = vor.u32 %v6691_v30, %v6303_v19  ;;  %v6295_v26 = vld [vmem:[#allocation9 + $0xa8] sm:$0xf]  ;;  %v6688_v42 = vld [vmem:[#allocation9 + $0xb4] sm:$0xf0]  ;;  %v6686_v20 = vld [vmem:[#allocation9 + $0xac] sm:$0xf] }
 0x71a   :  { %7044 = vpow2.f32 %v6200_v1  ;;  %4306 = vmatpush.bf16.msra.mxu3 %v6332_v18  ;;  %v6271_v36 = vld [vmem:[#allocation9 + $0x80] sm:$0xf]  ;;  %v6296_v57 = vor.u32 %v6688_v42, %v6295_v26 }
 0x71b   :  { %7046 = vpow2.f32 %v6201_v12  ;;  %4265 = vmatpush.bf16.msra.mxu0 %v6304_v29  ;;  %v6272_v30 = vor.u32 %v6683_v63, %v6271_v36  ;;  %v6682_v29 = vld [vmem:[#allocation9 + $0x8c] sm:$0xf]  ;;  %v6231_v63 = vld [vmem:[#allocation9 + $0x28] sm:$0xf] }
 0x71c   :  { %7048 = vpow2.f32 %v6202_v31 }
 0x71f   :  { %v7043_v51 = vpop.eup %7042 }
 0x720   :  { %v7045_v62 = vpop.eup %7044  ;;  %v3871_v21 = vadd.f32 1.0, %v7043_v51  ;;  %v6305_v51 = vld [vmem:[#allocation9 + $0xd0] sm:$0xf0] }
 0x721   :  { %v7047_v38 = vpop.eup %7046  ;;  %v8764_v55 = vadd.f32 1.0, %v7045_v62  ;;  %v6311_v62 = vld [vmem:[#allocation9 + $0xc8] sm:$0xf]  ;;  %v6308_v2 = vor.u32 %v6689_v40, %v6305_v51  ;;  %v6281_v51 = vld [vmem:[#allocation9 + $0x98] sm:$0xf0] }
 0x722   :  { %v7049_v45 = vpop.eup %7048  ;;  %7050 = vrcp.f32 %v3871_v21  ;;  %v3884_v0 = vand.u32 2147483648, %v3871_v21  ;;  %v8769_v35 = vadd.f32 1.0, %v7047_v38  ;;  %v3882_v16 = vand.u32 2147483647, %v3871_v21 }
 0x723   :  { %7052 = vrcp.f32 %v8764_v55  ;;  %v3899_v10 = vand.u32 2147483648, %v8764_v55  ;;  %v8771_v48 = vadd.f32 1.0, %v7049_v45  ;;  %v3897_v34 = vand.u32 2147483647, %v8764_v55  ;;  %v6692_v45 = vld [vmem:[#allocation9 + $0xd4] sm:$0xf0]  ;;  %4279 = vmatpush.bf16.msra.mxu1 %v6308_v2 }
 0x724   :  { %7054 = vrcp.f32 %v8769_v35  ;;  %v8777_v32 = vor.u32 1.1754944e-38, %v3884_v0  ;;  %v3924_v4 = vand.u32 2147483647, %v8769_v35  ;;  %vm3878_vm15 = vweird.f32 %v3871_v21 }
 0x725   :  { %7056 = vrcp.f32 %v8771_v48  ;;  %v8783_v59 = vor.u32 1.1754944e-38, %v3899_v10  ;;  %v3926_v54 = vand.u32 2147483648, %v8769_v35  ;;  %vm8790_vm1 = vcmp.eq.f32.partialorder %v3882_v16, 8.507059e+37  ;;  %v6313_v16 = vld [vmem:[#allocation9 + $0xd8] sm:$0xf0] }
 0x726   :  { %7058 = vtanh.f32 %v3860_v43  ;;  %vm3893_vm2 = vweird.f32 %v8764_v55  ;;  %v3939_v41 = vand.u32 2147483647, %v8771_v48  ;;  %vm8798_vm3 = vcmp.eq.f32.partialorder %v3897_v34, 8.507059e+37  ;;  %v6287_v34 = vld [vmem:[#allocation9 + $0xa0] sm:$0xf] }
 0x727   :  { %vm3920_vm4 = vweird.f32 %v8769_v35  ;;  %v3941_v37 = vand.u32 2147483648, %v8771_v48  ;;  %v8814_v50 = vor.u32 1.1754944e-38, %v3926_v54  ;;  %vm3935_vm7 = vweird.f32 %v8771_v48 }
 0x728   :  { %v8781_v47 = vpop.eup %7050  ;;  %vm8823_vm9 = vcmp.eq.f32.partialorder %v3924_v4, 8.507059e+37  ;;  %v6312_v10 = vor.u32 %v6692_v45, %v6311_v62  ;;  %v6316_v39 = vor.u32 %v6690_v46, %v6313_v16  ;;  %7060 = vtanh.f32 %v8775_v52  ;;  %v6297_v52 = vld [vmem:[#allocation9 + $0xb8] sm:$0xf0]  ;;  %v6255_v62 = vld [vmem:[#allocation9 + $0x60] sm:$0xf] }
 0x729   :  { %v8786_v14 = vpop.eup %7052  ;;  %v3874_v13 = vmul.f32 %v8781_v47, %v3871_v21  ;;  %vm3879_vm0 = vweird.f32 %v8781_v47  ;;  %v6300_v19 = vor.u32 %v6686_v20, %v6297_v52  ;;  %v6284_v2 = vor.u32 %v6682_v29, %v6281_v51  ;;  %v6257_v45 = vld [vmem:[#allocation9 + $0x70] sm:$0xf0]  ;;  %v6263_v46 = vld [vmem:[#allocation9 + $0x68] sm:$0xf]  ;;  %v6265_v16 = vld [vmem:[#allocation9 + $0x78] sm:$0xf0] }
 0x72a   :  { %v3889_v3 = vmul.f32 %v8786_v14, %v8764_v55  ;;  %vm3894_vm5 = vweird.f32 %v8786_v14  ;;  %v8805_v33 = vpop.eup %7054  ;;  %vm8810_vm6 = vmor %vm3878_vm15, %vm3879_vm0  ;;  %vm8850_vm0 = vcmp.eq.f32.partialorder %v3939_v41, 8.507059e+37  ;;  %v6685_v41 = vld [vmem:[#allocation9 + $0xa4] sm:$0xf]  ;;  %4293 = vmatpush.bf16.msra.mxu2 %v6312_v10  ;;  %4307 = vmatpush.bf16.msra.mxu3 %v6316_v39  ;;  %v6678_v10 = vld [vmem:[#allocation9 + $0x6c] sm:$0xf] }
 0x72b   :  { %v3875_v60 = vsub.f32 1.0, %v3874_v13  ;;  %v8817_v22 = vpop.eup %7056  ;;  %v3916_v1 = vmul.f32 %v8805_v33, %v8769_v35  ;;  %vm3921_vm8 = vweird.f32 %v8805_v33  ;;  %vm8834_vm10 = vmor %vm3893_vm2, %vm3894_vm5  ;;  %v3942_v35 = vor.u32 1.1754944e-38, %v3941_v37  ;;  %v6687_v13 = vld [vmem:[#allocation9 + $0xac] sm:$0xf0]  ;;  %v6673_v39 = vld [vmem:[#allocation9 + $0x44] sm:$0xf] }
 0x72c   :  { %v3890_v5 = vsub.f32 1.0, %v3889_v3  ;;  %v8827_v6 = vpop.eup %7058  ;;  %v3931_v38 = vmul.f32 %v8817_v22, %v8771_v48  ;;  %vm3936_vm13 = vweird.f32 %v8817_v22  ;;  %vm8846_vm15 = vmor %vm3920_vm4, %vm3921_vm8  ;;  %v6288_v48 = vor.u32 %v6687_v13, %v6287_v34  ;;  %v6289_v3 = vld [vmem:[#allocation9 + $0xb0] sm:$0xf0]  ;;  %v6669_v20 = vld [vmem:[#allocation9 + $0x24] sm:$0xf] }
 0x72d   :  { %v3876_v12 = vmul.f32 %v8781_v47, %v3875_v60  ;;  %v3917_v0 = vsub.f32 1.0, %v3916_v1  ;;  %vm8857_vm2 = vmor %vm3935_vm7, %vm3936_vm13  ;;  %v6292_v60 = vor.u32 %v6685_v41, %v6289_v3  ;;  %v6684_v1 = vld [vmem:[#allocation9 + $0x94] sm:$0xf0]  ;;  %v6268_v43 = vor.u32 %v6678_v10, %v6265_v16  ;;  %v6247_v41 = vld [vmem:[#allocation9 + $0x48] sm:$0xf] }
 0x72e   :  { %v3891_v8 = vmul.f32 %v8786_v14, %v3890_v5  ;;  %v3932_v54 = vsub.f32 1.0, %v3931_v38  ;;  %v6273_v5 = vld [vmem:[#allocation9 + $0x90] sm:$0xf0]  ;;  %4266 = vmatpush.bf16.msra.mxu0 %v6288_v48  ;;  %4294 = vmatpush.bf16.msra.mxu2 %v6296_v57  ;;  %v6249_v48 = vld [vmem:[#allocation9 + $0x58] sm:$0xf0] }
 0x72f   :  { %v3877_v27 = vadd.f32 %v8781_v47, %v3876_v12  ;;  %v3918_v11 = vmul.f32 %v8805_v33, %v3917_v0  ;;  %v6279_v12 = vld [vmem:[#allocation9 + $0x88] sm:$0xf]  ;;  %4280 = vmatpush.bf16.msra.mxu1 %v6292_v60  ;;  %4308 = vmatpush.bf16.msra.mxu3 %v6300_v19  ;;  %v6671_v60 = vld [vmem:[#allocation9 + $0x2c] sm:$0xf0]  ;;  %v6225_v57 = vld [vmem:[#allocation9 + $0x30] sm:$0xf0] }
 0x730   :  { %v3892_v4 = vadd.f32 %v8786_v14, %v3891_v8  ;;  %v6280_v40 = vor.u32 %v6684_v1, %v6279_v12  ;;  %v6679_v8 = vld [vmem:[#allocation9 + $0x6c] sm:$0xf0]  ;;  %v6207_v12 = vld [vmem:[#allocation9] sm:$0xf]  ;;  %v6228_v1 = vor.u32 %v6669_v20, %v6225_v57 }
 0x731   :  { %v3881_v28 = vsel %vm8810_vm6, %v8781_v47, %v3877_v27  ;;  %v3933_v47 = vmul.f32 %v8817_v22, %v3932_v54  ;;  %v3919_v23 = vadd.f32 %v8805_v33, %v3918_v11  ;;  %v7061_v27 = vpop.eup %7060  ;;  %v6239_v54 = vld [vmem:[#allocation9 + $0x40] sm:$0xf]  ;;  %v6674_v11 = vld [vmem:[#allocation9 + $0x4c] sm:$0xf] }
 0x732   :  { %v3886_v37 = vsel %vm8790_vm1, %v8777_v32, %v3881_v28  ;;  %v3896_v17 = vsel %vm8834_vm10, %v8786_v14, %v3892_v4  ;;  %v6681_v32 = vld [vmem:[#allocation9 + $0x84] sm:$0xf]  ;;  %4267 = vmatpush.bf16.msra.mxu0 %v6272_v30  ;;  %4295 = vmatpush.bf16.msra.mxu2 %v6280_v40  ;;  %v6240_v26 = vor.u32 %v6675_v25, %v6239_v54  ;;  %v6209_v40 = vld [vmem:[#allocation9 + $0x10] sm:$0xf0] }
 0x733   :  { %v3901_v49 = vsel %vm8798_vm3, %v8783_v59, %v3896_v17  ;;  %v3905_v18 = vmul.f32 %v3886_v37, %v8654_v56  ;;  %v3934_v14 = vadd.f32 %v8817_v22, %v3933_v47  ;;  %v3923_v59 = vsel %vm8846_vm15, %v8805_v33, %v3919_v23  ;;  %v6677_v33 = vld [vmem:[#allocation9 + $0x64] sm:$0xf]  ;;  %4309 = vmatpush.bf16.msra.mxu3 %v6284_v2  ;;  %v6223_v47 = vld [vmem:[#allocation9 + $0x20] sm:$0xf]  ;;  %v6666_v2 = vld [vmem:[#allocation9 + $0xc] sm:$0xf] }
 0x734   :  { %v6276_v9 = vor.u32 %v6681_v32, %v6273_v5  ;;  %v3906_v56 = vmul.f32 %v3901_v49, %v8657_v7  ;;  %v3928_v21 = vsel %vm8823_vm9, %v8814_v50, %v3923_v59  ;;  %v6680_v7 = vld [vmem:[#allocation9 + $0x74] sm:$0xf0]  ;;  %v6256_v50 = vor.u32 %v6679_v8, %v6255_v62  ;;  %v6670_v5 = vld [vmem:[#allocation9 + $0x2c] sm:$0xf]  ;;  %v6667_v59 = vld [vmem:[#allocation9 + $0xc] sm:$0xf0] }
 0x735   :  { %v3938_v38 = vsel %vm8857_vm2, %v8817_v22, %v3934_v14  ;;  %v3947_v55 = vmul.f32 %v8827_v6, %v3928_v21  ;;  %v6260_v22 = vor.u32 %v6677_v33, %v6257_v45  ;;  %v6264_v4 = vor.u32 %v6680_v7, %v6263_v46  ;;  %v6676_v6 = vld [vmem:[#allocation9 + $0x54] sm:$0xf0]  ;;  %v6217_v33 = vld [vmem:[#allocation9 + $0x18] sm:$0xf0] }
 0x736   :  { %v3943_v0 = vsel %vm8850_vm0, %v3942_v35, %v3938_v38  ;;  %4281 = vmatpush.bf16.msra.mxu1 %v6276_v9  ;;  %v6241_v35 = vld [vmem:[#allocation9 + $0x50] sm:$0xf0]  ;;  %4268 = vmatpush.bf16.msra.mxu0 %v6256_v50  ;;  %v6248_v17 = vor.u32 %v6676_v6, %v6247_v41  ;;  %v6252_v23 = vor.u32 %v6674_v11, %v6249_v48  ;;  %v6672_v32 = vld [vmem:[#allocation9 + $0x34] sm:$0xf0]  ;;  %v6665_v9 = vld [vmem:[#allocation9 + $0x4] sm:$0xf]  ;;  %v3410_v38 = vunpack.c.l.bf16 %v8757_v58 }
 0x737   :  { %v3948_v31 = vmul.f32 %v7061_v27, %v3943_v0  ;;  %v3949_v34 = vadd.f32 %v3947_v55, %v3905_v18  ;;  %4296 = vmatpush.bf16.msra.mxu2 %v6264_v4  ;;  %v6244_v37 = vor.u32 %v6673_v39, %v6241_v35  ;;  %4310 = vmatpush.bf16.msra.mxu3 %v6268_v43  ;;  %v6233_v18 = vld [vmem:[#allocation9 + $0x38] sm:$0xf0]  ;;  %v6668_v21 = vld [vmem:[#allocation9 + $0x14] sm:$0xf0]  ;;  %v3414_v45 = vunpack.c.l.bf16 %v8760_v44 }
 0x738   :  { %v6224_v30 = vor.u32 %v6671_v60, %v6223_v47  ;;  %v6232_v29 = vor.u32 %v6672_v32, %v6231_v63  ;;  %v6236_v8 = vor.u32 %v6670_v5, %v6233_v18  ;;  %v6208_v27 = vor.u32 %v6667_v59, %v6207_v12  ;;  %v7178_v63 = vld [vmem:[%s9315_s6] sm:$0x1] }
 0x739   :  { %v3950_v13 = vadd.f32 %v3948_v31, %v3906_v56  ;;  %v8893_v28 = vmul.f32 %v3949_v34, %v7645_v53  ;;  %v6215_v56 = vld [vmem:[#allocation9 + $0x8] sm:$0xf]  ;;  %v6212_v55 = vor.u32 %v6665_v9, %v6209_v40  ;;  %v6220_v16 = vor.u32 %v6666_v2, %v6217_v33 }
 0x73a   :  { %4282 = vmatpush.bf16.msra.mxu1 %v6260_v22  ;;  %4269 = vmatpush.bf16.msra.mxu0 %v6240_v26  ;;  %v6216_v7 = vor.u32 %v6668_v21, %v6215_v56  ;;  %v3859_v50 = vadd.f32 %v8753_v61, %v3410_v38  ;;  %v3863_v58 = vadd.f32 %v8755_v24, %v3414_v45 }
 0x73b   :  { %v8896_v3 = vmul.f32 %v3950_v13, %v7695_v15  ;;  %v3961_v42 = vmul.f32 %v8893_v28, %v8893_v28  ;;  %4297 = vmatpush.bf16.msra.mxu2 %v6248_v17  ;;  %4311 = vmatpush.bf16.msra.mxu3 %v6252_v23 }
 0x73c   :  { %v6203_v54 = vmul.f32 -1.442695, %v3859_v50  ;;  %v6204_v25 = vmul.f32 -1.442695, %v3863_v58 }
 0x73d   :  { %v3953_v52 = vadd.f32 %v8896_v3, %v8893_v28  ;;  %v3962_v36 = vmul.f32 %v8896_v3, %v8896_v3  ;;  %v6787_v49 = vpack.c.bf16 %v8896_v3, %v8893_v28 }
 0x73e   :  { %4283 = vmatpush.bf16.msra.mxu1 %v6244_v37  ;;  %4270 = vmatpush.bf16.msra.mxu0 %v6224_v30  ;;  %7062 = vpow2.f32 %v6203_v54  ;;  %v7179_v30 = vld [vmem:[%s9316_s7] sm:$0x1] }
 0x73f   :  { %v3954_v14 = vrot.slane %v3953_v52, 4  ;;  %v3963_v19 = vadd.f32 %v3962_v36, %v3961_v42  ;;  %6788 = vst [vmem:[#allocation14 + $0x28] sm:$0xff] %v6787_v49   ;;  %4298 = vmatpush.bf16.msra.mxu2 %v6232_v29  ;;  %4312 = vmatpush.bf16.msra.mxu3 %v6236_v8  ;;  %7064 = vpow2.f32 %v6204_v25 }
 0x741   :  { %v3955_v51 = vadd.f32 %v3954_v14, %v3953_v52  ;;  %v3964_v62 = vrot.slane %v3963_v19, 4 }
 0x742   :  { %4284 = vmatpush.bf16.msra.mxu1 %v6228_v1  ;;  %4271 = vmatpush.bf16.msra.mxu0 %v6208_v27 }
 0x743   :  { %v3965_v46 = vadd.f32 %v3964_v62, %v3963_v19  ;;  %v3956_v0 = vrot.slane %v3955_v51, 2  ;;  %4299 = vmatpush.bf16.msra.mxu2 %v6216_v7  ;;  %4313 = vmatpush.bf16.msra.mxu3 %v6220_v16 }
 0x744   :  { %v7063_v24 = vpop.eup %7062 }
 0x745   :  { %v3966_v10 = vrot.slane %v3965_v46, 2  ;;  %v3957_v31 = vadd.f32 %v3956_v0, %v3955_v51  ;;  %v7065_v11 = vpop.eup %7064  ;;  %v4004_v48 = vadd.f32 1.0, %v7063_v24 }
 0x746   :  { %4285 = vmatpush.bf16.msra.mxu1 %v6212_v55  ;;  %v4005_v26 = vadd.f32 1.0, %v7065_v11 }
 0x747   :  { %v3967_v34 = vadd.f32 %v3966_v10, %v3965_v46  ;;  %v3958_v22 = vrot.slane %v3957_v31, 1  ;;  %v4017_v56 = vand.u32 2147483648, %v4004_v48  ;;  %vm4011_vm7 = vweird.f32 %v4004_v48 }
 0x748   :  { %v4015_v38 = vand.u32 2147483647, %v4004_v48  ;;  %v4032_v2 = vand.u32 2147483648, %v4005_v26  ;;  %vm4026_vm9 = vweird.f32 %v4005_v26  ;;  %v4030_v33 = vand.u32 2147483647, %v4005_v26 }
 0x749   :  { %v3959_v44 = vadd.f32 %v3958_v22, %v3957_v31  ;;  %v3968_v4 = vrot.slane %v3967_v34, 1  ;;  %v4018_v46 = vor.u32 1.1754944e-38, %v4017_v56 }
 0x74a   :  { %vm4016_vm13 = vcmp.eq.f32.partialorder %v4015_v38, 8.507059e+37  ;;  %v4033_v0 = vor.u32 1.1754944e-38, %v4032_v2  ;;  %vm4031_vm15 = vcmp.eq.f32.partialorder %v4030_v33, 8.507059e+37 }
 0x74b   :  { %v3960_v39 = vmul.f32 0.5, %v3959_v44  ;;  %v3969_v13 = vadd.f32 %v3968_v4, %v3967_v34 }
 0x74d   :  { %v3970_v43 = vmul.f32 0.5, %v3969_v13  ;;  %v3971_v35 = vmul.f32 %v3960_v39, %v3960_v39 }
 0x74f   :  { %v3972_v41 = vsub.f32 %v3970_v43, %v3971_v35 }
 0x751   :  { %v3973_v61 = vmax.f32 %v3972_v41, 0.0 }
 0x753   :  { %v3974_v6 = vadd.f32 1e-05, %v3973_v61 }
 0x755   :  { %7066 = vrsqrt.f32 %v3974_v6  ;;  %vm3981_vm3 = vweird.f32 %v3974_v6 }
 0x756   :  { %7068 = vrcp.f32 %v4004_v48 }
 0x757   :  { %7070 = vrcp.f32 %v4005_v26 }
 0x75b   :  { %v7067_v42 = vpop.eup %7066 }
 0x75c   :  { %v3976_v37 = vmul.f32 %v7067_v42, %v3974_v6  ;;  %v7069_v60 = vpop.eup %7068  ;;  %vm3982_vm1 = vweird.f32 %v7067_v42 }
 0x75d   :  { %v7071_v20 = vpop.eup %7070  ;;  %v4007_v49 = vmul.f32 %v7069_v60, %v4004_v48  ;;  %vm3983_vm4 = vmor %vm3981_vm3, %vm3982_vm1  ;;  %vm4012_vm5 = vweird.f32 %v7069_v60 }
 0x75e   :  { %v3977_v17 = vmul.f32 %v7067_v42, %v3976_v37  ;;  %v4022_v23 = vmul.f32 %v7071_v20, %v4005_v26  ;;  %vm4027_vm6 = vweird.f32 %v7071_v20  ;;  %vm4013_vm8 = vmor %vm4011_vm7, %vm4012_vm5 }
 0x75f   :  { %v4008_v5 = vsub.f32 1.0, %v4007_v49  ;;  %vm4028_vm10 = vmor %vm4026_vm9, %vm4027_vm6 }
 0x760   :  { %v3978_v47 = vmul.f32 0.5, %v3977_v17  ;;  %v4023_v19 = vsub.f32 1.0, %v4022_v23 }
 0x761   :  { %v4009_v1 = vmul.f32 %v7069_v60, %v4008_v5 }
 0x762   :  { %v3979_v52 = vsub.f32 1.5, %v3978_v47  ;;  %v4024_v40 = vmul.f32 %v7071_v20, %v4023_v19 }
 0x763   :  { %v4010_v8 = vadd.f32 %v7069_v60, %v4009_v1 }
 0x764   :  { %v3980_v36 = vmul.f32 %v7067_v42, %v3979_v52  ;;  %v4025_v21 = vadd.f32 %v7071_v20, %v4024_v40 }
 0x765   :  { %v4014_v45 = vsel %vm4013_vm8, %v7069_v60, %v4010_v8 }
 0x766   :  { %v3984_v57 = vsel %vm3983_vm4, %v7067_v42, %v3980_v36  ;;  %v4029_v27 = vsel %vm4028_vm10, %v7071_v20, %v4025_v21  ;;  %v4019_v7 = vsel %vm4016_vm13, %v4018_v46, %v4014_v45 }
 0x767   :  { %v3985_v32 = vmul.f32 %v7178_v63, %v3984_v57  ;;  %v4034_v16 = vsel %vm4031_vm15, %v4033_v0, %v4029_v27 }
 0x769   :  { %v3986_v18 = vmul.f32 %v3985_v32, %v3960_v39  ;;  %v3989_v14 = vperm.slane %v3985_v32, 0 }
 0x76b   :  { %v3987_v12 = vsub.f32 %v7179_v30, %v3986_v18  ;;  %v3991_v29 = vmul.f32 %v3989_v14, %v8893_v28  ;;  %v3992_v59 = vmul.f32 %v3989_v14, %v8896_v3 }
 0x76d   :  { %v3994_v9 = vperm.slane %v3987_v12, 0 }
 0x76f   :  { %v3996_v51 = vadd.f32 %v3994_v9, %v3991_v29  ;;  %v3997_v62 = vadd.f32 %v3994_v9, %v3992_v59 }
 0x771   :  { %7072 = vtanh.f32 %v3996_v51 }
 0x772   :  { %7074 = vtanh.f32 %v3997_v62 }
 0x777   :  { %v7073_v55 = vpop.eup %7072 }
 0x778   :  { %v7075_v10 = vpop.eup %7074  ;;  %v4038_v31 = vmul.f32 %v7073_v55, %v4019_v7 }
 0x779   :  { %v4039_v50 = vmul.f32 %v7075_v10, %v4034_v16 }
 0x77a   :  { %v4040_v58 = vmul.f32 %v4038_v31, %v7645_v53 }
 0x77b   :  { %v4041_v34 = vmul.f32 %v4039_v50, %v7695_v15 }
 0x77d   :  { %v6782_v22 = vpack.c.bf16 %v4041_v34, %v4040_v58 }
 0x77f   :  { %6783 = vst [vmem:[#allocation13 + $0x28] sm:$0xff] %v6782_v22   ;;  %4272 = vmatmul.bf16.vlgmr.msra.gmra.mxu0 %v6782_v22  ;;  %4286 = vmatmul.bf16.vlgmr.msra.gmra.mxu1 %v6782_v22 }
 0x780   :  { %4300 = vmatmul.bf16.vlgmr.msra.gmra.mxu2 %v6782_v22  ;;  %4314 = vmatmul.bf16.vlgmr.msra.gmra.mxu3 %v6782_v22 }
 0x7fc   :  { %v8920_v44 = vpop.f32.mrf.mxu0  ;;  %v8922_v4 = vpop.f32.mrf.mxu1 }
 0x7fd   :  { %v4352_v39 = vmul.f32 %v8920_v44, %v8920_v44  ;;  %v4353_v13 = vmul.f32 %v8922_v4, %v8922_v4 }
 0x803   :  { %v8924_v54 = vpop.f32.mrf.mxu2  ;;  %v8926_v25 = vpop.f32.mrf.mxu3 }
 0x804   :  { %v8932_v43 = vpop.f32.mrf.mxu0  ;;  %v8934_v35 = vpop.f32.mrf.mxu1  ;;  %v4354_v20 = vmul.f32 %v8924_v54, %v8924_v54  ;;  %v4355_v52 = vmul.f32 %v8926_v25, %v8926_v25 }
 0x805   :  { %v4320_v41 = vadd.f32 %v8932_v43, %v8920_v44  ;;  %v4356_v61 = vmul.f32 %v8932_v43, %v8932_v43  ;;  %v4327_v6 = vadd.f32 %v8934_v35, %v8922_v4  ;;  %v4357_v24 = vmul.f32 %v8934_v35, %v8934_v35 }
 0x807   :  { %v4321_v11 = vrot.slane %v4320_v41, 4  ;;  %v4360_v48 = vadd.f32 %v4356_v61, %v4352_v39  ;;  %v4328_v26 = vrot.slane %v4327_v6, 4  ;;  %v4367_v42 = vadd.f32 %v4357_v24, %v4353_v13 }
 0x809   :  { %v4322_v37 = vadd.f32 %v4321_v11, %v4320_v41  ;;  %v4361_v17 = vrot.slane %v4360_v48, 4  ;;  %v4329_v47 = vadd.f32 %v4328_v26, %v4327_v6  ;;  %v4368_v60 = vrot.slane %v4367_v42, 4 }
 0x80b   :  { %v4323_v36 = vrot.slane %v4322_v37, 2  ;;  %v4362_v49 = vadd.f32 %v4361_v17, %v4360_v48  ;;  %v4330_v23 = vrot.slane %v4329_v47, 2  ;;  %v4369_v57 = vadd.f32 %v4368_v60, %v4367_v42  ;;  %v8948_v63 = vpop.f32.mrf.mxu2  ;;  %v8950_v32 = vpop.f32.mrf.mxu3 }
 0x80c   :  { %v4334_v5 = vadd.f32 %v8948_v63, %v8924_v54  ;;  %v4358_v18 = vmul.f32 %v8948_v63, %v8948_v63  ;;  %v4341_v14 = vadd.f32 %v8950_v32, %v8926_v25  ;;  %v4359_v19 = vmul.f32 %v8950_v32, %v8950_v32 }
 0x80d   :  { %v4324_v30 = vadd.f32 %v4323_v36, %v4322_v37  ;;  %v4363_v12 = vrot.slane %v4362_v49, 2  ;;  %v4331_v1 = vadd.f32 %v4330_v23, %v4329_v47  ;;  %v4370_v29 = vrot.slane %v4369_v57, 2 }
 0x80e   :  { %v4335_v59 = vrot.slane %v4334_v5, 4  ;;  %v4374_v9 = vadd.f32 %v4358_v18, %v4354_v20  ;;  %v4342_v40 = vrot.slane %v4341_v14, 4  ;;  %v4381_v51 = vadd.f32 %v4359_v19, %v4355_v52 }
 0x80f   :  { %v4325_v62 = vrot.slane %v4324_v30, 1  ;;  %v4364_v8 = vadd.f32 %v4363_v12, %v4362_v49  ;;  %v4332_v56 = vrot.slane %v4331_v1, 1  ;;  %v4371_v21 = vadd.f32 %v4370_v29, %v4369_v57 }
 0x810   :  { %v4336_v38 = vadd.f32 %v4335_v59, %v4334_v5  ;;  %v4375_v2 = vrot.slane %v4374_v9, 4  ;;  %v4343_v33 = vadd.f32 %v4342_v40, %v4341_v14  ;;  %v4382_v45 = vrot.slane %v4381_v51, 4 }
 0x811   :  { %v4326_v46 = vadd.f32 %v4325_v62, %v4324_v30  ;;  %v4365_v27 = vrot.slane %v4364_v8, 1  ;;  %v4333_v0 = vadd.f32 %v4332_v56, %v4331_v1  ;;  %v4372_v55 = vrot.slane %v4371_v21, 1 }
 0x812   :  { %v4337_v7 = vrot.slane %v4336_v38, 2  ;;  %v4376_v10 = vadd.f32 %v4375_v2, %v4374_v9  ;;  %v4344_v16 = vrot.slane %v4343_v33, 2  ;;  %v4383_v31 = vadd.f32 %v4382_v45, %v4381_v51 }
 0x813   :  { %v8960_v50 = vmul.f32 0.5, %v4326_v46  ;;  %v4366_v58 = vadd.f32 %v4365_v27, %v4364_v8  ;;  %v8962_v34 = vmul.f32 0.5, %v4333_v0  ;;  %v4373_v22 = vadd.f32 %v4372_v55, %v4371_v21 }
 0x814   :  { %v4338_v39 = vadd.f32 %v4337_v7, %v4336_v38  ;;  %v4377_v13 = vrot.slane %v4376_v10, 2  ;;  %v4345_v41 = vadd.f32 %v4344_v16, %v4343_v33  ;;  %v4384_v61 = vrot.slane %v4383_v31, 2 }
 0x815   :  { %v4388_v6 = vmul.f32 0.5, %v4366_v58  ;;  %v4392_v24 = vmul.f32 %v8960_v50, %v8960_v50  ;;  %v4389_v11 = vmul.f32 0.5, %v4373_v22  ;;  %v4393_v48 = vmul.f32 %v8962_v34, %v8962_v34 }
 0x816   :  { %v4339_v26 = vrot.slane %v4338_v39, 1  ;;  %v4378_v42 = vadd.f32 %v4377_v13, %v4376_v10  ;;  %v4346_v47 = vrot.slane %v4345_v41, 1  ;;  %v4385_v60 = vadd.f32 %v4384_v61, %v4383_v31 }
 0x817   :  { %v4396_v37 = vsub.f32 %v4388_v6, %v4392_v24  ;;  %v4397_v17 = vsub.f32 %v4389_v11, %v4393_v48 }
 0x818   :  { %v4340_v20 = vadd.f32 %v4339_v26, %v4338_v39  ;;  %v4379_v52 = vrot.slane %v4378_v42, 1  ;;  %v4347_v14 = vadd.f32 %v4346_v47, %v4345_v41  ;;  %v4386_v19 = vrot.slane %v4385_v60, 1 }
 0x819   :  { %v4400_v36 = vmax.f32 %v4396_v37, 0.0  ;;  %v4401_v49 = vmax.f32 %v4397_v17, 0.0 }
 0x81a   :  { %v8968_v23 = vmul.f32 0.5, %v4340_v20  ;;  %v4380_v57 = vadd.f32 %v4379_v52, %v4378_v42  ;;  %v8972_v1 = vmul.f32 0.5, %v4347_v14  ;;  %v4387_v59 = vadd.f32 %v4386_v19, %v4385_v60  ;;  %v7180_v14 = vld [vmem:[#allocation10] sm:$0xf] }
 0x81b   :  { %v4404_v5 = vadd.f32 1e-05, %v4400_v36  ;;  %v4405_v18 = vadd.f32 1e-05, %v4401_v49 }
 0x81c   :  { %v4390_v30 = vmul.f32 0.5, %v4380_v57  ;;  %v4394_v12 = vmul.f32 %v8968_v23, %v8968_v23  ;;  %v4395_v9 = vmul.f32 %v8972_v1, %v8972_v1  ;;  %v4391_v51 = vmul.f32 0.5, %v4387_v59 }
 0x81d   :  { %7076 = vrsqrt.f32 %v4405_v18  ;;  %vm4424_vm1 = vweird.f32 %v4405_v18  ;;  %vm4414_vm10 = vweird.f32 %v4404_v5 }
 0x81e   :  { %v4398_v29 = vsub.f32 %v4390_v30, %v4394_v12  ;;  %7078 = vrsqrt.f32 %v4404_v5  ;;  %v4399_v8 = vsub.f32 %v4391_v51, %v4395_v9 }
 0x820   :  { %v4402_v40 = vmax.f32 %v4398_v29, 0.0  ;;  %v4403_v2 = vmax.f32 %v4399_v8, 0.0 }
 0x822   :  { %v4406_v62 = vadd.f32 1e-05, %v4402_v40  ;;  %v4407_v45 = vadd.f32 1e-05, %v4403_v2  ;;  %v4059_v2 = vld [vmem:[#allocation4 + $0xd0] sm:$0xff] }
 0x823   :  { %v7077_v56 = vpop.eup %7076 }
 0x824   :  { %7080 = vrsqrt.f32 %v4406_v62  ;;  %v7079_v21 = vpop.eup %7078  ;;  %v4419_v38 = vmul.f32 %v7077_v56, %v4405_v18  ;;  %vm4425_vm0 = vweird.f32 %v7077_v56  ;;  %vm4434_vm4 = vweird.f32 %v4406_v62 }
 0x825   :  { %v4409_v46 = vmul.f32 %v7079_v21, %v4404_v5  ;;  %7082 = vrsqrt.f32 %v4407_v45  ;;  %vm4426_vm3 = vmor %vm4424_vm1, %vm4425_vm0  ;;  %vm4415_vm7 = vweird.f32 %v7079_v21  ;;  %vm4444_vm8 = vweird.f32 %v4407_v45 }
 0x826   :  { %v4420_v33 = vmul.f32 %v7077_v56, %v4419_v38  ;;  %vm4416_vm13 = vmor %vm4414_vm10, %vm4415_vm7  ;;  %v4057_v38 = vld [vmem:[#allocation4 + $0xc0] sm:$0xff] }
 0x827   :  { %v4410_v7 = vmul.f32 %v7079_v21, %v4409_v46 }
 0x828   :  { %v4421_v0 = vmul.f32 0.5, %v4420_v33 }
 0x829   :  { %v4411_v22 = vmul.f32 0.5, %v4410_v7 }
 0x82a   :  { %v7081_v27 = vpop.eup %7080  ;;  %v4422_v16 = vsub.f32 1.5, %v4421_v0  ;;  %v4062_v0 = vunpack.c.h.bf16 %v4057_v38 }
 0x82b   :  { %v4429_v55 = vmul.f32 %v7081_v27, %v4406_v62  ;;  %v7083_v31 = vpop.eup %7082  ;;  %vm4435_vm2 = vweird.f32 %v7081_v27  ;;  %v4412_v24 = vsub.f32 1.5, %v4411_v22 }
 0x82c   :  { %v4439_v39 = vmul.f32 %v7083_v31, %v4407_v45  ;;  %v4423_v41 = vmul.f32 %v7077_v56, %v4422_v16  ;;  %vm4436_vm5 = vmor %vm4434_vm4, %vm4435_vm2  ;;  %vm4445_vm6 = vweird.f32 %v7083_v31  ;;  %v4066_v16 = vunpack.c.h.bf16 %v4059_v2 }
 0x82d   :  { %v4430_v10 = vmul.f32 %v7081_v27, %v4429_v55  ;;  %v4413_v37 = vmul.f32 %v7079_v21, %v4412_v24  ;;  %vm4446_vm9 = vmor %vm4444_vm8, %vm4445_vm6 }
 0x82e   :  { %v4440_v61 = vmul.f32 %v7083_v31, %v4439_v39  ;;  %v4427_v48 = vsel %vm4426_vm3, %v7077_v56, %v4423_v41 }
 0x82f   :  { %v4431_v58 = vmul.f32 0.5, %v4430_v10  ;;  %v4452_v47 = vrot.slane %v4427_v48, 7  ;;  %v4417_v36 = vsel %vm4416_vm13, %v7079_v21, %v4413_v37 }
 0x830   :  { %v4441_v11 = vmul.f32 0.5, %v4440_v61 }
 0x831   :  { %v4432_v13 = vsub.f32 1.5, %v4431_v58  ;;  %v4455_v49 = vsel %vm526_vm11, %v4417_v36, %v4452_v47 }
 0x832   :  { %v4442_v42 = vsub.f32 1.5, %v4441_v11 }
 0x833   :  { %v4433_v6 = vmul.f32 %v7081_v27, %v4432_v13 }
 0x834   :  { %v4443_v17 = vmul.f32 %v7083_v31, %v4442_v42 }
 0x835   :  { %v4437_v26 = vsel %vm4436_vm5, %v7081_v27, %v4433_v6 }
 0x836   :  { %v4453_v60 = vrot.slane %v4437_v26, 6  ;;  %v4447_v20 = vsel %vm4446_vm9, %v7083_v31, %v4443_v17 }
 0x837   :  { %v4454_v52 = vrot.slane %v4447_v20, 5  ;;  %v8999_v20 = vld [vmem:[#allocation4 + $0xd8] sm:$0xff] }
 0x839   :  { %v4456_v57 = vsel %vm528_vm12, %v4453_v60, %v4454_v52 }
 0x83a   :  { %v4457_v18 = vsel %vm530_vm14, %v4455_v49, %v4456_v57 }
 0x83b   :  { %v4459_v19 = vmul.f32 %v7180_v14, %v4457_v18 }
 0x83d   :  { %v4461_v30 = vperm.slane %v4459_v19, 0  ;;  %v4462_v12 = vperm.slane %v4459_v19, 1  ;;  %v4463_v29 = vperm.slane %v4459_v19, 2  ;;  %v4464_v59 = vperm.slane %v4459_v19, 3 }
 0x83f   :  { %v4470_v9 = vmul.f32 %v4462_v12, %v8962_v34  ;;  %v4471_v5 = vmul.f32 %v4463_v29, %v8968_v23  ;;  %v4472_v40 = vmul.f32 %v4464_v59, %v8972_v1  ;;  %v4487_v51 = vmul.f32 %v4463_v29, %v8924_v54  ;;  %v7181_v34 = vld [vmem:[#allocation12] sm:$0xf] }
 0x840   :  { %v4469_v62 = vmul.f32 %v4461_v30, %v8960_v50  ;;  %v4061_v23 = vunpack.c.l.bf16 %v4057_v38  ;;  %v4065_v1 = vunpack.c.l.bf16 %v4059_v2  ;;  %v4485_v54 = vmul.f32 %v4461_v30, %v8920_v44  ;;  %v6453_v2 = vld [vmem:[#allocation9 + $0xe0] sm:$0xf] }
 0x841   :  { %v4477_v8 = vrot.slane %v4470_v9, 7  ;;  %v4478_v56 = vrot.slane %v4471_v5, 6  ;;  %v4479_v21 = vrot.slane %v4472_v40, 5  ;;  %v4486_v50 = vmul.f32 %v4462_v12, %v8922_v4 }
 0x842   :  { %v4489_v31 = vmul.f32 %v4461_v30, %v8932_v43  ;;  %v4490_v58 = vmul.f32 %v4462_v12, %v8934_v35  ;;  %v4491_v22 = vmul.f32 %v4463_v29, %v8948_v63  ;;  %v8996_v63 = vld [vmem:[#allocation4 + $0xc8] sm:$0xff]  ;;  %v4488_v17 = vmul.f32 %v4464_v59, %v8926_v25 }
 0x843   :  { %v4480_v33 = vsel %vm526_vm11, %v4469_v62, %v4477_v8  ;;  %v4481_v45 = vsel %vm528_vm12, %v4478_v56, %v4479_v21  ;;  %v4064_v52 = vunpack.c.h.bf16 %v8996_v63  ;;  %v4492_v18 = vmul.f32 %v4464_v59, %v8950_v32 }
 0x844   :  { %v4482_v46 = vsel %vm530_vm14, %v4480_v33, %v4481_v45  ;;  %v4068_v30 = vunpack.c.h.bf16 %v8999_v20  ;;  %v6727_v33 = vld [vmem:[#allocation9 + $0xec] sm:$0xf0] }
 0x845   :  { %v4484_v27 = vsub.f32 %v7181_v34, %v4482_v46  ;;  %v6715_v34 = vld [vmem:[#allocation9 + $0x8c] sm:$0xf0] }
 0x847   :  { %v4494_v55 = vperm.slane %v4484_v27, 0  ;;  %v4495_v7 = vperm.slane %v4484_v27, 1  ;;  %v4496_v10 = vperm.slane %v4484_v27, 2  ;;  %v4497_v35 = vperm.slane %v4484_v27, 3 }
 0x849   :  { %v4502_v39 = vadd.f32 %v4494_v55, %v4485_v54  ;;  %v4503_v13 = vadd.f32 %v4495_v7, %v4486_v50  ;;  %v8992_v41 = vadd.f32 %v4496_v10, %v4487_v51  ;;  %v4506_v61 = vadd.f32 %v4494_v55, %v4489_v31 }
 0x84a   :  { %v4507_v6 = vadd.f32 %v4495_v7, %v4490_v58  ;;  %v8994_v24 = vadd.f32 %v4496_v10, %v4491_v22  ;;  %v4505_v36 = vadd.f32 %v4497_v35, %v4488_v17  ;;  %v4509_v12 = vadd.f32 %v4497_v35, %v4492_v18  ;;  %v6461_v7 = vld [vmem:[#allocation9 + $0xe8] sm:$0xf]  ;;  %v6728_v10 = vld [vmem:[#allocation9 + $0xf4] sm:$0xf0]  ;;  %v6726_v22 = vld [vmem:[#allocation9 + $0xec] sm:$0xf] }
 0x84b   :  { %v4510_v44 = vadd.f32 %v4502_v39, %v4061_v23  ;;  %v4511_v4 = vadd.f32 %v4503_v13, %v4062_v0  ;;  %v4514_v11 = vadd.f32 %v4506_v61, %v4065_v1  ;;  %v6725_v23 = vld [vmem:[#allocation9 + $0xe4] sm:$0xf]  ;;  %v6455_v0 = vld [vmem:[#allocation9 + $0xf0] sm:$0xf0]  ;;  %v6454_v55 = vor.u32 %v6727_v33, %v6453_v2  ;;  %v6463_v39 = vld [vmem:[#allocation9 + $0xf8] sm:$0xf0] }
 0x84c   :  { %v4515_v48 = vadd.f32 %v4507_v6, %v4066_v16  ;;  %v4513_v25 = vadd.f32 %v4505_v36, %v4064_v52  ;;  %v9014_v59 = vadd.f32 %v4509_v12, %v4068_v30  ;;  %v6458_v31 = vor.u32 %v6725_v23, %v6455_v0  ;;  %v6721_v17 = vld [vmem:[#allocation9 + $0xc4] sm:$0xf]  ;;  %v6722_v30 = vld [vmem:[#allocation9 + $0xcc] sm:$0xf]  ;;  %v6707_v2 = vld [vmem:[#allocation9 + $0x4c] sm:$0xf0] }
 0x84d   :  { %v6333_v26 = vmul.f32 -1.442695, %v4510_v44  ;;  %v6335_v42 = vmul.f32 -1.442695, %v4511_v4  ;;  %v6334_v37 = vmul.f32 -1.442695, %v4514_v11  ;;  %v6462_v58 = vor.u32 %v6728_v10, %v6461_v7  ;;  %4917 = vmatpush.bf16.msrb.mxu0 %v6454_v55 }
 0x84e   :  { %v6336_v43 = vmul.f32 -1.442695, %v4515_v48  ;;  %v6466_v4 = vor.u32 %v6726_v22, %v6463_v39  ;;  %v6437_v11 = vld [vmem:[#allocation9 + $0xc0] sm:$0xf]  ;;  %v6723_v48 = vld [vmem:[#allocation9 + $0xcc] sm:$0xf0]  ;;  %4931 = vmatpush.bf16.msrb.mxu1 %v6458_v31 }
 0x84f   :  { %7084 = vpow2.f32 %v6333_v26  ;;  %4945 = vmatpush.bf16.msrb.mxu2 %v6462_v58  ;;  %v6438_v35 = vor.u32 %v6723_v48, %v6437_v11  ;;  %v6429_v55 = vld [vmem:[#allocation9 + $0xa8] sm:$0xf]  ;;  %v6720_v7 = vld [vmem:[#allocation9 + $0xb4] sm:$0xf0]  ;;  %v6718_v31 = vld [vmem:[#allocation9 + $0xac] sm:$0xf] }
 0x850   :  { %7086 = vpow2.f32 %v6334_v37  ;;  %4959 = vmatpush.bf16.msrb.mxu3 %v6466_v4  ;;  %v6405_v58 = vld [vmem:[#allocation9 + $0x80] sm:$0xf]  ;;  %v6430_v61 = vor.u32 %v6720_v7, %v6429_v55 }
 0x851   :  { %7088 = vpow2.f32 %v6335_v42  ;;  %4918 = vmatpush.bf16.msrb.mxu0 %v6438_v35  ;;  %v6406_v48 = vor.u32 %v6715_v34, %v6405_v58  ;;  %v6714_v35 = vld [vmem:[#allocation9 + $0x8c] sm:$0xf]  ;;  %v6365_v34 = vld [vmem:[#allocation9 + $0x28] sm:$0xf] }
 0x852   :  { %7090 = vpow2.f32 %v6336_v43 }
 0x855   :  { %v7085_v47 = vpop.eup %7084 }
 0x856   :  { %v7087_v60 = vpop.eup %7086  ;;  %v4524_v49 = vadd.f32 1.0, %v7085_v47  ;;  %v6439_v47 = vld [vmem:[#allocation9 + $0xd0] sm:$0xf0] }
 0x857   :  { %v7089_v57 = vpop.eup %7088  ;;  %v9003_v14 = vadd.f32 1.0, %v7087_v60  ;;  %v6445_v60 = vld [vmem:[#allocation9 + $0xc8] sm:$0xf]  ;;  %v6442_v18 = vor.u32 %v6721_v17, %v6439_v47  ;;  %v6415_v47 = vld [vmem:[#allocation9 + $0x98] sm:$0xf0] }
 0x858   :  { %v7091_v19 = vpop.eup %7090  ;;  %7092 = vrcp.f32 %v4524_v49  ;;  %v4537_v29 = vand.u32 2147483648, %v4524_v49  ;;  %v9008_v5 = vadd.f32 1.0, %v7089_v57  ;;  %v4535_v51 = vand.u32 2147483647, %v4524_v49 }
 0x859   :  { %7094 = vrcp.f32 %v9003_v14  ;;  %v4552_v9 = vand.u32 2147483648, %v9003_v14  ;;  %v9010_v40 = vadd.f32 1.0, %v7091_v19  ;;  %v4550_v32 = vand.u32 2147483647, %v9003_v14  ;;  %v6724_v19 = vld [vmem:[#allocation9 + $0xd4] sm:$0xf0]  ;;  %4932 = vmatpush.bf16.msrb.mxu1 %v6442_v18 }
 0x85a   :  { %7096 = vrcp.f32 %v9008_v5  ;;  %v9016_v62 = vor.u32 1.1754944e-38, %v4537_v29  ;;  %v4577_v8 = vand.u32 2147483647, %v9008_v5  ;;  %vm4531_vm15 = vweird.f32 %v4524_v49 }
 0x85b   :  { %7098 = vrcp.f32 %v9010_v40  ;;  %v9022_v21 = vor.u32 1.1754944e-38, %v4552_v9  ;;  %v4579_v38 = vand.u32 2147483648, %v9008_v5  ;;  %vm9029_vm2 = vcmp.eq.f32.partialorder %v4535_v51, 8.507059e+37  ;;  %v6447_v51 = vld [vmem:[#allocation9 + $0xd8] sm:$0xf0] }
 0x85c   :  { %7100 = vtanh.f32 %v4513_v25  ;;  %vm4546_vm1 = vweird.f32 %v9003_v14  ;;  %v4592_v27 = vand.u32 2147483647, %v9010_v40  ;;  %vm9037_vm3 = vcmp.eq.f32.partialorder %v4550_v32, 8.507059e+37  ;;  %v6421_v32 = vld [vmem:[#allocation9 + $0xa0] sm:$0xf] }
 0x85d   :  { %vm4573_vm4 = vweird.f32 %v9008_v5  ;;  %v4594_v50 = vand.u32 2147483648, %v9010_v40  ;;  %v9053_v44 = vor.u32 1.1754944e-38, %v4579_v38  ;;  %vm4588_vm7 = vweird.f32 %v9010_v40 }
 0x85e   :  { %v9020_v56 = vpop.eup %7092  ;;  %vm9062_vm9 = vcmp.eq.f32.partialorder %v4577_v8, 8.507059e+37  ;;  %v6446_v9 = vor.u32 %v6724_v19, %v6445_v60  ;;  %v6450_v33 = vor.u32 %v6722_v30, %v6447_v51  ;;  %7102 = vtanh.f32 %v9014_v59  ;;  %v6431_v59 = vld [vmem:[#allocation9 + $0xb8] sm:$0xf0]  ;;  %v6389_v60 = vld [vmem:[#allocation9 + $0x60] sm:$0xf] }
 0x85f   :  { %v9025_v45 = vpop.eup %7094  ;;  %v4527_v46 = vmul.f32 %v9020_v56, %v4524_v49  ;;  %vm4532_vm0 = vweird.f32 %v9020_v56  ;;  %v6434_v11 = vor.u32 %v6718_v31, %v6431_v59  ;;  %v6418_v18 = vor.u32 %v6714_v35, %v6415_v47  ;;  %v6391_v19 = vld [vmem:[#allocation9 + $0x70] sm:$0xf0]  ;;  %v6397_v30 = vld [vmem:[#allocation9 + $0x68] sm:$0xf]  ;;  %v6399_v51 = vld [vmem:[#allocation9 + $0x78] sm:$0xf0] }
 0x860   :  { %v4542_v1 = vmul.f32 %v9025_v45, %v9003_v14  ;;  %vm4547_vm5 = vweird.f32 %v9025_v45  ;;  %v9044_v13 = vpop.eup %7096  ;;  %vm9049_vm6 = vmor %vm4531_vm15, %vm4532_vm0  ;;  %vm9089_vm0 = vcmp.eq.f32.partialorder %v4592_v27, 8.507059e+37  ;;  %v6717_v27 = vld [vmem:[#allocation9 + $0xa4] sm:$0xf]  ;;  %4946 = vmatpush.bf16.msrb.mxu2 %v6446_v9  ;;  %4960 = vmatpush.bf16.msrb.mxu3 %v6450_v33  ;;  %v6710_v9 = vld [vmem:[#allocation9 + $0x6c] sm:$0xf] }
 0x861   :  { %v4528_v16 = vsub.f32 1.0, %v4527_v46  ;;  %v9056_v26 = vpop.eup %7098  ;;  %v4569_v37 = vmul.f32 %v9044_v13, %v9008_v5  ;;  %vm4574_vm8 = vweird.f32 %v9044_v13  ;;  %vm9073_vm10 = vmor %vm4546_vm1, %vm4547_vm5  ;;  %v4595_v5 = vor.u32 1.1754944e-38, %v4594_v50  ;;  %v6719_v46 = vld [vmem:[#allocation9 + $0xac] sm:$0xf0]  ;;  %v6705_v33 = vld [vmem:[#allocation9 + $0x44] sm:$0xf] }
 0x862   :  { %v4543_v6 = vsub.f32 1.0, %v4542_v1  ;;  %v9066_v52 = vpop.eup %7100  ;;  %v4584_v57 = vmul.f32 %v9056_v26, %v9010_v40  ;;  %vm4589_vm13 = vweird.f32 %v9056_v26  ;;  %vm9085_vm15 = vmor %vm4573_vm4, %vm4574_vm8  ;;  %v6422_v40 = vor.u32 %v6719_v46, %v6421_v32  ;;  %v6423_v1 = vld [vmem:[#allocation9 + $0xb0] sm:$0xf0]  ;;  %v6701_v31 = vld [vmem:[#allocation9 + $0x24] sm:$0xf] }
 0x863   :  { %v4529_v42 = vmul.f32 %v9020_v56, %v4528_v16  ;;  %v4570_v29 = vsub.f32 1.0, %v4569_v37  ;;  %vm9096_vm1 = vmor %vm4588_vm7, %vm4589_vm13  ;;  %v6426_v16 = vor.u32 %v6717_v27, %v6423_v1  ;;  %v6716_v37 = vld [vmem:[#allocation9 + $0x94] sm:$0xf0]  ;;  %v6402_v25 = vor.u32 %v6710_v9, %v6399_v51  ;;  %v6381_v27 = vld [vmem:[#allocation9 + $0x48] sm:$0xf] }
 0x864   :  { %v4544_v36 = vmul.f32 %v9025_v45, %v4543_v6  ;;  %v4585_v38 = vsub.f32 1.0, %v4584_v57  ;;  %v6407_v6 = vld [vmem:[#allocation9 + $0x90] sm:$0xf0]  ;;  %4919 = vmatpush.bf16.msrb.mxu0 %v6422_v40  ;;  %4947 = vmatpush.bf16.msrb.mxu2 %v6430_v61  ;;  %v6383_v40 = vld [vmem:[#allocation9 + $0x58] sm:$0xf0] }
 0x865   :  { %v4530_v12 = vadd.f32 %v9020_v56, %v4529_v42  ;;  %v4571_v0 = vmul.f32 %v9044_v13, %v4570_v29  ;;  %v6413_v42 = vld [vmem:[#allocation9 + $0x88] sm:$0xf]  ;;  %4933 = vmatpush.bf16.msrb.mxu1 %v6426_v16  ;;  %4961 = vmatpush.bf16.msrb.mxu3 %v6434_v11  ;;  %v6703_v16 = vld [vmem:[#allocation9 + $0x2c] sm:$0xf0]  ;;  %v6359_v61 = vld [vmem:[#allocation9 + $0x30] sm:$0xf0] }
 0x866   :  { %v4545_v8 = vadd.f32 %v9025_v45, %v4544_v36  ;;  %v6414_v17 = vor.u32 %v6716_v37, %v6413_v42  ;;  %v6711_v36 = vld [vmem:[#allocation9 + $0x6c] sm:$0xf0]  ;;  %v6341_v42 = vld [vmem:[#allocation9] sm:$0xf]  ;;  %v6362_v37 = vor.u32 %v6701_v31, %v6359_v61 }
 0x867   :  { %v4534_v23 = vsel %vm9049_vm6, %v9020_v56, %v4530_v12  ;;  %v4586_v56 = vmul.f32 %v9056_v26, %v4585_v38  ;;  %v4572_v39 = vadd.f32 %v9044_v13, %v4571_v0  ;;  %v7103_v12 = vpop.eup %7102  ;;  %v6373_v38 = vld [vmem:[#allocation9 + $0x40] sm:$0xf]  ;;  %v6706_v0 = vld [vmem:[#allocation9 + $0x4c] sm:$0xf] }
 0x868   :  { %v4539_v50 = vsel %vm9029_vm2, %v9016_v62, %v4534_v23  ;;  %v4549_v10 = vsel %vm9073_vm10, %v9025_v45, %v4545_v8  ;;  %v6713_v62 = vld [vmem:[#allocation9 + $0x84] sm:$0xf]  ;;  %4920 = vmatpush.bf16.msrb.mxu0 %v6406_v48  ;;  %4948 = vmatpush.bf16.msrb.mxu2 %v6414_v17  ;;  %v6374_v55 = vor.u32 %v6707_v2, %v6373_v38  ;;  %v6343_v17 = vld [vmem:[#allocation9 + $0x10] sm:$0xf0] }
 0x869   :  { %v4554_v22 = vsel %vm9037_vm3, %v9022_v21, %v4549_v10  ;;  %v4558_v4 = vmul.f32 %v4539_v50, %v8893_v28  ;;  %v4587_v45 = vadd.f32 %v9056_v26, %v4586_v56  ;;  %v4576_v21 = vsel %vm9085_vm15, %v9044_v13, %v4572_v39  ;;  %v6709_v13 = vld [vmem:[#allocation9 + $0x64] sm:$0xf]  ;;  %4962 = vmatpush.bf16.msrb.mxu3 %v6418_v18  ;;  %v6357_v56 = vld [vmem:[#allocation9 + $0x20] sm:$0xf]  ;;  %v6698_v18 = vld [vmem:[#allocation9 + $0xc] sm:$0xf] }
 0x86a   :  { %v6410_v54 = vor.u32 %v6713_v62, %v6407_v6  ;;  %v4559_v28 = vmul.f32 %v4554_v22, %v8896_v3  ;;  %v4581_v49 = vsel %vm9062_vm9, %v9053_v44, %v4576_v21  ;;  %v6712_v3 = vld [vmem:[#allocation9 + $0x74] sm:$0xf0]  ;;  %v6390_v44 = vor.u32 %v6711_v36, %v6389_v60  ;;  %v6702_v6 = vld [vmem:[#allocation9 + $0x2c] sm:$0xf]  ;;  %v6699_v21 = vld [vmem:[#allocation9 + $0xc] sm:$0xf0] }
 0x86b   :  { %v4591_v57 = vsel %vm9096_vm1, %v9056_v26, %v4587_v45  ;;  %v4600_v14 = vmul.f32 %v9066_v52, %v4581_v49  ;;  %v6394_v26 = vor.u32 %v6709_v13, %v6391_v19  ;;  %v6398_v8 = vor.u32 %v6712_v3, %v6397_v30  ;;  %v6708_v52 = vld [vmem:[#allocation9 + $0x54] sm:$0xf0]  ;;  %v6351_v13 = vld [vmem:[#allocation9 + $0x18] sm:$0xf0] }
 0x86c   :  { %v4596_v29 = vsel %vm9089_vm0, %v4595_v5, %v4591_v57  ;;  %4934 = vmatpush.bf16.msrb.mxu1 %v6410_v54  ;;  %v6375_v5 = vld [vmem:[#allocation9 + $0x50] sm:$0xf0]  ;;  %4921 = vmatpush.bf16.msrb.mxu0 %v6390_v44  ;;  %v6382_v10 = vor.u32 %v6708_v52, %v6381_v27  ;;  %v6386_v39 = vor.u32 %v6706_v0, %v6383_v40  ;;  %v6704_v62 = vld [vmem:[#allocation9 + $0x34] sm:$0xf0]  ;;  %v6697_v54 = vld [vmem:[#allocation9 + $0x4] sm:$0xf]  ;;  %v4063_v57 = vunpack.c.l.bf16 %v8996_v63 }
 0x86d   :  { %v4601_v43 = vmul.f32 %v7103_v12, %v4596_v29  ;;  %v4602_v32 = vadd.f32 %v4600_v14, %v4558_v4  ;;  %4949 = vmatpush.bf16.msrb.mxu2 %v6398_v8  ;;  %v6378_v50 = vor.u32 %v6705_v33, %v6375_v5  ;;  %4963 = vmatpush.bf16.msrb.mxu3 %v6402_v25  ;;  %v6367_v4 = vld [vmem:[#allocation9 + $0x38] sm:$0xf0]  ;;  %v6700_v49 = vld [vmem:[#allocation9 + $0x14] sm:$0xf0]  ;;  %v4067_v19 = vunpack.c.l.bf16 %v8999_v20 }
 0x86e   :  { %v6358_v48 = vor.u32 %v6703_v16, %v6357_v56  ;;  %v6366_v35 = vor.u32 %v6704_v62, %v6365_v34  ;;  %v6370_v36 = vor.u32 %v6702_v6, %v6367_v4  ;;  %v6342_v12 = vor.u32 %v6699_v21, %v6341_v42  ;;  %v9152_v34 = vld [vmem:[%s9315_s6] sm:$0x1]  ;;  %s7374_s6 = smov [#allocation14]  }
 0x86f   :  { %v4603_v46 = vadd.f32 %v4601_v43, %v4559_v28  ;;  %v9132_v23 = vmul.f32 %v4602_v32, %v7645_v53  ;;  %v6349_v28 = vld [vmem:[#allocation9 + $0x8] sm:$0xf]  ;;  %v6346_v14 = vor.u32 %v6697_v54, %v6343_v17  ;;  %v6354_v51 = vor.u32 %v6698_v18, %v6351_v13 }
 0x870   :  { %4935 = vmatpush.bf16.msrb.mxu1 %v6394_v26  ;;  %4922 = vmatpush.bf16.msrb.mxu0 %v6374_v55  ;;  %v6350_v3 = vor.u32 %v6700_v49, %v6349_v28  ;;  %v4512_v44 = vadd.f32 %v8992_v41, %v4063_v57  ;;  %v4516_v63 = vadd.f32 %v8994_v24, %v4067_v19 }
 0x871   :  { %v9135_v1 = vmul.f32 %v4603_v46, %v7695_v15  ;;  %v4614_v7 = vmul.f32 %v9132_v23, %v9132_v23  ;;  %4950 = vmatpush.bf16.msrb.mxu2 %v6382_v10  ;;  %4964 = vmatpush.bf16.msrb.mxu3 %v6386_v39 }
 0x872   :  { %v6337_v38 = vmul.f32 -1.442695, %v4512_v44  ;;  %v6338_v2 = vmul.f32 -1.442695, %v4516_v63 }
 0x873   :  { %v4606_v59 = vadd.f32 %v9135_v1, %v9132_v23  ;;  %v4615_v58 = vmul.f32 %v9135_v1, %v9135_v1  ;;  %v6797_v22 = vpack.c.bf16 %v9135_v1, %v9132_v23 }
 0x874   :  { %4936 = vmatpush.bf16.msrb.mxu1 %v6378_v50  ;;  %4923 = vmatpush.bf16.msrb.mxu0 %v6358_v48  ;;  %7104 = vpow2.f32 %v6337_v38  ;;  %v9158_v48 = vld [vmem:[%s9316_s7] sm:$0x1]  ;;  %s5379_s7 = sshll.u32 %s7374_s6, 4  ;;  %s5380_s7 = int_to_ptr.vmem [resolvable:$true] %s5379_s7 }
 0x875   :  { %v4607_v45 = vrot.slane %v4606_v59, 4  ;;  %v4616_v11 = vadd.f32 %v4615_v58, %v4614_v7  ;;  %6798 = vst [vmem:[#allocation14 + $0x30] sm:$0xff] %v6797_v22   ;;  %4951 = vmatpush.bf16.msrb.mxu2 %v6366_v35  ;;  %4965 = vmatpush.bf16.msrb.mxu3 %v6370_v36  ;;  %7106 = vpow2.f32 %v6338_v2 }
 0x877   :  { %v4608_v47 = vadd.f32 %v4607_v45, %v4606_v59  ;;  %v4617_v60 = vrot.slane %v4616_v11, 4 }
 0x878   :  { %4937 = vmatpush.bf16.msrb.mxu1 %v6362_v37  ;;  %4924 = vmatpush.bf16.msrb.mxu0 %v6342_v12 }
 0x879   :  { %v4618_v30 = vadd.f32 %v4617_v60, %v4616_v11  ;;  %v4609_v29 = vrot.slane %v4608_v47, 2  ;;  %4952 = vmatpush.bf16.msrb.mxu2 %v6350_v3  ;;  %4966 = vmatpush.bf16.msrb.mxu3 %v6354_v51 }
 0x87a   :  { %v7105_v24 = vpop.eup %7104 }
 0x87b   :  { %v4619_v9 = vrot.slane %v4618_v30, 2  ;;  %v4610_v43 = vadd.f32 %v4609_v29, %v4608_v47  ;;  %v7107_v0 = vpop.eup %7106  ;;  %v4657_v40 = vadd.f32 1.0, %v7105_v24 }
 0x87c   :  { %4938 = vmatpush.bf16.msrb.mxu1 %v6346_v14  ;;  %v4658_v55 = vadd.f32 1.0, %v7107_v0 }
 0x87d   :  { %v4620_v32 = vadd.f32 %v4619_v9, %v4618_v30  ;;  %v4611_v26 = vrot.slane %v4610_v43, 1  ;;  %v4670_v28 = vand.u32 2147483648, %v4657_v40  ;;  %vm4664_vm7 = vweird.f32 %v4657_v40 }
 0x87e   :  { %v4668_v57 = vand.u32 2147483647, %v4657_v40  ;;  %v4685_v18 = vand.u32 2147483648, %v4658_v55  ;;  %vm4679_vm9 = vweird.f32 %v4658_v55  ;;  %v4683_v13 = vand.u32 2147483647, %v4658_v55 }
 0x87f   :  { %v4612_v20 = vadd.f32 %v4611_v26, %v4610_v43  ;;  %v4621_v8 = vrot.slane %v4620_v32, 1  ;;  %v4671_v30 = vor.u32 1.1754944e-38, %v4670_v28 }
 0x880   :  { %vm4669_vm13 = vcmp.eq.f32.partialorder %v4668_v57, 8.507059e+37  ;;  %v4686_v29 = vor.u32 1.1754944e-38, %v4685_v18  ;;  %vm4684_vm15 = vcmp.eq.f32.partialorder %v4683_v13, 8.507059e+37 }
 0x881   :  { %v4613_v33 = vmul.f32 0.5, %v4612_v20  ;;  %v4622_v46 = vadd.f32 %v4621_v8, %v4620_v32 }
 0x883   :  { %v4623_v25 = vmul.f32 0.5, %v4622_v46  ;;  %v4624_v5 = vmul.f32 %v4613_v33, %v4613_v33 }
 0x885   :  { %v4625_v27 = vsub.f32 %v4623_v25, %v4624_v5 }
 0x887   :  { %v4626_v41 = vmax.f32 %v4625_v27, 0.0 }
 0x889   :  { %v4627_v52 = vadd.f32 1e-05, %v4626_v41 }
 0x88b   :  { %7108 = vrsqrt.f32 %v4627_v52  ;;  %vm4634_vm3 = vweird.f32 %v4627_v52 }
 0x88c   :  { %7110 = vrcp.f32 %v4657_v40 }
 0x88d   :  { %7112 = vrcp.f32 %v4658_v55 }
 0x891   :  { %v7109_v7 = vpop.eup %7108 }
 0x892   :  { %v4629_v50 = vmul.f32 %v7109_v7, %v4627_v52  ;;  %v7111_v16 = vpop.eup %7110  ;;  %vm4635_vm2 = vweird.f32 %v7109_v7 }
 0x893   :  { %v7113_v31 = vpop.eup %7112  ;;  %v4660_v22 = vmul.f32 %v7111_v16, %v4657_v40  ;;  %vm4636_vm4 = vmor %vm4634_vm3, %vm4635_vm2  ;;  %vm4665_vm5 = vweird.f32 %v7111_v16 }
 0x894   :  { %v4630_v10 = vmul.f32 %v7109_v7, %v4629_v50  ;;  %v4675_v39 = vmul.f32 %v7113_v31, %v4658_v55  ;;  %vm4680_vm6 = vweird.f32 %v7113_v31  ;;  %vm4666_vm8 = vmor %vm4664_vm7, %vm4665_vm5 }
 0x895   :  { %v4661_v6 = vsub.f32 1.0, %v4660_v22  ;;  %vm4681_vm10 = vmor %vm4679_vm9, %vm4680_vm6 }
 0x896   :  { %v4631_v56 = vmul.f32 0.5, %v4630_v10  ;;  %v4676_v11 = vsub.f32 1.0, %v4675_v39 }
 0x897   :  { %v4662_v37 = vmul.f32 %v7111_v16, %v4661_v6 }
 0x898   :  { %v4632_v59 = vsub.f32 1.5, %v4631_v56  ;;  %v4677_v17 = vmul.f32 %v7113_v31, %v4676_v11 }
 0x899   :  { %v4663_v36 = vadd.f32 %v7111_v16, %v4662_v37 }
 0x89a   :  { %v4633_v58 = vmul.f32 %v7109_v7, %v4632_v59  ;;  %v4678_v49 = vadd.f32 %v7113_v31, %v4677_v17 }
 0x89b   :  { %v4667_v19 = vsel %vm4666_vm8, %v7111_v16, %v4663_v36 }
 0x89c   :  { %v4637_v61 = vsel %vm4636_vm4, %v7109_v7, %v4633_v58  ;;  %v4682_v12 = vsel %vm4681_vm10, %v7113_v31, %v4678_v49  ;;  %v4672_v3 = vsel %vm4669_vm13, %v4671_v30, %v4667_v19 }
 0x89d   :  { %v4638_v62 = vmul.f32 %v9152_v34, %v4637_v61  ;;  %v4687_v51 = vsel %vm4684_vm15, %v4686_v29, %v4682_v12 }
 0x89f   :  { %v4639_v4 = vmul.f32 %v4638_v62, %v4613_v33  ;;  %v4642_v45 = vperm.slane %v4638_v62, 0 }
 0x8a1   :  { %v4640_v42 = vsub.f32 %v9158_v48, %v4639_v4  ;;  %v4644_v35 = vmul.f32 %v4642_v45, %v9132_v23  ;;  %v4645_v21 = vmul.f32 %v4642_v45, %v9135_v1 }
 0x8a3   :  { %v4647_v54 = vperm.slane %v4640_v42, 0 }
 0x8a5   :  { %v4649_v47 = vadd.f32 %v4647_v54, %v4644_v35  ;;  %v4650_v60 = vadd.f32 %v4647_v54, %v4645_v21 }
 0x8a7   :  { %7114 = vtanh.f32 %v4649_v47 }
 0x8a8   :  { %7116 = vtanh.f32 %v4650_v60 }
 0x8ad   :  { %v7115_v14 = vpop.eup %7114 }
 0x8ae   :  { %v7117_v9 = vpop.eup %7116  ;;  %v4691_v43 = vmul.f32 %v7115_v14, %v4672_v3 }
 0x8af   :  { %v4692_v44 = vmul.f32 %v7117_v9, %v4687_v51 }
 0x8b0   :  { %v4693_v63 = vmul.f32 %v4691_v43, %v7645_v53 }
 0x8b1   :  { %v4694_v32 = vmul.f32 %v4692_v44, %v7695_v15 }
 0x8b3   :  { %v6792_v26 = vpack.c.bf16 %v4694_v32, %v4693_v63 }
 0x8b5   :  { %6793 = vst [vmem:[#allocation13 + $0x30] sm:$0xff] %v6792_v26   ;;  %4925 = vmatmul.bf16.vlgmr.msrb.gmra.mxu0 %v6792_v26  ;;  %4939 = vmatmul.bf16.vlgmr.msrb.gmra.mxu1 %v6792_v26 }
 0x8b6   :  { %4953 = vmatmul.bf16.vlgmr.msrb.gmra.mxu2 %v6792_v26  ;;  %4967 = vmatmul.bf16.vlgmr.msrb.gmra.mxu3 %v6792_v26 }
 0x932   :  { %v9165_v20 = vpop.f32.mrf.mxu0  ;;  %v9167_v8 = vpop.f32.mrf.mxu1 }
 0x933   :  { %v5005_v33 = vmul.f32 %v9165_v20, %v9165_v20  ;;  %v5006_v46 = vmul.f32 %v9167_v8, %v9167_v8 }
 0x939   :  { %v9169_v38 = vpop.f32.mrf.mxu2  ;;  %v9171_v2 = vpop.f32.mrf.mxu3 }
 0x93a   :  { %v9177_v25 = vpop.f32.mrf.mxu0  ;;  %v9179_v5 = vpop.f32.mrf.mxu1  ;;  %v5007_v31 = vmul.f32 %v9169_v38, %v9169_v38  ;;  %v5008_v59 = vmul.f32 %v9171_v2, %v9171_v2 }
 0x93b   :  { %v4973_v27 = vadd.f32 %v9177_v25, %v9165_v20  ;;  %v5009_v41 = vmul.f32 %v9177_v25, %v9177_v25  ;;  %v4980_v52 = vadd.f32 %v9179_v5, %v9167_v8  ;;  %v5010_v24 = vmul.f32 %v9179_v5, %v9179_v5 }
 0x93d   :  { %v4974_v0 = vrot.slane %v4973_v27, 4  ;;  %v5013_v40 = vadd.f32 %v5009_v41, %v5005_v33  ;;  %v4981_v55 = vrot.slane %v4980_v52, 4  ;;  %v5020_v7 = vadd.f32 %v5010_v24, %v5006_v46 }
 0x93f   :  { %v4975_v50 = vadd.f32 %v4974_v0, %v4973_v27  ;;  %v5014_v10 = vrot.slane %v5013_v40, 4  ;;  %v4982_v56 = vadd.f32 %v4981_v55, %v4980_v52  ;;  %v5021_v16 = vrot.slane %v5020_v7, 4 }
 0x941   :  { %v4976_v58 = vrot.slane %v4975_v50, 2  ;;  %v5015_v22 = vadd.f32 %v5014_v10, %v5013_v40  ;;  %v4983_v39 = vrot.slane %v4982_v56, 2  ;;  %v5022_v61 = vadd.f32 %v5021_v16, %v5020_v7  ;;  %v9193_v62 = vpop.f32.mrf.mxu2  ;;  %v9195_v6 = vpop.f32.mrf.mxu3 }
 0x942   :  { %v4987_v4 = vadd.f32 %v9193_v62, %v9169_v38  ;;  %v5011_v45 = vmul.f32 %v9193_v62, %v9193_v62  ;;  %v4994_v11 = vadd.f32 %v9195_v6, %v9171_v2  ;;  %v5012_v42 = vmul.f32 %v9195_v6, %v9195_v6 }
 0x943   :  { %v4977_v37 = vadd.f32 %v4976_v58, %v4975_v50  ;;  %v5016_v35 = vrot.slane %v5015_v22, 2  ;;  %v4984_v21 = vadd.f32 %v4983_v39, %v4982_v56  ;;  %v5023_v54 = vrot.slane %v5022_v61, 2 }
 0x944   :  { %v4988_v17 = vrot.slane %v4987_v4, 4  ;;  %v5027_v47 = vadd.f32 %v5011_v45, %v5007_v31  ;;  %v4995_v60 = vrot.slane %v4994_v11, 4  ;;  %v5034_v36 = vadd.f32 %v5012_v42, %v5008_v59 }
 0x945   :  { %v4978_v28 = vrot.slane %v4977_v37, 1  ;;  %v5017_v49 = vadd.f32 %v5016_v35, %v5015_v22  ;;  %v4985_v57 = vrot.slane %v4984_v21, 1  ;;  %v5024_v18 = vadd.f32 %v5023_v54, %v5022_v61 }
 0x946   :  { %v4989_v13 = vadd.f32 %v4988_v17, %v4987_v4  ;;  %v5028_v19 = vrot.slane %v5027_v47, 4  ;;  %v4996_v30 = vadd.f32 %v4995_v60, %v4994_v11  ;;  %v5035_v12 = vrot.slane %v5034_v36, 4 }
 0x947   :  { %v4979_v29 = vadd.f32 %v4978_v28, %v4977_v37  ;;  %v5018_v14 = vrot.slane %v5017_v49, 1  ;;  %v4986_v3 = vadd.f32 %v4985_v57, %v4984_v21  ;;  %v5025_v9 = vrot.slane %v5024_v18, 1 }
 0x948   :  { %v4990_v51 = vrot.slane %v4989_v13, 2  ;;  %v5029_v43 = vadd.f32 %v5028_v19, %v5027_v47  ;;  %v4997_v44 = vrot.slane %v4996_v30, 2  ;;  %v5036_v63 = vadd.f32 %v5035_v12, %v5034_v36 }
 0x949   :  { %v9205_v32 = vmul.f32 0.5, %v4979_v29  ;;  %v5019_v26 = vadd.f32 %v5018_v14, %v5017_v49  ;;  %v9207_v33 = vmul.f32 0.5, %v4986_v3  ;;  %v5026_v46 = vadd.f32 %v5025_v9, %v5024_v18 }
 0x94a   :  { %v4991_v27 = vadd.f32 %v4990_v51, %v4989_v13  ;;  %v5030_v41 = vrot.slane %v5029_v43, 2  ;;  %v4998_v52 = vadd.f32 %v4997_v44, %v4996_v30  ;;  %v5037_v24 = vrot.slane %v5036_v63, 2 }
 0x94b   :  { %v5041_v0 = vmul.f32 0.5, %v5019_v26  ;;  %v5045_v40 = vmul.f32 %v9205_v32, %v9205_v32  ;;  %v5042_v55 = vmul.f32 0.5, %v5026_v46  ;;  %v5046_v7 = vmul.f32 %v9207_v33, %v9207_v33 }
 0x94c   :  { %v4992_v50 = vrot.slane %v4991_v27, 1  ;;  %v5031_v10 = vadd.f32 %v5030_v41, %v5029_v43  ;;  %v4999_v31 = vrot.slane %v4998_v52, 1  ;;  %v5038_v59 = vadd.f32 %v5037_v24, %v5036_v63 }
 0x94d   :  { %v5049_v56 = vsub.f32 %v5041_v0, %v5045_v40  ;;  %v5050_v16 = vsub.f32 %v5042_v55, %v5046_v7 }
 0x94e   :  { %v4993_v58 = vadd.f32 %v4992_v50, %v4991_v27  ;;  %v5032_v22 = vrot.slane %v5031_v10, 1  ;;  %v5000_v37 = vadd.f32 %v4999_v31, %v4998_v52  ;;  %v5039_v35 = vrot.slane %v5038_v59, 1 }
 0x94f   :  { %v5053_v39 = vmax.f32 %v5049_v56, 0.0  ;;  %v5054_v61 = vmax.f32 %v5050_v16, 0.0 }
 0x950   :  { %v9213_v4 = vmul.f32 0.5, %v4993_v58  ;;  %v5033_v45 = vadd.f32 %v5032_v22, %v5031_v10  ;;  %v9217_v17 = vmul.f32 0.5, %v5000_v37  ;;  %v5040_v60 = vadd.f32 %v5039_v35, %v5038_v59 }
 0x951   :  { %v5057_v11 = vadd.f32 1e-05, %v5053_v39  ;;  %v5058_v42 = vadd.f32 1e-05, %v5054_v61 }
 0x952   :  { %v5043_v21 = vmul.f32 0.5, %v5033_v45  ;;  %v5047_v54 = vmul.f32 %v9213_v4, %v9213_v4  ;;  %v5048_v36 = vmul.f32 %v9217_v17, %v9217_v17  ;;  %v5044_v49 = vmul.f32 0.5, %v5040_v60 }
 0x953   :  { %7118 = vrsqrt.f32 %v5058_v42  ;;  %vm5077_vm2 = vweird.f32 %v5058_v42  ;;  %vm5067_vm10 = vweird.f32 %v5057_v11 }
 0x954   :  { %v5051_v47 = vsub.f32 %v5043_v21, %v5047_v54  ;;  %7120 = vrsqrt.f32 %v5057_v11  ;;  %v5052_v18 = vsub.f32 %v5044_v49, %v5048_v36  ;;  %v7184_v21 = vld [vmem:[#allocation10] sm:$0xf] }
 0x956   :  { %v5055_v28 = vmax.f32 %v5051_v47, 0.0  ;;  %v5056_v12 = vmax.f32 %v5052_v18, 0.0 }
 0x958   :  { %v5059_v57 = vadd.f32 1e-05, %v5055_v28  ;;  %v5060_v14 = vadd.f32 1e-05, %v5056_v12 }
 0x959   :  { %v7119_v13 = vpop.eup %7118 }
 0x95a   :  { %7122 = vrsqrt.f32 %v5059_v57  ;;  %v7121_v19 = vpop.eup %7120  ;;  %v5072_v30 = vmul.f32 %v7119_v13, %v5058_v42  ;;  %vm5078_vm0 = vweird.f32 %v7119_v13  ;;  %vm5087_vm4 = vweird.f32 %v5059_v57 }
 0x95b   :  { %v5062_v3 = vmul.f32 %v7121_v19, %v5057_v11  ;;  %7124 = vrsqrt.f32 %v5060_v14  ;;  %vm5079_vm3 = vmor %vm5077_vm2, %vm5078_vm0  ;;  %vm5068_vm7 = vweird.f32 %v7121_v19  ;;  %vm5097_vm8 = vweird.f32 %v5060_v14 }
 0x95c   :  { %v5073_v29 = vmul.f32 %v7119_v13, %v5072_v30  ;;  %vm5069_vm13 = vmor %vm5067_vm10, %vm5068_vm7 }
 0x95d   :  { %v5063_v44 = vmul.f32 %v7121_v19, %v5062_v3 }
 0x95e   :  { %v5074_v51 = vmul.f32 0.5, %v5073_v29 }
 0x95f   :  { %v5064_v41 = vmul.f32 0.5, %v5063_v44 }
 0x960   :  { %v7123_v9 = vpop.eup %7122  ;;  %v5075_v26 = vsub.f32 1.5, %v5074_v51  ;;  %v4712_v51 = vld [vmem:[#allocation4 + $0xf0] sm:$0xff] }
 0x961   :  { %v5082_v43 = vmul.f32 %v7123_v9, %v5059_v57  ;;  %v7125_v46 = vpop.eup %7124  ;;  %vm5088_vm1 = vweird.f32 %v7123_v9  ;;  %v5065_v7 = vsub.f32 1.5, %v5064_v41 }
 0x962   :  { %v5092_v52 = vmul.f32 %v7125_v46, %v5060_v14  ;;  %v5076_v0 = vmul.f32 %v7119_v13, %v5075_v26  ;;  %vm5089_vm5 = vmor %vm5087_vm4, %vm5088_vm1  ;;  %vm5098_vm6 = vweird.f32 %v7125_v46  ;;  %v4710_v14 = vld [vmem:[#allocation4 + $0xe0] sm:$0xff] }
 0x963   :  { %v5083_v63 = vmul.f32 %v7123_v9, %v5082_v43  ;;  %v5066_v31 = vmul.f32 %v7121_v19, %v5065_v7  ;;  %vm5099_vm9 = vmor %vm5097_vm8, %vm5098_vm6  ;;  %v4715_v44 = vunpack.c.h.bf16 %v4710_v14 }
 0x964   :  { %v5093_v40 = vmul.f32 %v7125_v46, %v5092_v52  ;;  %v5080_v10 = vsel %vm5079_vm3, %v7119_v13, %v5076_v0 }
 0x965   :  { %v5084_v27 = vmul.f32 0.5, %v5083_v63  ;;  %v5105_v58 = vrot.slane %v5080_v10, 7  ;;  %v5070_v45 = vsel %vm5069_vm13, %v7121_v19, %v5066_v31 }
 0x966   :  { %v5094_v50 = vmul.f32 0.5, %v5093_v40 }
 0x967   :  { %v5085_v24 = vsub.f32 1.5, %v5084_v27  ;;  %v5108_v42 = vsel %vm526_vm11, %v5070_v45, %v5105_v58  ;;  %v4719_v27 = vunpack.c.h.bf16 %v4712_v51 }
 0x968   :  { %v5095_v16 = vsub.f32 1.5, %v5094_v50 }
 0x969   :  { %v5086_v55 = vmul.f32 %v7123_v9, %v5085_v24 }
 0x96a   :  { %v5096_v59 = vmul.f32 %v7125_v46, %v5095_v16 }
 0x96b   :  { %v5090_v56 = vsel %vm5089_vm5, %v7123_v9, %v5086_v55 }
 0x96c   :  { %v5106_v22 = vrot.slane %v5090_v56, 6  ;;  %v5100_v39 = vsel %vm5099_vm9, %v7125_v46, %v5096_v59 }
 0x96d   :  { %v5107_v61 = vrot.slane %v5100_v39, 5 }
 0x96f   :  { %v5109_v37 = vsel %vm528_vm12, %v5106_v22, %v5107_v61  ;;  %v9241_v22 = vld [vmem:[#allocation4 + $0xe8] sm:$0xff]  ;;  %v9243_v61 = vld [vmem:[#allocation4 + $0xf8] sm:$0xff] }
 0x970   :  { %v5110_v35 = vsel %vm530_vm14, %v5108_v42, %v5109_v37 }
 0x971   :  { %v5112_v54 = vmul.f32 %v7184_v21, %v5110_v35 }
 0x973   :  { %v5114_v47 = vperm.slane %v5112_v54, 0  ;;  %v5115_v60 = vperm.slane %v5112_v54, 1  ;;  %v5116_v36 = vperm.slane %v5112_v54, 2  ;;  %v5117_v28 = vperm.slane %v5112_v54, 3 }
 0x975   :  { %v5123_v49 = vmul.f32 %v5115_v60, %v9207_v33  ;;  %v5124_v11 = vmul.f32 %v5116_v36, %v9213_v4  ;;  %v5125_v57 = vmul.f32 %v5117_v28, %v9217_v17  ;;  %v5140_v18 = vmul.f32 %v5116_v36, %v9169_v38  ;;  %v7185_v4 = vld [vmem:[#allocation12] sm:$0xf] }
 0x976   :  { %v5122_v13 = vmul.f32 %v5114_v47, %v9205_v32  ;;  %v5144_v29 = vmul.f32 %v5116_v36, %v9193_v62  ;;  %v4714_v17 = vunpack.c.l.bf16 %v4710_v14  ;;  %v5138_v38 = vmul.f32 %v5114_v47, %v9165_v20 }
 0x977   :  { %v5130_v19 = vrot.slane %v5123_v49, 7  ;;  %v5131_v30 = vrot.slane %v5124_v11, 6  ;;  %v5132_v12 = vrot.slane %v5125_v57, 5  ;;  %v5139_v32 = vmul.f32 %v5115_v60, %v9167_v8 }
 0x978   :  { %v4718_v62 = vunpack.c.l.bf16 %v4712_v51  ;;  %v5142_v41 = vmul.f32 %v5114_v47, %v9177_v25  ;;  %v5143_v52 = vmul.f32 %v5115_v60, %v9179_v5  ;;  %v5141_v45 = vmul.f32 %v5117_v28, %v9171_v2 }
 0x979   :  { %v5133_v3 = vsel %vm526_vm11, %v5122_v13, %v5130_v19  ;;  %v5134_v9 = vsel %vm528_vm12, %v5131_v30, %v5132_v12  ;;  %v5145_v35 = vmul.f32 %v5117_v28, %v9195_v6  ;;  %v4717_v47 = vunpack.c.h.bf16 %v9241_v22 }
 0x97a   :  { %v5135_v33 = vsel %vm530_vm14, %v5133_v3, %v5134_v9  ;;  %v4721_v36 = vunpack.c.h.bf16 %v9243_v61 }
 0x97b   :  { %v5137_v43 = vsub.f32 %v7185_v4, %v5135_v33 }
 0x97d   :  { %v5147_v63 = vperm.slane %v5137_v43, 0  ;;  %v5148_v26 = vperm.slane %v5137_v43, 1  ;;  %v5149_v46 = vperm.slane %v5137_v43, 2  ;;  %v5150_v25 = vperm.slane %v5137_v43, 3 }
 0x97f   :  { %v5155_v24 = vadd.f32 %v5147_v63, %v5138_v38  ;;  %v5156_v0 = vadd.f32 %v5148_v26, %v5139_v32  ;;  %v9237_v40 = vadd.f32 %v5149_v46, %v5140_v18  ;;  %v5159_v55 = vadd.f32 %v5147_v63, %v5142_v41 }
 0x980   :  { %v5160_v7 = vadd.f32 %v5148_v26, %v5143_v52  ;;  %v9239_v50 = vadd.f32 %v5149_v46, %v5144_v29  ;;  %v5158_v60 = vadd.f32 %v5150_v25, %v5141_v45  ;;  %v5162_v49 = vadd.f32 %v5150_v25, %v5145_v35 }
 0x981   :  { %v5163_v20 = vadd.f32 %v5155_v24, %v4714_v17  ;;  %v5164_v10 = vadd.f32 %v5156_v0, %v4715_v44  ;;  %v5167_v8 = vadd.f32 %v5159_v55, %v4718_v62 }
 0x982   :  { %v5168_v56 = vadd.f32 %v5160_v7, %v4719_v27  ;;  %v5166_v18 = vadd.f32 %v5158_v60, %v4717_v47  ;;  %v5170_v2 = vadd.f32 %v5162_v49, %v4721_v36 }
 0x983   :  { %v6467_v16 = vmul.f32 -1.442695, %v5163_v20  ;;  %v6469_v31 = vmul.f32 -1.442695, %v5164_v10  ;;  %v6468_v59 = vmul.f32 -1.442695, %v5167_v8 }
 0x984   :  { %v6470_v58 = vmul.f32 -1.442695, %v5168_v56 }
 0x985   :  { %7126 = vpow2.f32 %v6467_v16 }
 0x986   :  { %7128 = vpow2.f32 %v6468_v59 }
 0x987   :  { %7130 = vpow2.f32 %v6469_v31 }
 0x988   :  { %7132 = vpow2.f32 %v6470_v58 }
 0x98b   :  { %v7127_v5 = vpop.eup %7126 }
 0x98c   :  { %v7129_v39 = vpop.eup %7128  ;;  %v5177_v42 = vadd.f32 1.0, %v7127_v5 }
 0x98d   :  { %v7131_v37 = vpop.eup %7130  ;;  %v5178_v21 = vadd.f32 1.0, %v7129_v39 }
 0x98e   :  { %v7133_v54 = vpop.eup %7132  ;;  %7134 = vrcp.f32 %v5177_v42  ;;  %v5219_v11 = vadd.f32 1.0, %v7131_v37  ;;  %v5188_v6 = vand.u32 2147483647, %v5177_v42  ;;  %v5190_v30 = vand.u32 2147483648, %v5177_v42 }
 0x98f   :  { %7136 = vrcp.f32 %v5178_v21  ;;  %v9249_v57 = vadd.f32 1.0, %v7133_v54  ;;  %v5203_v29 = vand.u32 2147483647, %v5178_v21  ;;  %v5205_v3 = vand.u32 2147483648, %v5178_v21 }
 0x990   :  { %7138 = vrcp.f32 %v5219_v11  ;;  %vm5184_vm11 = vweird.f32 %v5177_v42  ;;  %vm9252_vm12 = vcmp.eq.f32.partialorder %v5188_v6, 8.507059e+37  ;;  %vm5199_vm14 = vweird.f32 %v5178_v21 }
 0x991   :  { %7140 = vrcp.f32 %v9249_v57  ;;  %v5191_v17 = vor.u32 1.1754944e-38, %v5190_v30  ;;  %vm9256_vm1 = vcmp.eq.f32.partialorder %v5203_v29, 8.507059e+37  ;;  %v5206_v46 = vor.u32 1.1754944e-38, %v5205_v3 }
 0x992   :  { %7142 = vtanh.f32 %v5166_v18  ;;  %v5230_v27 = vand.u32 2147483647, %v5219_v11  ;;  %v5232_v24 = vand.u32 2147483648, %v5219_v11  ;;  %v5245_v55 = vand.u32 2147483647, %v9249_v57 }
 0x993   :  { %7144 = vtanh.f32 %v5170_v2  ;;  %v5247_v8 = vand.u32 2147483648, %v9249_v57  ;;  %vm5226_vm6 = vweird.f32 %v5219_v11  ;;  %vm5241_vm8 = vweird.f32 %v9249_v57 }
 0x994   :  { %v7135_v13 = vpop.eup %7134  ;;  %v5233_v25 = vor.u32 1.1754944e-38, %v5232_v24  ;;  %vm5231_vm9 = vcmp.eq.f32.partialorder %v5230_v27, 8.507059e+37  ;;  %vm5246_vm13 = vcmp.eq.f32.partialorder %v5245_v55, 8.507059e+37  ;;  %v4716_v30 = vunpack.c.l.bf16 %v9241_v22 }
 0x995   :  { %v7137_v28 = vpop.eup %7136  ;;  %v5180_v19 = vmul.f32 %v7135_v13, %v5177_v42  ;;  %vm5185_vm15 = vweird.f32 %v7135_v13  ;;  %v5248_v42 = vor.u32 1.1754944e-38, %v5247_v8 }
 0x996   :  { %v5195_v12 = vmul.f32 %v7137_v28, %v5178_v21  ;;  %v7139_v9 = vpop.eup %7138  ;;  %vm5200_vm0 = vweird.f32 %v7137_v28  ;;  %vm5186_vm2 = vmor %vm5184_vm11, %vm5185_vm15  ;;  %v5165_v33 = vadd.f32 %v9237_v40, %v4716_v30 }
 0x997   :  { %v5181_v14 = vsub.f32 1.0, %v5180_v19  ;;  %v7141_v4 = vpop.eup %7140  ;;  %v5222_v44 = vmul.f32 %v7139_v9, %v5219_v11  ;;  %vm5201_vm3 = vmor %vm5199_vm14, %vm5200_vm0  ;;  %vm5227_vm4 = vweird.f32 %v7139_v9 }
 0x998   :  { %v5196_v51 = vsub.f32 1.0, %v5195_v12  ;;  %v5237_v63 = vmul.f32 %v7141_v4, %v9249_v57  ;;  %v7143_v41 = vpop.eup %7142  ;;  %vm5242_vm5 = vweird.f32 %v7141_v4  ;;  %vm5228_vm7 = vmor %vm5226_vm6, %vm5227_vm4  ;;  %v4720_v12 = vunpack.c.l.bf16 %v9243_v61 }
 0x999   :  { %v5182_v43 = vmul.f32 %v7135_v13, %v5181_v14  ;;  %v5223_v62 = vsub.f32 1.0, %v5222_v44  ;;  %v7145_v7 = vpop.eup %7144  ;;  %vm5243_vm10 = vmor %vm5241_vm8, %vm5242_vm5 }
 0x99a   :  { %v5197_v38 = vmul.f32 %v7137_v28, %v5196_v51  ;;  %v5238_v0 = vsub.f32 1.0, %v5237_v63  ;;  %v5169_v51 = vadd.f32 %v9239_v50, %v4720_v12 }
 0x99b   :  { %v5183_v26 = vadd.f32 %v7135_v13, %v5182_v43  ;;  %v5224_v10 = vmul.f32 %v7139_v9, %v5223_v62 }
 0x99c   :  { %v5198_v52 = vadd.f32 %v7137_v28, %v5197_v38  ;;  %v5239_v31 = vmul.f32 %v7141_v4, %v5238_v0  ;;  %v6471_v38 = vmul.f32 -1.442695, %v5165_v33 }
 0x99d   :  { %v5187_v20 = vsel %vm5186_vm2, %v7135_v13, %v5183_v26  ;;  %v5225_v58 = vadd.f32 %v7139_v9, %v5224_v10  ;;  %v6472_v26 = vmul.f32 -1.442695, %v5169_v51 }
 0x99e   :  { %v5192_v56 = vsel %vm9252_vm12, %v5191_v17, %v5187_v20  ;;  %v5202_v16 = vsel %vm5201_vm3, %v7137_v28, %v5198_v52  ;;  %v5240_v5 = vadd.f32 %v7141_v4, %v5239_v31  ;;  %7146 = vpow2.f32 %v6471_v38 }
 0x99f   :  { %v5207_v59 = vsel %vm9256_vm1, %v5206_v46, %v5202_v16  ;;  %v5211_v39 = vmul.f32 %v5192_v56, %v9132_v23  ;;  %v5229_v45 = vsel %vm5228_vm7, %v7139_v9, %v5225_v58  ;;  %7148 = vpow2.f32 %v6472_v26 }
 0x9a0   :  { %v5212_v37 = vmul.f32 %v5207_v59, %v9135_v1  ;;  %v5234_v35 = vsel %vm5231_vm9, %v5233_v25, %v5229_v45  ;;  %v5244_v21 = vsel %vm5243_vm10, %v7141_v4, %v5240_v5 }
 0x9a1   :  { %v5249_v54 = vsel %vm5246_vm13, %v5248_v42, %v5244_v21  ;;  %v5253_v47 = vmul.f32 %v7143_v41, %v5234_v35 }
 0x9a2   :  { %v5254_v60 = vmul.f32 %v7145_v7, %v5249_v54 }
 0x9a3   :  { %v5255_v36 = vadd.f32 %v5253_v47, %v5211_v39 }
 0x9a4   :  { %v5256_v49 = vadd.f32 %v5254_v60, %v5212_v37  ;;  %v7147_v41 = vpop.eup %7146 }
 0x9a5   :  { %v9274_v11 = vmul.f32 %v5255_v36, %v7645_v53  ;;  %v7149_v52 = vpop.eup %7148  ;;  %v5310_v40 = vadd.f32 1.0, %v7147_v41 }
 0x9a6   :  { %v9280_v23 = vmul.f32 %v5256_v49, %v7695_v15  ;;  %v5311_v50 = vadd.f32 1.0, %v7149_v52 }
 0x9a7   :  { %v5267_v1 = vmul.f32 %v9274_v11, %v9274_v11  ;;  %vm5317_vm1 = vweird.f32 %v5310_v40 }
 0x9a8   :  { %v5259_v57 = vadd.f32 %v9280_v23, %v9274_v11  ;;  %v5268_v18 = vmul.f32 %v9280_v23, %v9280_v23  ;;  %v6807_v2 = vpack.c.bf16 %v9280_v23, %v9274_v11  ;;  %vm5332_vm3 = vweird.f32 %v5311_v50 }
 0x9aa   :  { %v5260_v13 = vrot.slane %v5259_v57, 4  ;;  %v5269_v6 = vadd.f32 %v5268_v18, %v5267_v1  ;;  %6808 = vst [vmem:[#allocation14 + $0x38] sm:$0xff] %v6807_v2   ;;  %v5323_v1 = vand.u32 2147483648, %v5310_v40  ;;  %v5338_v18 = vand.u32 2147483648, %v5311_v50 }
 0x9ab   :  { %5387 = dma.vmem_to_hbm [thread:$0]  %s5380_s7, 1024, %s5382_s26, [#allocation15], %s7375_s10, %s7375_s10, %s7376_s27  }
 0x9ac   :  { %v5261_v28 = vadd.f32 %v5260_v13, %v5259_v57  ;;  %v5270_v19 = vrot.slane %v5269_v6, 4  ;;  %v5339_v13 = vor.u32 1.1754944e-38, %v5338_v18 }
 0x9ae   :  { %v5262_v29 = vrot.slane %v5261_v28, 2  ;;  %v5271_v14 = vadd.f32 %v5270_v19, %v5269_v6 }
 0x9b0   :  { %v5263_v3 = vadd.f32 %v5262_v29, %v5261_v28  ;;  %v5272_v9 = vrot.slane %v5271_v14, 2 }
 0x9b2   :  { %v5264_v4 = vrot.slane %v5263_v3, 1  ;;  %v5273_v43 = vadd.f32 %v5272_v9, %v5271_v14 }
 0x9b4   :  { %v5265_v17 = vadd.f32 %v5264_v4, %v5263_v3  ;;  %v5274_v44 = vrot.slane %v5273_v43, 1 }
 0x9b6   :  { %v5266_v32 = vmul.f32 0.5, %v5265_v17  ;;  %v5275_v63 = vadd.f32 %v5274_v44, %v5273_v43 }
 0x9b8   :  { %v5276_v46 = vmul.f32 0.5, %v5275_v63  ;;  %v5277_v22 = vmul.f32 %v5266_v32, %v5266_v32 }
 0x9ba   :  { %v5278_v61 = vsub.f32 %v5276_v46, %v5277_v22 }
 0x9bc   :  { %v5279_v62 = vmax.f32 %v5278_v61, 0.0 }
 0x9be   :  { %v5280_v27 = vadd.f32 1e-05, %v5279_v62 }
 0x9c0   :  { %7150 = vrsqrt.f32 %v5280_v27  ;;  %vm5287_vm12 = vweird.f32 %v5280_v27 }
 0x9c1   :  { %7152 = vrcp.f32 %v5310_v40 }
 0x9c2   :  { %7154 = vrcp.f32 %v5311_v50 }
 0x9c6   :  { %v7151_v24 = vpop.eup %7150 }
 0x9c7   :  { %v5282_v0 = vmul.f32 %v7151_v24, %v5280_v27  ;;  %v7153_v20 = vpop.eup %7152  ;;  %vm5288_vm11 = vweird.f32 %v7151_v24 }
 0x9c8   :  { %v7155_v10 = vpop.eup %7154  ;;  %v5313_v16 = vmul.f32 %v7153_v20, %v5310_v40  ;;  %vm5289_vm14 = vmor %vm5287_vm12, %vm5288_vm11  ;;  %vm5318_vm15 = vweird.f32 %v7153_v20 }
 0x9c9   :  { %v5283_v55 = vmul.f32 %v7151_v24, %v5282_v0  ;;  %v5328_v31 = vmul.f32 %v7155_v10, %v5311_v50  ;;  %vm5333_vm0 = vweird.f32 %v7155_v10  ;;  %vm5319_vm2 = vmor %vm5317_vm1, %vm5318_vm15 }
 0x9ca   :  { %v5314_v25 = vsub.f32 1.0, %v5313_v16  ;;  %vm5334_vm4 = vmor %vm5332_vm3, %vm5333_vm0 }
 0x9cb   :  { %v5284_v7 = vmul.f32 0.5, %v5283_v55  ;;  %v5329_v45 = vsub.f32 1.0, %v5328_v31 }
 0x9cc   :  { %v5315_v21 = vmul.f32 %v7153_v20, %v5314_v25 }
 0x9cd   :  { %v5285_v8 = vsub.f32 1.5, %v5284_v7  ;;  %v5330_v47 = vmul.f32 %v7155_v10, %v5329_v45 }
 0x9ce   :  { %v5316_v49 = vadd.f32 %v7153_v20, %v5315_v21 }
 0x9cf   :  { %v5286_v56 = vmul.f32 %v7151_v24, %v5285_v8  ;;  %v5331_v57 = vadd.f32 %v7155_v10, %v5330_v47 }
 0x9d1   :  { %v5290_v59 = vsel %vm5289_vm14, %v7151_v24, %v5286_v56  ;;  %v5335_v2 = vsel %vm5334_vm4, %v7155_v10, %v5331_v57 }
 0x9d2   :  { %v5291_v58 = vmul.f32 %v9152_v34, %v5290_v59  ;;  %v5321_v34 = vand.u32 2147483647, %v5310_v40 }
 0x9d4   :  { %v5292_v5 = vmul.f32 %v5291_v58, %v5266_v32  ;;  %v5295_v39 = vperm.slane %v5291_v58, 0  ;;  %vm5322_vm5 = vcmp.eq.f32.partialorder %v5321_v34, 8.507059e+37 }
 0x9d6   :  { %v5293_v42 = vsub.f32 %v9158_v48, %v5292_v5  ;;  %v5297_v37 = vmul.f32 %v5295_v39, %v9274_v11  ;;  %v5298_v35 = vmul.f32 %v5295_v39, %v9280_v23  ;;  %v5336_v48 = vand.u32 2147483647, %v5311_v50 }
 0x9d7   :  { %v5320_v11 = vsel %vm5319_vm2, %v7153_v20, %v5316_v49  ;;  %v5324_v23 = vor.u32 1.1754944e-38, %v5323_v1 }
 0x9d8   :  { %v5300_v54 = vperm.slane %v5293_v42, 0  ;;  %vm5337_vm6 = vcmp.eq.f32.partialorder %v5336_v48, 8.507059e+37 }
 0x9d9   :  { %v5325_v28 = vsel %vm5322_vm5, %v5324_v23, %v5320_v11  ;;  %v5340_v30 = vsel %vm5337_vm6, %v5339_v13, %v5335_v2 }
 0x9da   :  { %v5302_v60 = vadd.f32 %v5300_v54, %v5297_v37  ;;  %v5303_v36 = vadd.f32 %v5300_v54, %v5298_v35 }
 0x9dc   :  { %7156 = vtanh.f32 %v5302_v60 }
 0x9dd   :  { %7158 = vtanh.f32 %v5303_v36 }
 0x9e2   :  { %v7157_v6 = vpop.eup %7156 }
 0x9e3   :  { %v7159_v19 = vpop.eup %7158  ;;  %v5344_v12 = vmul.f32 %v7157_v6, %v5325_v28 }
 0x9e4   :  { %v5345_v29 = vmul.f32 %v7159_v19, %v5340_v30 }
 0x9e5   :  { %v5346_v14 = vmul.f32 %v5344_v12, %v7645_v53 }
 0x9e6   :  { %v5347_v3 = vmul.f32 %v5345_v29, %v7695_v15 }
 0x9e8   :  { %v6802_v9 = vpack.c.bf16 %v5347_v3, %v5346_v14 }
 0x9ea   :  { %6803 = vst [vmem:[#allocation13 + $0x38] sm:$0xff] %v6802_v9  }
 0x9eb   :  { %5374 = dma.vmem_to_hbm [thread:$0]  %s5367_s28, 1024, %s5369_s4, [#allocation6], %s7375_s10, %s7375_s10, %s7376_s27  }
 0x9ec   :  { %7360 = dma.done.wait [#allocation6], 1024  }
 0x9ed   :  { %7361 = vsyncadd [#allocation6], 4294966272 }
 0x9ee   :  { %7362 = dma.done.wait [#allocation15], 1024  }
 0x9ef   :  { %7363 = vsyncadd [#allocation15], 4294966272 }
 0x9f0   :  { %5396 = vsyncpa [#allocation5], 1 }
 0x9f1   :  { %5397 = vsyncpa [#allocation8], 1 }
 0x9f2   :  { %5398 = vsyncpa [#allocation11], 1 }
 0x9f3   :  { %5399 = vsyncpa [#allocation6], 1 }
 0x9f4   :  { %5400 = vsyncpa [#allocation15], 1 }

</bundles_post_ra>
